<compile_context>
chip_gen: v7x
topology: tpu7x:2x2x1
jax: 0.10.0
libtpu: 0.0.40
codegen_flags: <defaults>
</compile_context>

<pallas_src>
import functools

import jax
import jax.numpy as jnp
from jax.experimental import pallas as pl
from jax.experimental.pallas import tpu as pltpu

# ---- model hyper-parameters (forward() hardcodes n_channels=3, latent=50, seq=5)
N_CHANNELS = 3
LATENT = 50
SEQ = 5
HIDDEN = 32          # hidden_dim (LSTM, num_layers=1)
N_CLASSES = 7
BN_EPS = 1e-5

CONV_M_TILES = 2     # 2 balanced M-tiles -> megacore-friendly on v7x, cheap on v5e/v6e


# ----------------------------------------------------------------------------
# Pallas kernels
# ----------------------------------------------------------------------------
def _conv_mm_kernel(x_ref, w_ref, shift_ref, o_ref):
    """One M-tile of: relu(patches @ w_folded + shift).  BN scale is already
    folded into w; operands bf16, accumulation + elementwise in f32."""
    acc = jnp.dot(x_ref[...], w_ref[...], preferred_element_type=jnp.float32)
    o_ref[...] = jnp.maximum(acc + shift_ref[...], 0.0).astype(o_ref.dtype)


def _balanced_tile(M, n_tiles):
    """Balanced M-tile: round_up(cdiv(M, n_tiles), 16) (16 = bf16 sublane pack)."""
    tm = -(-M // n_tiles)
    tm = ((tm + 15) // 16) * 16
    grid_m = -(-M // tm)
    return tm, grid_m


def conv_matmul(x, w, shift):
    """Fused conv-as-matmul + BN-shift + ReLU, 2 balanced parallel M-tiles."""
    M, K = x.shape
    N = w.shape[1]
    tm, grid_m = _balanced_tile(M, CONV_M_TILES)
    cost = pl.CostEstimate(
        flops=2 * M * K * N,
        transcendentals=0,
        bytes_accessed=M * K * 2 + K * N * 2 + M * N * 2 + N * 4,
    )
    return pl.pallas_call(
        _conv_mm_kernel,
        out_shape=jax.ShapeDtypeStruct((M, N), jnp.bfloat16),
        grid=(grid_m,),
        in_specs=[
            pl.BlockSpec((tm, K), lambda i: (i, 0)),
            pl.BlockSpec((K, N), lambda i: (0, 0)),
            pl.BlockSpec((1, N), lambda i: (0, 0)),
        ],
        out_specs=pl.BlockSpec((tm, N), lambda i: (i, 0)),
        compiler_params=pltpu.CompilerParams(
            dimension_semantics=("parallel",),
            vmem_limit_bytes=32 * 1024 * 1024,
        ),
        cost_estimate=cost,
    )(x, w, shift)


def _tail_kernel(flat_ref, enc_w_ref, enc_b_ref, wih_ref, bihh_ref, whh_ref,
                 fc1_w_ref, fc1_b_ref, fc3_w_ref, fc3_b_ref, o_ref,
                 *, batch, seq, hidden):
    """Fused tail: encoder Linear -> LSTM input projection -> LSTM recurrence
    (last hidden) -> fc1 + ReLU -> fc3.  Everything stays in VMEM.
    Rows of `flat` are TIME-MAJOR: row = t*batch + b."""
    # encoder Linear (bf16 operands, f32 accumulate)
    z = jnp.dot(flat_ref[...], enc_w_ref[...],
                preferred_element_type=jnp.float32) + enc_b_ref[...]      # (seq*B, 50)
    # LSTM input projection for all timesteps at once (+ b_ih + b_hh)
    xw = jnp.dot(z.astype(jnp.bfloat16), wih_ref[...],
                 preferred_element_type=jnp.float32) + bihh_ref[...]      # (seq*B, 4H)

    whh = whh_ref[...]                                                    # (H, 4H) bf16
    h = jnp.zeros((batch, hidden), jnp.float32)
    c = jnp.zeros((batch, hidden), jnp.float32)
    for t in range(seq):  # static unroll (seq = 5)
        gx = xw[t * batch:(t + 1) * batch, :]        # contiguous time-major slice
        gates = gx + jnp.dot(h.astype(jnp.bfloat16), whh,
                             preferred_element_type=jnp.float32)
        i_g = jax.nn.sigmoid(gates[:, 0 * hidden:1 * hidden])
        f_g = jax.nn.sigmoid(gates[:, 1 * hidden:2 * hidden])
        g_g = jnp.tanh(gates[:, 2 * hidden:3 * hidden])
        o_g = jax.nn.sigmoid(gates[:, 3 * hidden:4 * hidden])
        c = f_g * c + i_g * g_g
        h = o_g * jnp.tanh(c)

    mid = jnp.maximum(
        jnp.dot(h.astype(jnp.bfloat16), fc1_w_ref[...],
                preferred_element_type=jnp.float32) + fc1_b_ref[...], 0.0)
    # TODO(synk): nn.Dropout(0.5) is the identity in eval/inference mode; no randomness.
    o_ref[...] = (jnp.dot(mid.astype(jnp.bfloat16), fc3_w_ref[...],
                          preferred_element_type=jnp.float32)
                  + fc3_b_ref[...]).astype(o_ref.dtype)


def _full_spec(arr):
    return pl.BlockSpec(arr.shape, lambda i: (0,) * arr.ndim)


def tail_head(flat, pp, batch):
    args = (flat, pp['enc_w'], pp['enc_b'], pp['wih'], pp['bihh'], pp['whh'],
            pp['fc1_w'], pp['fc1_b'], pp['fc3_w'], pp['fc3_b'])
    kernel = functools.partial(_tail_kernel, batch=batch, seq=SEQ, hidden=HIDDEN)
    rows = batch * SEQ
    flops = (2 * rows * flat.shape[1] * LATENT
             + 2 * rows * LATENT * 4 * HIDDEN
             + SEQ * 2 * batch * HIDDEN * 4 * HIDDEN
             + 2 * batch * HIDDEN * LATENT
             + 2 * batch * LATENT * N_CLASSES)
    bytes_acc = sum(int(a.size) * a.dtype.itemsize for a in args) + batch * N_CLASSES * 4
    cost = pl.CostEstimate(flops=flops,
                           transcendentals=SEQ * batch * 4 * HIDDEN,
                           bytes_accessed=bytes_acc)
    return pl.pallas_call(
        kernel,
        out_shape=jax.ShapeDtypeStruct((batch, N_CLASSES), jnp.float32),
        grid=(1,),
        in_specs=[_full_spec(a) for a in args],
        out_specs=pl.BlockSpec((batch, N_CLASSES), lambda i: (0, 0)),
        compiler_params=pltpu.CompilerParams(
            dimension_semantics=("arbitrary",),
            vmem_limit_bytes=16 * 1024 * 1024,
        ),
        cost_estimate=cost,
    )(*args)


# ----------------------------------------------------------------------------
# JAX glue: im2col for 3x3 convs (pad=1, stride in {1,2}), bf16
# ----------------------------------------------------------------------------
def im2col_3x3(x_nhwc, stride):
    N, H, W, C = x_nhwc.shape
    xp = jnp.pad(x_nhwc, ((0, 0), (1, 1), (1, 1), (0, 0)))
    Ho = (H + 2 - 3) // stride + 1
    Wo = (W + 2 - 3) // stride + 1
    cols = []
    for dh in range(3):
        for dw in range(3):
            cols.append(xp[:, dh:dh + stride * (Ho - 1) + 1:stride,
                           dw:dw + stride * (Wo - 1) + 1:stride, :])
    patches = jnp.stack(cols, axis=3)                  # (N, Ho, Wo, 9, C)
    return patches.reshape(N * Ho * Wo, 9 * C), Ho, Wo


def conv_bn_relu(x_nhwc, w_mat, shift, *, stride):
    """Conv2d(k=3, pad=1) + BatchNorm2d (eval, scale folded into w) + ReLU."""
    N = x_nhwc.shape[0]
    patches, Ho, Wo = im2col_3x3(x_nhwc, stride)       # bf16 (M, 9*Cin)
    out = conv_matmul(patches, w_mat, shift)           # bf16 (M, 64)
    return out.reshape(N, Ho, Wo, w_mat.shape[1])


# ----------------------------------------------------------------------------
# Parameter init (PyTorch-layout) + one-time host-side preparation/folding
# ----------------------------------------------------------------------------
def _uniform(key, shape, bound):
    return jax.random.uniform(key, shape, jnp.float32, -bound, bound)


def init_params(seed=0):
    """Deterministic params in PyTorch layout (as if loaded from a checkpoint)."""
    key = jax.random.PRNGKey(seed)
    nk = iter(jax.random.split(key, 40))

    def conv_block(c_in):
        bound = 1.0 / jnp.sqrt(c_in * 9.0)
        w = _uniform(next(nk), (64, c_in, 3, 3), bound)
        b = _uniform(next(nk), (64,), bound)
        gamma = 1.0 + 0.1 * _uniform(next(nk), (64,), 1.0)
        beta = 0.1 * _uniform(next(nk), (64,), 1.0)
        mean = 0.1 * _uniform(next(nk), (64,), 1.0)
        var = 1.0 + 0.1 * jnp.abs(_uniform(next(nk), (64,), 1.0))
        return (w, b, gamma, beta, mean, var)

    p = {}
    p['conv1'] = conv_block(N_CHANNELS)
    p['conv2'] = conv_block(64)
    p['conv3'] = conv_block(64)
    p['conv4'] = conv_block(64)

    enc_in = 64 * 6 * 6
    b_enc = 1.0 / jnp.sqrt(float(enc_in))
    p['enc_fc_w'] = _uniform(next(nk), (LATENT, enc_in), b_enc)   # PyTorch (out, in)
    p['enc_fc_b'] = _uniform(next(nk), (LATENT,), b_enc)

    b_rnn = 1.0 / jnp.sqrt(float(HIDDEN))
    p['lstm_wih'] = _uniform(next(nk), (4 * HIDDEN, LATENT), b_rnn)
    p['lstm_whh'] = _uniform(next(nk), (4 * HIDDEN, HIDDEN), b_rnn)
    p['lstm_bih'] = _uniform(next(nk), (4 * HIDDEN,), b_rnn)
    p['lstm_bhh'] = _uniform(next(nk), (4 * HIDDEN,), b_rnn)

    b1 = 1.0 / jnp.sqrt(float(HIDDEN))
    p['fc1_w'] = _uniform(next(nk), (LATENT, HIDDEN), b1)
    p['fc1_b'] = _uniform(next(nk), (LATENT,), b1)

    b3 = 1.0 / jnp.sqrt(float(LATENT))
    p['fc3_w'] = _uniform(next(nk), (N_CLASSES, LATENT), b3)
    p['fc3_b'] = _uniform(next(nk), (N_CLASSES,), b3)
    return p


def prepare_params(p):
    """One-time folding: BN scale into conv weights (bf16), conv bias into the
    shift, encoder-FC row permutation (NCHW-flatten -> NHWC-flatten) so no
    runtime transpose is needed, and all Linear/LSTM weights transposed to
    (in, out) and stored bf16 (MXU operands); biases stay f32."""
    pp = {}
    for name in ('conv1', 'conv2', 'conv3', 'conv4'):
        w, b, gamma, beta, mean, var = p[name]
        inv = gamma / jnp.sqrt(var + BN_EPS)                       # (64,)
        # (O, C, kh, kw) -> (kh, kw, C, O) matching im2col patch ordering.
        w_mat = jnp.transpose(w, (2, 3, 1, 0)).reshape(-1, w.shape[0])
        pp[name + '_w'] = (w_mat * inv[None, :]).astype(jnp.bfloat16)
        pp[name + '_shift'] = (beta + (b - mean) * inv).reshape(1, -1).astype(jnp.float32)

    # Encoder Linear: rows are PyTorch NCHW-flatten order (c*36 + h*6 + w);
    # permute to NHWC-flatten order (h*384 + w*64 + c) so forward() can flatten
    # the NHWC conv output directly (no transpose at runtime).
    w_enc = p['enc_fc_w'].T                                        # (2304, 50)
    w_enc = w_enc.reshape(64, 6, 6, LATENT).transpose(1, 2, 0, 3).reshape(64 * 36, LATENT)
    pp['enc_w'] = w_enc.astype(jnp.bfloat16)
    pp['enc_b'] = p['enc_fc_b'].reshape(1, -1).astype(jnp.float32)

    pp['wih'] = p['lstm_wih'].T.astype(jnp.bfloat16)               # (50, 4H)
    pp['whh'] = p['lstm_whh'].T.astype(jnp.bfloat16)               # (H, 4H)
    pp['bihh'] = (p['lstm_bih'] + p['lstm_bhh']).reshape(1, -1).astype(jnp.float32)

    pp['fc1_w'] = p['fc1_w'].T.astype(jnp.bfloat16)                # (H, 50)
    pp['fc1_b'] = p['fc1_b'].reshape(1, -1).astype(jnp.float32)
    pp['fc3_w'] = p['fc3_w'].T.astype(jnp.bfloat16)                # (50, 7)
    pp['fc3_b'] = p['fc3_b'].reshape(1, -1).astype(jnp.float32)
    return pp


# ----------------------------------------------------------------------------
# forward() — mirrors FinalModel.forward (eval mode)
# ----------------------------------------------------------------------------
def forward(pp, x):
    """x: (B, 5, 3, 21, 21) float32 -> logits (B, n_classes)."""
    B = x.shape[0]
    # TIME-MAJOR image order (row = t*B + b): convs are per-image so nothing
    # changes there, but the LSTM step gather in the fused tail becomes one
    # contiguous static slice per timestep.
    imgs = jnp.transpose(x, (1, 0, 2, 3, 4)).reshape(-1, N_CHANNELS, 21, 21)
    h = jnp.transpose(imgs, (0, 2, 3, 1)).astype(jnp.bfloat16)       # NCHW -> NHWC

    # ---- encoder convs (fused im2col-matmul + BN + ReLU, bf16 activations)
    h = conv_bn_relu(h, pp['conv1_w'], pp['conv1_shift'], stride=1)  # (5B, 21, 21, 64)
    h = conv_bn_relu(h, pp['conv2_w'], pp['conv2_shift'], stride=2)  # (5B, 11, 11, 64)
    h = conv_bn_relu(h, pp['conv3_w'], pp['conv3_shift'], stride=1)  # (5B, 11, 11, 64)
    h = conv_bn_relu(h, pp['conv4_w'], pp['conv4_shift'], stride=2)  # (5B,  6,  6, 64)

    # NHWC flatten (enc_w rows were pre-permuted to match -> no transpose here)
    flat = h.reshape(h.shape[0], -1)                                 # (5B, 2304) bf16

    # ---- fused tail: enc Linear + LSTM (last hidden) + fc1/ReLU + fc3
    return tail_head(flat, pp, B)                                    # (B, n_classes)


if __name__ == "__main__":
    params = init_params(seed=0)
    pp = prepare_params(params)
    key = jax.random.PRNGKey(0)
    # input: (batch, seq=5, C=3, 21, 21), as consumed by x.view(-1, 3, 21, 21)
    x = jax.random.normal(key, (2, SEQ, N_CHANNELS, 21, 21), dtype=jnp.float32)
    fwd = jax.jit(forward)
    out = jax.block_until_ready(fwd(pp, x))
    assert out.shape == (2, N_CLASSES), out.shape
    print("KERNEL_OK")
</pallas_src>

<mosaic_0001>
module attributes {stable_mosaic.version = 11 : i64} {
  func.func @_conv_mm_kernel(%arg0: i32, %arg1: memref<2208x27xbf16, #tpu.memory_space<vmem>>, %arg2: memref<27x64xbf16, #tpu.memory_space<vmem>>, %arg3: memref<1x64xf32, #tpu.memory_space<vmem>>, %arg4: memref<2208x64xbf16, #tpu.memory_space<vmem>>) attributes {dimension_semantics = [#tpu.dimension_semantics<parallel>], iteration_bounds = array<i64: 2>, scalar_prefetch = 0 : i64, scratch_operands = 0 : i64, tpu.core_type = #tpu.core_type<tc>, window_params = [{transform_indices = @transform_0, window_bounds = array<i64: 2208, 27>}, {pipeline_mode = #tpu.pipeline_mode<synchronous>, transform_indices = @transform_1, window_bounds = array<i64: 27, 64>}, {pipeline_mode = #tpu.pipeline_mode<synchronous>, transform_indices = @transform_2, window_bounds = array<i64: 1, 64>}, {transform_indices = @transform_3, window_bounds = array<i64: 2208, 64>}]} {
    %c0 = arith.constant 0 : index
    %c0_0 = arith.constant 0 : index
    %0 = vector.load %arg1[%c0, %c0_0] : memref<2208x27xbf16, #tpu.memory_space<vmem>>, vector<2208x27xbf16>
    %c0_1 = arith.constant 0 : index
    %c0_2 = arith.constant 0 : index
    %1 = vector.load %arg2[%c0_1, %c0_2] : memref<27x64xbf16, #tpu.memory_space<vmem>>, vector<27x64xbf16>
    %cst = arith.constant dense<0.000000e+00> : vector<2208x64xf32>
    %2 = tpu.matmul %0, %1, %cst {dimension_numbers = #tpu.dot_dimension_numbers<[1], [0], [0], [1], [0, 0, 1, 1], [], []>} : vector<2208x27xbf16>, vector<27x64xbf16>, vector<2208x64xf32> -> vector<2208x64xf32>
    %c0_3 = arith.constant 0 : index
    %c0_4 = arith.constant 0 : index
    %3 = vector.load %arg3[%c0_3, %c0_4] : memref<1x64xf32, #tpu.memory_space<vmem>>, vector<1x64xf32>
    %4 = vector.broadcast %3 : vector<1x64xf32> to vector<2208x64xf32>
    %5 = arith.addf %2, %4 : vector<2208x64xf32>
    %cst_5 = arith.constant 0.000000e+00 : f32
    %6 = vector.broadcast %cst_5 : f32 to vector<2208x64xf32>
    %7 = arith.maximumf %5, %6 : vector<2208x64xf32>
    %8 = arith.truncf %7 : vector<2208x64xf32> to vector<2208x64xbf16>
    %c0_6 = arith.constant 0 : index
    %c0_7 = arith.constant 0 : index
    %9 = vector.load %arg4[%c0_6, %c0_7] : memref<2208x64xbf16, #tpu.memory_space<vmem>>, vector<2208x64xbf16>
    tpu.vector_store %arg4[%c0_6, %c0_7], %8 {strides = array<i32>} : memref<2208x64xbf16, #tpu.memory_space<vmem>>, vector<2208x64xbf16>,
    return
  }
  func.func @transform_0(%arg0: i32) -> (i32, i32) {
    %c0_i32 = arith.constant 0 : i32
    %c0_i32_0 = arith.constant 0 : i32
    return %arg0, %c0_i32 : i32, i32
  }
  func.func @transform_1(%arg0: i32) -> (i32, i32) {
    %c0_i32 = arith.constant 0 : i32
    %c0_i32_0 = arith.constant 0 : i32
    %c0_i32_1 = arith.constant 0 : i32
    return %c0_i32, %c0_i32_0 : i32, i32
  }
  func.func @transform_2(%arg0: i32) -> (i32, i32) {
    %c0_i32 = arith.constant 0 : i32
    %c0_i32_0 = arith.constant 0 : i32
    %c0_i32_1 = arith.constant 0 : i32
    return %c0_i32, %c0_i32_0 : i32, i32
  }
  func.func @transform_3(%arg0: i32) -> (i32, i32) {
    %c0_i32 = arith.constant 0 : i32
    %c0_i32_0 = arith.constant 0 : i32
    return %arg0, %c0_i32 : i32, i32
  }
}

module attributes {stable_mosaic.version = 11 : i64} {
  func.func @_conv_mm_kernel(%arg0: i32, %arg1: memref<608x576xbf16, #tpu.memory_space<vmem>>, %arg2: memref<576x64xbf16, #tpu.memory_space<vmem>>, %arg3: memref<1x64xf32, #tpu.memory_space<vmem>>, %arg4: memref<608x64xbf16, #tpu.memory_space<vmem>>) attributes {dimension_semantics = [#tpu.dimension_semantics<parallel>], iteration_bounds = array<i64: 2>, scalar_prefetch = 0 : i64, scratch_operands = 0 : i64, tpu.core_type = #tpu.core_type<tc>, window_params = [{transform_indices = @transform_0, window_bounds = array<i64: 608, 576>}, {pipeline_mode = #tpu.pipeline_mode<synchronous>, transform_indices = @transform_1, window_bounds = array<i64: 576, 64>}, {pipeline_mode = #tpu.pipeline_mode<synchronous>, transform_indices = @transform_2, window_bounds = array<i64: 1, 64>}, {transform_indices = @transform_3, window_bounds = array<i64: 608, 64>}]} {
    %c0 = arith.constant 0 : index
    %c0_0 = arith.constant 0 : index
    %0 = vector.load %arg1[%c0, %c0_0] : memref<608x576xbf16, #tpu.memory_space<vmem>>, vector<608x576xbf16>
    %c0_1 = arith.constant 0 : index
    %c0_2 = arith.constant 0 : index
    %1 = vector.load %arg2[%c0_1, %c0_2] : memref<576x64xbf16, #tpu.memory_space<vmem>>, vector<576x64xbf16>
    %cst = arith.constant dense<0.000000e+00> : vector<608x64xf32>
    %2 = tpu.matmul %0, %1, %cst {dimension_numbers = #tpu.dot_dimension_numbers<[1], [0], [0], [1], [0, 0, 1, 1], [], []>} : vector<608x576xbf16>, vector<576x64xbf16>, vector<608x64xf32> -> vector<608x64xf32>
    %c0_3 = arith.constant 0 : index
    %c0_4 = arith.constant 0 : index
    %3 = vector.load %arg3[%c0_3, %c0_4] : memref<1x64xf32, #tpu.memory_space<vmem>>, vector<1x64xf32>
    %4 = vector.broadcast %3 : vector<1x64xf32> to vector<608x64xf32>
    %5 = arith.addf %2, %4 : vector<608x64xf32>
    %cst_5 = arith.constant 0.000000e+00 : f32
    %6 = vector.broadcast %cst_5 : f32 to vector<608x64xf32>
    %7 = arith.maximumf %5, %6 : vector<608x64xf32>
    %8 = arith.truncf %7 : vector<608x64xf32> to vector<608x64xbf16>
    %c0_6 = arith.constant 0 : index
    %c0_7 = arith.constant 0 : index
    %9 = vector.load %arg4[%c0_6, %c0_7] : memref<608x64xbf16, #tpu.memory_space<vmem>>, vector<608x64xbf16>
    tpu.vector_store %arg4[%c0_6, %c0_7], %8 {strides = array<i32>} : memref<608x64xbf16, #tpu.memory_space<vmem>>, vector<608x64xbf16>,
    return
  }
  func.func @transform_0(%arg0: i32) -> (i32, i32) {
    %c0_i32 = arith.constant 0 : i32
    %c0_i32_0 = arith.constant 0 : i32
    return %arg0, %c0_i32 : i32, i32
  }
  func.func @transform_1(%arg0: i32) -> (i32, i32) {
    %c0_i32 = arith.constant 0 : i32
    %c0_i32_0 = arith.constant 0 : i32
    %c0_i32_1 = arith.constant 0 : i32
    return %c0_i32, %c0_i32_0 : i32, i32
  }
  func.func @transform_2(%arg0: i32) -> (i32, i32) {
    %c0_i32 = arith.constant 0 : i32
    %c0_i32_0 = arith.constant 0 : i32
    %c0_i32_1 = arith.constant 0 : i32
    return %c0_i32, %c0_i32_0 : i32, i32
  }
  func.func @transform_3(%arg0: i32) -> (i32, i32) {
    %c0_i32 = arith.constant 0 : i32
    %c0_i32_0 = arith.constant 0 : i32
    return %arg0, %c0_i32 : i32, i32
  }
}

module attributes {stable_mosaic.version = 11 : i64} {
  func.func @_conv_mm_kernel(%arg0: i32, %arg1: memref<192x576xbf16, #tpu.memory_space<vmem>>, %arg2: memref<576x64xbf16, #tpu.memory_space<vmem>>, %arg3: memref<1x64xf32, #tpu.memory_space<vmem>>, %arg4: memref<192x64xbf16, #tpu.memory_space<vmem>>) attributes {dimension_semantics = [#tpu.dimension_semantics<parallel>], iteration_bounds = array<i64: 2>, scalar_prefetch = 0 : i64, scratch_operands = 0 : i64, tpu.core_type = #tpu.core_type<tc>, window_params = [{transform_indices = @transform_0, window_bounds = array<i64: 192, 576>}, {pipeline_mode = #tpu.pipeline_mode<synchronous>, transform_indices = @transform_1, window_bounds = array<i64: 576, 64>}, {pipeline_mode = #tpu.pipeline_mode<synchronous>, transform_indices = @transform_2, window_bounds = array<i64: 1, 64>}, {transform_indices = @transform_3, window_bounds = array<i64: 192, 64>}]} {
    %c0 = arith.constant 0 : index
    %c0_0 = arith.constant 0 : index
    %0 = vector.load %arg1[%c0, %c0_0] : memref<192x576xbf16, #tpu.memory_space<vmem>>, vector<192x576xbf16>
    %c0_1 = arith.constant 0 : index
    %c0_2 = arith.constant 0 : index
    %1 = vector.load %arg2[%c0_1, %c0_2] : memref<576x64xbf16, #tpu.memory_space<vmem>>, vector<576x64xbf16>
    %cst = arith.constant dense<0.000000e+00> : vector<192x64xf32>
    %2 = tpu.matmul %0, %1, %cst {dimension_numbers = #tpu.dot_dimension_numbers<[1], [0], [0], [1], [0, 0, 1, 1], [], []>} : vector<192x576xbf16>, vector<576x64xbf16>, vector<192x64xf32> -> vector<192x64xf32>
    %c0_3 = arith.constant 0 : index
    %c0_4 = arith.constant 0 : index
    %3 = vector.load %arg3[%c0_3, %c0_4] : memref<1x64xf32, #tpu.memory_space<vmem>>, vector<1x64xf32>
    %4 = vector.broadcast %3 : vector<1x64xf32> to vector<192x64xf32>
    %5 = arith.addf %2, %4 : vector<192x64xf32>
    %cst_5 = arith.constant 0.000000e+00 : f32
    %6 = vector.broadcast %cst_5 : f32 to vector<192x64xf32>
    %7 = arith.maximumf %5, %6 : vector<192x64xf32>
    %8 = arith.truncf %7 : vector<192x64xf32> to vector<192x64xbf16>
    %c0_6 = arith.constant 0 : index
    %c0_7 = arith.constant 0 : index
    %9 = vector.load %arg4[%c0_6, %c0_7] : memref<192x64xbf16, #tpu.memory_space<vmem>>, vector<192x64xbf16>
    tpu.vector_store %arg4[%c0_6, %c0_7], %8 {strides = array<i32>} : memref<192x64xbf16, #tpu.memory_space<vmem>>, vector<192x64xbf16>,
    return
  }
  func.func @transform_0(%arg0: i32) -> (i32, i32) {
    %c0_i32 = arith.constant 0 : i32
    %c0_i32_0 = arith.constant 0 : i32
    return %arg0, %c0_i32 : i32, i32
  }
  func.func @transform_1(%arg0: i32) -> (i32, i32) {
    %c0_i32 = arith.constant 0 : i32
    %c0_i32_0 = arith.constant 0 : i32
    %c0_i32_1 = arith.constant 0 : i32
    return %c0_i32, %c0_i32_0 : i32, i32
  }
  func.func @transform_2(%arg0: i32) -> (i32, i32) {
    %c0_i32 = arith.constant 0 : i32
    %c0_i32_0 = arith.constant 0 : i32
    %c0_i32_1 = arith.constant 0 : i32
    return %c0_i32, %c0_i32_0 : i32, i32
  }
  func.func @transform_3(%arg0: i32) -> (i32, i32) {
    %c0_i32 = arith.constant 0 : i32
    %c0_i32_0 = arith.constant 0 : i32
    return %arg0, %c0_i32 : i32, i32
  }
}

module attributes {stable_mosaic.version = 11 : i64} {
  func.func @_tail_kernel(%arg0: i32, %arg1: memref<10x2304xbf16, #tpu.memory_space<vmem>>, %arg2: memref<2304x50xbf16, #tpu.memory_space<vmem>>, %arg3: memref<1x50xf32, #tpu.memory_space<vmem>>, %arg4: memref<50x128xbf16, #tpu.memory_space<vmem>>, %arg5: memref<1x128xf32, #tpu.memory_space<vmem>>, %arg6: memref<32x128xbf16, #tpu.memory_space<vmem>>, %arg7: memref<32x50xbf16, #tpu.memory_space<vmem>>, %arg8: memref<1x50xf32, #tpu.memory_space<vmem>>, %arg9: memref<50x7xbf16, #tpu.memory_space<vmem>>, %arg10: memref<1x7xf32, #tpu.memory_space<vmem>>, %arg11: memref<2x7xf32, #tpu.memory_space<vmem>>) attributes {dimension_semantics = [#tpu.dimension_semantics<arbitrary>], iteration_bounds = array<i64: 1>, scalar_prefetch = 0 : i64, scratch_operands = 0 : i64, tpu.core_type = #tpu.core_type<tc>, window_params = [{pipeline_mode = #tpu.pipeline_mode<synchronous>, transform_indices = @transform_0, window_bounds = array<i64: 10, 2304>}, {pipeline_mode = #tpu.pipeline_mode<synchronous>, transform_indices = @transform_1, window_bounds = array<i64: 2304, 50>}, {pipeline_mode = #tpu.pipeline_mode<synchronous>, transform_indices = @transform_2, window_bounds = array<i64: 1, 50>}, {pipeline_mode = #tpu.pipeline_mode<synchronous>, transform_indices = @transform_3, window_bounds = array<i64: 50, 128>}, {pipeline_mode = #tpu.pipeline_mode<synchronous>, transform_indices = @transform_4, window_bounds = array<i64: 1, 128>}, {pipeline_mode = #tpu.pipeline_mode<synchronous>, transform_indices = @transform_5, window_bounds = array<i64: 32, 128>}, {pipeline_mode = #tpu.pipeline_mode<synchronous>, transform_indices = @transform_6, window_bounds = array<i64: 32, 50>}, {pipeline_mode = #tpu.pipeline_mode<synchronous>, transform_indices = @transform_7, window_bounds = array<i64: 1, 50>}, {pipeline_mode = #tpu.pipeline_mode<synchronous>, transform_indices = @transform_8, window_bounds = array<i64: 50, 7>}, {pipeline_mode = #tpu.pipeline_mode<synchronous>, transform_indices = @transform_9, window_bounds = array<i64: 1, 7>}, {pipeline_mode = #tpu.pipeline_mode<synchronous>, transform_indices = @transform_10, window_bounds = array<i64: 2, 7>}]} {
    %c0 = arith.constant 0 : index
    %c0_0 = arith.constant 0 : index
    %0 = vector.load %arg1[%c0, %c0_0] : memref<10x2304xbf16, #tpu.memory_space<vmem>>, vector<10x2304xbf16>
    %c0_1 = arith.constant 0 : index
    %c0_2 = arith.constant 0 : index
    %1 = vector.load %arg2[%c0_1, %c0_2] : memref<2304x50xbf16, #tpu.memory_space<vmem>>, vector<2304x50xbf16>
    %cst = arith.constant dense<0.000000e+00> : vector<10x50xf32>
    %2 = tpu.matmul %0, %1, %cst {dimension_numbers = #tpu.dot_dimension_numbers<[1], [0], [0], [1], [0, 0, 1, 1], [], []>} : vector<10x2304xbf16>, vector<2304x50xbf16>, vector<10x50xf32> -> vector<10x50xf32>
    %c0_3 = arith.constant 0 : index
    %c0_4 = arith.constant 0 : index
    %3 = vector.load %arg3[%c0_3, %c0_4] : memref<1x50xf32, #tpu.memory_space<vmem>>, vector<1x50xf32>
    %4 = vector.broadcast %3 : vector<1x50xf32> to vector<10x50xf32>
    %5 = arith.addf %2, %4 : vector<10x50xf32>
    %6 = arith.truncf %5 : vector<10x50xf32> to vector<10x50xbf16>
    %c0_5 = arith.constant 0 : index
    %c0_6 = arith.constant 0 : index
    %7 = vector.load %arg4[%c0_5, %c0_6] : memref<50x128xbf16, #tpu.memory_space<vmem>>, vector<50x128xbf16>
    %cst_7 = arith.constant dense<0.000000e+00> : vector<10x128xf32>
    %8 = tpu.matmul %6, %7, %cst_7 {dimension_numbers = #tpu.dot_dimension_numbers<[1], [0], [0], [1], [0, 0, 1, 1], [], []>} : vector<10x50xbf16>, vector<50x128xbf16>, vector<10x128xf32> -> vector<10x128xf32>
    %c0_8 = arith.constant 0 : index
    %c0_9 = arith.constant 0 : index
    %9 = vector.load %arg5[%c0_8, %c0_9] : memref<1x128xf32, #tpu.memory_space<vmem>>, vector<1x128xf32>
    %10 = vector.broadcast %9 : vector<1x128xf32> to vector<10x128xf32>
    %11 = arith.addf %8, %10 : vector<10x128xf32>
    %c0_10 = arith.constant 0 : index
    %c0_11 = arith.constant 0 : index
    %12 = vector.load %arg6[%c0_10, %c0_11] : memref<32x128xbf16, #tpu.memory_space<vmem>>, vector<32x128xbf16>
    %cst_12 = arith.constant 0.000000e+00 : f32
    %13 = vector.broadcast %cst_12 : f32 to vector<2x32xf32>
    %cst_13 = arith.constant 0.000000e+00 : f32
    %14 = vector.broadcast %cst_13 : f32 to vector<2x32xf32>
    %15 = vector.extract_strided_slice %11 {offsets = [0, 0], sizes = [2, 128], strides = [1, 1]} : vector<10x128xf32> to vector<2x128xf32>
    %16 = arith.truncf %13 : vector<2x32xf32> to vector<2x32xbf16>
    %cst_14 = arith.constant dense<0.000000e+00> : vector<2x128xf32>
    %17 = tpu.matmul %16, %12, %cst_14 {dimension_numbers = #tpu.dot_dimension_numbers<[1], [0], [0], [1], [0, 0, 1, 1], [], []>} : vector<2x32xbf16>, vector<32x128xbf16>, vector<2x128xf32> -> vector<2x128xf32>
    %18 = arith.addf %15, %17 : vector<2x128xf32>
    %19 = vector.extract_strided_slice %18 {offsets = [0, 0], sizes = [2, 32], strides = [1, 1]} : vector<2x128xf32> to vector<2x32xf32>
    %20 = arith.negf %19 : vector<2x32xf32>
    %21 = math.exp %20 : vector<2x32xf32>
    %cst_15 = arith.constant 1.000000e+00 : f32
    %22 = vector.broadcast %cst_15 : f32 to vector<2x32xf32>
    %23 = arith.addf %22, %21 : vector<2x32xf32>
    %24 = arith.divf %22, %23 : vector<2x32xf32>
    %25 = vector.extract_strided_slice %18 {offsets = [0, 32], sizes = [2, 32], strides = [1, 1]} : vector<2x128xf32> to vector<2x32xf32>
    %26 = arith.negf %25 : vector<2x32xf32>
    %27 = math.exp %26 : vector<2x32xf32>
    %cst_16 = arith.constant 1.000000e+00 : f32
    %28 = vector.broadcast %cst_16 : f32 to vector<2x32xf32>
    %29 = arith.addf %28, %27 : vector<2x32xf32>
    %30 = arith.divf %28, %29 : vector<2x32xf32>
    %31 = vector.extract_strided_slice %18 {offsets = [0, 64], sizes = [2, 32], strides = [1, 1]} : vector<2x128xf32> to vector<2x32xf32>
    %32 = math.tanh %31 : vector<2x32xf32>
    %33 = vector.extract_strided_slice %18 {offsets = [0, 96], sizes = [2, 32], strides = [1, 1]} : vector<2x128xf32> to vector<2x32xf32>
    %34 = arith.negf %33 : vector<2x32xf32>
    %35 = math.exp %34 : vector<2x32xf32>
    %cst_17 = arith.constant 1.000000e+00 : f32
    %36 = vector.broadcast %cst_17 : f32 to vector<2x32xf32>
    %37 = arith.addf %36, %35 : vector<2x32xf32>
    %38 = arith.divf %36, %37 : vector<2x32xf32>
    %39 = arith.mulf %30, %14 : vector<2x32xf32>
    %40 = arith.mulf %24, %32 : vector<2x32xf32>
    %41 = arith.addf %39, %40 : vector<2x32xf32>
    %42 = math.tanh %41 : vector<2x32xf32>
    %43 = arith.mulf %38, %42 : vector<2x32xf32>
    %44 = vector.extract_strided_slice %11 {offsets = [2, 0], sizes = [2, 128], strides = [1, 1]} : vector<10x128xf32> to vector<2x128xf32>
    %45 = arith.truncf %43 : vector<2x32xf32> to vector<2x32xbf16>
    %cst_18 = arith.constant dense<0.000000e+00> : vector<2x128xf32>
    %46 = tpu.matmul %45, %12, %cst_18 {dimension_numbers = #tpu.dot_dimension_numbers<[1], [0], [0], [1], [0, 0, 1, 1], [], []>} : vector<2x32xbf16>, vector<32x128xbf16>, vector<2x128xf32> -> vector<2x128xf32>
    %47 = arith.addf %44, %46 : vector<2x128xf32>
    %48 = vector.extract_strided_slice %47 {offsets = [0, 0], sizes = [2, 32], strides = [1, 1]} : vector<2x128xf32> to vector<2x32xf32>
    %49 = arith.negf %48 : vector<2x32xf32>
    %50 = math.exp %49 : vector<2x32xf32>
    %cst_19 = arith.constant 1.000000e+00 : f32
    %51 = vector.broadcast %cst_19 : f32 to vector<2x32xf32>
    %52 = arith.addf %51, %50 : vector<2x32xf32>
    %53 = arith.divf %51, %52 : vector<2x32xf32>
    %54 = vector.extract_strided_slice %47 {offsets = [0, 32], sizes = [2, 32], strides = [1, 1]} : vector<2x128xf32> to vector<2x32xf32>
    %55 = arith.negf %54 : vector<2x32xf32>
    %56 = math.exp %55 : vector<2x32xf32>
    %cst_20 = arith.constant 1.000000e+00 : f32
    %57 = vector.broadcast %cst_20 : f32 to vector<2x32xf32>
    %58 = arith.addf %57, %56 : vector<2x32xf32>
    %59 = arith.divf %57, %58 : vector<2x32xf32>
    %60 = vector.extract_strided_slice %47 {offsets = [0, 64], sizes = [2, 32], strides = [1, 1]} : vector<2x128xf32> to vector<2x32xf32>
    %61 = math.tanh %60 : vector<2x32xf32>
    %62 = vector.extract_strided_slice %47 {offsets = [0, 96], sizes = [2, 32], strides = [1, 1]} : vector<2x128xf32> to vector<2x32xf32>
    %63 = arith.negf %62 : vector<2x32xf32>
    %64 = math.exp %63 : vector<2x32xf32>
    %cst_21 = arith.constant 1.000000e+00 : f32
    %65 = vector.broadcast %cst_21 : f32 to vector<2x32xf32>
    %66 = arith.addf %65, %64 : vector<2x32xf32>
    %67 = arith.divf %65, %66 : vector<2x32xf32>
    %68 = arith.mulf %59, %41 : vector<2x32xf32>
    %69 = arith.mulf %53, %61 : vector<2x32xf32>
    %70 = arith.addf %68, %69 : vector<2x32xf32>
    %71 = math.tanh %70 : vector<2x32xf32>
    %72 = arith.mulf %67, %71 : vector<2x32xf32>
    %73 = vector.extract_strided_slice %11 {offsets = [4, 0], sizes = [2, 128], strides = [1, 1]} : vector<10x128xf32> to vector<2x128xf32>
    %74 = arith.truncf %72 : vector<2x32xf32> to vector<2x32xbf16>
    %cst_22 = arith.constant dense<0.000000e+00> : vector<2x128xf32>
    %75 = tpu.matmul %74, %12, %cst_22 {dimension_numbers = #tpu.dot_dimension_numbers<[1], [0], [0], [1], [0, 0, 1, 1], [], []>} : vector<2x32xbf16>, vector<32x128xbf16>, vector<2x128xf32> -> vector<2x128xf32>
    %76 = arith.addf %73, %75 : vector<2x128xf32>
    %77 = vector.extract_strided_slice %76 {offsets = [0, 0], sizes = [2, 32], strides = [1, 1]} : vector<2x128xf32> to vector<2x32xf32>
    %78 = arith.negf %77 : vector<2x32xf32>
    %79 = math.exp %78 : vector<2x32xf32>
    %cst_23 = arith.constant 1.000000e+00 : f32
    %80 = vector.broadcast %cst_23 : f32 to vector<2x32xf32>
    %81 = arith.addf %80, %79 : vector<2x32xf32>
    %82 = arith.divf %80, %81 : vector<2x32xf32>
    %83 = vector.extract_strided_slice %76 {offsets = [0, 32], sizes = [2, 32], strides = [1, 1]} : vector<2x128xf32> to vector<2x32xf32>
    %84 = arith.negf %83 : vector<2x32xf32>
    %85 = math.exp %84 : vector<2x32xf32>
    %cst_24 = arith.constant 1.000000e+00 : f32
    %86 = vector.broadcast %cst_24 : f32 to vector<2x32xf32>
    %87 = arith.addf %86, %85 : vector<2x32xf32>
    %88 = arith.divf %86, %87 : vector<2x32xf32>
    %89 = vector.extract_strided_slice %76 {offsets = [0, 64], sizes = [2, 32], strides = [1, 1]} : vector<2x128xf32> to vector<2x32xf32>
    %90 = math.tanh %89 : vector<2x32xf32>
    %91 = vector.extract_strided_slice %76 {offsets = [0, 96], sizes = [2, 32], strides = [1, 1]} : vector<2x128xf32> to vector<2x32xf32>
    %92 = arith.negf %91 : vector<2x32xf32>
    %93 = math.exp %92 : vector<2x32xf32>
    %cst_25 = arith.constant 1.000000e+00 : f32
    %94 = vector.broadcast %cst_25 : f32 to vector<2x32xf32>
    %95 = arith.addf %94, %93 : vector<2x32xf32>
    %96 = arith.divf %94, %95 : vector<2x32xf32>
    %97 = arith.mulf %88, %70 : vector<2x32xf32>
    %98 = arith.mulf %82, %90 : vector<2x32xf32>
    %99 = arith.addf %97, %98 : vector<2x32xf32>
    %100 = math.tanh %99 : vector<2x32xf32>
    %101 = arith.mulf %96, %100 : vector<2x32xf32>
    %102 = vector.extract_strided_slice %11 {offsets = [6, 0], sizes = [2, 128], strides = [1, 1]} : vector<10x128xf32> to vector<2x128xf32>
    %103 = arith.truncf %101 : vector<2x32xf32> to vector<2x32xbf16>
    %cst_26 = arith.constant dense<0.000000e+00> : vector<2x128xf32>
    %104 = tpu.matmul %103, %12, %cst_26 {dimension_numbers = #tpu.dot_dimension_numbers<[1], [0], [0], [1], [0, 0, 1, 1], [], []>} : vector<2x32xbf16>, vector<32x128xbf16>, vector<2x128xf32> -> vector<2x128xf32>
    %105 = arith.addf %102, %104 : vector<2x128xf32>
    %106 = vector.extract_strided_slice %105 {offsets = [0, 0], sizes = [2, 32], strides = [1, 1]} : vector<2x128xf32> to vector<2x32xf32>
    %107 = arith.negf %106 : vector<2x32xf32>
    %108 = math.exp %107 : vector<2x32xf32>
    %cst_27 = arith.constant 1.000000e+00 : f32
    %109 = vector.broadcast %cst_27 : f32 to vector<2x32xf32>
    %110 = arith.addf %109, %108 : vector<2x32xf32>
    %111 = arith.divf %109, %110 : vector<2x32xf32>
    %112 = vector.extract_strided_slice %105 {offsets = [0, 32], sizes = [2, 32], strides = [1, 1]} : vector<2x128xf32> to vector<2x32xf32>
    %113 = arith.negf %112 : vector<2x32xf32>
    %114 = math.exp %113 : vector<2x32xf32>
    %cst_28 = arith.constant 1.000000e+00 : f32
    %115 = vector.broadcast %cst_28 : f32 to vector<2x32xf32>
    %116 = arith.addf %115, %114 : vector<2x32xf32>
    %117 = arith.divf %115, %116 : vector<2x32xf32>
    %118 = vector.extract_strided_slice %105 {offsets = [0, 64], sizes = [2, 32], strides = [1, 1]} : vector<2x128xf32> to vector<2x32xf32>
    %119 = math.tanh %118 : vector<2x32xf32>
    %120 = vector.extract_strided_slice %105 {offsets = [0, 96], sizes = [2, 32], strides = [1, 1]} : vector<2x128xf32> to vector<2x32xf32>
    %121 = arith.negf %120 : vector<2x32xf32>
    %122 = math.exp %121 : vector<2x32xf32>
    %cst_29 = arith.constant 1.000000e+00 : f32
    %123 = vector.broadcast %cst_29 : f32 to vector<2x32xf32>
    %124 = arith.addf %123, %122 : vector<2x32xf32>
    %125 = arith.divf %123, %124 : vector<2x32xf32>
    %126 = arith.mulf %117, %99 : vector<2x32xf32>
    %127 = arith.mulf %111, %119 : vector<2x32xf32>
    %128 = arith.addf %126, %127 : vector<2x32xf32>
    %129 = math.tanh %128 : vector<2x32xf32>
    %130 = arith.mulf %125, %129 : vector<2x32xf32>
    %131 = vector.extract_strided_slice %11 {offsets = [8, 0], sizes = [2, 128], strides = [1, 1]} : vector<10x128xf32> to vector<2x128xf32>
    %132 = arith.truncf %130 : vector<2x32xf32> to vector<2x32xbf16>
    %cst_30 = arith.constant dense<0.000000e+00> : vector<2x128xf32>
    %133 = tpu.matmul %132, %12, %cst_30 {dimension_numbers = #tpu.dot_dimension_numbers<[1], [0], [0], [1], [0, 0, 1, 1], [], []>} : vector<2x32xbf16>, vector<32x128xbf16>, vector<2x128xf32> -> vector<2x128xf32>
    %134 = arith.addf %131, %133 : vector<2x128xf32>
    %135 = vector.extract_strided_slice %134 {offsets = [0, 0], sizes = [2, 32], strides = [1, 1]} : vector<2x128xf32> to vector<2x32xf32>
    %136 = arith.negf %135 : vector<2x32xf32>
    %137 = math.exp %136 : vector<2x32xf32>
    %cst_31 = arith.constant 1.000000e+00 : f32
    %138 = vector.broadcast %cst_31 : f32 to vector<2x32xf32>
    %139 = arith.addf %138, %137 : vector<2x32xf32>
    %140 = arith.divf %138, %139 : vector<2x32xf32>
    %141 = vector.extract_strided_slice %134 {offsets = [0, 32], sizes = [2, 32], strides = [1, 1]} : vector<2x128xf32> to vector<2x32xf32>
    %142 = arith.negf %141 : vector<2x32xf32>
    %143 = math.exp %142 : vector<2x32xf32>
    %cst_32 = arith.constant 1.000000e+00 : f32
    %144 = vector.broadcast %cst_32 : f32 to vector<2x32xf32>
    %145 = arith.addf %144, %143 : vector<2x32xf32>
    %146 = arith.divf %144, %145 : vector<2x32xf32>
    %147 = vector.extract_strided_slice %134 {offsets = [0, 64], sizes = [2, 32], strides = [1, 1]} : vector<2x128xf32> to vector<2x32xf32>
    %148 = math.tanh %147 : vector<2x32xf32>
    %149 = vector.extract_strided_slice %134 {offsets = [0, 96], sizes = [2, 32], strides = [1, 1]} : vector<2x128xf32> to vector<2x32xf32>
    %150 = arith.negf %149 : vector<2x32xf32>
    %151 = math.exp %150 : vector<2x32xf32>
    %cst_33 = arith.constant 1.000000e+00 : f32
    %152 = vector.broadcast %cst_33 : f32 to vector<2x32xf32>
    %153 = arith.addf %152, %151 : vector<2x32xf32>
    %154 = arith.divf %152, %153 : vector<2x32xf32>
    %155 = arith.mulf %146, %128 : vector<2x32xf32>
    %156 = arith.mulf %140, %148 : vector<2x32xf32>
    %157 = arith.addf %155, %156 : vector<2x32xf32>
    %158 = math.tanh %157 : vector<2x32xf32>
    %159 = arith.mulf %154, %158 : vector<2x32xf32>
    %160 = arith.truncf %159 : vector<2x32xf32> to vector<2x32xbf16>
    %c0_34 = arith.constant 0 : index
    %c0_35 = arith.constant 0 : index
    %161 = vector.load %arg7[%c0_34, %c0_35] : memref<32x50xbf16, #tpu.memory_space<vmem>>, vector<32x50xbf16>
    %cst_36 = arith.constant dense<0.000000e+00> : vector<2x50xf32>
    %162 = tpu.matmul %160, %161, %cst_36 {dimension_numbers = #tpu.dot_dimension_numbers<[1], [0], [0], [1], [0, 0, 1, 1], [], []>} : vector<2x32xbf16>, vector<32x50xbf16>, vector<2x50xf32> -> vector<2x50xf32>
    %c0_37 = arith.constant 0 : index
    %c0_38 = arith.constant 0 : index
    %163 = vector.load %arg8[%c0_37, %c0_38] : memref<1x50xf32, #tpu.memory_space<vmem>>, vector<1x50xf32>
    %164 = vector.broadcast %163 : vector<1x50xf32> to vector<2x50xf32>
    %165 = arith.addf %162, %164 : vector<2x50xf32>
    %cst_39 = arith.constant 0.000000e+00 : f32
    %166 = vector.broadcast %cst_39 : f32 to vector<2x50xf32>
    %167 = arith.maximumf %165, %166 : vector<2x50xf32>
    %168 = arith.truncf %167 : vector<2x50xf32> to vector<2x50xbf16>
    %c0_40 = arith.constant 0 : index
    %c0_41 = arith.constant 0 : index
    %169 = vector.load %arg9[%c0_40, %c0_41] : memref<50x7xbf16, #tpu.memory_space<vmem>>, vector<50x7xbf16>
    %cst_42 = arith.constant dense<0.000000e+00> : vector<2x7xf32>
    %170 = tpu.matmul %168, %169, %cst_42 {dimension_numbers = #tpu.dot_dimension_numbers<[1], [0], [0], [1], [0, 0, 1, 1], [], []>} : vector<2x50xbf16>, vector<50x7xbf16>, vector<2x7xf32> -> vector<2x7xf32>
    %c0_43 = arith.constant 0 : index
    %c0_44 = arith.constant 0 : index
    %171 = vector.load %arg10[%c0_43, %c0_44] : memref<1x7xf32, #tpu.memory_space<vmem>>, vector<1x7xf32>
    %172 = vector.broadcast %171 : vector<1x7xf32> to vector<2x7xf32>
    %173 = arith.addf %170, %172 : vector<2x7xf32>
    %c0_45 = arith.constant 0 : index
    %c0_46 = arith.constant 0 : index
    %174 = vector.load %arg11[%c0_45, %c0_46] : memref<2x7xf32, #tpu.memory_space<vmem>>, vector<2x7xf32>
    tpu.vector_store %arg11[%c0_45, %c0_46], %173 {strides = array<i32>} : memref<2x7xf32, #tpu.memory_space<vmem>>, vector<2x7xf32>,
    return
  }
  func.func @transform_0(%arg0: i32) -> (i32, i32) {
    %c0_i32 = arith.constant 0 : i32
    %c0_i32_0 = arith.constant 0 : i32
    %c0_i32_1 = arith.constant 0 : i32
    return %c0_i32, %c0_i32_0 : i32, i32
  }
  func.func @transform_1(%arg0: i32) -> (i32, i32) {
    %c0_i32 = arith.constant 0 : i32
    %c0_i32_0 = arith.constant 0 : i32
    %c0_i32_1 = arith.constant 0 : i32
    return %c0_i32, %c0_i32_0 : i32, i32
  }
  func.func @transform_2(%arg0: i32) -> (i32, i32) {
    %c0_i32 = arith.constant 0 : i32
    %c0_i32_0 = arith.constant 0 : i32
    %c0_i32_1 = arith.constant 0 : i32
    return %c0_i32, %c0_i32_0 : i32, i32
  }
  func.func @transform_3(%arg0: i32) -> (i32, i32) {
    %c0_i32 = arith.constant 0 : i32
    %c0_i32_0 = arith.constant 0 : i32
    %c0_i32_1 = arith.constant 0 : i32
    return %c0_i32, %c0_i32_0 : i32, i32
  }
  func.func @transform_4(%arg0: i32) -> (i32, i32) {
    %c0_i32 = arith.constant 0 : i32
    %c0_i32_0 = arith.constant 0 : i32
    %c0_i32_1 = arith.constant 0 : i32
    return %c0_i32, %c0_i32_0 : i32, i32
  }
  func.func @transform_5(%arg0: i32) -> (i32, i32) {
    %c0_i32 = arith.constant 0 : i32
    %c0_i32_0 = arith.constant 0 : i32
    %c0_i32_1 = arith.constant 0 : i32
    return %c0_i32, %c0_i32_0 : i32, i32
  }
  func.func @transform_6(%arg0: i32) -> (i32, i32) {
    %c0_i32 = arith.constant 0 : i32
    %c0_i32_0 = arith.constant 0 : i32
    %c0_i32_1 = arith.constant 0 : i32
    return %c0_i32, %c0_i32_0 : i32, i32
  }
  func.func @transform_7(%arg0: i32) -> (i32, i32) {
    %c0_i32 = arith.constant 0 : i32
    %c0_i32_0 = arith.constant 0 : i32
    %c0_i32_1 = arith.constant 0 : i32
    return %c0_i32, %c0_i32_0 : i32, i32
  }
  func.func @transform_8(%arg0: i32) -> (i32, i32) {
    %c0_i32 = arith.constant 0 : i32
    %c0_i32_0 = arith.constant 0 : i32
    %c0_i32_1 = arith.constant 0 : i32
    return %c0_i32, %c0_i32_0 : i32, i32
  }
  func.func @transform_9(%arg0: i32) -> (i32, i32) {
    %c0_i32 = arith.constant 0 : i32
    %c0_i32_0 = arith.constant 0 : i32
    %c0_i32_1 = arith.constant 0 : i32
    return %c0_i32, %c0_i32_0 : i32, i32
  }
  func.func @transform_10(%arg0: i32) -> (i32, i32) {
    %c0_i32 = arith.constant 0 : i32
    %c0_i32_0 = arith.constant 0 : i32
    %c0_i32_1 = arith.constant 0 : i32
    return %c0_i32, %c0_i32_0 : i32, i32
  }
}

</mosaic_0001>

<bundles_post_ra>
// kernel: forward.5
= control target key start
LH: loop header
LB: loop body
LE: loop exit
PB: predicated region body
PF: predicated region fallthrough
CT: control target
= control target key end

     0   :  { %s5879_s12 = smov 0   ;;  %s7032_s0 = inlined_call_operand.vmem [shape: bf16[4410,27], index: 0, kind: input, shape index: {}]   ;;  %s7033_s1 = inlined_call_operand.vmem [shape: bf16[27,64], index: 1, kind: input, shape index: {}]   ;;  %s7034_s2 = inlined_call_operand.vmem [shape: f32[1,64], index: 2, kind: input, shape index: {}]   ;;  %s7035_s3 = inlined_call_operand.vmem [shape: bf16[4410,64], index: 3, kind: output, shape index: {}]  }
   0x1 LB: > { %s4435_s13 = sadd.s32 4294967295, %s5856_s12   ;;  %p4439_p0 = scmp.ge.s32.totalorder %s5856_s12, 1  ;;  %s5856_s12 = sphi %s5879_s12, %s13_s12  }
   0x2   : > { %p138_p1 = scmp.lt.s32.totalorder %s5856_s12, 3 }
   0x4   : > { %p139_p2 = pnand %p4439_p0, %p138_p1 }
   0x5   : > { %v5708_v0 = vld [vmem:[%s7033_s1] sm:$0xff] (!%p139_p2)   ;;  %vm1578_vm0 = vcmask (!%p139_p2), 1044480   ;;  %v5709_v1 = vld [vmem:[%s7033_s1 + $0x8] sm:$0x3f] (!%p139_p2)   ;;  %vm1579_vm1 = vcmask (!%p139_p2), 1045504   ;;  %s162_s18 = smul.u32 (!%p139_p2), 276, %s4435_s13 }
   0x6   : > { %142 = sbr.rel (%p139_p2) target bundleno = 512 (0x200), region = 32  ;;  %5415 = vmatprep.subr.bf16.mxu0 (!%p139_p2), %v5708_v0  ;;  %5695 = vmatprep.subr.bf16.mxu1 (!%p139_p2), %v5708_v0  ;;  %v5858_v2 = vmov (!%p139_p2), 65535   ;;  %vm1163_vm2 = vcmask (!%p139_p2), 220160   ;;  %vm4102_vm3 = vcmask (!%p139_p2), 519168  }
   0x7   : > { %5416 = vmatpush3.bf16.msra.mxu0 (!%p139_p2), %v5708_v0  ;;  %v1580_v3 = vsel (!%p139_p2), %vm1578_vm0, 4294967295, %v5858_v2  ;;  %5697 = vmatpush3.bf16.msra.mxu1 (!%p139_p2), %v5708_v0  ;;  %p163_p3 = scmp.lt.s32.totalorder (!%p139_p2), %s162_s18, 551 }
   0x8   : > { %v1581_v4 = vsel (!%p139_p2), %vm1579_vm1, %v1580_v3, 0 }
   0x9   : > { %v1583_v5 = vand.u32 (!%p139_p2), %v5709_v1, %v1581_v4 }
   0xb   : > { %5417 = vmatprep.subr.bf16.mxu0 (!%p139_p2), %v1583_v5  ;;  %5696 = vmatprep.subr.bf16.mxu1 (!%p139_p2), %v1583_v5 }
   0xc   : > { %5418 = vmatpush3.bf16.msra.mxu0 (!%p139_p2), %v1583_v5  ;;  %5698 = vmatpush3.bf16.msra.mxu1 (!%p139_p2), %v1583_v5 }
   0xd   : > { %s7037_s18 = smov (!%p163_p3, %s162_s18), 551 }
   0xe   : > { %s4440_s19 = sshll.u32 %s7037_s18, 2 }
   0xf   : > { %s5901_s22 = scalar_lea.vmem %s7032_s0, %s4440_s19  ;;  %s6140_s27 = scalar_lea.vmem %s7035_s3, %s4440_s19 }
  0x10   : > { %v5710_v6 = vld [vmem:[%s5901_s22] sm:$0xff]   ;;  %v5711_v7 = vld [vmem:[%s5901_s22 + $0x8] sm:$0xff]   ;;  %v5712_v8 = vld [vmem:[%s5901_s22 + $0x230] sm:$0xff]  }
  0x11   : > { %5419 = vmatprep.mubr.msk.bf16.mxu0 %vm1163_vm2, %v5710_v6  ;;  %v5713_v9 = vld [vmem:[%s5901_s22 + $0x238] sm:$0xff]   ;;  %5559 = vmatprep.mubr.msk.bf16.mxu1 %vm1163_vm2, %v5712_v8  ;;  %v5714_v10 = vld [vmem:[%s5901_s22 + $0x10] sm:$0xff]   ;;  %v5716_v11 = vld [vmem:[%s5901_s22 + $0x240] sm:$0xff]  }
  0x12   : > { %5420 = vmatmul.mubr.msk.bf16.vlgmr.msra.gmra.mrb[0].mxu0 %vm1163_vm2, %v5711_v7  ;;  %5560 = vmatmul.mubr.msk.bf16.vlgmr.msra.gmra.mrb[0].mxu1 %vm1163_vm2, %v5713_v9  ;;  %v5715_v12 = vld [vmem:[%s5901_s22 + $0x18] sm:$0xff]   ;;  %v5718_v13 = vld [vmem:[%s5901_s22 + $0x20] sm:$0xff]   ;;  %v5717_v14 = vld [vmem:[%s5901_s22 + $0x248] sm:$0xff]  }
  0x13   : > { %5423 = vmatprep.mubr.msk.bf16.mxu0 %vm1163_vm2, %v5714_v10  ;;  %5563 = vmatprep.mubr.msk.bf16.mxu1 %vm1163_vm2, %v5716_v11  ;;  %v5720_v15 = vld [vmem:[%s5901_s22 + $0x250] sm:$0xff]   ;;  %v5719_v16 = vld [vmem:[%s5901_s22 + $0x28] sm:$0xff]   ;;  %v5721_v18 = vld [vmem:[%s5901_s22 + $0x258] sm:$0xff]  }
  0x14   : > { %v5722_v17 = vld [vmem:[%s5901_s22 + $0x30] sm:$0xff]   ;;  %v5724_v19 = vld [vmem:[%s5901_s22 + $0x260] sm:$0xff]   ;;  %v5723_v20 = vld [vmem:[%s5901_s22 + $0x38] sm:$0xff]  }
  0x15   : > { %v5726_v21 = vld [vmem:[%s5901_s22 + $0x40] sm:$0xff]   ;;  %v5725_v22 = vld [vmem:[%s5901_s22 + $0x268] sm:$0xff]   ;;  %v5728_v23 = vld [vmem:[%s5901_s22 + $0x270] sm:$0xff]  }
  0x16   : > { %v5727_v24 = vld [vmem:[%s5901_s22 + $0x48] sm:$0xff]   ;;  %v5730_v25 = vld [vmem:[%s5901_s22 + $0x50] sm:$0xff]   ;;  %v5729_v26 = vld [vmem:[%s5901_s22 + $0x278] sm:$0xff]  }
  0x17   : > { %v5732_v27 = vld [vmem:[%s5901_s22 + $0x280] sm:$0xff]   ;;  %v5731_v28 = vld [vmem:[%s5901_s22 + $0x58] sm:$0xff]   ;;  %v5733_v30 = vld [vmem:[%s5901_s22 + $0x288] sm:$0xff]  }
  0x18   : > { %v5734_v29 = vld [vmem:[%s5901_s22 + $0x60] sm:$0xff]   ;;  %v5736_v31 = vld [vmem:[%s5901_s22 + $0x290] sm:$0xff]   ;;  %v5735_v32 = vld [vmem:[%s5901_s22 + $0x68] sm:$0xff]  }
  0x19   : > { %v5738_v33 = vld [vmem:[%s5901_s22 + $0x70] sm:$0xff]   ;;  %v5737_v34 = vld [vmem:[%s5901_s22 + $0x298] sm:$0xff]   ;;  %v5740_v35 = vld [vmem:[%s5901_s22 + $0x2a0] sm:$0xff]  }
  0x1a   : > { %5424 = vmatmul.mubr.msk.bf16.gmra.mrb[4].mxu0 %vm1163_vm2, %v5715_v12  ;;  %5564 = vmatmul.mubr.msk.bf16.gmra.mrb[4].mxu1 %vm1163_vm2, %v5717_v14  ;;  %v5739_v36 = vld [vmem:[%s5901_s22 + $0x78] sm:$0xff]   ;;  %v5742_v37 = vld [vmem:[%s5901_s22 + $0x80] sm:$0xff]   ;;  %v5741_v38 = vld [vmem:[%s5901_s22 + $0x2a8] sm:$0xff]  }
  0x1b   : > { %5427 = vmatprep.mubr.msk.bf16.mxu0 %vm1163_vm2, %v5718_v13  ;;  %5567 = vmatprep.mubr.msk.bf16.mxu1 %vm1163_vm2, %v5720_v15  ;;  %v5744_v39 = vld [vmem:[%s5901_s22 + $0x2b0] sm:$0xff]   ;;  %v5743_v40 = vld [vmem:[%s5901_s22 + $0x88] sm:$0xff]   ;;  %v5745_v42 = vld [vmem:[%s5901_s22 + $0x2b8] sm:$0xff]  }
  0x1c   : > { %v5746_v41 = vld [vmem:[%s5901_s22 + $0x90] sm:$0xff]   ;;  %v5748_v43 = vld [vmem:[%s5901_s22 + $0x2c0] sm:$0xff]   ;;  %v5747_v44 = vld [vmem:[%s5901_s22 + $0x98] sm:$0xff]  }
  0x1d   : > { %v5750_v45 = vld [vmem:[%s5901_s22 + $0xa0] sm:$0xff]   ;;  %v5749_v46 = vld [vmem:[%s5901_s22 + $0x2c8] sm:$0xff]   ;;  %v5752_v47 = vld [vmem:[%s5901_s22 + $0x2d0] sm:$0xff]  }
  0x1e   : > { %v5751_v48 = vld [vmem:[%s5901_s22 + $0xa8] sm:$0xff]   ;;  %v5754_v49 = vld [vmem:[%s5901_s22 + $0xb0] sm:$0xff]   ;;  %v5753_v50 = vld [vmem:[%s5901_s22 + $0x2d8] sm:$0xff]  }
  0x1f   : > { %v5756_v51 = vld [vmem:[%s5901_s22 + $0x2e0] sm:$0xff]   ;;  %v5755_v52 = vld [vmem:[%s5901_s22 + $0xb8] sm:$0xff]   ;;  %v5757_v54 = vld [vmem:[%s5901_s22 + $0x2e8] sm:$0xff]  }
  0x20   : > { %v5758_v53 = vld [vmem:[%s5901_s22 + $0xc0] sm:$0xff]   ;;  %v5760_v55 = vld [vmem:[%s5901_s22 + $0x2f0] sm:$0xff]   ;;  %v5759_v56 = vld [vmem:[%s5901_s22 + $0xc8] sm:$0xff]  }
  0x21   : > { %v5762_v57 = vld [vmem:[%s5901_s22 + $0xd0] sm:$0xff]   ;;  %v5761_v58 = vld [vmem:[%s5901_s22 + $0x2f8] sm:$0xff]   ;;  %v5764_v59 = vld [vmem:[%s5901_s22 + $0x300] sm:$0xff]  }
  0x22   : > { %5428 = vmatmul.mubr.msk.bf16.gmra.mrb[8].mxu0 %vm1163_vm2, %v5719_v16  ;;  %5568 = vmatmul.mubr.msk.bf16.gmra.mrb[8].mxu1 %vm1163_vm2, %v5721_v18  ;;  %v5763_v60 = vld [vmem:[%s5901_s22 + $0xd8] sm:$0xff]   ;;  %v5766_v61 = vld [vmem:[%s5901_s22 + $0xe0] sm:$0xff]   ;;  %v5765_v62 = vld [vmem:[%s5901_s22 + $0x308] sm:$0xff]  }
  0x23   : > { %5431 = vmatprep.mubr.msk.bf16.mxu0 %vm1163_vm2, %v5722_v17  ;;  %5571 = vmatprep.mubr.msk.bf16.mxu1 %vm1163_vm2, %v5724_v19  ;;  %v5768_v63 = vld [vmem:[%s5901_s22 + $0x310] sm:$0xff]   ;;  %v5767_v0 = vld [vmem:[%s5901_s22 + $0xe8] sm:$0xff]   ;;  %v5769_v2 = vld [vmem:[%s5901_s22 + $0x318] sm:$0xff]  }
  0x24   : > { %v5770_v1 = vld [vmem:[%s5901_s22 + $0xf0] sm:$0xff]   ;;  %v5772_v3 = vld [vmem:[%s5901_s22 + $0x320] sm:$0xff]   ;;  %v5771_v4 = vld [vmem:[%s5901_s22 + $0xf8] sm:$0xff]  }
  0x25   : > { %v5774_v5 = vld [vmem:[%s5901_s22 + $0x100] sm:$0xff]   ;;  %v5773_v6 = vld [vmem:[%s5901_s22 + $0x328] sm:$0xff]   ;;  %v5776_v7 = vld [vmem:[%s5901_s22 + $0x330] sm:$0xff]  }
  0x26   : > { %v5775_v8 = vld [vmem:[%s5901_s22 + $0x108] sm:$0xff]   ;;  %v5778_v9 = vld [vmem:[%s5901_s22 + $0x110] sm:$0xff]   ;;  %v5777_v10 = vld [vmem:[%s5901_s22 + $0x338] sm:$0xff]  }
  0x27   : > { %v5780_v11 = vld [vmem:[%s5901_s22 + $0x340] sm:$0xff]   ;;  %v5779_v12 = vld [vmem:[%s5901_s22 + $0x118] sm:$0xff]   ;;  %v5781_v14 = vld [vmem:[%s5901_s22 + $0x348] sm:$0xff]  }
  0x28   : > { %v5782_v13 = vld [vmem:[%s5901_s22 + $0x120] sm:$0xff]   ;;  %v5784_v15 = vld [vmem:[%s5901_s22 + $0x350] sm:$0xff]   ;;  %v5783_v16 = vld [vmem:[%s5901_s22 + $0x128] sm:$0xff]  }
  0x29   : > { %v5786_v17 = vld [vmem:[%s5901_s22 + $0x130] sm:$0xff]   ;;  %v5785_v18 = vld [vmem:[%s5901_s22 + $0x358] sm:$0xff]   ;;  %v5788_v19 = vld [vmem:[%s5901_s22 + $0x360] sm:$0xff]  }
  0x2a   : > { %5432 = vmatmul.mubr.msk.bf16.gmra.mrb[12].mxu0 %vm1163_vm2, %v5723_v20  ;;  %5572 = vmatmul.mubr.msk.bf16.gmra.mrb[12].mxu1 %vm1163_vm2, %v5725_v22  ;;  %v5787_v20 = vld [vmem:[%s5901_s22 + $0x138] sm:$0xff]   ;;  %v5789_v22 = vld [vmem:[%s5901_s22 + $0x368] sm:$0xff]  }
  0x2b   : > { %5435 = vmatprep.mubr.msk.bf16.mxu0 %vm1163_vm2, %v5726_v21  ;;  %5575 = vmatprep.mubr.msk.bf16.mxu1 %vm1163_vm2, %v5728_v23  ;;  %v5790_v21 = vld [vmem:[%s5901_s22 + $0x140] sm:$0xff]   ;;  %v5792_v23 = vld [vmem:[%s5901_s22 + $0x370] sm:$0xff]  }
  0x32   : > { %5436 = vmatmul.mubr.msk.bf16.gmra.mrb[16].mxu0 %vm1163_vm2, %v5727_v24  ;;  %5576 = vmatmul.mubr.msk.bf16.gmra.mrb[16].mxu1 %vm1163_vm2, %v5729_v26  ;;  %v5791_v24 = vld [vmem:[%s5901_s22 + $0x148] sm:$0xff]   ;;  %v5793_v26 = vld [vmem:[%s5901_s22 + $0x378] sm:$0xff]  }
  0x33   : > { %5439 = vmatprep.mubr.msk.bf16.mxu0 %vm1163_vm2, %v5730_v25  ;;  %5579 = vmatprep.mubr.msk.bf16.mxu1 %vm1163_vm2, %v5732_v27  ;;  %v5794_v25 = vld [vmem:[%s5901_s22 + $0x150] sm:$0xff]   ;;  %v5796_v27 = vld [vmem:[%s5901_s22 + $0x380] sm:$0xff]  }
  0x3a   : > { %5440 = vmatmul.mubr.msk.bf16.gmra.mrb[20].mxu0 %vm1163_vm2, %v5731_v28  ;;  %5580 = vmatmul.mubr.msk.bf16.gmra.mrb[20].mxu1 %vm1163_vm2, %v5733_v30  ;;  %v5795_v28 = vld [vmem:[%s5901_s22 + $0x158] sm:$0xff]   ;;  %v5797_v30 = vld [vmem:[%s5901_s22 + $0x388] sm:$0xff]  }
  0x3b   : > { %5443 = vmatprep.mubr.msk.bf16.mxu0 %vm1163_vm2, %v5734_v29  ;;  %5583 = vmatprep.mubr.msk.bf16.mxu1 %vm1163_vm2, %v5736_v31  ;;  %v5798_v29 = vld [vmem:[%s5901_s22 + $0x160] sm:$0xff]   ;;  %v5800_v31 = vld [vmem:[%s5901_s22 + $0x390] sm:$0xff]  }
  0x42   : > { %5444 = vmatmul.mubr.msk.bf16.gmra.mrb[24].mxu0 %vm1163_vm2, %v5735_v32  ;;  %5584 = vmatmul.mubr.msk.bf16.gmra.mrb[24].mxu1 %vm1163_vm2, %v5737_v34  ;;  %v5799_v32 = vld [vmem:[%s5901_s22 + $0x168] sm:$0xff]   ;;  %v5801_v34 = vld [vmem:[%s5901_s22 + $0x398] sm:$0xff]  }
  0x43   : > { %5447 = vmatprep.mubr.msk.bf16.mxu0 %vm1163_vm2, %v5738_v33  ;;  %5587 = vmatprep.mubr.msk.bf16.mxu1 %vm1163_vm2, %v5740_v35  ;;  %v5802_v33 = vld [vmem:[%s5901_s22 + $0x170] sm:$0xff]   ;;  %v5804_v35 = vld [vmem:[%s5901_s22 + $0x3a0] sm:$0xff]  }
  0x4a   : > { %5448 = vmatmul.mubr.msk.bf16.gmra.mrb[28].mxu0 %vm1163_vm2, %v5739_v36  ;;  %5588 = vmatmul.mubr.msk.bf16.gmra.mrb[28].mxu1 %vm1163_vm2, %v5741_v38  ;;  %v5803_v36 = vld [vmem:[%s5901_s22 + $0x178] sm:$0xff]   ;;  %v5805_v38 = vld [vmem:[%s5901_s22 + $0x3a8] sm:$0xff]  }
  0x4b   : > { %5451 = vmatprep.mubr.msk.bf16.mxu0 %vm1163_vm2, %v5742_v37  ;;  %5591 = vmatprep.mubr.msk.bf16.mxu1 %vm1163_vm2, %v5744_v39  ;;  %v5806_v37 = vld [vmem:[%s5901_s22 + $0x180] sm:$0xff]   ;;  %v5808_v39 = vld [vmem:[%s5901_s22 + $0x3b0] sm:$0xff]  }
  0x52   : > { %5452 = vmatmul.mubr.msk.bf16.gmra.mrb[32].mxu0 %vm1163_vm2, %v5743_v40  ;;  %5592 = vmatmul.mubr.msk.bf16.gmra.mrb[32].mxu1 %vm1163_vm2, %v5745_v42  ;;  %v5807_v40 = vld [vmem:[%s5901_s22 + $0x188] sm:$0xff]   ;;  %v5809_v42 = vld [vmem:[%s5901_s22 + $0x3b8] sm:$0xff]  }
  0x53   : > { %5455 = vmatprep.mubr.msk.bf16.mxu0 %vm1163_vm2, %v5746_v41  ;;  %5595 = vmatprep.mubr.msk.bf16.mxu1 %vm1163_vm2, %v5748_v43  ;;  %v5810_v41 = vld [vmem:[%s5901_s22 + $0x190] sm:$0xff]   ;;  %v5812_v43 = vld [vmem:[%s5901_s22 + $0x3c0] sm:$0xff]  }
  0x5a   : > { %5456 = vmatmul.mubr.msk.bf16.gmra.mrb[36].mxu0 %vm1163_vm2, %v5747_v44  ;;  %5596 = vmatmul.mubr.msk.bf16.gmra.mrb[36].mxu1 %vm1163_vm2, %v5749_v46  ;;  %v5811_v44 = vld [vmem:[%s5901_s22 + $0x198] sm:$0xff]   ;;  %v5813_v46 = vld [vmem:[%s5901_s22 + $0x3c8] sm:$0xff]  }
  0x5b   : > { %5459 = vmatprep.mubr.msk.bf16.mxu0 %vm1163_vm2, %v5750_v45  ;;  %5599 = vmatprep.mubr.msk.bf16.mxu1 %vm1163_vm2, %v5752_v47  ;;  %v5814_v45 = vld [vmem:[%s5901_s22 + $0x1a0] sm:$0xff]   ;;  %v5816_v47 = vld [vmem:[%s5901_s22 + $0x3d0] sm:$0xff]  }
  0x62   : > { %5460 = vmatmul.mubr.msk.bf16.gmra.mrb[40].mxu0 %vm1163_vm2, %v5751_v48  ;;  %5600 = vmatmul.mubr.msk.bf16.gmra.mrb[40].mxu1 %vm1163_vm2, %v5753_v50  ;;  %v5815_v48 = vld [vmem:[%s5901_s22 + $0x1a8] sm:$0xff]   ;;  %v5817_v50 = vld [vmem:[%s5901_s22 + $0x3d8] sm:$0xff]  }
  0x63   : > { %5463 = vmatprep.mubr.msk.bf16.mxu0 %vm1163_vm2, %v5754_v49  ;;  %5603 = vmatprep.mubr.msk.bf16.mxu1 %vm1163_vm2, %v5756_v51  ;;  %v5818_v49 = vld [vmem:[%s5901_s22 + $0x1b0] sm:$0xff]   ;;  %v5820_v51 = vld [vmem:[%s5901_s22 + $0x3e0] sm:$0xff]  }
  0x6a   : > { %5464 = vmatmul.mubr.msk.bf16.gmra.mrb[44].mxu0 %vm1163_vm2, %v5755_v52  ;;  %5604 = vmatmul.mubr.msk.bf16.gmra.mrb[44].mxu1 %vm1163_vm2, %v5757_v54  ;;  %v6123_v52 = vld [vmem:[%s7034_s2] ss:$0 sm:$0xff] }
  0x6b   : > { %5467 = vmatprep.mubr.msk.bf16.mxu0 %vm1163_vm2, %v5758_v53  ;;  %5607 = vmatprep.mubr.msk.bf16.mxu1 %vm1163_vm2, %v5760_v55 }
  0x72   : > { %5468 = vmatmul.mubr.msk.bf16.gmra.mrb[48].mxu0 %vm1163_vm2, %v5759_v56  ;;  %5608 = vmatmul.mubr.msk.bf16.gmra.mrb[48].mxu1 %vm1163_vm2, %v5761_v58  ;;  %v5819_v56 = vld [vmem:[%s5901_s22 + $0x1b8] sm:$0xff]  }
  0x73   : > { %5471 = vmatprep.mubr.msk.bf16.mxu0 %vm1163_vm2, %v5762_v57  ;;  %5611 = vmatprep.mubr.msk.bf16.mxu1 %vm1163_vm2, %v5764_v59 }
  0x7a   : > { %5472 = vmatmul.mubr.msk.bf16.gmra.mrb[52].mxu0 %vm1163_vm2, %v5763_v60  ;;  %5612 = vmatmul.mubr.msk.bf16.gmra.mrb[52].mxu1 %vm1163_vm2, %v5765_v62  ;;  %v5822_v60 = vld [vmem:[%s5901_s22 + $0x1c0] sm:$0xff]  }
  0x7b   : > { %5475 = vmatprep.mubr.msk.bf16.mxu0 %vm1163_vm2, %v5766_v61  ;;  %5615 = vmatprep.mubr.msk.bf16.mxu1 %vm1163_vm2, %v5768_v63 }
  0x82   : > { %5476 = vmatmul.mubr.msk.bf16.gmra.mrb[56].mxu0 %vm1163_vm2, %v5767_v0  ;;  %5616 = vmatmul.mubr.msk.bf16.gmra.mrb[56].mxu1 %vm1163_vm2, %v5769_v2  ;;  %v5821_v2 = vld [vmem:[%s5901_s22 + $0x3e8] sm:$0xff]  }
  0x83   : > { %5479 = vmatprep.mubr.msk.bf16.mxu0 %vm1163_vm2, %v5770_v1  ;;  %5619 = vmatprep.mubr.msk.bf16.mxu1 %vm1163_vm2, %v5772_v3 }
  0x8a   : > { %5480 = vmatmul.mubr.msk.bf16.gmra.mrb[60].mxu0 %vm1163_vm2, %v5771_v4  ;;  %5620 = vmatmul.mubr.msk.bf16.gmra.mrb[60].mxu1 %vm1163_vm2, %v5773_v6 }
  0x8b   : > { %5483 = vmatprep.mubr.msk.bf16.mxu0 %vm1163_vm2, %v5774_v5  ;;  %5623 = vmatprep.mubr.msk.bf16.mxu1 %vm1163_vm2, %v5776_v7  ;;  %v5824_v7 = vld [vmem:[%s5901_s22 + $0x3f0] sm:$0xff]  }
  0x92   : > { %5484 = vmatmul.mubr.msk.bf16.gmra.mrb[64].mxu0 %vm1163_vm2, %v5775_v8  ;;  %5624 = vmatmul.mubr.msk.bf16.gmra.mrb[64].mxu1 %vm1163_vm2, %v5777_v10 }
  0x93   : > { %5487 = vmatprep.mubr.msk.bf16.mxu0 %vm1163_vm2, %v5778_v9  ;;  %5627 = vmatprep.mubr.msk.bf16.mxu1 %vm1163_vm2, %v5780_v11 }
  0x9a   : > { %5488 = vmatmul.mubr.msk.bf16.gmra.mrb[68].mxu0 %vm1163_vm2, %v5779_v12  ;;  %5628 = vmatmul.mubr.msk.bf16.gmra.mrb[68].mxu1 %vm1163_vm2, %v5781_v14 }
  0x9b   : > { %5491 = vmatprep.mubr.msk.bf16.mxu0 %vm1163_vm2, %v5782_v13  ;;  %5631 = vmatprep.mubr.msk.bf16.mxu1 %vm1163_vm2, %v5784_v15 }
  0xa2   : > { %5492 = vmatmul.mubr.msk.bf16.gmra.mrb[72].mxu0 %vm1163_vm2, %v5783_v16  ;;  %5632 = vmatmul.mubr.msk.bf16.gmra.mrb[72].mxu1 %vm1163_vm2, %v5785_v18 }
  0xa3   : > { %5495 = vmatprep.mubr.msk.bf16.mxu0 %vm1163_vm2, %v5786_v17  ;;  %5635 = vmatprep.mubr.msk.bf16.mxu1 %vm1163_vm2, %v5788_v19 }
  0xaa   : > { %5496 = vmatmul.mubr.msk.bf16.gmra.mrb[76].mxu0 %vm1163_vm2, %v5787_v20  ;;  %5636 = vmatmul.mubr.msk.bf16.gmra.mrb[76].mxu1 %vm1163_vm2, %v5789_v22 }
  0xab   : > { %5499 = vmatprep.mubr.msk.bf16.mxu0 %vm1163_vm2, %v5790_v21  ;;  %5639 = vmatprep.mubr.msk.bf16.mxu1 %vm1163_vm2, %v5792_v23 }
  0xb2   : > { %5500 = vmatmul.mubr.msk.bf16.gmra.mrb[80].mxu0 %vm1163_vm2, %v5791_v24  ;;  %5640 = vmatmul.mubr.msk.bf16.gmra.mrb[80].mxu1 %vm1163_vm2, %v5793_v26 }
  0xb3   : > { %5503 = vmatprep.mubr.msk.bf16.mxu0 %vm1163_vm2, %v5794_v25  ;;  %5643 = vmatprep.mubr.msk.bf16.mxu1 %vm1163_vm2, %v5796_v27  ;;  %v5823_v27 = vld [vmem:[%s5901_s22 + $0x1c8] sm:$0xff]  }
  0xba   : > { %5504 = vmatmul.mubr.msk.bf16.gmra.mrb[84].mxu0 %vm1163_vm2, %v5795_v28  ;;  %5644 = vmatmul.mubr.msk.bf16.gmra.mrb[84].mxu1 %vm1163_vm2, %v5797_v30 }
  0xbb   : > { %5507 = vmatprep.mubr.msk.bf16.mxu0 %vm1163_vm2, %v5798_v29  ;;  %5647 = vmatprep.mubr.msk.bf16.mxu1 %vm1163_vm2, %v5800_v31 }
  0xc2   : > { %5508 = vmatmul.mubr.msk.bf16.gmra.mrb[88].mxu0 %vm1163_vm2, %v5799_v32  ;;  %5648 = vmatmul.mubr.msk.bf16.gmra.mrb[88].mxu1 %vm1163_vm2, %v5801_v34  ;;  %v5826_v32 = vld [vmem:[%s5901_s22 + $0x1d0] sm:$0xff]  }
  0xc3   : > { %5511 = vmatprep.mubr.msk.bf16.mxu0 %vm1163_vm2, %v5802_v33  ;;  %5651 = vmatprep.mubr.msk.bf16.mxu1 %vm1163_vm2, %v5804_v35 }
  0xca   : > { %5512 = vmatmul.mubr.msk.bf16.gmra.mrb[92].mxu0 %vm1163_vm2, %v5803_v36  ;;  %5652 = vmatmul.mubr.msk.bf16.gmra.mrb[92].mxu1 %vm1163_vm2, %v5805_v38  ;;  %v5825_v38 = vld [vmem:[%s5901_s22 + $0x3f8] sm:$0xff]  }
  0xcb   : > { %5515 = vmatprep.mubr.msk.bf16.mxu0 %vm1163_vm2, %v5806_v37  ;;  %5655 = vmatprep.mubr.msk.bf16.mxu1 %vm1163_vm2, %v5808_v39 }
  0xd2   : > { %5516 = vmatmul.mubr.msk.bf16.gmra.mrb[96].mxu0 %vm1163_vm2, %v5807_v40  ;;  %5656 = vmatmul.mubr.msk.bf16.gmra.mrb[96].mxu1 %vm1163_vm2, %v5809_v42 }
  0xd3   : > { %5519 = vmatprep.mubr.msk.bf16.mxu0 %vm1163_vm2, %v5810_v41  ;;  %5659 = vmatprep.mubr.msk.bf16.mxu1 %vm1163_vm2, %v5812_v43  ;;  %v5828_v43 = vld [vmem:[%s5901_s22 + $0x400] sm:$0xff]  }
  0xda   : > { %5520 = vmatmul.mubr.msk.bf16.gmra.mrb[100].mxu0 %vm1163_vm2, %v5811_v44  ;;  %5660 = vmatmul.mubr.msk.bf16.gmra.mrb[100].mxu1 %vm1163_vm2, %v5813_v46 }
  0xdb   : > { %5523 = vmatprep.mubr.msk.bf16.mxu0 %vm1163_vm2, %v5814_v45  ;;  %5663 = vmatprep.mubr.msk.bf16.mxu1 %vm1163_vm2, %v5816_v47 }
  0xe2   : > { %5524 = vmatmul.mubr.msk.bf16.gmra.mrb[104].mxu0 %vm1163_vm2, %v5815_v48  ;;  %5664 = vmatmul.mubr.msk.bf16.gmra.mrb[104].mxu1 %vm1163_vm2, %v5817_v50 }
  0xe3   : > { %5527 = vmatprep.mubr.msk.bf16.mxu0 %vm1163_vm2, %v5818_v49  ;;  %5667 = vmatprep.mubr.msk.bf16.mxu1 %vm1163_vm2, %v5820_v51 }
  0xe5   : > { %v5421_v53 = vpop.f32.mrb[0].mxu0  ;;  %v5561_v59 = vpop.f32.mrb[0].mxu1 }
  0xe6   : > { %v1628_v54 = vadd.f32 %v5421_v53, %v6123_v52  ;;  %v1619_v55 = vpop.f32.mrb[1].mxu0  ;;  %v2188_v0 = vadd.f32 %v5561_v59, %v6123_v52  ;;  %v2179_v1 = vpop.f32.mrb[1].mxu1 }
  0xe7   : > { %v1620_v57 = vadd.f32 %v6123_v52, %v1619_v55  ;;  %v5422_v58 = vpop.f32.mrb[2].mxu0  ;;  %v2180_v5 = vadd.f32 %v6123_v52, %v2179_v1  ;;  %v5562_v6 = vpop.f32.mrb[2].mxu1 }
  0xe8   : > { %v2724_v61 = vmax.f32 %v1628_v54, 0.0  ;;  %v1631_v62 = vadd.f32 %v5422_v58, %v6123_v52  ;;  %v1622_v63 = vpop.f32.mrb[3].mxu0  ;;  %v2864_v10 = vmax.f32 %v2188_v0, 0.0  ;;  %v2191_v11 = vadd.f32 %v5562_v6, %v6123_v52  ;;  %v2182_v12 = vpop.f32.mrb[3].mxu1  ;;  %v5827_v0 = vld [vmem:[%s5901_s22 + $0x1d8] sm:$0xff]  }
  0xe9   : > { %v2722_v3 = vmax.f32 %v1620_v57, 0.0  ;;  %v1623_v4 = vadd.f32 %v6123_v52, %v1622_v63  ;;  %v2862_v15 = vmax.f32 %v2180_v5, 0.0  ;;  %v2183_v16 = vadd.f32 %v6123_v52, %v2182_v12  ;;  %v5830_v5 = vld [vmem:[%s5901_s22 + $0x1e0] sm:$0xff]  }
  0xea   : > { %v5001_v8 = vpack.c.bf16 %v2724_v61, %v2724_v61  ;;  %v2725_v9 = vmax.f32 %v1631_v62, 0.0  ;;  %5528 = vmatmul.mubr.msk.bf16.gmra.mrb[108].mxu0 %vm1163_vm2, %v5819_v56  ;;  %v5141_v18 = vpack.c.bf16 %v2864_v10, %v2864_v10  ;;  %v2865_v19 = vmax.f32 %v2191_v11, 0.0  ;;  %5668 = vmatmul.mubr.msk.bf16.gmra.mrb[108].mxu1 %vm1163_vm2, %v5821_v2  ;;  %v5829_v11 = vld [vmem:[%s5901_s22 + $0x408] sm:$0xff]  }
  0xeb   : > { %v4999_v13 = vpack.c.bf16 %v2722_v3, %v2722_v3  ;;  %v2723_v14 = vmax.f32 %v1623_v4, 0.0  ;;  %5531 = vmatprep.mubr.msk.bf16.mxu0 %vm1163_vm2, %v5822_v60  ;;  %v5139_v21 = vpack.c.bf16 %v2862_v15, %v2862_v15  ;;  %v2863_v23 = vmax.f32 %v2183_v16, 0.0  ;;  %5671 = vmatprep.mubr.msk.bf16.mxu1 %vm1163_vm2, %v5824_v7  ;;  %v5832_v16 = vld [vmem:[%s5901_s22 + $0x410] sm:$0xff]  }
  0xec   : > { %4105 = vst.msk [vmem:[%s6140_s27 + $0x8] sm:$0xf] %vm4102_vm3, %v5001_v8  ;;  %v5002_v17 = vpack.c.bf16 %v2725_v9, %v2725_v9  ;;  %4245 = vst.msk [vmem:[%s6140_s27 + $0x238] sm:$0xf] %vm4102_vm3, %v5141_v18  ;;  %v5142_v24 = vpack.c.bf16 %v2865_v19, %v2865_v19 }
  0xed   : > { %4103 = vst.msk [vmem:[%s6140_s27] sm:$0xf] %vm4102_vm3, %v4999_v13  ;;  %v5000_v20 = vpack.c.bf16 %v2723_v14, %v2723_v14  ;;  %v5425_v22 = vpop.f32.mrb[4].mxu0  ;;  %4243 = vst.msk [vmem:[%s6140_s27 + $0x230] sm:$0xf] %vm4102_vm3, %v5139_v21  ;;  %v5140_v28 = vpack.c.bf16 %v2863_v23, %v2863_v23  ;;  %v5565_v31 = vpop.f32.mrb[4].mxu1 }
  0xee   : > { %4106 = vst.msk [vmem:[%s6140_s27 + $0xc] sm:$0xf] %vm4102_vm3, %v5002_v17  ;;  %v1644_v25 = vadd.f32 %v5425_v22, %v6123_v52  ;;  %v1635_v26 = vpop.f32.mrb[5].mxu0  ;;  %4246 = vst.msk [vmem:[%s6140_s27 + $0x23c] sm:$0xf] %vm4102_vm3, %v5142_v24  ;;  %v2204_v36 = vadd.f32 %v5565_v31, %v6123_v52  ;;  %v2195_v37 = vpop.f32.mrb[5].mxu1 }
  0xef   : > { %4104 = vst.msk [vmem:[%s6140_s27 + $0x4] sm:$0xf] %vm4102_vm3, %v5000_v20  ;;  %v1636_v29 = vadd.f32 %v6123_v52, %v1635_v26  ;;  %v5426_v30 = vpop.f32.mrb[6].mxu0  ;;  %4244 = vst.msk [vmem:[%s6140_s27 + $0x234] sm:$0xf] %vm4102_vm3, %v5140_v28  ;;  %v2196_v41 = vadd.f32 %v6123_v52, %v2195_v37  ;;  %v5566_v42 = vpop.f32.mrb[6].mxu1 }
  0xf0   : > { %v2728_v33 = vmax.f32 %v1644_v25, 0.0  ;;  %v1647_v34 = vadd.f32 %v5426_v30, %v6123_v52  ;;  %v1638_v35 = vpop.f32.mrb[7].mxu0  ;;  %v2868_v46 = vmax.f32 %v2204_v36, 0.0  ;;  %v2207_v47 = vadd.f32 %v5566_v42, %v6123_v52  ;;  %v2198_v48 = vpop.f32.mrb[7].mxu1  ;;  %v5831_v36 = vld [vmem:[%s5901_s22 + $0x1e8] sm:$0xff]  }
  0xf1   : > { %v2726_v39 = vmax.f32 %v1636_v29, 0.0  ;;  %v1639_v40 = vadd.f32 %v6123_v52, %v1638_v35  ;;  %v2866_v51 = vmax.f32 %v2196_v41, 0.0  ;;  %v2199_v53 = vadd.f32 %v6123_v52, %v2198_v48  ;;  %v5834_v41 = vld [vmem:[%s5901_s22 + $0x1f0] sm:$0xff]  }
  0xf2   : > { %v5005_v44 = vpack.c.bf16 %v2728_v33, %v2728_v33  ;;  %v2729_v45 = vmax.f32 %v1647_v34, 0.0  ;;  %5532 = vmatmul.mubr.msk.bf16.gmra.mrb[112].mxu0 %vm1163_vm2, %v5823_v27  ;;  %v5145_v55 = vpack.c.bf16 %v2868_v46, %v2868_v46  ;;  %v2869_v56 = vmax.f32 %v2207_v47, 0.0  ;;  %5672 = vmatmul.mubr.msk.bf16.gmra.mrb[112].mxu1 %vm1163_vm2, %v5825_v38  ;;  %v5833_v47 = vld [vmem:[%s5901_s22 + $0x418] sm:$0xff]  }
  0xf3   : > { %v5003_v49 = vpack.c.bf16 %v2726_v39, %v2726_v39  ;;  %v2727_v50 = vmax.f32 %v1639_v40, 0.0  ;;  %5535 = vmatprep.mubr.msk.bf16.mxu0 %vm1163_vm2, %v5826_v32  ;;  %v5143_v58 = vpack.c.bf16 %v2866_v51, %v2866_v51  ;;  %v2867_v60 = vmax.f32 %v2199_v53, 0.0  ;;  %5675 = vmatprep.mubr.msk.bf16.mxu1 %vm1163_vm2, %v5828_v43  ;;  %v5836_v53 = vld [vmem:[%s5901_s22 + $0x420] sm:$0xff]  }
  0xf4   : > { %4109 = vst.msk [vmem:[%s6140_s27 + $0x18] sm:$0xf] %vm4102_vm3, %v5005_v44  ;;  %v5006_v54 = vpack.c.bf16 %v2729_v45, %v2729_v45  ;;  %4249 = vst.msk [vmem:[%s6140_s27 + $0x248] sm:$0xf] %vm4102_vm3, %v5145_v55  ;;  %v5146_v61 = vpack.c.bf16 %v2869_v56, %v2869_v56 }
  0xf5   : > { %4107 = vst.msk [vmem:[%s6140_s27 + $0x10] sm:$0xf] %vm4102_vm3, %v5003_v49  ;;  %v5004_v57 = vpack.c.bf16 %v2727_v50, %v2727_v50  ;;  %v5429_v59 = vpop.f32.mrb[8].mxu0  ;;  %4247 = vst.msk [vmem:[%s6140_s27 + $0x240] sm:$0xf] %vm4102_vm3, %v5143_v58  ;;  %v5144_v1 = vpack.c.bf16 %v2867_v60, %v2867_v60  ;;  %v5569_v4 = vpop.f32.mrb[8].mxu1 }
  0xf6   : > { %4110 = vst.msk [vmem:[%s6140_s27 + $0x1c] sm:$0xf] %vm4102_vm3, %v5006_v54  ;;  %v1660_v62 = vadd.f32 %v5429_v59, %v6123_v52  ;;  %v1651_v63 = vpop.f32.mrb[9].mxu0  ;;  %4250 = vst.msk [vmem:[%s6140_s27 + $0x24c] sm:$0xf] %vm4102_vm3, %v5146_v61  ;;  %v2220_v9 = vadd.f32 %v5569_v4, %v6123_v52  ;;  %v2211_v10 = vpop.f32.mrb[9].mxu1 }
  0xf7   : > { %4108 = vst.msk [vmem:[%s6140_s27 + $0x14] sm:$0xf] %vm4102_vm3, %v5004_v57  ;;  %v1652_v2 = vadd.f32 %v6123_v52, %v1651_v63  ;;  %v5430_v3 = vpop.f32.mrb[10].mxu0  ;;  %4248 = vst.msk [vmem:[%s6140_s27 + $0x244] sm:$0xf] %vm4102_vm3, %v5144_v1  ;;  %v2212_v14 = vadd.f32 %v6123_v52, %v2211_v10  ;;  %v5570_v15 = vpop.f32.mrb[10].mxu1 }
  0xf8   : > { %v2732_v6 = vmax.f32 %v1660_v62, 0.0  ;;  %v1663_v7 = vadd.f32 %v5430_v3, %v6123_v52  ;;  %v1654_v8 = vpop.f32.mrb[11].mxu0  ;;  %v2872_v19 = vmax.f32 %v2220_v9, 0.0  ;;  %v2223_v20 = vadd.f32 %v5570_v15, %v6123_v52  ;;  %v2214_v21 = vpop.f32.mrb[11].mxu1  ;;  %v5835_v9 = vld [vmem:[%s5901_s22 + $0x1f8] sm:$0xff]  }
  0xf9   : > { %v2730_v12 = vmax.f32 %v1652_v2, 0.0  ;;  %v1655_v13 = vadd.f32 %v6123_v52, %v1654_v8  ;;  %v2870_v24 = vmax.f32 %v2212_v14, 0.0  ;;  %v2215_v25 = vadd.f32 %v6123_v52, %v2214_v21  ;;  %v5838_v14 = vld [vmem:[%s5901_s22 + $0x200] sm:$0xff]  }
  0xfa   : > { %v5009_v17 = vpack.c.bf16 %v2732_v6, %v2732_v6  ;;  %v2733_v18 = vmax.f32 %v1663_v7, 0.0  ;;  %5536 = vmatmul.mubr.msk.bf16.gmra.mrb[116].mxu0 %vm1163_vm2, %v5827_v0  ;;  %v5149_v27 = vpack.c.bf16 %v2872_v19, %v2872_v19  ;;  %v2873_v28 = vmax.f32 %v2223_v20, 0.0  ;;  %5676 = vmatmul.mubr.msk.bf16.gmra.mrb[116].mxu1 %vm1163_vm2, %v5829_v11  ;;  %v5837_v20 = vld [vmem:[%s5901_s22 + $0x428] sm:$0xff]  }
  0xfb   : > { %v5007_v22 = vpack.c.bf16 %v2730_v12, %v2730_v12  ;;  %v2731_v23 = vmax.f32 %v1655_v13, 0.0  ;;  %5539 = vmatprep.mubr.msk.bf16.mxu0 %vm1163_vm2, %v5830_v5  ;;  %v5147_v30 = vpack.c.bf16 %v2870_v24, %v2870_v24  ;;  %v2871_v32 = vmax.f32 %v2215_v25, 0.0  ;;  %5679 = vmatprep.mubr.msk.bf16.mxu1 %vm1163_vm2, %v5832_v16  ;;  %v5840_v25 = vld [vmem:[%s5901_s22 + $0x430] sm:$0xff]  }
  0xfc   : > { %4113 = vst.msk [vmem:[%s6140_s27 + $0x28] sm:$0xf] %vm4102_vm3, %v5009_v17  ;;  %v5010_v26 = vpack.c.bf16 %v2733_v18, %v2733_v18  ;;  %4253 = vst.msk [vmem:[%s6140_s27 + $0x258] sm:$0xf] %vm4102_vm3, %v5149_v27  ;;  %v5150_v33 = vpack.c.bf16 %v2873_v28, %v2873_v28 }
  0xfd   : > { %4111 = vst.msk [vmem:[%s6140_s27 + $0x20] sm:$0xf] %vm4102_vm3, %v5007_v22  ;;  %v5008_v29 = vpack.c.bf16 %v2731_v23, %v2731_v23  ;;  %v5433_v31 = vpop.f32.mrb[12].mxu0  ;;  %4251 = vst.msk [vmem:[%s6140_s27 + $0x250] sm:$0xf] %vm4102_vm3, %v5147_v30  ;;  %v5148_v37 = vpack.c.bf16 %v2871_v32, %v2871_v32  ;;  %v5573_v40 = vpop.f32.mrb[12].mxu1 }
  0xfe   : > { %4114 = vst.msk [vmem:[%s6140_s27 + $0x2c] sm:$0xf] %vm4102_vm3, %v5010_v26  ;;  %v1676_v34 = vadd.f32 %v5433_v31, %v6123_v52  ;;  %v1667_v35 = vpop.f32.mrb[13].mxu0  ;;  %4254 = vst.msk [vmem:[%s6140_s27 + $0x25c] sm:$0xf] %vm4102_vm3, %v5150_v33  ;;  %v2236_v45 = vadd.f32 %v5573_v40, %v6123_v52  ;;  %v2227_v46 = vpop.f32.mrb[13].mxu1 }
  0xff   : > { %4112 = vst.msk [vmem:[%s6140_s27 + $0x24] sm:$0xf] %vm4102_vm3, %v5008_v29  ;;  %v1668_v38 = vadd.f32 %v6123_v52, %v1667_v35  ;;  %v5434_v39 = vpop.f32.mrb[14].mxu0  ;;  %4252 = vst.msk [vmem:[%s6140_s27 + $0x254] sm:$0xf] %vm4102_vm3, %v5148_v37  ;;  %v2228_v50 = vadd.f32 %v6123_v52, %v2227_v46  ;;  %v5574_v51 = vpop.f32.mrb[14].mxu1 }
 0x100   : > { %v2736_v42 = vmax.f32 %v1676_v34, 0.0  ;;  %v1679_v43 = vadd.f32 %v5434_v39, %v6123_v52  ;;  %v1670_v44 = vpop.f32.mrb[15].mxu0  ;;  %v2876_v56 = vmax.f32 %v2236_v45, 0.0  ;;  %v2239_v57 = vadd.f32 %v5574_v51, %v6123_v52  ;;  %v2230_v58 = vpop.f32.mrb[15].mxu1  ;;  %v5839_v45 = vld [vmem:[%s5901_s22 + $0x208] sm:$0xff]  }
 0x101   : > { %v2734_v48 = vmax.f32 %v1668_v38, 0.0  ;;  %v1671_v49 = vadd.f32 %v6123_v52, %v1670_v44  ;;  %v2874_v61 = vmax.f32 %v2228_v50, 0.0  ;;  %v2231_v62 = vadd.f32 %v6123_v52, %v2230_v58  ;;  %v5842_v50 = vld [vmem:[%s5901_s22 + $0x210] sm:$0xff]  }
 0x102   : > { %v5013_v54 = vpack.c.bf16 %v2736_v42, %v2736_v42  ;;  %v2737_v55 = vmax.f32 %v1679_v43, 0.0  ;;  %5540 = vmatmul.mubr.msk.bf16.gmra.mrb[120].mxu0 %vm1163_vm2, %v5831_v36  ;;  %v5153_v0 = vpack.c.bf16 %v2876_v56, %v2876_v56  ;;  %v2877_v1 = vmax.f32 %v2239_v57, 0.0  ;;  %5680 = vmatmul.mubr.msk.bf16.gmra.mrb[120].mxu1 %vm1163_vm2, %v5833_v47  ;;  %v5841_v57 = vld [vmem:[%s5901_s22 + $0x438] sm:$0xff]  }
 0x103   : > { %v5011_v59 = vpack.c.bf16 %v2734_v48, %v2734_v48  ;;  %v2735_v60 = vmax.f32 %v1671_v49, 0.0  ;;  %5543 = vmatprep.mubr.msk.bf16.mxu0 %vm1163_vm2, %v5834_v41  ;;  %v5151_v3 = vpack.c.bf16 %v2874_v61, %v2874_v61  ;;  %v2875_v5 = vmax.f32 %v2231_v62, 0.0  ;;  %5683 = vmatprep.mubr.msk.bf16.mxu1 %vm1163_vm2, %v5836_v53  ;;  %v5844_v62 = vld [vmem:[%s5901_s22 + $0x440] sm:$0xff]  }
 0x104   : > { %4117 = vst.msk [vmem:[%s6140_s27 + $0x38] sm:$0xf] %vm4102_vm3, %v5013_v54  ;;  %v5014_v63 = vpack.c.bf16 %v2737_v55, %v2737_v55  ;;  %4257 = vst.msk [vmem:[%s6140_s27 + $0x268] sm:$0xf] %vm4102_vm3, %v5153_v0  ;;  %v5154_v6 = vpack.c.bf16 %v2877_v1, %v2877_v1 }
 0x105   : > { %4115 = vst.msk [vmem:[%s6140_s27 + $0x30] sm:$0xf] %vm4102_vm3, %v5011_v59  ;;  %v5012_v2 = vpack.c.bf16 %v2735_v60, %v2735_v60  ;;  %v5437_v4 = vpop.f32.mrb[16].mxu0  ;;  %4255 = vst.msk [vmem:[%s6140_s27 + $0x260] sm:$0xf] %vm4102_vm3, %v5151_v3  ;;  %v5152_v10 = vpack.c.bf16 %v2875_v5, %v2875_v5  ;;  %v5577_v13 = vpop.f32.mrb[16].mxu1 }
 0x106   : > { %4118 = vst.msk [vmem:[%s6140_s27 + $0x3c] sm:$0xf] %vm4102_vm3, %v5014_v63  ;;  %v1692_v7 = vadd.f32 %v5437_v4, %v6123_v52  ;;  %v1683_v8 = vpop.f32.mrb[17].mxu0  ;;  %4258 = vst.msk [vmem:[%s6140_s27 + $0x26c] sm:$0xf] %vm4102_vm3, %v5154_v6  ;;  %v2252_v18 = vadd.f32 %v5577_v13, %v6123_v52  ;;  %v2243_v19 = vpop.f32.mrb[17].mxu1 }
 0x107   : > { %4116 = vst.msk [vmem:[%s6140_s27 + $0x34] sm:$0xf] %vm4102_vm3, %v5012_v2  ;;  %v1684_v11 = vadd.f32 %v6123_v52, %v1683_v8  ;;  %v5438_v12 = vpop.f32.mrb[18].mxu0  ;;  %4256 = vst.msk [vmem:[%s6140_s27 + $0x264] sm:$0xf] %vm4102_vm3, %v5152_v10  ;;  %v2244_v23 = vadd.f32 %v6123_v52, %v2243_v19  ;;  %v5578_v24 = vpop.f32.mrb[18].mxu1 }
 0x108   : > { %v2740_v15 = vmax.f32 %v1692_v7, 0.0  ;;  %v1695_v16 = vadd.f32 %v5438_v12, %v6123_v52  ;;  %v1686_v17 = vpop.f32.mrb[19].mxu0  ;;  %v2880_v28 = vmax.f32 %v2252_v18, 0.0  ;;  %v2255_v29 = vadd.f32 %v5578_v24, %v6123_v52  ;;  %v2246_v30 = vpop.f32.mrb[19].mxu1  ;;  %v5843_v18 = vld [vmem:[%s5901_s22 + $0x218] sm:$0xff]  }
 0x109   : > { %v2738_v21 = vmax.f32 %v1684_v11, 0.0  ;;  %v1687_v22 = vadd.f32 %v6123_v52, %v1686_v17  ;;  %v2878_v33 = vmax.f32 %v2244_v23, 0.0  ;;  %v2247_v34 = vadd.f32 %v6123_v52, %v2246_v30  ;;  %v5846_v23 = vld [vmem:[%s5901_s22 + $0x220] sm:$0xff]  }
 0x10a   : > { %v5017_v26 = vpack.c.bf16 %v2740_v15, %v2740_v15  ;;  %v2741_v27 = vmax.f32 %v1695_v16, 0.0  ;;  %5544 = vmatmul.mubr.msk.bf16.gmra.mrb[124].mxu0 %vm1163_vm2, %v5835_v9  ;;  %v5157_v36 = vpack.c.bf16 %v2880_v28, %v2880_v28  ;;  %v2881_v37 = vmax.f32 %v2255_v29, 0.0  ;;  %5684 = vmatmul.mubr.msk.bf16.gmra.mrb[124].mxu1 %vm1163_vm2, %v5837_v20  ;;  %v5845_v29 = vld [vmem:[%s5901_s22 + $0x448] sm:$0xff]  }
 0x10b   : > { %v5015_v31 = vpack.c.bf16 %v2738_v21, %v2738_v21  ;;  %v2739_v32 = vmax.f32 %v1687_v22, 0.0  ;;  %5547 = vmatprep.mubr.msk.bf16.mxu0 %vm1163_vm2, %v5838_v14  ;;  %v5155_v39 = vpack.c.bf16 %v2878_v33, %v2878_v33  ;;  %v2879_v41 = vmax.f32 %v2247_v34, 0.0  ;;  %5687 = vmatprep.mubr.msk.bf16.mxu1 %vm1163_vm2, %v5840_v25 }
 0x10c   : > { %4121 = vst.msk [vmem:[%s6140_s27 + $0x48] sm:$0xf] %vm4102_vm3, %v5017_v26  ;;  %v5018_v35 = vpack.c.bf16 %v2741_v27, %v2741_v27  ;;  %4261 = vst.msk [vmem:[%s6140_s27 + $0x278] sm:$0xf] %vm4102_vm3, %v5157_v36  ;;  %v5158_v42 = vpack.c.bf16 %v2881_v37, %v2881_v37 }
 0x10d   : > { %4119 = vst.msk [vmem:[%s6140_s27 + $0x40] sm:$0xf] %vm4102_vm3, %v5015_v31  ;;  %v5016_v38 = vpack.c.bf16 %v2739_v32, %v2739_v32  ;;  %v5441_v40 = vpop.f32.mrb[20].mxu0  ;;  %4259 = vst.msk [vmem:[%s6140_s27 + $0x270] sm:$0xf] %vm4102_vm3, %v5155_v39  ;;  %v5156_v46 = vpack.c.bf16 %v2879_v41, %v2879_v41  ;;  %v5581_v49 = vpop.f32.mrb[20].mxu1 }
 0x10e   : > { %4122 = vst.msk [vmem:[%s6140_s27 + $0x4c] sm:$0xf] %vm4102_vm3, %v5018_v35  ;;  %v1708_v43 = vadd.f32 %v5441_v40, %v6123_v52  ;;  %v1699_v44 = vpop.f32.mrb[21].mxu0  ;;  %4262 = vst.msk [vmem:[%s6140_s27 + $0x27c] sm:$0xf] %vm4102_vm3, %v5158_v42  ;;  %v2268_v55 = vadd.f32 %v5581_v49, %v6123_v52  ;;  %v2259_v56 = vpop.f32.mrb[21].mxu1 }
 0x10f   : > { %4120 = vst.msk [vmem:[%s6140_s27 + $0x44] sm:$0xf] %vm4102_vm3, %v5016_v38  ;;  %v1700_v47 = vadd.f32 %v6123_v52, %v1699_v44  ;;  %v5442_v48 = vpop.f32.mrb[22].mxu0  ;;  %4260 = vst.msk [vmem:[%s6140_s27 + $0x274] sm:$0xf] %vm4102_vm3, %v5156_v46  ;;  %v2260_v60 = vadd.f32 %v6123_v52, %v2259_v56  ;;  %v5582_v61 = vpop.f32.mrb[22].mxu1 }
 0x110   : > { %v2744_v51 = vmax.f32 %v1708_v43, 0.0  ;;  %v1711_v53 = vadd.f32 %v5442_v48, %v6123_v52  ;;  %v1702_v54 = vpop.f32.mrb[23].mxu0  ;;  %v2884_v1 = vmax.f32 %v2268_v55, 0.0  ;;  %v2271_v2 = vadd.f32 %v5582_v61, %v6123_v52  ;;  %v2262_v3 = vpop.f32.mrb[23].mxu1 }
 0x111   : > { %v2742_v58 = vmax.f32 %v1700_v47, 0.0  ;;  %v1703_v59 = vadd.f32 %v6123_v52, %v1702_v54  ;;  %v2882_v6 = vmax.f32 %v2260_v60, 0.0  ;;  %v2263_v7 = vadd.f32 %v6123_v52, %v2262_v3  ;;  %v5847_v54 = vld [vmem:[%s5901_s22 + $0x228] sm:$0xff]  }
 0x112   : > { %v5021_v63 = vpack.c.bf16 %v2744_v51, %v2744_v51  ;;  %v2745_v0 = vmax.f32 %v1711_v53, 0.0  ;;  %5548 = vmatmul.mubr.msk.bf16.gmra.mrb[128].mxu0 %vm1163_vm2, %v5839_v45  ;;  %v5161_v9 = vpack.c.bf16 %v2884_v1, %v2884_v1  ;;  %v2885_v10 = vmax.f32 %v2271_v2, 0.0  ;;  %5688 = vmatmul.mubr.msk.bf16.gmra.mrb[128].mxu1 %vm1163_vm2, %v5841_v57 }
 0x113   : > { %v5019_v4 = vpack.c.bf16 %v2742_v58, %v2742_v58  ;;  %v2743_v5 = vmax.f32 %v1703_v59, 0.0  ;;  %5551 = vmatprep.mubr.msk.bf16.mxu0 %vm1163_vm2, %v5842_v50  ;;  %v5159_v12 = vpack.c.bf16 %v2882_v6, %v2882_v6  ;;  %v2883_v14 = vmax.f32 %v2263_v7, 0.0  ;;  %5691 = vmatprep.mubr.msk.bf16.mxu1 %vm1163_vm2, %v5844_v62 }
 0x114   : > { %4125 = vst.msk [vmem:[%s6140_s27 + $0x58] sm:$0xf] %vm4102_vm3, %v5021_v63  ;;  %v5022_v8 = vpack.c.bf16 %v2745_v0, %v2745_v0  ;;  %4265 = vst.msk [vmem:[%s6140_s27 + $0x288] sm:$0xf] %vm4102_vm3, %v5161_v9  ;;  %v5162_v15 = vpack.c.bf16 %v2885_v10, %v2885_v10 }
 0x115   : > { %4123 = vst.msk [vmem:[%s6140_s27 + $0x50] sm:$0xf] %vm4102_vm3, %v5019_v4  ;;  %v5020_v11 = vpack.c.bf16 %v2743_v5, %v2743_v5  ;;  %v5445_v13 = vpop.f32.mrb[24].mxu0  ;;  %4263 = vst.msk [vmem:[%s6140_s27 + $0x280] sm:$0xf] %vm4102_vm3, %v5159_v12  ;;  %v5160_v19 = vpack.c.bf16 %v2883_v14, %v2883_v14  ;;  %v5585_v22 = vpop.f32.mrb[24].mxu1 }
 0x116   : > { %4126 = vst.msk [vmem:[%s6140_s27 + $0x5c] sm:$0xf] %vm4102_vm3, %v5022_v8  ;;  %v1724_v16 = vadd.f32 %v5445_v13, %v6123_v52  ;;  %v1715_v17 = vpop.f32.mrb[25].mxu0  ;;  %4266 = vst.msk [vmem:[%s6140_s27 + $0x28c] sm:$0xf] %vm4102_vm3, %v5162_v15  ;;  %v2284_v27 = vadd.f32 %v5585_v22, %v6123_v52  ;;  %v2275_v28 = vpop.f32.mrb[25].mxu1 }
 0x117   : > { %4124 = vst.msk [vmem:[%s6140_s27 + $0x54] sm:$0xf] %vm4102_vm3, %v5020_v11  ;;  %v1716_v20 = vadd.f32 %v6123_v52, %v1715_v17  ;;  %v5446_v21 = vpop.f32.mrb[26].mxu0  ;;  %4264 = vst.msk [vmem:[%s6140_s27 + $0x284] sm:$0xf] %vm4102_vm3, %v5160_v19  ;;  %v2276_v32 = vadd.f32 %v6123_v52, %v2275_v28  ;;  %v5586_v33 = vpop.f32.mrb[26].mxu1 }
 0x118   : > { %v2748_v24 = vmax.f32 %v1724_v16, 0.0  ;;  %v1727_v25 = vadd.f32 %v5446_v21, %v6123_v52  ;;  %v1718_v26 = vpop.f32.mrb[27].mxu0  ;;  %v2888_v36 = vmax.f32 %v2284_v27, 0.0  ;;  %v2287_v37 = vadd.f32 %v5586_v33, %v6123_v52  ;;  %v2278_v38 = vpop.f32.mrb[27].mxu1 }
 0x119   : > { %v2746_v30 = vmax.f32 %v1716_v20, 0.0  ;;  %v1719_v31 = vadd.f32 %v6123_v52, %v1718_v26  ;;  %v2886_v41 = vmax.f32 %v2276_v32, 0.0  ;;  %v2279_v42 = vadd.f32 %v6123_v52, %v2278_v38 }
 0x11a   : > { %v5025_v34 = vpack.c.bf16 %v2748_v24, %v2748_v24  ;;  %v2749_v35 = vmax.f32 %v1727_v25, 0.0  ;;  %5552 = vmatmul.mubr.msk.bf16.gmra.mrb[132].mxu0 %vm1163_vm2, %v5843_v18  ;;  %v5165_v44 = vpack.c.bf16 %v2888_v36, %v2888_v36  ;;  %v2889_v45 = vmax.f32 %v2287_v37, 0.0  ;;  %5692 = vmatmul.mubr.msk.bf16.gmra.mrb[132].mxu1 %vm1163_vm2, %v5845_v29 }
 0x11b   : > { %v5023_v39 = vpack.c.bf16 %v2746_v30, %v2746_v30  ;;  %v2747_v40 = vmax.f32 %v1719_v31, 0.0  ;;  %5555 = vmatprep.mubr.msk.bf16.mxu0 %vm1163_vm2, %v5846_v23  ;;  %v5163_v47 = vpack.c.bf16 %v2886_v41, %v2886_v41  ;;  %v2887_v49 = vmax.f32 %v2279_v42, 0.0 }
 0x11c   : > { %4129 = vst.msk [vmem:[%s6140_s27 + $0x68] sm:$0xf] %vm4102_vm3, %v5025_v34  ;;  %v5026_v43 = vpack.c.bf16 %v2749_v35, %v2749_v35  ;;  %4269 = vst.msk [vmem:[%s6140_s27 + $0x298] sm:$0xf] %vm4102_vm3, %v5165_v44  ;;  %v5166_v50 = vpack.c.bf16 %v2889_v45, %v2889_v45 }
 0x11d   : > { %4127 = vst.msk [vmem:[%s6140_s27 + $0x60] sm:$0xf] %vm4102_vm3, %v5023_v39  ;;  %v5024_v46 = vpack.c.bf16 %v2747_v40, %v2747_v40  ;;  %v5449_v48 = vpop.f32.mrb[28].mxu0  ;;  %4267 = vst.msk [vmem:[%s6140_s27 + $0x290] sm:$0xf] %vm4102_vm3, %v5163_v47  ;;  %v5164_v55 = vpack.c.bf16 %v2887_v49, %v2887_v49  ;;  %v5589_v58 = vpop.f32.mrb[28].mxu1 }
 0x11e   : > { %4130 = vst.msk [vmem:[%s6140_s27 + $0x6c] sm:$0xf] %vm4102_vm3, %v5026_v43  ;;  %v1740_v51 = vadd.f32 %v5449_v48, %v6123_v52  ;;  %v1731_v53 = vpop.f32.mrb[29].mxu0  ;;  %4270 = vst.msk [vmem:[%s6140_s27 + $0x29c] sm:$0xf] %vm4102_vm3, %v5166_v50  ;;  %v2300_v62 = vadd.f32 %v5589_v58, %v6123_v52  ;;  %v2291_v63 = vpop.f32.mrb[29].mxu1 }
 0x11f   : > { %4128 = vst.msk [vmem:[%s6140_s27 + $0x64] sm:$0xf] %vm4102_vm3, %v5024_v46  ;;  %v1732_v56 = vadd.f32 %v6123_v52, %v1731_v53  ;;  %v5450_v57 = vpop.f32.mrb[30].mxu0  ;;  %4268 = vst.msk [vmem:[%s6140_s27 + $0x294] sm:$0xf] %vm4102_vm3, %v5164_v55  ;;  %v2292_v2 = vadd.f32 %v6123_v52, %v2291_v63  ;;  %v5590_v3 = vpop.f32.mrb[30].mxu1 }
 0x120   : > { %v2752_v59 = vmax.f32 %v1740_v51, 0.0  ;;  %v1743_v60 = vadd.f32 %v5450_v57, %v6123_v52  ;;  %v1734_v61 = vpop.f32.mrb[31].mxu0  ;;  %v2892_v6 = vmax.f32 %v2300_v62, 0.0  ;;  %v2303_v7 = vadd.f32 %v5590_v3, %v6123_v52  ;;  %v2294_v8 = vpop.f32.mrb[31].mxu1 }
 0x121   : > { %v2750_v0 = vmax.f32 %v1732_v56, 0.0  ;;  %v1735_v1 = vadd.f32 %v6123_v52, %v1734_v61  ;;  %v2890_v11 = vmax.f32 %v2292_v2, 0.0  ;;  %v2295_v12 = vadd.f32 %v6123_v52, %v2294_v8 }
 0x122   : > { %v5029_v4 = vpack.c.bf16 %v2752_v59, %v2752_v59  ;;  %v2753_v5 = vmax.f32 %v1743_v60, 0.0  ;;  %5556 = vmatmul.mubr.msk.bf16.gmra.mrb[136].mxu0 %vm1163_vm2, %v5847_v54  ;;  %v5169_v14 = vpack.c.bf16 %v2892_v6, %v2892_v6  ;;  %v2893_v15 = vmax.f32 %v2303_v7, 0.0 }
 0x123   : > { %v5027_v9 = vpack.c.bf16 %v2750_v0, %v2750_v0  ;;  %v2751_v10 = vmax.f32 %v1735_v1, 0.0  ;;  %v5167_v17 = vpack.c.bf16 %v2890_v11, %v2890_v11  ;;  %v2891_v19 = vmax.f32 %v2295_v12, 0.0 }
 0x124   : > { %4133 = vst.msk [vmem:[%s6140_s27 + $0x78] sm:$0xf] %vm4102_vm3, %v5029_v4  ;;  %v5030_v13 = vpack.c.bf16 %v2753_v5, %v2753_v5  ;;  %4273 = vst.msk [vmem:[%s6140_s27 + $0x2a8] sm:$0xf] %vm4102_vm3, %v5169_v14  ;;  %v5170_v20 = vpack.c.bf16 %v2893_v15, %v2893_v15 }
 0x125   : > { %4131 = vst.msk [vmem:[%s6140_s27 + $0x70] sm:$0xf] %vm4102_vm3, %v5027_v9  ;;  %v5028_v16 = vpack.c.bf16 %v2751_v10, %v2751_v10  ;;  %v5453_v18 = vpop.f32.mrb[32].mxu0  ;;  %4271 = vst.msk [vmem:[%s6140_s27 + $0x2a0] sm:$0xf] %vm4102_vm3, %v5167_v17  ;;  %v5168_v23 = vpack.c.bf16 %v2891_v19, %v2891_v19  ;;  %v5593_v26 = vpop.f32.mrb[32].mxu1 }
 0x126   : > { %4134 = vst.msk [vmem:[%s6140_s27 + $0x7c] sm:$0xf] %vm4102_vm3, %v5030_v13  ;;  %v1756_v21 = vadd.f32 %v5453_v18, %v6123_v52  ;;  %v1747_v22 = vpop.f32.mrb[33].mxu0  ;;  %4274 = vst.msk [vmem:[%s6140_s27 + $0x2ac] sm:$0xf] %vm4102_vm3, %v5170_v20  ;;  %v2316_v30 = vadd.f32 %v5593_v26, %v6123_v52  ;;  %v2307_v31 = vpop.f32.mrb[33].mxu1 }
 0x127   : > { %4132 = vst.msk [vmem:[%s6140_s27 + $0x74] sm:$0xf] %vm4102_vm3, %v5028_v16  ;;  %v1748_v24 = vadd.f32 %v6123_v52, %v1747_v22  ;;  %v5454_v25 = vpop.f32.mrb[34].mxu0  ;;  %4272 = vst.msk [vmem:[%s6140_s27 + $0x2a4] sm:$0xf] %vm4102_vm3, %v5168_v23  ;;  %v2308_v34 = vadd.f32 %v6123_v52, %v2307_v31  ;;  %v5594_v35 = vpop.f32.mrb[34].mxu1 }
 0x128   : > { %v2756_v27 = vmax.f32 %v1756_v21, 0.0  ;;  %v1759_v28 = vadd.f32 %v5454_v25, %v6123_v52  ;;  %v1750_v29 = vpop.f32.mrb[35].mxu0  ;;  %v2896_v38 = vmax.f32 %v2316_v30, 0.0  ;;  %v2319_v39 = vadd.f32 %v5594_v35, %v6123_v52  ;;  %v2310_v40 = vpop.f32.mrb[35].mxu1 }
 0x129   : > { %v2754_v32 = vmax.f32 %v1748_v24, 0.0  ;;  %v1751_v33 = vadd.f32 %v6123_v52, %v1750_v29  ;;  %v2894_v43 = vmax.f32 %v2308_v34, 0.0  ;;  %v2311_v44 = vadd.f32 %v6123_v52, %v2310_v40 }
 0x12a   : > { %v5033_v36 = vpack.c.bf16 %v2756_v27, %v2756_v27  ;;  %v2757_v37 = vmax.f32 %v1759_v28, 0.0  ;;  %v5173_v46 = vpack.c.bf16 %v2896_v38, %v2896_v38  ;;  %v2897_v47 = vmax.f32 %v2319_v39, 0.0 }
 0x12b   : > { %v5031_v41 = vpack.c.bf16 %v2754_v32, %v2754_v32  ;;  %v2755_v42 = vmax.f32 %v1751_v33, 0.0  ;;  %v5171_v49 = vpack.c.bf16 %v2894_v43, %v2894_v43  ;;  %v2895_v51 = vmax.f32 %v2311_v44, 0.0 }
 0x12c   : > { %4137 = vst.msk [vmem:[%s6140_s27 + $0x88] sm:$0xf] %vm4102_vm3, %v5033_v36  ;;  %v5034_v45 = vpack.c.bf16 %v2757_v37, %v2757_v37  ;;  %4277 = vst.msk [vmem:[%s6140_s27 + $0x2b8] sm:$0xf] %vm4102_vm3, %v5173_v46  ;;  %v5174_v53 = vpack.c.bf16 %v2897_v47, %v2897_v47 }
 0x12d   : > { %4135 = vst.msk [vmem:[%s6140_s27 + $0x80] sm:$0xf] %vm4102_vm3, %v5031_v41  ;;  %v5032_v48 = vpack.c.bf16 %v2755_v42, %v2755_v42  ;;  %v5457_v50 = vpop.f32.mrb[36].mxu0  ;;  %4275 = vst.msk [vmem:[%s6140_s27 + $0x2b0] sm:$0xf] %vm4102_vm3, %v5171_v49  ;;  %v5172_v56 = vpack.c.bf16 %v2895_v51, %v2895_v51  ;;  %v5597_v59 = vpop.f32.mrb[36].mxu1 }
 0x12e   : > { %4138 = vst.msk [vmem:[%s6140_s27 + $0x8c] sm:$0xf] %vm4102_vm3, %v5034_v45  ;;  %v1772_v54 = vadd.f32 %v5457_v50, %v6123_v52  ;;  %v1763_v55 = vpop.f32.mrb[37].mxu0  ;;  %4278 = vst.msk [vmem:[%s6140_s27 + $0x2bc] sm:$0xf] %vm4102_vm3, %v5174_v53  ;;  %v2332_v63 = vadd.f32 %v5597_v59, %v6123_v52  ;;  %v2323_v0 = vpop.f32.mrb[37].mxu1 }
 0x12f   : > { %4136 = vst.msk [vmem:[%s6140_s27 + $0x84] sm:$0xf] %vm4102_vm3, %v5032_v48  ;;  %v1764_v57 = vadd.f32 %v6123_v52, %v1763_v55  ;;  %v5458_v58 = vpop.f32.mrb[38].mxu0  ;;  %4276 = vst.msk [vmem:[%s6140_s27 + $0x2b4] sm:$0xf] %vm4102_vm3, %v5172_v56  ;;  %v2324_v3 = vadd.f32 %v6123_v52, %v2323_v0  ;;  %v5598_v4 = vpop.f32.mrb[38].mxu1 }
 0x130   : > { %v2760_v60 = vmax.f32 %v1772_v54, 0.0  ;;  %v1775_v61 = vadd.f32 %v5458_v58, %v6123_v52  ;;  %v1766_v62 = vpop.f32.mrb[39].mxu0  ;;  %v2900_v7 = vmax.f32 %v2332_v63, 0.0  ;;  %v2335_v8 = vadd.f32 %v5598_v4, %v6123_v52  ;;  %v2326_v9 = vpop.f32.mrb[39].mxu1 }
 0x131   : > { %v2758_v1 = vmax.f32 %v1764_v57, 0.0  ;;  %v1767_v2 = vadd.f32 %v6123_v52, %v1766_v62  ;;  %v2898_v12 = vmax.f32 %v2324_v3, 0.0  ;;  %v2327_v13 = vadd.f32 %v6123_v52, %v2326_v9  ;;  %v6462_v3 = vld [vmem:[%s7034_s2] ss:$0 sm:$0xff] }
 0x132   : > { %v5037_v5 = vpack.c.bf16 %v2760_v60, %v2760_v60  ;;  %v2761_v6 = vmax.f32 %v1775_v61, 0.0  ;;  %v5177_v15 = vpack.c.bf16 %v2900_v7, %v2900_v7  ;;  %v2901_v16 = vmax.f32 %v2335_v8, 0.0 }
 0x133   : > { %v5035_v10 = vpack.c.bf16 %v2758_v1, %v2758_v1  ;;  %v2759_v11 = vmax.f32 %v1767_v2, 0.0  ;;  %v5175_v18 = vpack.c.bf16 %v2898_v12, %v2898_v12  ;;  %v2899_v20 = vmax.f32 %v2327_v13, 0.0 }
 0x134   : > { %4141 = vst.msk [vmem:[%s6140_s27 + $0x98] sm:$0xf] %vm4102_vm3, %v5037_v5  ;;  %v5038_v14 = vpack.c.bf16 %v2761_v6, %v2761_v6  ;;  %4281 = vst.msk [vmem:[%s6140_s27 + $0x2c8] sm:$0xf] %vm4102_vm3, %v5177_v15  ;;  %v5178_v21 = vpack.c.bf16 %v2901_v16, %v2901_v16 }
 0x135   : > { %4139 = vst.msk [vmem:[%s6140_s27 + $0x90] sm:$0xf] %vm4102_vm3, %v5035_v10  ;;  %v5036_v17 = vpack.c.bf16 %v2759_v11, %v2759_v11  ;;  %v5461_v19 = vpop.f32.mrb[40].mxu0  ;;  %4279 = vst.msk [vmem:[%s6140_s27 + $0x2c0] sm:$0xf] %vm4102_vm3, %v5175_v18  ;;  %v5176_v24 = vpack.c.bf16 %v2899_v20, %v2899_v20  ;;  %v5601_v27 = vpop.f32.mrb[40].mxu1 }
 0x136   : > { %4142 = vst.msk [vmem:[%s6140_s27 + $0x9c] sm:$0xf] %vm4102_vm3, %v5038_v14  ;;  %v1788_v22 = vadd.f32 %v5461_v19, %v6123_v52  ;;  %v1779_v23 = vpop.f32.mrb[41].mxu0  ;;  %4282 = vst.msk [vmem:[%s6140_s27 + $0x2cc] sm:$0xf] %vm4102_vm3, %v5178_v21  ;;  %v2348_v31 = vadd.f32 %v5601_v27, %v6123_v52  ;;  %v2339_v32 = vpop.f32.mrb[41].mxu1 }
 0x137   : > { %4140 = vst.msk [vmem:[%s6140_s27 + $0x94] sm:$0xf] %vm4102_vm3, %v5036_v17  ;;  %v1780_v25 = vadd.f32 %v6123_v52, %v1779_v23  ;;  %v5462_v26 = vpop.f32.mrb[42].mxu0  ;;  %4280 = vst.msk [vmem:[%s6140_s27 + $0x2c4] sm:$0xf] %vm4102_vm3, %v5176_v24  ;;  %v2340_v35 = vadd.f32 %v6123_v52, %v2339_v32  ;;  %v5602_v36 = vpop.f32.mrb[42].mxu1 }
 0x138   : > { %v2764_v28 = vmax.f32 %v1788_v22, 0.0  ;;  %v1791_v29 = vadd.f32 %v5462_v26, %v6123_v52  ;;  %v1782_v30 = vpop.f32.mrb[43].mxu0  ;;  %v2904_v39 = vmax.f32 %v2348_v31, 0.0  ;;  %v2351_v40 = vadd.f32 %v5602_v36, %v6123_v52  ;;  %v2342_v41 = vpop.f32.mrb[43].mxu1 }
 0x139   : > { %v2762_v33 = vmax.f32 %v1780_v25, 0.0  ;;  %v1783_v34 = vadd.f32 %v6123_v52, %v1782_v30  ;;  %v2902_v44 = vmax.f32 %v2340_v35, 0.0  ;;  %v2343_v45 = vadd.f32 %v6123_v52, %v2342_v41 }
 0x13a   : > { %v5041_v37 = vpack.c.bf16 %v2764_v28, %v2764_v28  ;;  %v2765_v38 = vmax.f32 %v1791_v29, 0.0  ;;  %v5181_v47 = vpack.c.bf16 %v2904_v39, %v2904_v39  ;;  %v2905_v48 = vmax.f32 %v2351_v40, 0.0 }
 0x13b   : > { %v5039_v42 = vpack.c.bf16 %v2762_v33, %v2762_v33  ;;  %v2763_v43 = vmax.f32 %v1783_v34, 0.0  ;;  %v5179_v50 = vpack.c.bf16 %v2902_v44, %v2902_v44  ;;  %v2903_v53 = vmax.f32 %v2343_v45, 0.0 }
 0x13c   : > { %4145 = vst.msk [vmem:[%s6140_s27 + $0xa8] sm:$0xf] %vm4102_vm3, %v5041_v37  ;;  %v5042_v46 = vpack.c.bf16 %v2765_v38, %v2765_v38  ;;  %4285 = vst.msk [vmem:[%s6140_s27 + $0x2d8] sm:$0xf] %vm4102_vm3, %v5181_v47  ;;  %v5182_v54 = vpack.c.bf16 %v2905_v48, %v2905_v48 }
 0x13d   : > { %4143 = vst.msk [vmem:[%s6140_s27 + $0xa0] sm:$0xf] %vm4102_vm3, %v5039_v42  ;;  %v5040_v49 = vpack.c.bf16 %v2763_v43, %v2763_v43  ;;  %v5465_v51 = vpop.f32.mrb[44].mxu0  ;;  %4283 = vst.msk [vmem:[%s6140_s27 + $0x2d0] sm:$0xf] %vm4102_vm3, %v5179_v50  ;;  %v5180_v57 = vpack.c.bf16 %v2903_v53, %v2903_v53  ;;  %v5605_v60 = vpop.f32.mrb[44].mxu1 }
 0x13e   : > { %4146 = vst.msk [vmem:[%s6140_s27 + $0xac] sm:$0xf] %vm4102_vm3, %v5042_v46  ;;  %v1804_v55 = vadd.f32 %v5465_v51, %v6123_v52  ;;  %v1795_v56 = vpop.f32.mrb[45].mxu0  ;;  %4286 = vst.msk [vmem:[%s6140_s27 + $0x2dc] sm:$0xf] %vm4102_vm3, %v5182_v54  ;;  %v2364_v0 = vadd.f32 %v5605_v60, %v6123_v52  ;;  %v2355_v1 = vpop.f32.mrb[45].mxu1 }
 0x13f   : > { %4144 = vst.msk [vmem:[%s6140_s27 + $0xa4] sm:$0xf] %vm4102_vm3, %v5040_v49  ;;  %v1796_v58 = vadd.f32 %v6123_v52, %v1795_v56  ;;  %v5466_v59 = vpop.f32.mrb[46].mxu0  ;;  %4284 = vst.msk [vmem:[%s6140_s27 + $0x2d4] sm:$0xf] %vm4102_vm3, %v5180_v57  ;;  %v2356_v5 = vadd.f32 %v6462_v3, %v2355_v1  ;;  %v5606_v6 = vpop.f32.mrb[46].mxu1 }
 0x140   : > { %v2768_v61 = vmax.f32 %v1804_v55, 0.0  ;;  %v1807_v62 = vadd.f32 %v5466_v59, %v6123_v52  ;;  %v1798_v63 = vpop.f32.mrb[47].mxu0  ;;  %v2908_v9 = vmax.f32 %v2364_v0, 0.0  ;;  %v2367_v52 = vadd.f32 %v6462_v3, %v5606_v6  ;;  %v2358_v10 = vpop.f32.mrb[47].mxu1 }
 0x141   : > { %v2766_v2 = vmax.f32 %v1796_v58, 0.0  ;;  %v1799_v4 = vadd.f32 %v6462_v3, %v1798_v63  ;;  %v2906_v13 = vmax.f32 %v2356_v5, 0.0  ;;  %v2359_v14 = vadd.f32 %v6462_v3, %v2358_v10 }
 0x142   : > { %v5045_v7 = vpack.c.bf16 %v2768_v61, %v2768_v61  ;;  %v2769_v8 = vmax.f32 %v1807_v62, 0.0  ;;  %v5185_v16 = vpack.c.bf16 %v2908_v9, %v2908_v9  ;;  %v2909_v17 = vmax.f32 %v2367_v52, 0.0 }
 0x143   : > { %v5043_v11 = vpack.c.bf16 %v2766_v2, %v2766_v2  ;;  %v2767_v12 = vmax.f32 %v1799_v4, 0.0  ;;  %v5183_v19 = vpack.c.bf16 %v2906_v13, %v2906_v13  ;;  %v2907_v21 = vmax.f32 %v2359_v14, 0.0 }
 0x144   : > { %4149 = vst.msk [vmem:[%s6140_s27 + $0xb8] sm:$0xf] %vm4102_vm3, %v5045_v7  ;;  %v5046_v15 = vpack.c.bf16 %v2769_v8, %v2769_v8  ;;  %4289 = vst.msk [vmem:[%s6140_s27 + $0x2e8] sm:$0xf] %vm4102_vm3, %v5185_v16  ;;  %v5186_v22 = vpack.c.bf16 %v2909_v17, %v2909_v17 }
 0x145   : > { %4147 = vst.msk [vmem:[%s6140_s27 + $0xb0] sm:$0xf] %vm4102_vm3, %v5043_v11  ;;  %v5044_v18 = vpack.c.bf16 %v2767_v12, %v2767_v12  ;;  %v5469_v20 = vpop.f32.mrb[48].mxu0  ;;  %4287 = vst.msk [vmem:[%s6140_s27 + $0x2e0] sm:$0xf] %vm4102_vm3, %v5183_v19  ;;  %v5184_v25 = vpack.c.bf16 %v2907_v21, %v2907_v21  ;;  %v5609_v28 = vpop.f32.mrb[48].mxu1 }
 0x146   : > { %4150 = vst.msk [vmem:[%s6140_s27 + $0xbc] sm:$0xf] %vm4102_vm3, %v5046_v15  ;;  %v1820_v23 = vadd.f32 %v6462_v3, %v5469_v20  ;;  %v1811_v24 = vpop.f32.mrb[49].mxu0  ;;  %4290 = vst.msk [vmem:[%s6140_s27 + $0x2ec] sm:$0xf] %vm4102_vm3, %v5186_v22  ;;  %v2380_v32 = vadd.f32 %v6462_v3, %v5609_v28  ;;  %v2371_v33 = vpop.f32.mrb[49].mxu1 }
 0x147   : > { %4148 = vst.msk [vmem:[%s6140_s27 + $0xb4] sm:$0xf] %vm4102_vm3, %v5044_v18  ;;  %v1812_v26 = vadd.f32 %v6462_v3, %v1811_v24  ;;  %v5470_v27 = vpop.f32.mrb[50].mxu0  ;;  %4288 = vst.msk [vmem:[%s6140_s27 + $0x2e4] sm:$0xf] %vm4102_vm3, %v5184_v25  ;;  %v2372_v36 = vadd.f32 %v6462_v3, %v2371_v33  ;;  %v5610_v37 = vpop.f32.mrb[50].mxu1 }
 0x148   : > { %v2772_v29 = vmax.f32 %v1820_v23, 0.0  ;;  %v1823_v30 = vadd.f32 %v6462_v3, %v5470_v27  ;;  %v1814_v31 = vpop.f32.mrb[51].mxu0  ;;  %v2912_v40 = vmax.f32 %v2380_v32, 0.0  ;;  %v2383_v41 = vadd.f32 %v6462_v3, %v5610_v37  ;;  %v2374_v42 = vpop.f32.mrb[51].mxu1 }
 0x149   : > { %v2770_v34 = vmax.f32 %v1812_v26, 0.0  ;;  %v1815_v35 = vadd.f32 %v6462_v3, %v1814_v31  ;;  %v2910_v45 = vmax.f32 %v2372_v36, 0.0  ;;  %v2375_v46 = vadd.f32 %v6462_v3, %v2374_v42 }
 0x14a   : > { %v5049_v38 = vpack.c.bf16 %v2772_v29, %v2772_v29  ;;  %v2773_v39 = vmax.f32 %v1823_v30, 0.0  ;;  %v5189_v48 = vpack.c.bf16 %v2912_v40, %v2912_v40  ;;  %v2913_v49 = vmax.f32 %v2383_v41, 0.0 }
 0x14b   : > { %v5047_v43 = vpack.c.bf16 %v2770_v34, %v2770_v34  ;;  %v2771_v44 = vmax.f32 %v1815_v35, 0.0  ;;  %v5187_v51 = vpack.c.bf16 %v2910_v45, %v2910_v45  ;;  %v2911_v54 = vmax.f32 %v2375_v46, 0.0 }
 0x14c   : > { %4153 = vst.msk [vmem:[%s6140_s27 + $0xc8] sm:$0xf] %vm4102_vm3, %v5049_v38  ;;  %v5050_v47 = vpack.c.bf16 %v2773_v39, %v2773_v39  ;;  %4293 = vst.msk [vmem:[%s6140_s27 + $0x2f8] sm:$0xf] %vm4102_vm3, %v5189_v48  ;;  %v5190_v55 = vpack.c.bf16 %v2913_v49, %v2913_v49 }
 0x14d   : > { %4151 = vst.msk [vmem:[%s6140_s27 + $0xc0] sm:$0xf] %vm4102_vm3, %v5047_v43  ;;  %v5048_v50 = vpack.c.bf16 %v2771_v44, %v2771_v44  ;;  %v5473_v53 = vpop.f32.mrb[52].mxu0  ;;  %4291 = vst.msk [vmem:[%s6140_s27 + $0x2f0] sm:$0xf] %vm4102_vm3, %v5187_v51  ;;  %v5188_v58 = vpack.c.bf16 %v2911_v54, %v2911_v54  ;;  %v5613_v61 = vpop.f32.mrb[52].mxu1 }
 0x14e   : > { %4154 = vst.msk [vmem:[%s6140_s27 + $0xcc] sm:$0xf] %vm4102_vm3, %v5050_v47  ;;  %v1836_v56 = vadd.f32 %v6462_v3, %v5473_v53  ;;  %v1827_v57 = vpop.f32.mrb[53].mxu0  ;;  %4294 = vst.msk [vmem:[%s6140_s27 + $0x2fc] sm:$0xf] %vm4102_vm3, %v5190_v55  ;;  %v2396_v1 = vadd.f32 %v6462_v3, %v5613_v61  ;;  %v2387_v2 = vpop.f32.mrb[53].mxu1 }
 0x14f   : > { %4152 = vst.msk [vmem:[%s6140_s27 + $0xc4] sm:$0xf] %vm4102_vm3, %v5048_v50  ;;  %v1828_v59 = vadd.f32 %v6462_v3, %v1827_v57  ;;  %v5474_v60 = vpop.f32.mrb[54].mxu0  ;;  %4292 = vst.msk [vmem:[%s6140_s27 + $0x2f4] sm:$0xf] %vm4102_vm3, %v5188_v58  ;;  %v2388_v6 = vadd.f32 %v6462_v3, %v2387_v2  ;;  %v5614_v7 = vpop.f32.mrb[54].mxu1 }
 0x150   : > { %v2776_v62 = vmax.f32 %v1836_v56, 0.0  ;;  %v1839_v63 = vadd.f32 %v6462_v3, %v5474_v60  ;;  %v1830_v0 = vpop.f32.mrb[55].mxu0  ;;  %v2916_v52 = vmax.f32 %v2396_v1, 0.0  ;;  %v2399_v10 = vadd.f32 %v6462_v3, %v5614_v7  ;;  %v2390_v11 = vpop.f32.mrb[55].mxu1 }
 0x151   : > { %v2774_v4 = vmax.f32 %v1828_v59, 0.0  ;;  %v1831_v5 = vadd.f32 %v6462_v3, %v1830_v0  ;;  %v2914_v14 = vmax.f32 %v2388_v6, 0.0  ;;  %v2391_v15 = vadd.f32 %v6462_v3, %v2390_v11 }
 0x152   : > { %v5053_v8 = vpack.c.bf16 %v2776_v62, %v2776_v62  ;;  %v2777_v9 = vmax.f32 %v1839_v63, 0.0  ;;  %v5193_v17 = vpack.c.bf16 %v2916_v52, %v2916_v52  ;;  %v2917_v18 = vmax.f32 %v2399_v10, 0.0 }
 0x153   : > { %v5051_v12 = vpack.c.bf16 %v2774_v4, %v2774_v4  ;;  %v2775_v13 = vmax.f32 %v1831_v5, 0.0  ;;  %v5191_v20 = vpack.c.bf16 %v2914_v14, %v2914_v14  ;;  %v2915_v22 = vmax.f32 %v2391_v15, 0.0 }
 0x154   : > { %4157 = vst.msk [vmem:[%s6140_s27 + $0xd8] sm:$0xf] %vm4102_vm3, %v5053_v8  ;;  %v5054_v16 = vpack.c.bf16 %v2777_v9, %v2777_v9  ;;  %4297 = vst.msk [vmem:[%s6140_s27 + $0x308] sm:$0xf] %vm4102_vm3, %v5193_v17  ;;  %v5194_v23 = vpack.c.bf16 %v2917_v18, %v2917_v18 }
 0x155   : > { %4155 = vst.msk [vmem:[%s6140_s27 + $0xd0] sm:$0xf] %vm4102_vm3, %v5051_v12  ;;  %v5052_v19 = vpack.c.bf16 %v2775_v13, %v2775_v13  ;;  %v5477_v21 = vpop.f32.mrb[56].mxu0  ;;  %4295 = vst.msk [vmem:[%s6140_s27 + $0x300] sm:$0xf] %vm4102_vm3, %v5191_v20  ;;  %v5192_v26 = vpack.c.bf16 %v2915_v22, %v2915_v22  ;;  %v5617_v29 = vpop.f32.mrb[56].mxu1 }
 0x156   : > { %4158 = vst.msk [vmem:[%s6140_s27 + $0xdc] sm:$0xf] %vm4102_vm3, %v5054_v16  ;;  %v1852_v24 = vadd.f32 %v6462_v3, %v5477_v21  ;;  %v1843_v25 = vpop.f32.mrb[57].mxu0  ;;  %4298 = vst.msk [vmem:[%s6140_s27 + $0x30c] sm:$0xf] %vm4102_vm3, %v5194_v23  ;;  %v2412_v33 = vadd.f32 %v6462_v3, %v5617_v29  ;;  %v2403_v34 = vpop.f32.mrb[57].mxu1 }
 0x157   : > { %4156 = vst.msk [vmem:[%s6140_s27 + $0xd4] sm:$0xf] %vm4102_vm3, %v5052_v19  ;;  %v1844_v27 = vadd.f32 %v6462_v3, %v1843_v25  ;;  %v5478_v28 = vpop.f32.mrb[58].mxu0  ;;  %4296 = vst.msk [vmem:[%s6140_s27 + $0x304] sm:$0xf] %vm4102_vm3, %v5192_v26  ;;  %v2404_v37 = vadd.f32 %v6462_v3, %v2403_v34  ;;  %v5618_v38 = vpop.f32.mrb[58].mxu1 }
 0x158   : > { %v2780_v30 = vmax.f32 %v1852_v24, 0.0  ;;  %v1855_v31 = vadd.f32 %v6462_v3, %v5478_v28  ;;  %v1846_v32 = vpop.f32.mrb[59].mxu0  ;;  %v2920_v41 = vmax.f32 %v2412_v33, 0.0  ;;  %v2415_v42 = vadd.f32 %v6462_v3, %v5618_v38  ;;  %v2406_v43 = vpop.f32.mrb[59].mxu1 }
 0x159   : > { %v2778_v35 = vmax.f32 %v1844_v27, 0.0  ;;  %v1847_v36 = vadd.f32 %v6462_v3, %v1846_v32  ;;  %v2918_v46 = vmax.f32 %v2404_v37, 0.0  ;;  %v2407_v47 = vadd.f32 %v6462_v3, %v2406_v43 }
 0x15a   : > { %v5057_v39 = vpack.c.bf16 %v2780_v30, %v2780_v30  ;;  %v2781_v40 = vmax.f32 %v1855_v31, 0.0  ;;  %v5197_v49 = vpack.c.bf16 %v2920_v41, %v2920_v41  ;;  %v2921_v50 = vmax.f32 %v2415_v42, 0.0 }
 0x15b   : > { %v5055_v44 = vpack.c.bf16 %v2778_v35, %v2778_v35  ;;  %v2779_v45 = vmax.f32 %v1847_v36, 0.0  ;;  %v5195_v53 = vpack.c.bf16 %v2918_v46, %v2918_v46  ;;  %v2919_v55 = vmax.f32 %v2407_v47, 0.0 }
 0x15c   : > { %4161 = vst.msk [vmem:[%s6140_s27 + $0xe8] sm:$0xf] %vm4102_vm3, %v5057_v39  ;;  %v5058_v48 = vpack.c.bf16 %v2781_v40, %v2781_v40  ;;  %4301 = vst.msk [vmem:[%s6140_s27 + $0x318] sm:$0xf] %vm4102_vm3, %v5197_v49  ;;  %v5198_v56 = vpack.c.bf16 %v2921_v50, %v2921_v50 }
 0x15d   : > { %4159 = vst.msk [vmem:[%s6140_s27 + $0xe0] sm:$0xf] %vm4102_vm3, %v5055_v44  ;;  %v5056_v51 = vpack.c.bf16 %v2779_v45, %v2779_v45  ;;  %v5481_v54 = vpop.f32.mrb[60].mxu0  ;;  %4299 = vst.msk [vmem:[%s6140_s27 + $0x310] sm:$0xf] %vm4102_vm3, %v5195_v53  ;;  %v5196_v59 = vpack.c.bf16 %v2919_v55, %v2919_v55  ;;  %v5621_v62 = vpop.f32.mrb[60].mxu1 }
 0x15e   : > { %4162 = vst.msk [vmem:[%s6140_s27 + $0xec] sm:$0xf] %vm4102_vm3, %v5058_v48  ;;  %v1868_v57 = vadd.f32 %v6462_v3, %v5481_v54  ;;  %v1859_v58 = vpop.f32.mrb[61].mxu0  ;;  %4302 = vst.msk [vmem:[%s6140_s27 + $0x31c] sm:$0xf] %vm4102_vm3, %v5198_v56  ;;  %v2428_v2 = vadd.f32 %v6462_v3, %v5621_v62  ;;  %v2419_v4 = vpop.f32.mrb[61].mxu1 }
 0x15f   : > { %4160 = vst.msk [vmem:[%s6140_s27 + $0xe4] sm:$0xf] %vm4102_vm3, %v5056_v51  ;;  %v1860_v60 = vadd.f32 %v6462_v3, %v1859_v58  ;;  %v5482_v61 = vpop.f32.mrb[62].mxu0  ;;  %4300 = vst.msk [vmem:[%s6140_s27 + $0x314] sm:$0xf] %vm4102_vm3, %v5196_v59  ;;  %v2420_v7 = vadd.f32 %v6462_v3, %v2419_v4  ;;  %v5622_v8 = vpop.f32.mrb[62].mxu1 }
 0x160   : > { %v2784_v63 = vmax.f32 %v1868_v57, 0.0  ;;  %v1871_v0 = vadd.f32 %v6462_v3, %v5482_v61  ;;  %v1862_v1 = vpop.f32.mrb[63].mxu0  ;;  %v2924_v10 = vmax.f32 %v2428_v2, 0.0  ;;  %v2431_v11 = vadd.f32 %v6462_v3, %v5622_v8  ;;  %v2422_v12 = vpop.f32.mrb[63].mxu1 }
 0x161   : > { %v2782_v5 = vmax.f32 %v1860_v60, 0.0  ;;  %v1863_v6 = vadd.f32 %v6462_v3, %v1862_v1  ;;  %v2922_v15 = vmax.f32 %v2420_v7, 0.0  ;;  %v2423_v16 = vadd.f32 %v6462_v3, %v2422_v12 }
 0x162   : > { %v5061_v9 = vpack.c.bf16 %v2784_v63, %v2784_v63  ;;  %v2785_v52 = vmax.f32 %v1871_v0, 0.0  ;;  %v5201_v18 = vpack.c.bf16 %v2924_v10, %v2924_v10  ;;  %v2925_v19 = vmax.f32 %v2431_v11, 0.0 }
 0x163   : > { %v5059_v13 = vpack.c.bf16 %v2782_v5, %v2782_v5  ;;  %v2783_v14 = vmax.f32 %v1863_v6, 0.0  ;;  %v5199_v21 = vpack.c.bf16 %v2922_v15, %v2922_v15  ;;  %v2923_v23 = vmax.f32 %v2423_v16, 0.0 }
 0x164   : > { %4165 = vst.msk [vmem:[%s6140_s27 + $0xf8] sm:$0xf] %vm4102_vm3, %v5061_v9  ;;  %v5062_v17 = vpack.c.bf16 %v2785_v52, %v2785_v52  ;;  %4305 = vst.msk [vmem:[%s6140_s27 + $0x328] sm:$0xf] %vm4102_vm3, %v5201_v18  ;;  %v5202_v24 = vpack.c.bf16 %v2925_v19, %v2925_v19 }
 0x165   : > { %4163 = vst.msk [vmem:[%s6140_s27 + $0xf0] sm:$0xf] %vm4102_vm3, %v5059_v13  ;;  %v5060_v20 = vpack.c.bf16 %v2783_v14, %v2783_v14  ;;  %v5485_v22 = vpop.f32.mrb[64].mxu0  ;;  %4303 = vst.msk [vmem:[%s6140_s27 + $0x320] sm:$0xf] %vm4102_vm3, %v5199_v21  ;;  %v5200_v27 = vpack.c.bf16 %v2923_v23, %v2923_v23  ;;  %v5625_v30 = vpop.f32.mrb[64].mxu1 }
 0x166   : > { %4166 = vst.msk [vmem:[%s6140_s27 + $0xfc] sm:$0xf] %vm4102_vm3, %v5062_v17  ;;  %v1884_v25 = vadd.f32 %v6462_v3, %v5485_v22  ;;  %v1875_v26 = vpop.f32.mrb[65].mxu0  ;;  %4306 = vst.msk [vmem:[%s6140_s27 + $0x32c] sm:$0xf] %vm4102_vm3, %v5202_v24  ;;  %v2444_v34 = vadd.f32 %v6462_v3, %v5625_v30  ;;  %v2435_v35 = vpop.f32.mrb[65].mxu1 }
 0x167   : > { %4164 = vst.msk [vmem:[%s6140_s27 + $0xf4] sm:$0xf] %vm4102_vm3, %v5060_v20  ;;  %v1876_v28 = vadd.f32 %v6462_v3, %v1875_v26  ;;  %v5486_v29 = vpop.f32.mrb[66].mxu0  ;;  %4304 = vst.msk [vmem:[%s6140_s27 + $0x324] sm:$0xf] %vm4102_vm3, %v5200_v27  ;;  %v2436_v38 = vadd.f32 %v6462_v3, %v2435_v35  ;;  %v5626_v39 = vpop.f32.mrb[66].mxu1 }
 0x168   : > { %v2788_v31 = vmax.f32 %v1884_v25, 0.0  ;;  %v1887_v32 = vadd.f32 %v6462_v3, %v5486_v29  ;;  %v1878_v33 = vpop.f32.mrb[67].mxu0  ;;  %v2928_v42 = vmax.f32 %v2444_v34, 0.0  ;;  %v2447_v43 = vadd.f32 %v6462_v3, %v5626_v39  ;;  %v2438_v44 = vpop.f32.mrb[67].mxu1 }
 0x169   : > { %v2786_v36 = vmax.f32 %v1876_v28, 0.0  ;;  %v1879_v37 = vadd.f32 %v6462_v3, %v1878_v33  ;;  %v2926_v47 = vmax.f32 %v2436_v38, 0.0  ;;  %v2439_v48 = vadd.f32 %v6462_v3, %v2438_v44 }
 0x16a   : > { %v5065_v40 = vpack.c.bf16 %v2788_v31, %v2788_v31  ;;  %v2789_v41 = vmax.f32 %v1887_v32, 0.0  ;;  %v5205_v50 = vpack.c.bf16 %v2928_v42, %v2928_v42  ;;  %v2929_v51 = vmax.f32 %v2447_v43, 0.0 }
 0x16b   : > { %v5063_v45 = vpack.c.bf16 %v2786_v36, %v2786_v36  ;;  %v2787_v46 = vmax.f32 %v1879_v37, 0.0  ;;  %v5203_v54 = vpack.c.bf16 %v2926_v47, %v2926_v47  ;;  %v2927_v56 = vmax.f32 %v2439_v48, 0.0 }
 0x16c   : > { %4169 = vst.msk [vmem:[%s6140_s27 + $0x108] sm:$0xf] %vm4102_vm3, %v5065_v40  ;;  %v5066_v49 = vpack.c.bf16 %v2789_v41, %v2789_v41  ;;  %4309 = vst.msk [vmem:[%s6140_s27 + $0x338] sm:$0xf] %vm4102_vm3, %v5205_v50  ;;  %v5206_v57 = vpack.c.bf16 %v2929_v51, %v2929_v51 }
 0x16d   : > { %4167 = vst.msk [vmem:[%s6140_s27 + $0x100] sm:$0xf] %vm4102_vm3, %v5063_v45  ;;  %v5064_v53 = vpack.c.bf16 %v2787_v46, %v2787_v46  ;;  %v5489_v55 = vpop.f32.mrb[68].mxu0  ;;  %4307 = vst.msk [vmem:[%s6140_s27 + $0x330] sm:$0xf] %vm4102_vm3, %v5203_v54  ;;  %v5204_v60 = vpack.c.bf16 %v2927_v56, %v2927_v56  ;;  %v5629_v63 = vpop.f32.mrb[68].mxu1 }
 0x16e   : > { %4170 = vst.msk [vmem:[%s6140_s27 + $0x10c] sm:$0xf] %vm4102_vm3, %v5066_v49  ;;  %v1900_v58 = vadd.f32 %v6462_v3, %v5489_v55  ;;  %v1891_v59 = vpop.f32.mrb[69].mxu0  ;;  %4310 = vst.msk [vmem:[%s6140_s27 + $0x33c] sm:$0xf] %vm4102_vm3, %v5206_v57  ;;  %v2460_v4 = vadd.f32 %v6462_v3, %v5629_v63  ;;  %v2451_v5 = vpop.f32.mrb[69].mxu1 }
 0x16f   : > { %4168 = vst.msk [vmem:[%s6140_s27 + $0x104] sm:$0xf] %vm4102_vm3, %v5064_v53  ;;  %v1892_v61 = vadd.f32 %v6462_v3, %v1891_v59  ;;  %v5490_v62 = vpop.f32.mrb[70].mxu0  ;;  %4308 = vst.msk [vmem:[%s6140_s27 + $0x334] sm:$0xf] %vm4102_vm3, %v5204_v60  ;;  %v2452_v8 = vadd.f32 %v6462_v3, %v2451_v5  ;;  %v5630_v9 = vpop.f32.mrb[70].mxu1 }
 0x170   : > { %v2792_v0 = vmax.f32 %v1900_v58, 0.0  ;;  %v1903_v1 = vadd.f32 %v6462_v3, %v5490_v62  ;;  %v1894_v2 = vpop.f32.mrb[71].mxu0  ;;  %v2932_v11 = vmax.f32 %v2460_v4, 0.0  ;;  %v2463_v12 = vadd.f32 %v6462_v3, %v5630_v9  ;;  %v2454_v13 = vpop.f32.mrb[71].mxu1 }
 0x171   : > { %v2790_v6 = vmax.f32 %v1892_v61, 0.0  ;;  %v1895_v7 = vadd.f32 %v6462_v3, %v1894_v2  ;;  %v2930_v16 = vmax.f32 %v2452_v8, 0.0  ;;  %v2455_v17 = vadd.f32 %v6462_v3, %v2454_v13 }
 0x172   : > { %v5069_v52 = vpack.c.bf16 %v2792_v0, %v2792_v0  ;;  %v2793_v10 = vmax.f32 %v1903_v1, 0.0  ;;  %v5209_v19 = vpack.c.bf16 %v2932_v11, %v2932_v11  ;;  %v2933_v20 = vmax.f32 %v2463_v12, 0.0 }
 0x173   : > { %v5067_v14 = vpack.c.bf16 %v2790_v6, %v2790_v6  ;;  %v2791_v15 = vmax.f32 %v1895_v7, 0.0  ;;  %v5207_v22 = vpack.c.bf16 %v2930_v16, %v2930_v16  ;;  %v2931_v24 = vmax.f32 %v2455_v17, 0.0 }
 0x174   : > { %4173 = vst.msk [vmem:[%s6140_s27 + $0x118] sm:$0xf] %vm4102_vm3, %v5069_v52  ;;  %v5070_v18 = vpack.c.bf16 %v2793_v10, %v2793_v10  ;;  %4313 = vst.msk [vmem:[%s6140_s27 + $0x348] sm:$0xf] %vm4102_vm3, %v5209_v19  ;;  %v5210_v25 = vpack.c.bf16 %v2933_v20, %v2933_v20 }
 0x175   : > { %4171 = vst.msk [vmem:[%s6140_s27 + $0x110] sm:$0xf] %vm4102_vm3, %v5067_v14  ;;  %v5068_v21 = vpack.c.bf16 %v2791_v15, %v2791_v15  ;;  %v5493_v23 = vpop.f32.mrb[72].mxu0  ;;  %4311 = vst.msk [vmem:[%s6140_s27 + $0x340] sm:$0xf] %vm4102_vm3, %v5207_v22  ;;  %v5208_v28 = vpack.c.bf16 %v2931_v24, %v2931_v24  ;;  %v5633_v31 = vpop.f32.mrb[72].mxu1 }
 0x176   : > { %4174 = vst.msk [vmem:[%s6140_s27 + $0x11c] sm:$0xf] %vm4102_vm3, %v5070_v18  ;;  %v1916_v26 = vadd.f32 %v6462_v3, %v5493_v23  ;;  %v1907_v27 = vpop.f32.mrb[73].mxu0  ;;  %4314 = vst.msk [vmem:[%s6140_s27 + $0x34c] sm:$0xf] %vm4102_vm3, %v5210_v25  ;;  %v2476_v35 = vadd.f32 %v6462_v3, %v5633_v31  ;;  %v2467_v36 = vpop.f32.mrb[73].mxu1 }
 0x177   : > { %4172 = vst.msk [vmem:[%s6140_s27 + $0x114] sm:$0xf] %vm4102_vm3, %v5068_v21  ;;  %v1908_v29 = vadd.f32 %v6462_v3, %v1907_v27  ;;  %v5494_v30 = vpop.f32.mrb[74].mxu0  ;;  %4312 = vst.msk [vmem:[%s6140_s27 + $0x344] sm:$0xf] %vm4102_vm3, %v5208_v28  ;;  %v2468_v39 = vadd.f32 %v6462_v3, %v2467_v36  ;;  %v5634_v40 = vpop.f32.mrb[74].mxu1 }
 0x178   : > { %v2796_v32 = vmax.f32 %v1916_v26, 0.0  ;;  %v1919_v33 = vadd.f32 %v6462_v3, %v5494_v30  ;;  %v1910_v34 = vpop.f32.mrb[75].mxu0  ;;  %v2936_v43 = vmax.f32 %v2476_v35, 0.0  ;;  %v2479_v44 = vadd.f32 %v6462_v3, %v5634_v40  ;;  %v2470_v45 = vpop.f32.mrb[75].mxu1 }
 0x179   : > { %v2794_v37 = vmax.f32 %v1908_v29, 0.0  ;;  %v1911_v38 = vadd.f32 %v6462_v3, %v1910_v34  ;;  %v2934_v48 = vmax.f32 %v2468_v39, 0.0  ;;  %v2471_v49 = vadd.f32 %v6462_v3, %v2470_v45 }
 0x17a   : > { %v5073_v41 = vpack.c.bf16 %v2796_v32, %v2796_v32  ;;  %v2797_v42 = vmax.f32 %v1919_v33, 0.0  ;;  %v5213_v51 = vpack.c.bf16 %v2936_v43, %v2936_v43  ;;  %v2937_v53 = vmax.f32 %v2479_v44, 0.0 }
 0x17b   : > { %v5071_v46 = vpack.c.bf16 %v2794_v37, %v2794_v37  ;;  %v2795_v47 = vmax.f32 %v1911_v38, 0.0  ;;  %v5211_v55 = vpack.c.bf16 %v2934_v48, %v2934_v48  ;;  %v2935_v57 = vmax.f32 %v2471_v49, 0.0 }
 0x17c   : > { %4177 = vst.msk [vmem:[%s6140_s27 + $0x128] sm:$0xf] %vm4102_vm3, %v5073_v41  ;;  %v5074_v50 = vpack.c.bf16 %v2797_v42, %v2797_v42  ;;  %4317 = vst.msk [vmem:[%s6140_s27 + $0x358] sm:$0xf] %vm4102_vm3, %v5213_v51  ;;  %v5214_v58 = vpack.c.bf16 %v2937_v53, %v2937_v53 }
 0x17d   : > { %4175 = vst.msk [vmem:[%s6140_s27 + $0x120] sm:$0xf] %vm4102_vm3, %v5071_v46  ;;  %v5072_v54 = vpack.c.bf16 %v2795_v47, %v2795_v47  ;;  %v5497_v56 = vpop.f32.mrb[76].mxu0  ;;  %4315 = vst.msk [vmem:[%s6140_s27 + $0x350] sm:$0xf] %vm4102_vm3, %v5211_v55  ;;  %v5212_v61 = vpack.c.bf16 %v2935_v57, %v2935_v57  ;;  %v5637_v0 = vpop.f32.mrb[76].mxu1 }
 0x17e   : > { %4178 = vst.msk [vmem:[%s6140_s27 + $0x12c] sm:$0xf] %vm4102_vm3, %v5074_v50  ;;  %v1932_v59 = vadd.f32 %v6462_v3, %v5497_v56  ;;  %v1923_v60 = vpop.f32.mrb[77].mxu0  ;;  %4318 = vst.msk [vmem:[%s6140_s27 + $0x35c] sm:$0xf] %vm4102_vm3, %v5214_v58  ;;  %v2492_v5 = vadd.f32 %v6462_v3, %v5637_v0  ;;  %v2483_v6 = vpop.f32.mrb[77].mxu1 }
 0x17f   : > { %4176 = vst.msk [vmem:[%s6140_s27 + $0x124] sm:$0xf] %vm4102_vm3, %v5072_v54  ;;  %v1924_v62 = vadd.f32 %v6462_v3, %v1923_v60  ;;  %v5498_v63 = vpop.f32.mrb[78].mxu0  ;;  %4316 = vst.msk [vmem:[%s6140_s27 + $0x354] sm:$0xf] %vm4102_vm3, %v5212_v61  ;;  %v2484_v9 = vadd.f32 %v6462_v3, %v2483_v6  ;;  %v5638_v52 = vpop.f32.mrb[78].mxu1 }
 0x180   : > { %v2800_v1 = vmax.f32 %v1932_v59, 0.0  ;;  %v1935_v2 = vadd.f32 %v6462_v3, %v5498_v63  ;;  %v1926_v4 = vpop.f32.mrb[79].mxu0  ;;  %v2940_v12 = vmax.f32 %v2492_v5, 0.0  ;;  %v2495_v13 = vadd.f32 %v6462_v3, %v5638_v52  ;;  %v2486_v14 = vpop.f32.mrb[79].mxu1 }
 0x181   : > { %v2798_v7 = vmax.f32 %v1924_v62, 0.0  ;;  %v1927_v8 = vadd.f32 %v6462_v3, %v1926_v4  ;;  %v2938_v17 = vmax.f32 %v2484_v9, 0.0  ;;  %v2487_v18 = vadd.f32 %v6462_v3, %v2486_v14 }
 0x182   : > { %v5077_v10 = vpack.c.bf16 %v2800_v1, %v2800_v1  ;;  %v2801_v11 = vmax.f32 %v1935_v2, 0.0  ;;  %v5217_v20 = vpack.c.bf16 %v2940_v12, %v2940_v12  ;;  %v2941_v21 = vmax.f32 %v2495_v13, 0.0 }
 0x183   : > { %v5075_v15 = vpack.c.bf16 %v2798_v7, %v2798_v7  ;;  %v2799_v16 = vmax.f32 %v1927_v8, 0.0  ;;  %v5215_v23 = vpack.c.bf16 %v2938_v17, %v2938_v17  ;;  %v2939_v25 = vmax.f32 %v2487_v18, 0.0 }
 0x184   : > { %4181 = vst.msk [vmem:[%s6140_s27 + $0x138] sm:$0xf] %vm4102_vm3, %v5077_v10  ;;  %v5078_v19 = vpack.c.bf16 %v2801_v11, %v2801_v11  ;;  %4321 = vst.msk [vmem:[%s6140_s27 + $0x368] sm:$0xf] %vm4102_vm3, %v5217_v20  ;;  %v5218_v26 = vpack.c.bf16 %v2941_v21, %v2941_v21 }
 0x185   : > { %4179 = vst.msk [vmem:[%s6140_s27 + $0x130] sm:$0xf] %vm4102_vm3, %v5075_v15  ;;  %v5076_v22 = vpack.c.bf16 %v2799_v16, %v2799_v16  ;;  %v5501_v24 = vpop.f32.mrb[80].mxu0  ;;  %4319 = vst.msk [vmem:[%s6140_s27 + $0x360] sm:$0xf] %vm4102_vm3, %v5215_v23  ;;  %v5216_v29 = vpack.c.bf16 %v2939_v25, %v2939_v25  ;;  %v5641_v32 = vpop.f32.mrb[80].mxu1 }
 0x186   : > { %4182 = vst.msk [vmem:[%s6140_s27 + $0x13c] sm:$0xf] %vm4102_vm3, %v5078_v19  ;;  %v1948_v27 = vadd.f32 %v6462_v3, %v5501_v24  ;;  %v1939_v28 = vpop.f32.mrb[81].mxu0  ;;  %4322 = vst.msk [vmem:[%s6140_s27 + $0x36c] sm:$0xf] %vm4102_vm3, %v5218_v26  ;;  %v2508_v36 = vadd.f32 %v6462_v3, %v5641_v32  ;;  %v2499_v37 = vpop.f32.mrb[81].mxu1 }
 0x187   : > { %4180 = vst.msk [vmem:[%s6140_s27 + $0x134] sm:$0xf] %vm4102_vm3, %v5076_v22  ;;  %v1940_v30 = vadd.f32 %v6462_v3, %v1939_v28  ;;  %v5502_v31 = vpop.f32.mrb[82].mxu0  ;;  %4320 = vst.msk [vmem:[%s6140_s27 + $0x364] sm:$0xf] %vm4102_vm3, %v5216_v29  ;;  %v2500_v40 = vadd.f32 %v6462_v3, %v2499_v37  ;;  %v5642_v41 = vpop.f32.mrb[82].mxu1 }
 0x188   : > { %v2804_v33 = vmax.f32 %v1948_v27, 0.0  ;;  %v1951_v34 = vadd.f32 %v6462_v3, %v5502_v31  ;;  %v1942_v35 = vpop.f32.mrb[83].mxu0  ;;  %v2944_v44 = vmax.f32 %v2508_v36, 0.0  ;;  %v2511_v45 = vadd.f32 %v6462_v3, %v5642_v41  ;;  %v2502_v46 = vpop.f32.mrb[83].mxu1 }
 0x189   : > { %v2802_v38 = vmax.f32 %v1940_v30, 0.0  ;;  %v1943_v39 = vadd.f32 %v6462_v3, %v1942_v35  ;;  %v2942_v49 = vmax.f32 %v2500_v40, 0.0  ;;  %v2503_v50 = vadd.f32 %v6462_v3, %v2502_v46 }
 0x18a   : > { %v5081_v42 = vpack.c.bf16 %v2804_v33, %v2804_v33  ;;  %v2805_v43 = vmax.f32 %v1951_v34, 0.0  ;;  %v5221_v53 = vpack.c.bf16 %v2944_v44, %v2944_v44  ;;  %v2945_v54 = vmax.f32 %v2511_v45, 0.0 }
 0x18b   : > { %v5079_v47 = vpack.c.bf16 %v2802_v38, %v2802_v38  ;;  %v2803_v48 = vmax.f32 %v1943_v39, 0.0  ;;  %v5219_v56 = vpack.c.bf16 %v2942_v49, %v2942_v49  ;;  %v2943_v58 = vmax.f32 %v2503_v50, 0.0 }
 0x18c   : > { %4185 = vst.msk [vmem:[%s6140_s27 + $0x148] sm:$0xf] %vm4102_vm3, %v5081_v42  ;;  %v5082_v51 = vpack.c.bf16 %v2805_v43, %v2805_v43  ;;  %4325 = vst.msk [vmem:[%s6140_s27 + $0x378] sm:$0xf] %vm4102_vm3, %v5221_v53  ;;  %v5222_v59 = vpack.c.bf16 %v2945_v54, %v2945_v54 }
 0x18d   : > { %4183 = vst.msk [vmem:[%s6140_s27 + $0x140] sm:$0xf] %vm4102_vm3, %v5079_v47  ;;  %v5080_v55 = vpack.c.bf16 %v2803_v48, %v2803_v48  ;;  %v5505_v57 = vpop.f32.mrb[84].mxu0  ;;  %4323 = vst.msk [vmem:[%s6140_s27 + $0x370] sm:$0xf] %vm4102_vm3, %v5219_v56  ;;  %v5220_v62 = vpack.c.bf16 %v2943_v58, %v2943_v58  ;;  %v5645_v1 = vpop.f32.mrb[84].mxu1 }
 0x18e   : > { %4186 = vst.msk [vmem:[%s6140_s27 + $0x14c] sm:$0xf] %vm4102_vm3, %v5082_v51  ;;  %v1964_v60 = vadd.f32 %v6462_v3, %v5505_v57  ;;  %v1955_v61 = vpop.f32.mrb[85].mxu0  ;;  %4326 = vst.msk [vmem:[%s6140_s27 + $0x37c] sm:$0xf] %vm4102_vm3, %v5222_v59  ;;  %v2524_v6 = vadd.f32 %v6462_v3, %v5645_v1  ;;  %v2515_v7 = vpop.f32.mrb[85].mxu1 }
 0x18f   : > { %4184 = vst.msk [vmem:[%s6140_s27 + $0x144] sm:$0xf] %vm4102_vm3, %v5080_v55  ;;  %v1956_v63 = vadd.f32 %v6462_v3, %v1955_v61  ;;  %v5506_v0 = vpop.f32.mrb[86].mxu0  ;;  %4324 = vst.msk [vmem:[%s6140_s27 + $0x374] sm:$0xf] %vm4102_vm3, %v5220_v62  ;;  %v2516_v52 = vadd.f32 %v6462_v3, %v2515_v7  ;;  %v5646_v10 = vpop.f32.mrb[86].mxu1 }
 0x190   : > { %v2808_v2 = vmax.f32 %v1964_v60, 0.0  ;;  %v1967_v4 = vadd.f32 %v6462_v3, %v5506_v0  ;;  %v1958_v5 = vpop.f32.mrb[87].mxu0  ;;  %v2948_v13 = vmax.f32 %v2524_v6, 0.0  ;;  %v2527_v14 = vadd.f32 %v6462_v3, %v5646_v10  ;;  %v2518_v15 = vpop.f32.mrb[87].mxu1 }
 0x191   : > { %v2806_v8 = vmax.f32 %v1956_v63, 0.0  ;;  %v1959_v9 = vadd.f32 %v6462_v3, %v1958_v5  ;;  %v2946_v18 = vmax.f32 %v2516_v52, 0.0  ;;  %v2519_v19 = vadd.f32 %v6462_v3, %v2518_v15 }
 0x192   : > { %v5085_v11 = vpack.c.bf16 %v2808_v2, %v2808_v2  ;;  %v2809_v12 = vmax.f32 %v1967_v4, 0.0  ;;  %v5225_v21 = vpack.c.bf16 %v2948_v13, %v2948_v13  ;;  %v2949_v22 = vmax.f32 %v2527_v14, 0.0 }
 0x193   : > { %v5083_v16 = vpack.c.bf16 %v2806_v8, %v2806_v8  ;;  %v2807_v17 = vmax.f32 %v1959_v9, 0.0  ;;  %v5223_v24 = vpack.c.bf16 %v2946_v18, %v2946_v18  ;;  %v2947_v26 = vmax.f32 %v2519_v19, 0.0 }
 0x194   : > { %4189 = vst.msk [vmem:[%s6140_s27 + $0x158] sm:$0xf] %vm4102_vm3, %v5085_v11  ;;  %v5086_v20 = vpack.c.bf16 %v2809_v12, %v2809_v12  ;;  %4329 = vst.msk [vmem:[%s6140_s27 + $0x388] sm:$0xf] %vm4102_vm3, %v5225_v21  ;;  %v5226_v27 = vpack.c.bf16 %v2949_v22, %v2949_v22 }
 0x195   : > { %4187 = vst.msk [vmem:[%s6140_s27 + $0x150] sm:$0xf] %vm4102_vm3, %v5083_v16  ;;  %v5084_v23 = vpack.c.bf16 %v2807_v17, %v2807_v17  ;;  %v5509_v25 = vpop.f32.mrb[88].mxu0  ;;  %4327 = vst.msk [vmem:[%s6140_s27 + $0x380] sm:$0xf] %vm4102_vm3, %v5223_v24  ;;  %v5224_v30 = vpack.c.bf16 %v2947_v26, %v2947_v26  ;;  %v5649_v33 = vpop.f32.mrb[88].mxu1 }
 0x196   : > { %4190 = vst.msk [vmem:[%s6140_s27 + $0x15c] sm:$0xf] %vm4102_vm3, %v5086_v20  ;;  %v1980_v28 = vadd.f32 %v6462_v3, %v5509_v25  ;;  %v1971_v29 = vpop.f32.mrb[89].mxu0  ;;  %4330 = vst.msk [vmem:[%s6140_s27 + $0x38c] sm:$0xf] %vm4102_vm3, %v5226_v27  ;;  %v2540_v37 = vadd.f32 %v6462_v3, %v5649_v33  ;;  %v2531_v38 = vpop.f32.mrb[89].mxu1 }
 0x197   : > { %4188 = vst.msk [vmem:[%s6140_s27 + $0x154] sm:$0xf] %vm4102_vm3, %v5084_v23  ;;  %v1972_v31 = vadd.f32 %v6462_v3, %v1971_v29  ;;  %v5510_v32 = vpop.f32.mrb[90].mxu0  ;;  %4328 = vst.msk [vmem:[%s6140_s27 + $0x384] sm:$0xf] %vm4102_vm3, %v5224_v30  ;;  %v2532_v41 = vadd.f32 %v6462_v3, %v2531_v38  ;;  %v5650_v42 = vpop.f32.mrb[90].mxu1 }
 0x198   : > { %v2812_v34 = vmax.f32 %v1980_v28, 0.0  ;;  %v1983_v35 = vadd.f32 %v6462_v3, %v5510_v32  ;;  %v1974_v36 = vpop.f32.mrb[91].mxu0  ;;  %v2952_v45 = vmax.f32 %v2540_v37, 0.0  ;;  %v2543_v46 = vadd.f32 %v6462_v3, %v5650_v42  ;;  %v2534_v47 = vpop.f32.mrb[91].mxu1 }
 0x199   : > { %v2810_v39 = vmax.f32 %v1972_v31, 0.0  ;;  %v1975_v40 = vadd.f32 %v6462_v3, %v1974_v36  ;;  %v2950_v50 = vmax.f32 %v2532_v41, 0.0  ;;  %v2535_v51 = vadd.f32 %v6462_v3, %v2534_v47  ;;  %v6775_v36 = vld [vmem:[%s7034_s2] ss:$0 sm:$0xff] }
 0x19a   : > { %v5089_v43 = vpack.c.bf16 %v2812_v34, %v2812_v34  ;;  %v2813_v44 = vmax.f32 %v1983_v35, 0.0  ;;  %v5229_v54 = vpack.c.bf16 %v2952_v45, %v2952_v45  ;;  %v2953_v55 = vmax.f32 %v2543_v46, 0.0 }
 0x19b   : > { %v5087_v48 = vpack.c.bf16 %v2810_v39, %v2810_v39  ;;  %v2811_v49 = vmax.f32 %v1975_v40, 0.0  ;;  %v5227_v57 = vpack.c.bf16 %v2950_v50, %v2950_v50  ;;  %v2951_v59 = vmax.f32 %v2535_v51, 0.0 }
 0x19c   : > { %4193 = vst.msk [vmem:[%s6140_s27 + $0x168] sm:$0xf] %vm4102_vm3, %v5089_v43  ;;  %v5090_v53 = vpack.c.bf16 %v2813_v44, %v2813_v44  ;;  %4333 = vst.msk [vmem:[%s6140_s27 + $0x398] sm:$0xf] %vm4102_vm3, %v5229_v54  ;;  %v5230_v60 = vpack.c.bf16 %v2953_v55, %v2953_v55 }
 0x19d   : > { %4191 = vst.msk [vmem:[%s6140_s27 + $0x160] sm:$0xf] %vm4102_vm3, %v5087_v48  ;;  %v5088_v56 = vpack.c.bf16 %v2811_v49, %v2811_v49  ;;  %v5513_v58 = vpop.f32.mrb[92].mxu0  ;;  %4331 = vst.msk [vmem:[%s6140_s27 + $0x390] sm:$0xf] %vm4102_vm3, %v5227_v57  ;;  %v5228_v63 = vpack.c.bf16 %v2951_v59, %v2951_v59  ;;  %v5653_v2 = vpop.f32.mrb[92].mxu1 }
 0x19e   : > { %4194 = vst.msk [vmem:[%s6140_s27 + $0x16c] sm:$0xf] %vm4102_vm3, %v5090_v53  ;;  %v1996_v61 = vadd.f32 %v6462_v3, %v5513_v58  ;;  %v1987_v62 = vpop.f32.mrb[93].mxu0  ;;  %4334 = vst.msk [vmem:[%s6140_s27 + $0x39c] sm:$0xf] %vm4102_vm3, %v5230_v60  ;;  %v2556_v7 = vadd.f32 %v6462_v3, %v5653_v2  ;;  %v2547_v8 = vpop.f32.mrb[93].mxu1 }
 0x19f   : > { %4192 = vst.msk [vmem:[%s6140_s27 + $0x164] sm:$0xf] %vm4102_vm3, %v5088_v56  ;;  %v1988_v0 = vadd.f32 %v6462_v3, %v1987_v62  ;;  %v5514_v1 = vpop.f32.mrb[94].mxu0  ;;  %4332 = vst.msk [vmem:[%s6140_s27 + $0x394] sm:$0xf] %vm4102_vm3, %v5228_v63  ;;  %v2548_v10 = vadd.f32 %v6462_v3, %v2547_v8  ;;  %v5654_v11 = vpop.f32.mrb[94].mxu1 }
 0x1a0   : > { %v2816_v4 = vmax.f32 %v1996_v61, 0.0  ;;  %v1999_v5 = vadd.f32 %v6462_v3, %v5514_v1  ;;  %v1990_v6 = vpop.f32.mrb[95].mxu0  ;;  %v2956_v14 = vmax.f32 %v2556_v7, 0.0  ;;  %v2559_v15 = vadd.f32 %v6462_v3, %v5654_v11  ;;  %v2550_v16 = vpop.f32.mrb[95].mxu1 }
 0x1a1   : > { %v2814_v9 = vmax.f32 %v1988_v0, 0.0  ;;  %v1991_v52 = vadd.f32 %v6462_v3, %v1990_v6  ;;  %v2954_v19 = vmax.f32 %v2548_v10, 0.0  ;;  %v2551_v20 = vadd.f32 %v6462_v3, %v2550_v16 }
 0x1a2   : > { %v5093_v12 = vpack.c.bf16 %v2816_v4, %v2816_v4  ;;  %v2817_v13 = vmax.f32 %v1999_v5, 0.0  ;;  %v5233_v22 = vpack.c.bf16 %v2956_v14, %v2956_v14  ;;  %v2957_v23 = vmax.f32 %v2559_v15, 0.0 }
 0x1a3   : > { %v5091_v17 = vpack.c.bf16 %v2814_v9, %v2814_v9  ;;  %v2815_v18 = vmax.f32 %v1991_v52, 0.0  ;;  %v5231_v25 = vpack.c.bf16 %v2954_v19, %v2954_v19  ;;  %v2955_v27 = vmax.f32 %v2551_v20, 0.0 }
 0x1a4   : > { %4197 = vst.msk [vmem:[%s6140_s27 + $0x178] sm:$0xf] %vm4102_vm3, %v5093_v12  ;;  %v5094_v21 = vpack.c.bf16 %v2817_v13, %v2817_v13  ;;  %4337 = vst.msk [vmem:[%s6140_s27 + $0x3a8] sm:$0xf] %vm4102_vm3, %v5233_v22  ;;  %v5234_v28 = vpack.c.bf16 %v2957_v23, %v2957_v23 }
 0x1a5   : > { %4195 = vst.msk [vmem:[%s6140_s27 + $0x170] sm:$0xf] %vm4102_vm3, %v5091_v17  ;;  %v5092_v24 = vpack.c.bf16 %v2815_v18, %v2815_v18  ;;  %v5517_v26 = vpop.f32.mrb[96].mxu0  ;;  %4335 = vst.msk [vmem:[%s6140_s27 + $0x3a0] sm:$0xf] %vm4102_vm3, %v5231_v25  ;;  %v5232_v31 = vpack.c.bf16 %v2955_v27, %v2955_v27  ;;  %v5657_v34 = vpop.f32.mrb[96].mxu1 }
 0x1a6   : > { %4198 = vst.msk [vmem:[%s6140_s27 + $0x17c] sm:$0xf] %vm4102_vm3, %v5094_v21  ;;  %v2012_v29 = vadd.f32 %v6462_v3, %v5517_v26  ;;  %v2003_v30 = vpop.f32.mrb[97].mxu0  ;;  %4338 = vst.msk [vmem:[%s6140_s27 + $0x3ac] sm:$0xf] %vm4102_vm3, %v5234_v28  ;;  %v2572_v39 = vadd.f32 %v6775_v36, %v5657_v34  ;;  %v2563_v40 = vpop.f32.mrb[97].mxu1 }
 0x1a7   : > { %4196 = vst.msk [vmem:[%s6140_s27 + $0x174] sm:$0xf] %vm4102_vm3, %v5092_v24  ;;  %v2004_v32 = vadd.f32 %v6462_v3, %v2003_v30  ;;  %v5518_v33 = vpop.f32.mrb[98].mxu0  ;;  %4336 = vst.msk [vmem:[%s6140_s27 + $0x3a4] sm:$0xf] %vm4102_vm3, %v5232_v31  ;;  %v2564_v42 = vadd.f32 %v6775_v36, %v2563_v40  ;;  %v5658_v43 = vpop.f32.mrb[98].mxu1 }
 0x1a8   : > { %v2820_v35 = vmax.f32 %v2012_v29, 0.0  ;;  %v2015_v37 = vadd.f32 %v6775_v36, %v5518_v33  ;;  %v2006_v38 = vpop.f32.mrb[99].mxu0  ;;  %v2960_v46 = vmax.f32 %v2572_v39, 0.0  ;;  %v2575_v47 = vadd.f32 %v6775_v36, %v5658_v43  ;;  %v2566_v48 = vpop.f32.mrb[99].mxu1 }
 0x1a9   : > { %v2818_v3 = vmax.f32 %v2004_v32, 0.0  ;;  %v2007_v41 = vadd.f32 %v6775_v36, %v2006_v38  ;;  %v2958_v51 = vmax.f32 %v2564_v42, 0.0  ;;  %v2567_v53 = vadd.f32 %v6775_v36, %v2566_v48 }
 0x1aa   : > { %v5097_v44 = vpack.c.bf16 %v2820_v35, %v2820_v35  ;;  %v2821_v45 = vmax.f32 %v2015_v37, 0.0  ;;  %v5237_v55 = vpack.c.bf16 %v2960_v46, %v2960_v46  ;;  %v2961_v56 = vmax.f32 %v2575_v47, 0.0 }
 0x1ab   : > { %v5095_v49 = vpack.c.bf16 %v2818_v3, %v2818_v3  ;;  %v2819_v50 = vmax.f32 %v2007_v41, 0.0  ;;  %v5235_v58 = vpack.c.bf16 %v2958_v51, %v2958_v51  ;;  %v2959_v60 = vmax.f32 %v2567_v53, 0.0 }
 0x1ac   : > { %4201 = vst.msk [vmem:[%s6140_s27 + $0x188] sm:$0xf] %vm4102_vm3, %v5097_v44  ;;  %v5098_v54 = vpack.c.bf16 %v2821_v45, %v2821_v45  ;;  %4341 = vst.msk [vmem:[%s6140_s27 + $0x3b8] sm:$0xf] %vm4102_vm3, %v5237_v55  ;;  %v5238_v61 = vpack.c.bf16 %v2961_v56, %v2961_v56 }
 0x1ad   : > { %4199 = vst.msk [vmem:[%s6140_s27 + $0x180] sm:$0xf] %vm4102_vm3, %v5095_v49  ;;  %v5096_v57 = vpack.c.bf16 %v2819_v50, %v2819_v50  ;;  %v5521_v59 = vpop.f32.mrb[100].mxu0  ;;  %4339 = vst.msk [vmem:[%s6140_s27 + $0x3b0] sm:$0xf] %vm4102_vm3, %v5235_v58  ;;  %v5236_v0 = vpack.c.bf16 %v2959_v60, %v2959_v60  ;;  %v5661_v4 = vpop.f32.mrb[100].mxu1 }
 0x1ae   : > { %4202 = vst.msk [vmem:[%s6140_s27 + $0x18c] sm:$0xf] %vm4102_vm3, %v5098_v54  ;;  %v2028_v62 = vadd.f32 %v6775_v36, %v5521_v59  ;;  %v2019_v63 = vpop.f32.mrb[101].mxu0  ;;  %4342 = vst.msk [vmem:[%s6140_s27 + $0x3bc] sm:$0xf] %vm4102_vm3, %v5238_v61  ;;  %v2588_v8 = vadd.f32 %v6775_v36, %v5661_v4  ;;  %v2579_v9 = vpop.f32.mrb[101].mxu1 }
 0x1af   : > { %4200 = vst.msk [vmem:[%s6140_s27 + $0x184] sm:$0xf] %vm4102_vm3, %v5096_v57  ;;  %v2020_v1 = vadd.f32 %v6775_v36, %v2019_v63  ;;  %v5522_v2 = vpop.f32.mrb[102].mxu0  ;;  %4340 = vst.msk [vmem:[%s6140_s27 + $0x3b4] sm:$0xf] %vm4102_vm3, %v5236_v0  ;;  %v2580_v11 = vadd.f32 %v6775_v36, %v2579_v9  ;;  %v5662_v12 = vpop.f32.mrb[102].mxu1 }
 0x1b0   : > { %v2824_v5 = vmax.f32 %v2028_v62, 0.0  ;;  %v2031_v6 = vadd.f32 %v6775_v36, %v5522_v2  ;;  %v2022_v7 = vpop.f32.mrb[103].mxu0  ;;  %v2964_v15 = vmax.f32 %v2588_v8, 0.0  ;;  %v2591_v16 = vadd.f32 %v6775_v36, %v5662_v12  ;;  %v2582_v17 = vpop.f32.mrb[103].mxu1 }
 0x1b1   : > { %v2822_v52 = vmax.f32 %v2020_v1, 0.0  ;;  %v2023_v10 = vadd.f32 %v6775_v36, %v2022_v7  ;;  %v2962_v20 = vmax.f32 %v2580_v11, 0.0  ;;  %v2583_v21 = vadd.f32 %v6775_v36, %v2582_v17 }
 0x1b2   : > { %v5101_v13 = vpack.c.bf16 %v2824_v5, %v2824_v5  ;;  %v2825_v14 = vmax.f32 %v2031_v6, 0.0  ;;  %v5241_v23 = vpack.c.bf16 %v2964_v15, %v2964_v15  ;;  %v2965_v24 = vmax.f32 %v2591_v16, 0.0 }
 0x1b3   : > { %v5099_v18 = vpack.c.bf16 %v2822_v52, %v2822_v52  ;;  %v2823_v19 = vmax.f32 %v2023_v10, 0.0  ;;  %v5239_v26 = vpack.c.bf16 %v2962_v20, %v2962_v20  ;;  %v2963_v28 = vmax.f32 %v2583_v21, 0.0 }
 0x1b4   : > { %4205 = vst.msk [vmem:[%s6140_s27 + $0x198] sm:$0xf] %vm4102_vm3, %v5101_v13  ;;  %v5102_v22 = vpack.c.bf16 %v2825_v14, %v2825_v14  ;;  %4345 = vst.msk [vmem:[%s6140_s27 + $0x3c8] sm:$0xf] %vm4102_vm3, %v5241_v23  ;;  %v5242_v29 = vpack.c.bf16 %v2965_v24, %v2965_v24 }
 0x1b5   : > { %4203 = vst.msk [vmem:[%s6140_s27 + $0x190] sm:$0xf] %vm4102_vm3, %v5099_v18  ;;  %v5100_v25 = vpack.c.bf16 %v2823_v19, %v2823_v19  ;;  %v5525_v27 = vpop.f32.mrb[104].mxu0  ;;  %4343 = vst.msk [vmem:[%s6140_s27 + $0x3c0] sm:$0xf] %vm4102_vm3, %v5239_v26  ;;  %v5240_v32 = vpack.c.bf16 %v2963_v28, %v2963_v28  ;;  %v5665_v35 = vpop.f32.mrb[104].mxu1 }
 0x1b6   : > { %4206 = vst.msk [vmem:[%s6140_s27 + $0x19c] sm:$0xf] %vm4102_vm3, %v5102_v22  ;;  %v2044_v30 = vadd.f32 %v6775_v36, %v5525_v27  ;;  %v2035_v31 = vpop.f32.mrb[105].mxu0  ;;  %4346 = vst.msk [vmem:[%s6140_s27 + $0x3cc] sm:$0xf] %vm4102_vm3, %v5242_v29  ;;  %v2604_v40 = vadd.f32 %v6775_v36, %v5665_v35  ;;  %v2595_v3 = vpop.f32.mrb[105].mxu1 }
 0x1b7   : > { %4204 = vst.msk [vmem:[%s6140_s27 + $0x194] sm:$0xf] %vm4102_vm3, %v5100_v25  ;;  %v2036_v33 = vadd.f32 %v6775_v36, %v2035_v31  ;;  %v5526_v34 = vpop.f32.mrb[106].mxu0  ;;  %4344 = vst.msk [vmem:[%s6140_s27 + $0x3c4] sm:$0xf] %vm4102_vm3, %v5240_v32  ;;  %v2596_v43 = vadd.f32 %v6775_v36, %v2595_v3  ;;  %v5666_v44 = vpop.f32.mrb[106].mxu1 }
 0x1b8   : > { %v2828_v37 = vmax.f32 %v2044_v30, 0.0  ;;  %v2047_v38 = vadd.f32 %v6775_v36, %v5526_v34  ;;  %v2038_v39 = vpop.f32.mrb[107].mxu0  ;;  %v2968_v47 = vmax.f32 %v2604_v40, 0.0  ;;  %v2607_v48 = vadd.f32 %v6775_v36, %v5666_v44  ;;  %v2598_v49 = vpop.f32.mrb[107].mxu1 }
 0x1b9   : > { %v2826_v41 = vmax.f32 %v2036_v33, 0.0  ;;  %v2039_v42 = vadd.f32 %v6775_v36, %v2038_v39  ;;  %v2966_v53 = vmax.f32 %v2596_v43, 0.0  ;;  %v2599_v54 = vadd.f32 %v6775_v36, %v2598_v49 }
 0x1ba   : > { %v5105_v45 = vpack.c.bf16 %v2828_v37, %v2828_v37  ;;  %v2829_v46 = vmax.f32 %v2047_v38, 0.0  ;;  %v5245_v56 = vpack.c.bf16 %v2968_v47, %v2968_v47  ;;  %v2969_v57 = vmax.f32 %v2607_v48, 0.0 }
 0x1bb   : > { %v5103_v50 = vpack.c.bf16 %v2826_v41, %v2826_v41  ;;  %v2827_v51 = vmax.f32 %v2039_v42, 0.0  ;;  %v5243_v59 = vpack.c.bf16 %v2966_v53, %v2966_v53  ;;  %v2967_v61 = vmax.f32 %v2599_v54, 0.0 }
 0x1bc   : > { %4209 = vst.msk [vmem:[%s6140_s27 + $0x1a8] sm:$0xf] %vm4102_vm3, %v5105_v45  ;;  %v5106_v55 = vpack.c.bf16 %v2829_v46, %v2829_v46  ;;  %4349 = vst.msk [vmem:[%s6140_s27 + $0x3d8] sm:$0xf] %vm4102_vm3, %v5245_v56  ;;  %v5246_v62 = vpack.c.bf16 %v2969_v57, %v2969_v57 }
 0x1bd   : > { %4207 = vst.msk [vmem:[%s6140_s27 + $0x1a0] sm:$0xf] %vm4102_vm3, %v5103_v50  ;;  %v5104_v58 = vpack.c.bf16 %v2827_v51, %v2827_v51  ;;  %v5529_v60 = vpop.f32.mrb[108].mxu0  ;;  %4347 = vst.msk [vmem:[%s6140_s27 + $0x3d0] sm:$0xf] %vm4102_vm3, %v5243_v59  ;;  %v5244_v1 = vpack.c.bf16 %v2967_v61, %v2967_v61  ;;  %v5669_v5 = vpop.f32.mrb[108].mxu1 }
 0x1be   : > { %4210 = vst.msk [vmem:[%s6140_s27 + $0x1ac] sm:$0xf] %vm4102_vm3, %v5106_v55  ;;  %v2060_v63 = vadd.f32 %v6775_v36, %v5529_v60  ;;  %v2051_v0 = vpop.f32.mrb[109].mxu0  ;;  %4350 = vst.msk [vmem:[%s6140_s27 + $0x3dc] sm:$0xf] %vm4102_vm3, %v5246_v62  ;;  %v2620_v9 = vadd.f32 %v6775_v36, %v5669_v5  ;;  %v2611_v52 = vpop.f32.mrb[109].mxu1 }
 0x1bf   : > { %4208 = vst.msk [vmem:[%s6140_s27 + $0x1a4] sm:$0xf] %vm4102_vm3, %v5104_v58  ;;  %v2052_v2 = vadd.f32 %v6775_v36, %v2051_v0  ;;  %v5530_v4 = vpop.f32.mrb[110].mxu0  ;;  %4348 = vst.msk [vmem:[%s6140_s27 + $0x3d4] sm:$0xf] %vm4102_vm3, %v5244_v1  ;;  %v2612_v12 = vadd.f32 %v6775_v36, %v2611_v52  ;;  %v5670_v13 = vpop.f32.mrb[110].mxu1 }
 0x1c0   : > { %v2832_v6 = vmax.f32 %v2060_v63, 0.0  ;;  %v2063_v7 = vadd.f32 %v6775_v36, %v5530_v4  ;;  %v2054_v8 = vpop.f32.mrb[111].mxu0  ;;  %v2972_v16 = vmax.f32 %v2620_v9, 0.0  ;;  %v2623_v17 = vadd.f32 %v6775_v36, %v5670_v13  ;;  %v2614_v18 = vpop.f32.mrb[111].mxu1 }
 0x1c1   : > { %v2830_v10 = vmax.f32 %v2052_v2, 0.0  ;;  %v2055_v11 = vadd.f32 %v6775_v36, %v2054_v8  ;;  %v2970_v21 = vmax.f32 %v2612_v12, 0.0  ;;  %v2615_v22 = vadd.f32 %v6775_v36, %v2614_v18 }
 0x1c2   : > { %v5109_v14 = vpack.c.bf16 %v2832_v6, %v2832_v6  ;;  %v2833_v15 = vmax.f32 %v2063_v7, 0.0  ;;  %v5249_v24 = vpack.c.bf16 %v2972_v16, %v2972_v16  ;;  %v2973_v25 = vmax.f32 %v2623_v17, 0.0 }
 0x1c3   : > { %v5107_v19 = vpack.c.bf16 %v2830_v10, %v2830_v10  ;;  %v2831_v20 = vmax.f32 %v2055_v11, 0.0  ;;  %v5247_v27 = vpack.c.bf16 %v2970_v21, %v2970_v21  ;;  %v2971_v29 = vmax.f32 %v2615_v22, 0.0 }
 0x1c4   : > { %4213 = vst.msk [vmem:[%s6140_s27 + $0x1b8] sm:$0xf] %vm4102_vm3, %v5109_v14  ;;  %v5110_v23 = vpack.c.bf16 %v2833_v15, %v2833_v15  ;;  %4353 = vst.msk [vmem:[%s6140_s27 + $0x3e8] sm:$0xf] %vm4102_vm3, %v5249_v24  ;;  %v5250_v30 = vpack.c.bf16 %v2973_v25, %v2973_v25 }
 0x1c5   : > { %4211 = vst.msk [vmem:[%s6140_s27 + $0x1b0] sm:$0xf] %vm4102_vm3, %v5107_v19  ;;  %v5108_v26 = vpack.c.bf16 %v2831_v20, %v2831_v20  ;;  %v5533_v28 = vpop.f32.mrb[112].mxu0  ;;  %4351 = vst.msk [vmem:[%s6140_s27 + $0x3e0] sm:$0xf] %vm4102_vm3, %v5247_v27  ;;  %v5248_v33 = vpack.c.bf16 %v2971_v29, %v2971_v29  ;;  %v5673_v37 = vpop.f32.mrb[112].mxu1 }
 0x1c6   : > { %4214 = vst.msk [vmem:[%s6140_s27 + $0x1bc] sm:$0xf] %vm4102_vm3, %v5110_v23  ;;  %v2076_v31 = vadd.f32 %v6775_v36, %v5533_v28  ;;  %v2067_v32 = vpop.f32.mrb[113].mxu0  ;;  %4354 = vst.msk [vmem:[%s6140_s27 + $0x3ec] sm:$0xf] %vm4102_vm3, %v5250_v30  ;;  %v2636_v3 = vadd.f32 %v6775_v36, %v5673_v37  ;;  %v2627_v41 = vpop.f32.mrb[113].mxu1 }
 0x1c7   : > { %4212 = vst.msk [vmem:[%s6140_s27 + $0x1b4] sm:$0xf] %vm4102_vm3, %v5108_v26  ;;  %v2068_v34 = vadd.f32 %v6775_v36, %v2067_v32  ;;  %v5534_v35 = vpop.f32.mrb[114].mxu0  ;;  %4352 = vst.msk [vmem:[%s6140_s27 + $0x3e4] sm:$0xf] %vm4102_vm3, %v5248_v33  ;;  %v2628_v44 = vadd.f32 %v6775_v36, %v2627_v41  ;;  %v5674_v45 = vpop.f32.mrb[114].mxu1 }
 0x1c8   : > { %v2836_v38 = vmax.f32 %v2076_v31, 0.0  ;;  %v2079_v39 = vadd.f32 %v6775_v36, %v5534_v35  ;;  %v2070_v40 = vpop.f32.mrb[115].mxu0  ;;  %v2976_v48 = vmax.f32 %v2636_v3, 0.0  ;;  %v2639_v49 = vadd.f32 %v6775_v36, %v5674_v45  ;;  %v2630_v50 = vpop.f32.mrb[115].mxu1 }
 0x1c9   : > { %v2834_v42 = vmax.f32 %v2068_v34, 0.0  ;;  %v2071_v43 = vadd.f32 %v6775_v36, %v2070_v40  ;;  %v2974_v54 = vmax.f32 %v2628_v44, 0.0  ;;  %v2631_v55 = vadd.f32 %v6775_v36, %v2630_v50 }
 0x1ca   : > { %v5113_v46 = vpack.c.bf16 %v2836_v38, %v2836_v38  ;;  %v2837_v47 = vmax.f32 %v2079_v39, 0.0  ;;  %v5253_v57 = vpack.c.bf16 %v2976_v48, %v2976_v48  ;;  %v2977_v58 = vmax.f32 %v2639_v49, 0.0 }
 0x1cb   : > { %v5111_v51 = vpack.c.bf16 %v2834_v42, %v2834_v42  ;;  %v2835_v53 = vmax.f32 %v2071_v43, 0.0  ;;  %v5251_v60 = vpack.c.bf16 %v2974_v54, %v2974_v54  ;;  %v2975_v62 = vmax.f32 %v2631_v55, 0.0 }
 0x1cc   : > { %4217 = vst.msk [vmem:[%s6140_s27 + $0x1c8] sm:$0xf] %vm4102_vm3, %v5113_v46  ;;  %v5114_v56 = vpack.c.bf16 %v2837_v47, %v2837_v47  ;;  %4357 = vst.msk [vmem:[%s6140_s27 + $0x3f8] sm:$0xf] %vm4102_vm3, %v5253_v57  ;;  %v5254_v63 = vpack.c.bf16 %v2977_v58, %v2977_v58 }
 0x1cd   : > { %4215 = vst.msk [vmem:[%s6140_s27 + $0x1c0] sm:$0xf] %vm4102_vm3, %v5111_v51  ;;  %v5112_v59 = vpack.c.bf16 %v2835_v53, %v2835_v53  ;;  %v5537_v61 = vpop.f32.mrb[116].mxu0  ;;  %4355 = vst.msk [vmem:[%s6140_s27 + $0x3f0] sm:$0xf] %vm4102_vm3, %v5251_v60  ;;  %v5252_v2 = vpack.c.bf16 %v2975_v62, %v2975_v62  ;;  %v5677_v6 = vpop.f32.mrb[116].mxu1 }
 0x1ce   : > { %4218 = vst.msk [vmem:[%s6140_s27 + $0x1cc] sm:$0xf] %vm4102_vm3, %v5114_v56  ;;  %v2092_v0 = vadd.f32 %v6775_v36, %v5537_v61  ;;  %v2083_v1 = vpop.f32.mrb[117].mxu0  ;;  %4358 = vst.msk [vmem:[%s6140_s27 + $0x3fc] sm:$0xf] %vm4102_vm3, %v5254_v63  ;;  %v2652_v52 = vadd.f32 %v6775_v36, %v5677_v6  ;;  %v2643_v10 = vpop.f32.mrb[117].mxu1 }
 0x1cf   : > { %4216 = vst.msk [vmem:[%s6140_s27 + $0x1c4] sm:$0xf] %vm4102_vm3, %v5112_v59  ;;  %v2084_v4 = vadd.f32 %v6775_v36, %v2083_v1  ;;  %v5538_v5 = vpop.f32.mrb[118].mxu0  ;;  %4356 = vst.msk [vmem:[%s6140_s27 + $0x3f4] sm:$0xf] %vm4102_vm3, %v5252_v2  ;;  %v2644_v13 = vadd.f32 %v6775_v36, %v2643_v10  ;;  %v5678_v14 = vpop.f32.mrb[118].mxu1 }
 0x1d0   : > { %v2840_v7 = vmax.f32 %v2092_v0, 0.0  ;;  %v2095_v8 = vadd.f32 %v6775_v36, %v5538_v5  ;;  %v2086_v9 = vpop.f32.mrb[119].mxu0  ;;  %v2980_v17 = vmax.f32 %v2652_v52, 0.0  ;;  %v2655_v18 = vadd.f32 %v6775_v36, %v5678_v14  ;;  %v2646_v19 = vpop.f32.mrb[119].mxu1 }
 0x1d1   : > { %v2838_v11 = vmax.f32 %v2084_v4, 0.0  ;;  %v2087_v12 = vadd.f32 %v6775_v36, %v2086_v9  ;;  %v2978_v22 = vmax.f32 %v2644_v13, 0.0  ;;  %v2647_v23 = vadd.f32 %v6775_v36, %v2646_v19 }
 0x1d2   : > { %v5117_v15 = vpack.c.bf16 %v2840_v7, %v2840_v7  ;;  %v2841_v16 = vmax.f32 %v2095_v8, 0.0  ;;  %v5257_v25 = vpack.c.bf16 %v2980_v17, %v2980_v17  ;;  %v2981_v26 = vmax.f32 %v2655_v18, 0.0 }
 0x1d3   : > { %v5115_v20 = vpack.c.bf16 %v2838_v11, %v2838_v11  ;;  %v2839_v21 = vmax.f32 %v2087_v12, 0.0  ;;  %v5255_v28 = vpack.c.bf16 %v2978_v22, %v2978_v22  ;;  %v2979_v30 = vmax.f32 %v2647_v23, 0.0 }
 0x1d4   : > { %4221 = vst.msk [vmem:[%s6140_s27 + $0x1d8] sm:$0xf] %vm4102_vm3, %v5117_v15  ;;  %v5118_v24 = vpack.c.bf16 %v2841_v16, %v2841_v16  ;;  %4361 = vst.msk [vmem:[%s6140_s27 + $0x408] sm:$0xf] %vm4102_vm3, %v5257_v25  ;;  %v5258_v31 = vpack.c.bf16 %v2981_v26, %v2981_v26 }
 0x1d5   : > { %4219 = vst.msk [vmem:[%s6140_s27 + $0x1d0] sm:$0xf] %vm4102_vm3, %v5115_v20  ;;  %v5116_v27 = vpack.c.bf16 %v2839_v21, %v2839_v21  ;;  %v5541_v29 = vpop.f32.mrb[120].mxu0  ;;  %4359 = vst.msk [vmem:[%s6140_s27 + $0x400] sm:$0xf] %vm4102_vm3, %v5255_v28  ;;  %v5256_v34 = vpack.c.bf16 %v2979_v30, %v2979_v30  ;;  %v5681_v38 = vpop.f32.mrb[120].mxu1 }
 0x1d6   : > { %4222 = vst.msk [vmem:[%s6140_s27 + $0x1dc] sm:$0xf] %vm4102_vm3, %v5118_v24  ;;  %v2108_v32 = vadd.f32 %v6775_v36, %v5541_v29  ;;  %v2099_v33 = vpop.f32.mrb[121].mxu0  ;;  %4362 = vst.msk [vmem:[%s6140_s27 + $0x40c] sm:$0xf] %vm4102_vm3, %v5258_v31  ;;  %v2668_v41 = vadd.f32 %v6775_v36, %v5681_v38  ;;  %v2659_v42 = vpop.f32.mrb[121].mxu1 }
 0x1d7   : > { %4220 = vst.msk [vmem:[%s6140_s27 + $0x1d4] sm:$0xf] %vm4102_vm3, %v5116_v27  ;;  %v2100_v35 = vadd.f32 %v6775_v36, %v2099_v33  ;;  %v5542_v37 = vpop.f32.mrb[122].mxu0  ;;  %4360 = vst.msk [vmem:[%s6140_s27 + $0x404] sm:$0xf] %vm4102_vm3, %v5256_v34  ;;  %v2660_v45 = vadd.f32 %v6775_v36, %v2659_v42  ;;  %v5682_v46 = vpop.f32.mrb[122].mxu1 }
 0x1d8   : > { %v2844_v39 = vmax.f32 %v2108_v32, 0.0  ;;  %v2111_v40 = vadd.f32 %v6775_v36, %v5542_v37  ;;  %v2102_v3 = vpop.f32.mrb[123].mxu0  ;;  %v2984_v49 = vmax.f32 %v2668_v41, 0.0  ;;  %v2671_v50 = vadd.f32 %v6775_v36, %v5682_v46  ;;  %v2662_v51 = vpop.f32.mrb[123].mxu1 }
 0x1d9   : > { %v2842_v43 = vmax.f32 %v2100_v35, 0.0  ;;  %v2103_v44 = vadd.f32 %v6775_v36, %v2102_v3  ;;  %v2982_v55 = vmax.f32 %v2660_v45, 0.0  ;;  %v2663_v56 = vadd.f32 %v6775_v36, %v2662_v51 }
 0x1da   : > { %v5121_v47 = vpack.c.bf16 %v2844_v39, %v2844_v39  ;;  %v2845_v48 = vmax.f32 %v2111_v40, 0.0  ;;  %v5261_v58 = vpack.c.bf16 %v2984_v49, %v2984_v49  ;;  %v2985_v59 = vmax.f32 %v2671_v50, 0.0 }
 0x1db   : > { %v5119_v53 = vpack.c.bf16 %v2842_v43, %v2842_v43  ;;  %v2843_v54 = vmax.f32 %v2103_v44, 0.0  ;;  %v5259_v61 = vpack.c.bf16 %v2982_v55, %v2982_v55  ;;  %v2983_v63 = vmax.f32 %v2663_v56, 0.0 }
 0x1dc   : > { %4225 = vst.msk [vmem:[%s6140_s27 + $0x1e8] sm:$0xf] %vm4102_vm3, %v5121_v47  ;;  %v5122_v57 = vpack.c.bf16 %v2845_v48, %v2845_v48  ;;  %4365 = vst.msk [vmem:[%s6140_s27 + $0x418] sm:$0xf] %vm4102_vm3, %v5261_v58  ;;  %v5262_v0 = vpack.c.bf16 %v2985_v59, %v2985_v59 }
 0x1dd   : > { %4223 = vst.msk [vmem:[%s6140_s27 + $0x1e0] sm:$0xf] %vm4102_vm3, %v5119_v53  ;;  %v5120_v60 = vpack.c.bf16 %v2843_v54, %v2843_v54  ;;  %v5545_v62 = vpop.f32.mrb[124].mxu0  ;;  %4363 = vst.msk [vmem:[%s6140_s27 + $0x410] sm:$0xf] %vm4102_vm3, %v5259_v61  ;;  %v5260_v4 = vpack.c.bf16 %v2983_v63, %v2983_v63  ;;  %v5685_v7 = vpop.f32.mrb[124].mxu1 }
 0x1de   : > { %4226 = vst.msk [vmem:[%s6140_s27 + $0x1ec] sm:$0xf] %vm4102_vm3, %v5122_v57  ;;  %v2124_v1 = vadd.f32 %v6775_v36, %v5545_v62  ;;  %v2115_v2 = vpop.f32.mrb[125].mxu0  ;;  %4366 = vst.msk [vmem:[%s6140_s27 + $0x41c] sm:$0xf] %vm4102_vm3, %v5262_v0  ;;  %v2684_v10 = vadd.f32 %v6775_v36, %v5685_v7  ;;  %v2675_v11 = vpop.f32.mrb[125].mxu1 }
 0x1df   : > { %4224 = vst.msk [vmem:[%s6140_s27 + $0x1e4] sm:$0xf] %vm4102_vm3, %v5120_v60  ;;  %v2116_v5 = vadd.f32 %v6775_v36, %v2115_v2  ;;  %v5546_v6 = vpop.f32.mrb[126].mxu0  ;;  %4364 = vst.msk [vmem:[%s6140_s27 + $0x414] sm:$0xf] %vm4102_vm3, %v5260_v4  ;;  %v2676_v14 = vadd.f32 %v6775_v36, %v2675_v11  ;;  %v5686_v15 = vpop.f32.mrb[126].mxu1 }
 0x1e0   : > { %v2848_v8 = vmax.f32 %v2124_v1, 0.0  ;;  %v2127_v9 = vadd.f32 %v6775_v36, %v5546_v6  ;;  %v2118_v52 = vpop.f32.mrb[127].mxu0  ;;  %v2988_v18 = vmax.f32 %v2684_v10, 0.0  ;;  %v2687_v19 = vadd.f32 %v6775_v36, %v5686_v15  ;;  %v2678_v20 = vpop.f32.mrb[127].mxu1 }
 0x1e1   : > { %v2846_v12 = vmax.f32 %v2116_v5, 0.0  ;;  %v2119_v13 = vadd.f32 %v6775_v36, %v2118_v52  ;;  %v2986_v23 = vmax.f32 %v2676_v14, 0.0  ;;  %v2679_v24 = vadd.f32 %v6775_v36, %v2678_v20 }
 0x1e2   : > { %v5125_v16 = vpack.c.bf16 %v2848_v8, %v2848_v8  ;;  %v2849_v17 = vmax.f32 %v2127_v9, 0.0  ;;  %v5265_v26 = vpack.c.bf16 %v2988_v18, %v2988_v18  ;;  %v2989_v27 = vmax.f32 %v2687_v19, 0.0 }
 0x1e3   : > { %v5123_v21 = vpack.c.bf16 %v2846_v12, %v2846_v12  ;;  %v2847_v22 = vmax.f32 %v2119_v13, 0.0  ;;  %v5263_v29 = vpack.c.bf16 %v2986_v23, %v2986_v23  ;;  %v2987_v31 = vmax.f32 %v2679_v24, 0.0 }
 0x1e4   : > { %4229 = vst.msk [vmem:[%s6140_s27 + $0x1f8] sm:$0xf] %vm4102_vm3, %v5125_v16  ;;  %v5126_v25 = vpack.c.bf16 %v2849_v17, %v2849_v17  ;;  %4369 = vst.msk [vmem:[%s6140_s27 + $0x428] sm:$0xf] %vm4102_vm3, %v5265_v26  ;;  %v5266_v32 = vpack.c.bf16 %v2989_v27, %v2989_v27 }
 0x1e5   : > { %4227 = vst.msk [vmem:[%s6140_s27 + $0x1f0] sm:$0xf] %vm4102_vm3, %v5123_v21  ;;  %v5124_v28 = vpack.c.bf16 %v2847_v22, %v2847_v22  ;;  %v5549_v30 = vpop.f32.mrb[128].mxu0  ;;  %4367 = vst.msk [vmem:[%s6140_s27 + $0x420] sm:$0xf] %vm4102_vm3, %v5263_v29  ;;  %v5264_v35 = vpack.c.bf16 %v2987_v31, %v2987_v31  ;;  %v5689_v39 = vpop.f32.mrb[128].mxu1 }
 0x1e6   : > { %4230 = vst.msk [vmem:[%s6140_s27 + $0x1fc] sm:$0xf] %vm4102_vm3, %v5126_v25  ;;  %v2140_v33 = vadd.f32 %v6775_v36, %v5549_v30  ;;  %v2131_v34 = vpop.f32.mrb[129].mxu0  ;;  %4370 = vst.msk [vmem:[%s6140_s27 + $0x42c] sm:$0xf] %vm4102_vm3, %v5266_v32  ;;  %v2700_v42 = vadd.f32 %v6775_v36, %v5689_v39  ;;  %v2691_v43 = vpop.f32.mrb[129].mxu1 }
 0x1e7   : > { %4228 = vst.msk [vmem:[%s6140_s27 + $0x1f4] sm:$0xf] %vm4102_vm3, %v5124_v28  ;;  %v2132_v37 = vadd.f32 %v6775_v36, %v2131_v34  ;;  %v5550_v38 = vpop.f32.mrb[130].mxu0  ;;  %4368 = vst.msk [vmem:[%s6140_s27 + $0x424] sm:$0xf] %vm4102_vm3, %v5264_v35  ;;  %v2692_v46 = vadd.f32 %v6775_v36, %v2691_v43  ;;  %v5690_v47 = vpop.f32.mrb[130].mxu1 }
 0x1e8   : > { %v2852_v40 = vmax.f32 %v2140_v33, 0.0  ;;  %v2143_v3 = vadd.f32 %v6775_v36, %v5550_v38  ;;  %v2134_v41 = vpop.f32.mrb[131].mxu0  ;;  %v2992_v50 = vmax.f32 %v2700_v42, 0.0  ;;  %v2703_v51 = vadd.f32 %v6775_v36, %v5690_v47  ;;  %v2694_v53 = vpop.f32.mrb[131].mxu1 }
 0x1e9   : > { %v2850_v44 = vmax.f32 %v2132_v37, 0.0  ;;  %v2135_v45 = vadd.f32 %v6775_v36, %v2134_v41  ;;  %v2990_v56 = vmax.f32 %v2692_v46, 0.0  ;;  %v2695_v57 = vadd.f32 %v6775_v36, %v2694_v53 }
 0x1ea   : > { %v5129_v48 = vpack.c.bf16 %v2852_v40, %v2852_v40  ;;  %v2853_v49 = vmax.f32 %v2143_v3, 0.0  ;;  %v5269_v59 = vpack.c.bf16 %v2992_v50, %v2992_v50  ;;  %v2993_v60 = vmax.f32 %v2703_v51, 0.0 }
 0x1eb   : > { %v5127_v54 = vpack.c.bf16 %v2850_v44, %v2850_v44  ;;  %v2851_v55 = vmax.f32 %v2135_v45, 0.0  ;;  %v5267_v62 = vpack.c.bf16 %v2990_v56, %v2990_v56  ;;  %v2991_v0 = vmax.f32 %v2695_v57, 0.0 }
 0x1ec   : > { %4233 = vst.msk [vmem:[%s6140_s27 + $0x208] sm:$0xf] %vm4102_vm3, %v5129_v48  ;;  %v5130_v58 = vpack.c.bf16 %v2853_v49, %v2853_v49  ;;  %4373 = vst.msk [vmem:[%s6140_s27 + $0x438] sm:$0xf] %vm4102_vm3, %v5269_v59  ;;  %v5270_v1 = vpack.c.bf16 %v2993_v60, %v2993_v60 }
 0x1ed   : > { %4231 = vst.msk [vmem:[%s6140_s27 + $0x200] sm:$0xf] %vm4102_vm3, %v5127_v54  ;;  %v5128_v61 = vpack.c.bf16 %v2851_v55, %v2851_v55  ;;  %v5553_v63 = vpop.f32.mrb[132].mxu0  ;;  %4371 = vst.msk [vmem:[%s6140_s27 + $0x430] sm:$0xf] %vm4102_vm3, %v5267_v62  ;;  %v5268_v5 = vpack.c.bf16 %v2991_v0, %v2991_v0  ;;  %v5693_v8 = vpop.f32.mrb[132].mxu1 }
 0x1ee   : > { %4234 = vst.msk [vmem:[%s6140_s27 + $0x20c] sm:$0xf] %vm4102_vm3, %v5130_v58  ;;  %v2156_v2 = vadd.f32 %v6775_v36, %v5553_v63  ;;  %v2147_v4 = vpop.f32.mrb[133].mxu0  ;;  %4374 = vst.msk [vmem:[%s6140_s27 + $0x43c] sm:$0xf] %vm4102_vm3, %v5270_v1  ;;  %v2716_v11 = vadd.f32 %v6775_v36, %v5693_v8  ;;  %v2707_v12 = vpop.f32.mrb[133].mxu1 }
 0x1ef   : > { %4232 = vst.msk [vmem:[%s6140_s27 + $0x204] sm:$0xf] %vm4102_vm3, %v5128_v61  ;;  %v2148_v6 = vadd.f32 %v6775_v36, %v2147_v4  ;;  %v5554_v7 = vpop.f32.mrb[134].mxu0  ;;  %4372 = vst.msk [vmem:[%s6140_s27 + $0x434] sm:$0xf] %vm4102_vm3, %v5268_v5  ;;  %v2708_v15 = vadd.f32 %v6775_v36, %v2707_v12  ;;  %v5694_v16 = vpop.f32.mrb[134].mxu1 }
 0x1f0   : > { %v2856_v9 = vmax.f32 %v2156_v2, 0.0  ;;  %v2159_v52 = vadd.f32 %v6775_v36, %v5554_v7  ;;  %v2150_v10 = vpop.f32.mrb[135].mxu0  ;;  %v2996_v19 = vmax.f32 %v2716_v11, 0.0  ;;  %v2719_v20 = vadd.f32 %v6775_v36, %v5694_v16  ;;  %v2710_v21 = vpop.f32.mrb[135].mxu1 }
 0x1f1   : > { %v2854_v13 = vmax.f32 %v2148_v6, 0.0  ;;  %v2151_v14 = vadd.f32 %v6775_v36, %v2150_v10  ;;  %v2994_v24 = vmax.f32 %v2708_v15, 0.0  ;;  %v2711_v25 = vadd.f32 %v6775_v36, %v2710_v21 }
 0x1f2   : > { %v5133_v17 = vpack.c.bf16 %v2856_v9, %v2856_v9  ;;  %v2857_v18 = vmax.f32 %v2159_v52, 0.0  ;;  %v5273_v27 = vpack.c.bf16 %v2996_v19, %v2996_v19  ;;  %v2997_v28 = vmax.f32 %v2719_v20, 0.0 }
 0x1f3   : > { %v5131_v22 = vpack.c.bf16 %v2854_v13, %v2854_v13  ;;  %v2855_v23 = vmax.f32 %v2151_v14, 0.0  ;;  %v5271_v30 = vpack.c.bf16 %v2994_v24, %v2994_v24  ;;  %v2995_v32 = vmax.f32 %v2711_v25, 0.0 }
 0x1f4   : > { %4237 = vst.msk [vmem:[%s6140_s27 + $0x218] sm:$0xf] %vm4102_vm3, %v5133_v17  ;;  %v5134_v26 = vpack.c.bf16 %v2857_v18, %v2857_v18  ;;  %4377 = vst.msk [vmem:[%s6140_s27 + $0x448] sm:$0xf] %vm4102_vm3, %v5273_v27  ;;  %v5274_v33 = vpack.c.bf16 %v2997_v28, %v2997_v28 }
 0x1f5   : > { %4235 = vst.msk [vmem:[%s6140_s27 + $0x210] sm:$0xf] %vm4102_vm3, %v5131_v22  ;;  %v5132_v29 = vpack.c.bf16 %v2855_v23, %v2855_v23  ;;  %v5557_v31 = vpop.f32.mrb[136].mxu0  ;;  %4375 = vst.msk [vmem:[%s6140_s27 + $0x440] sm:$0xf] %vm4102_vm3, %v5271_v30  ;;  %v5272_v37 = vpack.c.bf16 %v2995_v32, %v2995_v32 }
 0x1f6   : > { %4238 = vst.msk [vmem:[%s6140_s27 + $0x21c] sm:$0xf] %vm4102_vm3, %v5134_v26  ;;  %v2172_v34 = vadd.f32 %v6775_v36, %v5557_v31  ;;  %v2163_v35 = vpop.f32.mrb[137].mxu0  ;;  %4378 = vst.msk [vmem:[%s6140_s27 + $0x44c] sm:$0xf] %vm4102_vm3, %v5274_v33 }
 0x1f7   : > { %4236 = vst.msk [vmem:[%s6140_s27 + $0x214] sm:$0xf] %vm4102_vm3, %v5132_v29  ;;  %v2164_v38 = vadd.f32 %v6775_v36, %v2163_v35  ;;  %v5558_v39 = vpop.f32.mrb[138].mxu0  ;;  %4376 = vst.msk [vmem:[%s6140_s27 + $0x444] sm:$0xf] %vm4102_vm3, %v5272_v37 }
 0x1f8   : > { %v2860_v40 = vmax.f32 %v2172_v34, 0.0  ;;  %v2175_v3 = vadd.f32 %v6775_v36, %v5558_v39  ;;  %v2166_v41 = vpop.f32.mrb[139].mxu0 }
 0x1f9   : > { %v2858_v42 = vmax.f32 %v2164_v38, 0.0  ;;  %v2167_v43 = vadd.f32 %v6775_v36, %v2166_v41 }
 0x1fa   : > { %v5137_v44 = vpack.c.bf16 %v2860_v40, %v2860_v40  ;;  %v2861_v45 = vmax.f32 %v2175_v3, 0.0 }
 0x1fb   : > { %v5135_v46 = vpack.c.bf16 %v2858_v42, %v2858_v42  ;;  %v2859_v47 = vmax.f32 %v2167_v43, 0.0 }
 0x1fc   : > { %4241 = vst.msk [vmem:[%s6140_s27 + $0x228] sm:$0xf] %vm4102_vm3, %v5137_v44  ;;  %v5138_v48 = vpack.c.bf16 %v2861_v45, %v2861_v45 }
 0x1fd   : > { %4239 = vst.msk [vmem:[%s6140_s27 + $0x220] sm:$0xf] %vm4102_vm3, %v5135_v46  ;;  %v5136_v49 = vpack.c.bf16 %v2859_v47, %v2859_v47 }
 0x1fe   : > { %4242 = vst.msk [vmem:[%s6140_s27 + $0x22c] sm:$0xf] %vm4102_vm3, %v5138_v48 }
 0x1ff   : > { %4240 = vst.msk [vmem:[%s6140_s27 + $0x224] sm:$0xf] %vm4102_vm3, %v5136_v49 }
 0x200 PF: > { %s13_s12 = sadd.s32 1, %s5856_s12  }
 0x201   : > { %p10_p4 = scmp.ge.s32.totalorder %s13_s12, 4  }
 0x203   :  { %12 = sbr.rel (!%p10_p4) target bundleno = 1 (0x1), region = 62 }

// kernel: forward.6
= control target key start
LH: loop header
LB: loop body
LE: loop exit
PB: predicated region body
PF: predicated region fallthrough
CT: control target
= control target key end

     0   :  { %s4388_s12 = smov 0   ;;  %s5389_s0 = inlined_call_operand.vmem [shape: bf16[1210,576], index: 0, kind: input, shape index: {}]   ;;  %s5390_s1 = inlined_call_operand.vmem [shape: bf16[576,64], index: 1, kind: input, shape index: {}]   ;;  %s5391_s2 = inlined_call_operand.vmem [shape: f32[1,64], index: 2, kind: input, shape index: {}]   ;;  %s5392_s3 = inlined_call_operand.vmem [shape: bf16[1210,64], index: 3, kind: output, shape index: {}]  }
   0x1 LB: > { %s3290_s13 = sadd.s32 4294967295, %s4365_s12   ;;  %p3294_p0 = scmp.ge.s32.totalorder %s4365_s12, 1  ;;  %s4365_s12 = sphi %s4388_s12, %s13_s12  }
   0x2   : > { %p139_p1 = scmp.lt.s32.totalorder %s4365_s12, 3 }
   0x4   : > { %p140_p2 = pnand %p3294_p0, %p139_p1 }
   0x6   : > { %143 = sbr.rel (%p140_p2) target bundleno = 677 (0x2a5), region = 32 }
   0xd   : > { %v4056_v0 = vld [vmem:[%s5390_s1] sm:$0xff]   ;;  %v4367_v1 = vmov 0   ;;  %s164_s16 = smul.u32 76, %s3290_s13  ;;  %v4057_v2 = vld [vmem:[%s5390_s1 + $0x8] sm:$0xff]   ;;  %v4058_v3 = vld [vmem:[%s5390_s1 + $0x10] sm:$0xff]   ;;  %vm1651_vm0 = vcmask 523264  }
   0xe   : > { %1766 = vmatprep.subr.bf16.mxu0 %v4367_v1  ;;  %3842 = vmatprep.subr.bf16.mxu1 %v4367_v1  ;;  %v4059_v4 = vld [vmem:[%s5390_s1 + $0x18] sm:$0xff]   ;;  %v4060_v5 = vld [vmem:[%s5390_s1 + $0x20] sm:$0xff]   ;;  %v4061_v7 = vld [vmem:[%s5390_s1 + $0x28] sm:$0xff]   ;;  %vm3157_vm1 = vcmask 519168  }
   0xf   : > { %1767 = vmatpush1.bf16.msra.mxu0 %v4056_v0  ;;  %3858 = vmatpush1.bf16.msra.mxu1 %v4056_v0  ;;  %p165_p3 = scmp.lt.s32.totalorder %s164_s16, 151  ;;  %v4062_v9 = vld [vmem:[%s5390_s1 + $0x30] sm:$0xff]   ;;  %v4063_v10 = vld [vmem:[%s5390_s1 + $0x38] sm:$0xff]   ;;  %v4064_v11 = vld [vmem:[%s5390_s1 + $0x40] sm:$0xff]  }
  0x10   : > { %1768 = vmatprep.subr.bf16.mxu0 %v4367_v1  ;;  %3843 = vmatprep.subr.bf16.mxu1 %v4367_v1  ;;  %v4065_v12 = vld [vmem:[%s5390_s1 + $0x48] sm:$0xff]   ;;  %v4066_v13 = vld [vmem:[%s5390_s1 + $0x50] sm:$0xff]   ;;  %v4067_v14 = vld [vmem:[%s5390_s1 + $0x58] sm:$0xff]  }
  0x11   : > { %s5452_s16 = smov (!%p165_p3, %s164_s16), 151  ;;  %v4068_v15 = vld [vmem:[%s5390_s1 + $0x60] sm:$0xff]   ;;  %v4069_v16 = vld [vmem:[%s5390_s1 + $0x68] sm:$0xff]   ;;  %v4070_v17 = vld [vmem:[%s5390_s1 + $0x70] sm:$0xff]  }
  0x12   : > { %s4046_s23 = smul.u32 20, %s5452_s16  ;;  %v4071_v18 = vld [vmem:[%s5390_s1 + $0x78] sm:$0xff]   ;;  %v4086_v19 = vld [vmem:[%s5390_s1 + $0x100] sm:$0xff]   ;;  %v4140_v25 = vld [vmem:[%s5390_s1 + $0x108] sm:$0xff]  }
  0x13   : > { %1769 = vmatpush1.bf16.msra.mxu0 %v4057_v2  ;;  %3859 = vmatpush1.bf16.msra.mxu1 %v4057_v2  ;;  %v4078_v22 = vld [vmem:[%s5390_s1 + $0x80] sm:$0xff]   ;;  %v4079_v26 = vld [vmem:[%s5390_s1 + $0x88] sm:$0xff]   ;;  %v4087_v29 = vld [vmem:[%s5390_s1 + $0x90] sm:$0xff]  }
  0x14   : > { %1770 = vmatprep.subr.bf16.mxu0 %v4367_v1  ;;  %3844 = vmatprep.subr.bf16.mxu1 %v4367_v1  ;;  %s4425_s28 = scalar_lea.vmem %s5389_s0, %s4046_s23  ;;  %v4094_v32 = vld [vmem:[%s5390_s1 + $0x98] sm:$0xff]   ;;  %v4095_v35 = vld [vmem:[%s5390_s1 + $0xa0] sm:$0xff]   ;;  %v4186_v36 = vld [vmem:[%s5390_s1 + $0x110] sm:$0xff]  }
  0x15   : > { %v4074_v6 = vld [vmem:[%s4425_s28 + $0x4] ss:$20 sps:$4 sm:$0xff]   ;;  %v4077_v8 = vld [vmem:[%s4425_s28 + $0x194] ss:$20 sps:$4 sm:$0xff]   ;;  %v4080_v23 = vld [vmem:[%s4425_s28 + $0x2c] ss:$20 sps:$4 sm:$0xff]  }
  0x16   : > { %1798 = vmatprep.mubr.bf16.mxu0 %v4074_v6  ;;  %1878 = vmatprep.mubr.bf16.mxu1 %v4077_v8  ;;  %v4072_v20 = vld [vmem:[%s4425_s28] ss:$20 sps:$4 sm:$0xff]   ;;  %v4075_v21 = vld [vmem:[%s4425_s28 + $0x190] ss:$20 sps:$4 sm:$0xff]   ;;  %v4084_v27 = vld [vmem:[%s4425_s28 + $0x28] ss:$20 sps:$4 sm:$0xff]  }
  0x17   : > { %1771 = vmatpush1.bf16.msra.mxu0 %v4058_v3  ;;  %3860 = vmatpush1.bf16.msra.mxu1 %v4058_v3  ;;  %v4082_v24 = vld [vmem:[%s4425_s28 + $0x1bc] ss:$20 sps:$4 sm:$0xff]   ;;  %v4085_v28 = vld [vmem:[%s4425_s28 + $0x1b8] ss:$20 sps:$4 sm:$0xff]   ;;  %v4088_v30 = vld [vmem:[%s4425_s28 + $0x54] ss:$20 sps:$4 sm:$0xff]  }
  0x18   : > { %1772 = vmatprep.subr.bf16.mxu0 %v4367_v1  ;;  %3845 = vmatprep.subr.bf16.mxu1 %v4367_v1  ;;  %v4090_v31 = vld [vmem:[%s4425_s28 + $0x1e4] ss:$20 sps:$4 sm:$0xff]   ;;  %v4093_v34 = vld [vmem:[%s4425_s28 + $0x1e0] ss:$20 sps:$4 sm:$0xff]   ;;  %v4096_v37 = vld [vmem:[%s4425_s28 + $0x7c] ss:$20 sps:$4 sm:$0xff]  }
  0x19   : > { %v4092_v33 = vld [vmem:[%s4425_s28 + $0x50] ss:$20 sps:$4 sm:$0xff]   ;;  %v4098_v38 = vld [vmem:[%s4425_s28 + $0x20c] ss:$20 sps:$4 sm:$0xff]   ;;  %v4101_v41 = vld [vmem:[%s4425_s28 + $0x208] ss:$20 sps:$4 sm:$0xff]  }
  0x1a   : > { %v4102_v39 = vld [vmem:[%s5390_s1 + $0xa8] sm:$0xff]   ;;  %v4103_v42 = vld [vmem:[%s4425_s28 + $0xa4] ss:$20 sps:$4 sm:$0xff]   ;;  %v4107_v44 = vld [vmem:[%s5390_s1 + $0xb0] sm:$0xff]  }
  0x1b   : > { %1773 = vmatpush1.bf16.msra.mxu0 %v4059_v4  ;;  %3861 = vmatpush1.bf16.msra.mxu1 %v4059_v4  ;;  %v4100_v40 = vld [vmem:[%s4425_s28 + $0x78] ss:$20 sps:$4 sm:$0xff]   ;;  %v4105_v43 = vld [vmem:[%s4425_s28 + $0x234] ss:$20 sps:$4 sm:$0xff]   ;;  %v4109_v47 = vld [vmem:[%s4425_s28 + $0x230] ss:$20 sps:$4 sm:$0xff]  }
  0x1c   : > { %1774 = vmatprep.subr.bf16.mxu0 %v4367_v1  ;;  %3846 = vmatprep.subr.bf16.mxu1 %v4367_v1  ;;  %v4110_v45 = vld [vmem:[%s5390_s1 + $0xb8] sm:$0xff]   ;;  %v4108_v46 = vld [vmem:[%s4425_s28 + $0xa0] ss:$20 sps:$4 sm:$0xff]   ;;  %v4118_v51 = vld [vmem:[%s5390_s1 + $0xc8] sm:$0xff]  }
  0x1d   : > { %v4111_v48 = vld [vmem:[%s4425_s28 + $0xcc] ss:$20 sps:$4 sm:$0xff]   ;;  %v4113_v49 = vld [vmem:[%s4425_s28 + $0x25c] ss:$20 sps:$4 sm:$0xff]   ;;  %v4119_v54 = vld [vmem:[%s4425_s28 + $0xf4] ss:$20 sps:$4 sm:$0xff]  }
  0x1e   : > { %v4117_v50 = vld [vmem:[%s5390_s1 + $0xc0] sm:$0xff]   ;;  %v4115_v52 = vld [vmem:[%s4425_s28 + $0xc8] ss:$20 sps:$4 sm:$0xff]   ;;  %v4116_v53 = vld [vmem:[%s4425_s28 + $0x258] ss:$20 sps:$4 sm:$0xff]  }
  0x1f   : > { %1775 = vmatpush1.bf16.msra.mxu0 %v4060_v5  ;;  %3862 = vmatpush1.bf16.msra.mxu1 %v4060_v5  ;;  %v4121_v55 = vld [vmem:[%s4425_s28 + $0x284] ss:$20 sps:$4 sm:$0xff]   ;;  %v4125_v56 = vld [vmem:[%s5390_s1 + $0xd0] sm:$0xff]   ;;  %v4128_v61 = vld [vmem:[%s4425_s28 + $0x2ac] ss:$20 sps:$4 sm:$0xff]  }
  0x20   : > { %1776 = vmatprep.subr.bf16.mxu0 %v4367_v1  ;;  %3847 = vmatprep.subr.bf16.mxu1 %v4367_v1  ;;  %v4132_v57 = vld [vmem:[%s5390_s1 + $0xd8] sm:$0xff]   ;;  %v4123_v58 = vld [vmem:[%s4425_s28 + $0xf0] ss:$20 sps:$4 sm:$0xff]   ;;  %v4124_v59 = vld [vmem:[%s4425_s28 + $0x280] ss:$20 sps:$4 sm:$0xff]  }
  0x21   : > { %v4126_v60 = vld [vmem:[%s4425_s28 + $0x11c] ss:$20 sps:$4 sm:$0xff]   ;;  %v4133_v62 = vld [vmem:[%s5390_s1 + $0xe0] sm:$0xff]   ;;  %v4141_v0 = vld [vmem:[%s5390_s1 + $0xe8] sm:$0xff]  }
  0x22   : > { %v4229_v63 = vld [vmem:[%s5390_s1 + $0x118] sm:$0xff]   ;;  %v4136_v5 = vld [vmem:[%s4425_s28 + $0x2d4] ss:$20 sps:$4 sm:$0xff]  }
  0x23   : > { %1777 = vmatpush1.bf16.msra.mxu0 %v4061_v7  ;;  %3863 = vmatpush1.bf16.msra.mxu1 %v4061_v7  ;;  %v4130_v2 = vld [vmem:[%s4425_s28 + $0x118] ss:$20 sps:$4 sm:$0xff]   ;;  %v4131_v3 = vld [vmem:[%s4425_s28 + $0x2a8] ss:$20 sps:$4 sm:$0xff]   ;;  %v4146_v6 = vld [vmem:[%s5390_s1 + $0xf0] sm:$0xff]  }
  0x24   : > { %1778 = vmatprep.subr.bf16.mxu0 %v4367_v1  ;;  %3848 = vmatprep.subr.bf16.mxu1 %v4367_v1  ;;  %v4134_v4 = vld [vmem:[%s4425_s28 + $0x144] ss:$20 sps:$4 sm:$0xff]   ;;  %v4138_v8 = vld [vmem:[%s4425_s28 + $0x140] ss:$20 sps:$4 sm:$0xff]  }
  0x25   : > { %v4149_v7 = vld [vmem:[%s5390_s1 + $0xf8] sm:$0xff]  }
  0x27   : > { %1779 = vmatpush1.bf16.msra.mxu0 %v4062_v9  ;;  %3864 = vmatpush1.bf16.msra.mxu1 %v4062_v9  ;;  %v4139_v9 = vld [vmem:[%s4425_s28 + $0x2d0] ss:$20 sps:$4 sm:$0xff]  }
  0x28   : > { %1780 = vmatprep.subr.bf16.mxu0 %v4367_v1  ;;  %3849 = vmatprep.subr.bf16.mxu1 %v4367_v1 }
  0x2b   : > { %1781 = vmatpush1.bf16.msra.mxu0 %v4063_v10  ;;  %3865 = vmatpush1.bf16.msra.mxu1 %v4063_v10  ;;  %v4142_v10 = vld [vmem:[%s4425_s28 + $0x16c] ss:$20 sps:$4 sm:$0xff]  }
  0x2c   : > { %1782 = vmatprep.subr.bf16.mxu0 %v4367_v1  ;;  %3850 = vmatprep.subr.bf16.mxu1 %v4367_v1 }
  0x2f   : > { %1783 = vmatpush1.bf16.msra.mxu0 %v4064_v11  ;;  %3866 = vmatpush1.bf16.msra.mxu1 %v4064_v11  ;;  %v4144_v11 = vld [vmem:[%s4425_s28 + $0x2fc] ss:$20 sps:$4 sm:$0xff]  }
  0x30   : > { %1784 = vmatprep.subr.bf16.mxu0 %v4367_v1  ;;  %3851 = vmatprep.subr.bf16.mxu1 %v4367_v1 }
  0x33   : > { %1785 = vmatpush1.bf16.msra.mxu0 %v4065_v12  ;;  %3867 = vmatpush1.bf16.msra.mxu1 %v4065_v12  ;;  %v4147_v12 = vld [vmem:[%s4425_s28 + $0x168] ss:$20 sps:$4 sm:$0xff]  }
  0x34   : > { %1786 = vmatprep.subr.bf16.mxu0 %v4367_v1  ;;  %3852 = vmatprep.subr.bf16.mxu1 %v4367_v1 }
  0x37   : > { %1787 = vmatpush1.bf16.msra.mxu0 %v4066_v13  ;;  %3868 = vmatpush1.bf16.msra.mxu1 %v4066_v13  ;;  %v4148_v13 = vld [vmem:[%s4425_s28 + $0x2f8] ss:$20 sps:$4 sm:$0xff]  }
  0x38   : > { %1788 = vmatprep.subr.bf16.mxu0 %v4367_v1  ;;  %3853 = vmatprep.subr.bf16.mxu1 %v4367_v1 }
  0x3b   : > { %1789 = vmatpush1.bf16.msra.mxu0 %v4067_v14  ;;  %3869 = vmatpush1.bf16.msra.mxu1 %v4067_v14  ;;  %v4150_v14 = vld [vmem:[%s4425_s28 + $0x324] ss:$20 sps:$4 sm:$0xff]  }
  0x3c   : > { %1790 = vmatprep.subr.bf16.mxu0 %v4367_v1  ;;  %3854 = vmatprep.subr.bf16.mxu1 %v4367_v1 }
  0x3f   : > { %1791 = vmatpush1.bf16.msra.mxu0 %v4068_v15  ;;  %3870 = vmatpush1.bf16.msra.mxu1 %v4068_v15  ;;  %v4154_v15 = vld [vmem:[%s4425_s28 + $0xc] ss:$20 sps:$4 sm:$0xff]  }
  0x40   : > { %1792 = vmatprep.subr.bf16.mxu0 %v4367_v1  ;;  %3855 = vmatprep.subr.bf16.mxu1 %v4367_v1 }
  0x43   : > { %1793 = vmatpush1.bf16.msra.mxu0 %v4069_v16  ;;  %3871 = vmatpush1.bf16.msra.mxu1 %v4069_v16  ;;  %v4155_v16 = vld [vmem:[%s4425_s28 + $0x320] ss:$20 sps:$4 sm:$0xff]  }
  0x44   : > { %1794 = vmatprep.subr.bf16.mxu0 %v4367_v1  ;;  %3856 = vmatprep.subr.bf16.mxu1 %v4367_v1 }
  0x47   : > { %1795 = vmatpush1.bf16.msra.mxu0 %v4070_v17  ;;  %3872 = vmatpush1.bf16.msra.mxu1 %v4070_v17  ;;  %v4156_v17 = vld [vmem:[%s4425_s28 + $0x34c] ss:$20 sps:$4 sm:$0xff]  }
  0x48   : > { %1796 = vmatprep.subr.bf16.mxu0 %v4367_v1  ;;  %3857 = vmatprep.subr.bf16.mxu1 %v4367_v1 }
  0x4b   : > { %1797 = vmatpush1.bf16.msra.mxu0 %v4071_v18  ;;  %3873 = vmatpush1.bf16.msra.mxu1 %v4071_v18  ;;  %v4158_v18 = vld [vmem:[%s4425_s28 + $0x34] ss:$20 sps:$4 sm:$0xff]  }
  0x4c   : > { %2103 = vmatprep.subr.bf16.mxu0 %v4367_v1  ;;  %3758 = vmatprep.subr.bf16.mxu1 %v4086_v19 }
  0x4e   : > { %1799 = vmatmul.mubr.bf16.vlgmr.msra.gmra.mrb[0].mxu0 %v4072_v20  ;;  %1879 = vmatmul.mubr.bf16.vlgmr.msra.gmra.mrb[0].mxu1 %v4075_v21  ;;  %v4161_v20 = vld [vmem:[%s4425_s28 + $0x30] ss:$20 sps:$4 sm:$0xff]   ;;  %v4162_v21 = vld [vmem:[%s4425_s28 + $0x374] ss:$20 sps:$4 sm:$0xff]  }
  0x4f   : > { %2104 = vmatpush1.bf16.msra.mxu0 %v4078_v22  ;;  %1806 = vmatprep.mubr.bf16.mxu0 %v4080_v23  ;;  %v4164_v22 = vld [vmem:[%s4425_s28 + $0x5c] ss:$20 sps:$4 sm:$0xff]  }
  0x50   : > { %2105 = vmatprep.subr.bf16.mxu0 %v4367_v1  ;;  %1886 = vmatprep.mubr.bf16.mxu1 %v4082_v24  ;;  %v4166_v23 = vld [vmem:[%s4425_s28 + $0x370] ss:$20 sps:$4 sm:$0xff]   ;;  %v4167_v24 = vld [vmem:[%s4425_s28 + $0x58] ss:$20 sps:$4 sm:$0xff]  }
  0x51   : > { %3759 = vmatpush3.bf16.msra.mxu1 %v4086_v19  ;;  %v4160_v19 = vld [vmem:[%s4425_s28 + $0x348] ss:$20 sps:$4 sm:$0xff]  }
  0x52   : > { %3760 = vmatprep.subr.bf16.mxu1 %v4140_v25 }
  0x53   : > { %2106 = vmatpush1.bf16.msra.mxu0 %v4079_v26  ;;  %v4170_v26 = vld [vmem:[%s4425_s28 + $0x84] ss:$20 sps:$4 sm:$0xff]  }
  0x54   : > { %2107 = vmatprep.subr.bf16.mxu0 %v4367_v1 }
  0x55   : > { %3761 = vmatpush3.bf16.msra.mxu1 %v4140_v25  ;;  %v4168_v25 = vld [vmem:[%s4425_s28 + $0x39c] ss:$20 sps:$4 sm:$0xff]  }
  0x56   : > { %1807 = vmatmul.mubr.bf16.gmra.mrb[4].mxu0 %v4084_v27  ;;  %1887 = vmatmul.mubr.bf16.gmra.mrb[4].mxu1 %v4085_v28  ;;  %v4172_v27 = vld [vmem:[%s4425_s28 + $0x398] ss:$20 sps:$4 sm:$0xff]   ;;  %v4173_v28 = vld [vmem:[%s4425_s28 + $0x80] ss:$20 sps:$4 sm:$0xff]  }
  0x57   : > { %2108 = vmatpush1.bf16.msra.mxu0 %v4087_v29  ;;  %1814 = vmatprep.mubr.bf16.mxu0 %v4088_v30  ;;  %v4174_v29 = vld [vmem:[%s4425_s28 + $0x3c4] ss:$20 sps:$4 sm:$0xff]   ;;  %v4176_v30 = vld [vmem:[%s4425_s28 + $0xac] ss:$20 sps:$4 sm:$0xff]  }
  0x58   : > { %1894 = vmatprep.mubr.bf16.mxu1 %v4090_v31  ;;  %2109 = vmatprep.subr.bf16.mxu0 %v4367_v1  ;;  %v4178_v31 = vld [vmem:[%s4425_s28 + $0x3c0] ss:$20 sps:$4 sm:$0xff]  }
  0x59   : > { %3762 = vmatprep.subr.bf16.mxu1 %v4186_v36 }
  0x5a   : > { %3763 = vmatpush3.bf16.msra.mxu1 %v4186_v36  ;;  %v4185_v36 = vld [vmem:[%s4425_s28 + $0xd0] ss:$20 sps:$4 sm:$0xff]  }
  0x5b   : > { %2110 = vmatpush1.bf16.msra.mxu0 %v4094_v32  ;;  %3764 = vmatprep.subr.bf16.mxu1 %v4229_v63  ;;  %v4179_v32 = vld [vmem:[%s4425_s28 + $0xa8] ss:$20 sps:$4 sm:$0xff]  }
  0x5c   : > { %2111 = vmatprep.subr.bf16.mxu0 %v4367_v1 }
  0x5e   : > { %1815 = vmatmul.mubr.bf16.gmra.mrb[8].mxu0 %v4092_v33  ;;  %1895 = vmatmul.mubr.bf16.gmra.mrb[8].mxu1 %v4093_v34  ;;  %v4180_v33 = vld [vmem:[%s4425_s28 + $0x3ec] ss:$20 sps:$4 sm:$0xff]   ;;  %v4182_v34 = vld [vmem:[%s4425_s28 + $0xd4] ss:$20 sps:$4 sm:$0xff]  }
  0x5f   : > { %2112 = vmatpush1.bf16.msra.mxu0 %v4095_v35  ;;  %1822 = vmatprep.mubr.bf16.mxu0 %v4096_v37  ;;  %v4184_v35 = vld [vmem:[%s4425_s28 + $0x3e8] ss:$20 sps:$4 sm:$0xff]  }
  0x60   : > { %1902 = vmatprep.mubr.bf16.mxu1 %v4098_v38  ;;  %2113 = vmatprep.subr.bf16.mxu0 %v4367_v1  ;;  %v4187_v37 = vld [vmem:[%s4425_s28 + $0x414] ss:$20 sps:$4 sm:$0xff]   ;;  %v4189_v38 = vld [vmem:[%s4425_s28 + $0xfc] ss:$20 sps:$4 sm:$0xff]  }
  0x61   : > { %3765 = vmatpush3.bf16.msra.mxu1 %v4229_v63  ;;  %v4227_v63 = vld [vmem:[%s4425_s28 + $0x500] ss:$20 sps:$4 sm:$0xff]  }
  0x63   : > { %2114 = vmatpush1.bf16.msra.mxu0 %v4102_v39  ;;  %v4191_v39 = vld [vmem:[%s4425_s28 + $0x410] ss:$20 sps:$4 sm:$0xff]  }
  0x64   : > { %2115 = vmatprep.subr.bf16.mxu0 %v4367_v1 }
  0x66   : > { %1823 = vmatmul.mubr.bf16.gmra.mrb[12].mxu0 %v4100_v40  ;;  %1903 = vmatmul.mubr.bf16.gmra.mrb[12].mxu1 %v4101_v41  ;;  %v4192_v40 = vld [vmem:[%s4425_s28 + $0xf8] ss:$20 sps:$4 sm:$0xff]   ;;  %v4193_v41 = vld [vmem:[%s4425_s28 + $0x43c] ss:$20 sps:$4 sm:$0xff]  }
  0x67   : > { %1830 = vmatprep.mubr.bf16.mxu0 %v4103_v42  ;;  %1910 = vmatprep.mubr.bf16.mxu1 %v4105_v43  ;;  %v4195_v42 = vld [vmem:[%s4425_s28 + $0x124] ss:$20 sps:$4 sm:$0xff]  }
  0x68   : > { %2116 = vmatpush1.bf16.msra.mxu0 %v4107_v44  ;;  %v4197_v43 = vld [vmem:[%s4425_s28 + $0x438] ss:$20 sps:$4 sm:$0xff]   ;;  %v4198_v44 = vld [vmem:[%s4425_s28 + $0x120] ss:$20 sps:$4 sm:$0xff]  }
  0x69   : > { %2117 = vmatprep.subr.bf16.mxu0 %v4367_v1 }
  0x6c   : > { %2118 = vmatpush1.bf16.msra.mxu0 %v4110_v45  ;;  %v4199_v45 = vld [vmem:[%s4425_s28 + $0x464] ss:$20 sps:$4 sm:$0xff]  }
  0x6d   : > { %2119 = vmatprep.subr.bf16.mxu0 %v4367_v1 }
  0x6e   : > { %1831 = vmatmul.mubr.bf16.gmra.mrb[16].mxu0 %v4108_v46  ;;  %1911 = vmatmul.mubr.bf16.gmra.mrb[16].mxu1 %v4109_v47  ;;  %v4201_v46 = vld [vmem:[%s4425_s28 + $0x14c] ss:$20 sps:$4 sm:$0xff]  }
  0x6f   : > { %1838 = vmatprep.mubr.bf16.mxu0 %v4111_v48  ;;  %1918 = vmatprep.mubr.bf16.mxu1 %v4113_v49  ;;  %v4203_v47 = vld [vmem:[%s4425_s28 + $0x460] ss:$20 sps:$4 sm:$0xff]   ;;  %v4204_v48 = vld [vmem:[%s4425_s28 + $0x148] ss:$20 sps:$4 sm:$0xff]  }
  0x70   : > { %2120 = vmatpush1.bf16.msra.mxu0 %v4117_v50  ;;  %v4205_v49 = vld [vmem:[%s4425_s28 + $0x48c] ss:$20 sps:$4 sm:$0xff]   ;;  %v4207_v50 = vld [vmem:[%s4425_s28 + $0x174] ss:$20 sps:$4 sm:$0xff]  }
  0x71   : > { %2121 = vmatprep.subr.bf16.mxu0 %v4367_v1 }
  0x74   : > { %2122 = vmatpush1.bf16.msra.mxu0 %v4118_v51  ;;  %v4209_v51 = vld [vmem:[%s4425_s28 + $0x488] ss:$20 sps:$4 sm:$0xff]  }
  0x75   : > { %2123 = vmatprep.subr.bf16.mxu0 %v4367_v1 }
  0x76   : > { %1839 = vmatmul.mubr.bf16.gmra.mrb[20].mxu0 %v4115_v52  ;;  %1919 = vmatmul.mubr.bf16.gmra.mrb[20].mxu1 %v4116_v53  ;;  %v4210_v52 = vld [vmem:[%s4425_s28 + $0x170] ss:$20 sps:$4 sm:$0xff]   ;;  %v4211_v53 = vld [vmem:[%s4425_s28 + $0x4b4] ss:$20 sps:$4 sm:$0xff]  }
  0x77   : > { %1846 = vmatprep.mubr.bf16.mxu0 %v4119_v54  ;;  %1926 = vmatprep.mubr.bf16.mxu1 %v4121_v55  ;;  %v4213_v54 = vld [vmem:[%s4425_s28 + $0x19c] ss:$20 sps:$4 sm:$0xff]  }
  0x78   : > { %2124 = vmatpush1.bf16.msra.mxu0 %v4125_v56  ;;  %v4215_v55 = vld [vmem:[%s4425_s28 + $0x4b0] ss:$20 sps:$4 sm:$0xff]   ;;  %v4216_v56 = vld [vmem:[%s4425_s28 + $0x198] ss:$20 sps:$4 sm:$0xff]  }
  0x79   : > { %2125 = vmatprep.subr.bf16.mxu0 %v4367_v1 }
  0x7c   : > { %2126 = vmatpush1.bf16.msra.mxu0 %v4132_v57  ;;  %v4217_v57 = vld [vmem:[%s4425_s28 + $0x4dc] ss:$20 sps:$4 sm:$0xff]  }
  0x7d   : > { %2127 = vmatprep.subr.bf16.mxu0 %v4367_v1 }
  0x7e   : > { %1847 = vmatmul.mubr.bf16.gmra.mrb[24].mxu0 %v4123_v58  ;;  %1927 = vmatmul.mubr.bf16.gmra.mrb[24].mxu1 %v4124_v59  ;;  %v4219_v58 = vld [vmem:[%s4425_s28 + $0x1c4] ss:$20 sps:$4 sm:$0xff]  }
  0x7f   : > { %1854 = vmatprep.mubr.bf16.mxu0 %v4126_v60  ;;  %1934 = vmatprep.mubr.bf16.mxu1 %v4128_v61  ;;  %v4221_v59 = vld [vmem:[%s4425_s28 + $0x4d8] ss:$20 sps:$4 sm:$0xff]   ;;  %v4222_v60 = vld [vmem:[%s4425_s28 + $0x1c0] ss:$20 sps:$4 sm:$0xff]  }
  0x80   : > { %2128 = vmatpush1.bf16.msra.mxu0 %v4133_v62  ;;  %v4223_v61 = vld [vmem:[%s4425_s28 + $0x504] ss:$20 sps:$4 sm:$0xff]   ;;  %v4225_v62 = vld [vmem:[%s4425_s28 + $0x1ec] ss:$20 sps:$4 sm:$0xff]  }
  0x81   : > { %2129 = vmatprep.subr.bf16.mxu0 %v4367_v1 }
  0x84   : > { %2130 = vmatpush1.bf16.msra.mxu0 %v4141_v0  ;;  %v4228_v0 = vld [vmem:[%s4425_s28 + $0x1e8] ss:$20 sps:$4 sm:$0xff]  }
  0x85   : > { %2131 = vmatprep.subr.bf16.mxu0 %v4367_v1 }
  0x86   : > { %1855 = vmatmul.mubr.bf16.gmra.mrb[28].mxu0 %v4130_v2  ;;  %1935 = vmatmul.mubr.bf16.gmra.mrb[28].mxu1 %v4131_v3  ;;  %v4230_v2 = vld [vmem:[%s4425_s28 + $0x52c] ss:$20 sps:$4 sm:$0xff]   ;;  %v4232_v3 = vld [vmem:[%s4425_s28 + $0x214] ss:$20 sps:$4 sm:$0xff]  }
  0x87   : > { %1862 = vmatprep.mubr.bf16.mxu0 %v4134_v4  ;;  %1942 = vmatprep.mubr.bf16.mxu1 %v4136_v5  ;;  %v4234_v4 = vld [vmem:[%s4425_s28 + $0x528] ss:$20 sps:$4 sm:$0xff]   ;;  %v4235_v5 = vld [vmem:[%s4425_s28 + $0x210] ss:$20 sps:$4 sm:$0xff]  }
  0x88   : > { %2132 = vmatpush1.bf16.msra.mxu0 %v4146_v6  ;;  %v4236_v6 = vld [vmem:[%s4425_s28 + $0x554] ss:$20 sps:$4 sm:$0xff]  }
  0x89   : > { %2133 = vmatprep.subr.bf16.mxu0 %v4367_v1  ;;  %v4152_v1 = vld [vmem:[%s4425_s28 + $0x8] ss:$20 sps:$4 sm:$0xff]  }
  0x8c   : > { %2134 = vmatpush1.bf16.msra.mxu0 %v4149_v7  ;;  %v4238_v7 = vld [vmem:[%s4425_s28 + $0x23c] ss:$20 sps:$4 sm:$0xff]  }
  0x8e   : > { %1863 = vmatmul.mubr.bf16.gmra.mrb[32].mxu0 %v4138_v8  ;;  %1943 = vmatmul.mubr.bf16.gmra.mrb[32].mxu1 %v4139_v9  ;;  %v4240_v8 = vld [vmem:[%s4425_s28 + $0x550] ss:$20 sps:$4 sm:$0xff]   ;;  %v4241_v9 = vld [vmem:[%s4425_s28 + $0x238] ss:$20 sps:$4 sm:$0xff]  }
  0x8f   : > { %1870 = vmatprep.mubr.bf16.mxu0 %v4142_v10  ;;  %1950 = vmatprep.mubr.bf16.mxu1 %v4144_v11  ;;  %v4242_v10 = vld [vmem:[%s4425_s28 + $0x57c] ss:$20 sps:$4 sm:$0xff]   ;;  %v4244_v11 = vld [vmem:[%s4425_s28 + $0x264] ss:$20 sps:$4 sm:$0xff]  }
  0x96   : > { %1871 = vmatmul.mubr.bf16.gmra.mrb[36].mxu0 %v4147_v12  ;;  %1951 = vmatmul.mubr.bf16.gmra.mrb[36].mxu1 %v4148_v13  ;;  %v4246_v12 = vld [vmem:[%s4425_s28 + $0x578] ss:$20 sps:$4 sm:$0xff]   ;;  %v4247_v13 = vld [vmem:[%s4425_s28 + $0x260] ss:$20 sps:$4 sm:$0xff]  }
  0x97   : > { %1958 = vmatprep.mubr.bf16.mxu1 %v4150_v14  ;;  %2135 = vmatprep.mubr.bf16.mxu0 %v4154_v15  ;;  %v4248_v14 = vld [vmem:[%s4425_s28 + $0x5a4] ss:$20 sps:$4 sm:$0xff]   ;;  %v4250_v15 = vld [vmem:[%s4425_s28 + $0x28c] ss:$20 sps:$4 sm:$0xff]  }
  0x9e   : > { %1959 = vmatmul.mubr.bf16.gmra.mrb[40].mxu1 %v4155_v16  ;;  %2136 = vmatmul.mubr.bf16.vlgmr.msra.gmra.mrb[0].mxu0 %v4152_v1  ;;  %v4252_v1 = vld [vmem:[%s4425_s28 + $0x5a0] ss:$20 sps:$4 sm:$0xff]   ;;  %v4253_v16 = vld [vmem:[%s4425_s28 + $0x288] ss:$20 sps:$4 sm:$0xff]  }
  0x9f   : > { %1966 = vmatprep.mubr.bf16.mxu1 %v4156_v17  ;;  %2143 = vmatprep.mubr.bf16.mxu0 %v4158_v18  ;;  %v4254_v17 = vld [vmem:[%s4425_s28 + $0x5cc] ss:$20 sps:$4 sm:$0xff]   ;;  %v4256_v18 = vld [vmem:[%s4425_s28 + $0x2b4] ss:$20 sps:$4 sm:$0xff]  }
  0xa6   : > { %1967 = vmatmul.mubr.bf16.gmra.mrb[44].mxu1 %v4160_v19  ;;  %2144 = vmatmul.mubr.bf16.gmra.mrb[4].mxu0 %v4161_v20  ;;  %v4258_v20 = vld [vmem:[%s4425_s28 + $0x5c8] ss:$20 sps:$4 sm:$0xff]  }
  0xa7   : > { %1974 = vmatprep.mubr.bf16.mxu1 %v4162_v21  ;;  %2151 = vmatprep.mubr.bf16.mxu0 %v4164_v22  ;;  %v4259_v21 = vld [vmem:[%s4425_s28 + $0x2b0] ss:$20 sps:$4 sm:$0xff]  }
  0xae   : > { %1975 = vmatmul.mubr.bf16.gmra.mrb[48].mxu1 %v4166_v23  ;;  %2152 = vmatmul.mubr.bf16.gmra.mrb[8].mxu0 %v4167_v24  ;;  %v4260_v24 = vld [vmem:[%s4425_s28 + $0x2dc] ss:$20 sps:$4 sm:$0xff]  }
  0xaf   : > { %1982 = vmatprep.mubr.bf16.mxu1 %v4168_v25  ;;  %2159 = vmatprep.mubr.bf16.mxu0 %v4170_v26  ;;  %v4262_v25 = vld [vmem:[%s4425_s28 + $0x10] ss:$20 sps:$4 sm:$0xff]  }
  0xb6   : > { %1983 = vmatmul.mubr.bf16.gmra.mrb[52].mxu1 %v4172_v27  ;;  %2160 = vmatmul.mubr.bf16.gmra.mrb[12].mxu0 %v4173_v28  ;;  %v4263_v28 = vld [vmem:[%s4425_s28 + $0x2d8] ss:$20 sps:$4 sm:$0xff]  }
  0xb7   : > { %1990 = vmatprep.mubr.bf16.mxu1 %v4174_v29  ;;  %2167 = vmatprep.mubr.bf16.mxu0 %v4176_v30  ;;  %v4264_v29 = vld [vmem:[%s4425_s28 + $0x38] ss:$20 sps:$4 sm:$0xff]  }
  0xbe   : > { %1991 = vmatmul.mubr.bf16.gmra.mrb[56].mxu1 %v4178_v31  ;;  %2168 = vmatmul.mubr.bf16.gmra.mrb[16].mxu0 %v4179_v32  ;;  %v4265_v32 = vld [vmem:[%s4425_s28 + $0x304] ss:$20 sps:$4 sm:$0xff]  }
  0xbf   : > { %1998 = vmatprep.mubr.bf16.mxu1 %v4180_v33  ;;  %2175 = vmatprep.mubr.bf16.mxu0 %v4182_v34  ;;  %v4267_v33 = vld [vmem:[%s4425_s28 + $0x60] ss:$20 sps:$4 sm:$0xff]  }
  0xc6   : > { %1999 = vmatmul.mubr.bf16.gmra.mrb[60].mxu1 %v4184_v35  ;;  %2176 = vmatmul.mubr.bf16.gmra.mrb[20].mxu0 %v4185_v36  ;;  %v4268_v36 = vld [vmem:[%s4425_s28 + $0x300] ss:$20 sps:$4 sm:$0xff]  }
  0xc7   : > { %2006 = vmatprep.mubr.bf16.mxu1 %v4187_v37  ;;  %2183 = vmatprep.mubr.bf16.mxu0 %v4189_v38  ;;  %v4269_v37 = vld [vmem:[%s4425_s28 + $0x88] ss:$20 sps:$4 sm:$0xff]  }
  0xce   : > { %2007 = vmatmul.mubr.bf16.gmra.mrb[64].mxu1 %v4191_v39  ;;  %2184 = vmatmul.mubr.bf16.gmra.mrb[24].mxu0 %v4192_v40  ;;  %v4270_v40 = vld [vmem:[%s4425_s28 + $0x32c] ss:$20 sps:$4 sm:$0xff]  }
  0xcf   : > { %2014 = vmatprep.mubr.bf16.mxu1 %v4193_v41  ;;  %2191 = vmatprep.mubr.bf16.mxu0 %v4195_v42  ;;  %v4272_v41 = vld [vmem:[%s4425_s28 + $0xb0] ss:$20 sps:$4 sm:$0xff]  }
  0xd6   : > { %2015 = vmatmul.mubr.bf16.gmra.mrb[68].mxu1 %v4197_v43  ;;  %2192 = vmatmul.mubr.bf16.gmra.mrb[28].mxu0 %v4198_v44  ;;  %v4273_v44 = vld [vmem:[%s4425_s28 + $0x328] ss:$20 sps:$4 sm:$0xff]  }
  0xd7   : > { %2022 = vmatprep.mubr.bf16.mxu1 %v4199_v45  ;;  %2199 = vmatprep.mubr.bf16.mxu0 %v4201_v46  ;;  %v4274_v45 = vld [vmem:[%s4425_s28 + $0xd8] ss:$20 sps:$4 sm:$0xff]  }
  0xde   : > { %2023 = vmatmul.mubr.bf16.gmra.mrb[72].mxu1 %v4203_v47  ;;  %2200 = vmatmul.mubr.bf16.gmra.mrb[32].mxu0 %v4204_v48  ;;  %v4275_v48 = vld [vmem:[%s4425_s28 + $0x354] ss:$20 sps:$4 sm:$0xff]  }
  0xdf   : > { %2030 = vmatprep.mubr.bf16.mxu1 %v4205_v49  ;;  %2207 = vmatprep.mubr.bf16.mxu0 %v4207_v50  ;;  %v4277_v49 = vld [vmem:[%s4425_s28 + $0x100] ss:$20 sps:$4 sm:$0xff]  }
  0xe6   : > { %2031 = vmatmul.mubr.bf16.gmra.mrb[76].mxu1 %v4209_v51  ;;  %2208 = vmatmul.mubr.bf16.gmra.mrb[36].mxu0 %v4210_v52  ;;  %v4278_v52 = vld [vmem:[%s4425_s28 + $0x350] ss:$20 sps:$4 sm:$0xff]  }
  0xe7   : > { %2038 = vmatprep.mubr.bf16.mxu1 %v4211_v53  ;;  %2215 = vmatprep.mubr.bf16.mxu0 %v4213_v54  ;;  %v4279_v53 = vld [vmem:[%s4425_s28 + $0x128] ss:$20 sps:$4 sm:$0xff]  }
  0xee   : > { %2039 = vmatmul.mubr.bf16.gmra.mrb[80].mxu1 %v4215_v55  ;;  %2216 = vmatmul.mubr.bf16.gmra.mrb[40].mxu0 %v4216_v56  ;;  %v4280_v56 = vld [vmem:[%s4425_s28 + $0x37c] ss:$20 sps:$4 sm:$0xff]  }
  0xef   : > { %2046 = vmatprep.mubr.bf16.mxu1 %v4217_v57  ;;  %2223 = vmatprep.mubr.bf16.mxu0 %v4219_v58  ;;  %v4282_v57 = vld [vmem:[%s4425_s28 + $0x150] ss:$20 sps:$4 sm:$0xff]  }
  0xf6   : > { %2047 = vmatmul.mubr.bf16.gmra.mrb[84].mxu1 %v4221_v59  ;;  %2224 = vmatmul.mubr.bf16.gmra.mrb[44].mxu0 %v4222_v60  ;;  %v4283_v60 = vld [vmem:[%s4425_s28 + $0x378] ss:$20 sps:$4 sm:$0xff]  }
  0xf7   : > { %2054 = vmatprep.mubr.bf16.mxu1 %v4223_v61  ;;  %2231 = vmatprep.mubr.bf16.mxu0 %v4225_v62  ;;  %v4284_v61 = vld [vmem:[%s4425_s28 + $0x178] ss:$20 sps:$4 sm:$0xff]  }
  0xfe   : > { %2055 = vmatmul.mubr.bf16.gmra.mrb[88].mxu1 %v4227_v63  ;;  %2232 = vmatmul.mubr.bf16.gmra.mrb[48].mxu0 %v4228_v0  ;;  %v4285_v0 = vld [vmem:[%s4425_s28 + $0x3a4] ss:$20 sps:$4 sm:$0xff]  }
  0xff   : > { %2062 = vmatprep.mubr.bf16.mxu1 %v4230_v2  ;;  %2239 = vmatprep.mubr.bf16.mxu0 %v4232_v3  ;;  %v4287_v2 = vld [vmem:[%s4425_s28 + $0x1a0] ss:$20 sps:$4 sm:$0xff]  }
 0x106   : > { %2063 = vmatmul.mubr.bf16.gmra.mrb[92].mxu1 %v4234_v4  ;;  %2240 = vmatmul.mubr.bf16.gmra.mrb[52].mxu0 %v4235_v5  ;;  %v4288_v5 = vld [vmem:[%s4425_s28 + $0x3a0] ss:$20 sps:$4 sm:$0xff]  }
 0x107   : > { %2070 = vmatprep.mubr.bf16.mxu1 %v4236_v6  ;;  %2247 = vmatprep.mubr.bf16.mxu0 %v4238_v7  ;;  %v4289_v6 = vld [vmem:[%s4425_s28 + $0x1c8] ss:$20 sps:$4 sm:$0xff]  }
 0x10e   : > { %2071 = vmatmul.mubr.bf16.gmra.mrb[96].mxu1 %v4240_v8  ;;  %2248 = vmatmul.mubr.bf16.gmra.mrb[56].mxu0 %v4241_v9  ;;  %v4290_v9 = vld [vmem:[%s4425_s28 + $0x3cc] ss:$20 sps:$4 sm:$0xff]  }
 0x10f   : > { %2078 = vmatprep.mubr.bf16.mxu1 %v4242_v10  ;;  %2255 = vmatprep.mubr.bf16.mxu0 %v4244_v11  ;;  %v4292_v10 = vld [vmem:[%s4425_s28 + $0x1f0] ss:$20 sps:$4 sm:$0xff]  }
 0x116   : > { %2079 = vmatmul.mubr.bf16.gmra.mrb[100].mxu1 %v4246_v12  ;;  %2256 = vmatmul.mubr.bf16.gmra.mrb[60].mxu0 %v4247_v13  ;;  %v4293_v13 = vld [vmem:[%s4425_s28 + $0x3c8] ss:$20 sps:$4 sm:$0xff]  }
 0x117   : > { %2086 = vmatprep.mubr.bf16.mxu1 %v4248_v14  ;;  %2263 = vmatprep.mubr.bf16.mxu0 %v4250_v15  ;;  %v4294_v14 = vld [vmem:[%s4425_s28 + $0x218] ss:$20 sps:$4 sm:$0xff]  }
 0x11e   : > { %2087 = vmatmul.mubr.bf16.gmra.mrb[104].mxu1 %v4252_v1  ;;  %2264 = vmatmul.mubr.bf16.gmra.mrb[64].mxu0 %v4253_v16  ;;  %v4295_v16 = vld [vmem:[%s4425_s28 + $0x3f4] ss:$20 sps:$4 sm:$0xff]  }
 0x11f   : > { %2094 = vmatprep.mubr.bf16.mxu1 %v4254_v17  ;;  %2271 = vmatprep.mubr.bf16.mxu0 %v4256_v18  ;;  %v4297_v17 = vld [vmem:[%s4425_s28 + $0x240] ss:$20 sps:$4 sm:$0xff]  }
 0x121   : > { %v4670_v19 = vpop.f32.mrb[0].mxu1 }
 0x122   : > { %v1882_v22 = vpop.f32.mrb[1].mxu1 }
 0x123   : > { %v4674_v23 = vpop.f32.mrb[2].mxu1  ;;  %v4299_v22 = vld [vmem:[%s4425_s28 + $0x268] ss:$20 sps:$4 sm:$0xff]  }
 0x124   : > { %v1885_v26 = vpop.f32.mrb[3].mxu1 }
 0x125   : > { %v4300_v26 = vld [vmem:[%s4425_s28 + $0x41c] ss:$20 sps:$4 sm:$0xff]  }
 0x126   : > { %2095 = vmatmul.mubr.bf16.gmra.mrb[108].mxu1 %v4258_v20  ;;  %2272 = vmatmul.mubr.bf16.gmra.mrb[68].mxu0 %v4259_v21  ;;  %v4298_v21 = vld [vmem:[%s4425_s28 + $0x3f0] ss:$20 sps:$4 sm:$0xff]  }
 0x127   : > { %2279 = vmatprep.mubr.bf16.mxu0 %v4260_v24  ;;  %3766 = vmatprep.mubr.msk.bf16.mxu1 %vm1651_vm0, %v4262_v25 }
 0x129   : > { %v4679_v27 = vpop.f32.mrb[4].mxu1 }
 0x12a   : > { %v1890_v30 = vpop.f32.mrb[5].mxu1 }
 0x12b   : > { %v4683_v31 = vpop.f32.mrb[6].mxu1 }
 0x12c   : > { %v1893_v34 = vpop.f32.mrb[7].mxu1 }
 0x12e   : > { %2280 = vmatmul.mubr.bf16.gmra.mrb[72].mxu0 %v4263_v28  ;;  %3767 = vmatmul.mubr.msk.bf16.vlgmr.msra.gmra.mrb[112].mxu1 %vm1651_vm0, %v4264_v29  ;;  %v4302_v28 = vld [vmem:[%s4425_s28 + $0x290] ss:$20 sps:$4 sm:$0xff]  }
 0x12f   : > { %2287 = vmatprep.mubr.bf16.mxu0 %v4265_v32  ;;  %3770 = vmatprep.mubr.msk.bf16.mxu1 %vm1651_vm0, %v4267_v33  ;;  %v4303_v32 = vld [vmem:[%s4425_s28 + $0x418] ss:$20 sps:$4 sm:$0xff]  }
 0x130   : > { %v4304_v33 = vld [vmem:[%s4425_s28 + $0x2b8] ss:$20 sps:$4 sm:$0xff]  }
 0x131   : > { %v4689_v35 = vpop.f32.mrb[8].mxu1 }
 0x132   : > { %v1898_v38 = vpop.f32.mrb[9].mxu1 }
 0x133   : > { %v4693_v39 = vpop.f32.mrb[10].mxu1  ;;  %v4307_v38 = vld [vmem:[%s4425_s28 + $0x2e0] ss:$20 sps:$4 sm:$0xff]  }
 0x134   : > { %v1901_v42 = vpop.f32.mrb[11].mxu1 }
 0x136   : > { %2288 = vmatmul.mubr.bf16.gmra.mrb[76].mxu0 %v4268_v36  ;;  %3771 = vmatmul.mubr.msk.bf16.gmra.mrb[116].mxu1 %vm1651_vm0, %v4269_v37  ;;  %v4305_v37 = vld [vmem:[%s4425_s28 + $0x444] ss:$20 sps:$4 sm:$0xff]  }
 0x137   : > { %2295 = vmatprep.mubr.bf16.mxu0 %v4270_v40  ;;  %3774 = vmatprep.mubr.msk.bf16.mxu1 %vm1651_vm0, %v4272_v41 }
 0x139   : > { %v4699_v43 = vpop.f32.mrb[12].mxu1 }
 0x13a   : > { %v1906_v46 = vpop.f32.mrb[13].mxu1 }
 0x13b   : > { %v4703_v47 = vpop.f32.mrb[14].mxu1  ;;  %v4309_v46 = vld [vmem:[%s4425_s28 + $0x308] ss:$20 sps:$4 sm:$0xff]  }
 0x13c   : > { %v1909_v50 = vpop.f32.mrb[15].mxu1 }
 0x13e   : > { %2296 = vmatmul.mubr.bf16.gmra.mrb[80].mxu0 %v4273_v44  ;;  %3775 = vmatmul.mubr.msk.bf16.gmra.mrb[120].mxu1 %vm1651_vm0, %v4274_v45  ;;  %v4308_v45 = vld [vmem:[%s4425_s28 + $0x440] ss:$20 sps:$4 sm:$0xff]  }
 0x13f   : > { %2303 = vmatprep.mubr.bf16.mxu0 %v4275_v48  ;;  %3778 = vmatprep.mubr.msk.bf16.mxu1 %vm1651_vm0, %v4277_v49 }
 0x141   : > { %v4709_v51 = vpop.f32.mrb[16].mxu1 }
 0x142   : > { %v1914_v54 = vpop.f32.mrb[17].mxu1 }
 0x143   : > { %v4713_v55 = vpop.f32.mrb[18].mxu1 }
 0x144   : > { %v1917_v58 = vpop.f32.mrb[19].mxu1 }
 0x146   : > { %2304 = vmatmul.mubr.bf16.gmra.mrb[84].mxu0 %v4278_v52  ;;  %3779 = vmatmul.mubr.msk.bf16.gmra.mrb[124].mxu1 %vm1651_vm0, %v4279_v53  ;;  %v4310_v52 = vld [vmem:[%s4425_s28 + $0x46c] ss:$20 sps:$4 sm:$0xff]   ;;  %v4312_v53 = vld [vmem:[%s4425_s28 + $0x330] ss:$20 sps:$4 sm:$0xff]  }
 0x147   : > { %2311 = vmatprep.mubr.bf16.mxu0 %v4280_v56  ;;  %3782 = vmatprep.mubr.msk.bf16.mxu1 %vm1651_vm0, %v4282_v57 }
 0x149   : > { %v4719_v59 = vpop.f32.mrb[20].mxu1 }
 0x14a   : > { %v1922_v62 = vpop.f32.mrb[21].mxu1 }
 0x14b   : > { %v4723_v63 = vpop.f32.mrb[22].mxu1  ;;  %v4314_v62 = vld [vmem:[%s4425_s28 + $0x358] ss:$20 sps:$4 sm:$0xff]  }
 0x14c   : > { %v1925_v3 = vpop.f32.mrb[23].mxu1 }
 0x14e   : > { %2312 = vmatmul.mubr.bf16.gmra.mrb[88].mxu0 %v4283_v60  ;;  %3783 = vmatmul.mubr.msk.bf16.gmra.mrb[128].mxu1 %vm1651_vm0, %v4284_v61  ;;  %v4313_v61 = vld [vmem:[%s4425_s28 + $0x468] ss:$20 sps:$4 sm:$0xff]  }
 0x14f   : > { %2319 = vmatprep.mubr.bf16.mxu0 %v4285_v0  ;;  %3786 = vmatprep.mubr.msk.bf16.mxu1 %vm1651_vm0, %v4287_v2 }
 0x151   : > { %v4729_v4 = vpop.f32.mrb[24].mxu1 }
 0x152   : > { %v1930_v7 = vpop.f32.mrb[25].mxu1 }
 0x153   : > { %v4733_v8 = vpop.f32.mrb[26].mxu1 }
 0x154   : > { %v1933_v11 = vpop.f32.mrb[27].mxu1 }
 0x156   : > { %2320 = vmatmul.mubr.bf16.gmra.mrb[92].mxu0 %v4288_v5  ;;  %3787 = vmatmul.mubr.msk.bf16.gmra.mrb[132].mxu1 %vm1651_vm0, %v4289_v6  ;;  %v4315_v5 = vld [vmem:[%s4425_s28 + $0x494] ss:$20 sps:$4 sm:$0xff]  }
 0x157   : > { %2327 = vmatprep.mubr.bf16.mxu0 %v4290_v9  ;;  %3790 = vmatprep.mubr.msk.bf16.mxu1 %vm1651_vm0, %v4292_v10  ;;  %v4317_v6 = vld [vmem:[%s4425_s28 + $0x380] ss:$20 sps:$4 sm:$0xff]  }
 0x159   : > { %v4739_v12 = vpop.f32.mrb[28].mxu1 }
 0x15a   : > { %v1938_v15 = vpop.f32.mrb[29].mxu1 }
 0x15b   : > { %v4743_v1 = vpop.f32.mrb[30].mxu1  ;;  %v4319_v15 = vld [vmem:[%s4425_s28 + $0x3a8] ss:$20 sps:$4 sm:$0xff]  }
 0x15c   : > { %v1941_v18 = vpop.f32.mrb[31].mxu1 }
 0x15e   : > { %2328 = vmatmul.mubr.bf16.gmra.mrb[96].mxu0 %v4293_v13  ;;  %3791 = vmatmul.mubr.msk.bf16.gmra.mrb[136].mxu1 %vm1651_vm0, %v4294_v14  ;;  %v4318_v14 = vld [vmem:[%s4425_s28 + $0x490] ss:$20 sps:$4 sm:$0xff]  }
 0x15f   : > { %2335 = vmatprep.mubr.bf16.mxu0 %v4295_v16  ;;  %3794 = vmatprep.mubr.msk.bf16.mxu1 %vm1651_vm0, %v4297_v17 }
 0x161   : > { %v4749_v20 = vpop.f32.mrb[32].mxu1 }
 0x162   : > { %v1946_v24 = vpop.f32.mrb[33].mxu1 }
 0x163   : > { %v4753_v25 = vpop.f32.mrb[34].mxu1 }
 0x164   : > { %v1949_v29 = vpop.f32.mrb[35].mxu1 }
 0x166   : > { %2336 = vmatmul.mubr.bf16.gmra.mrb[100].mxu0 %v4298_v21  ;;  %3795 = vmatmul.mubr.msk.bf16.gmra.mrb[140].mxu1 %vm1651_vm0, %v4299_v22  ;;  %v4320_v21 = vld [vmem:[%s4425_s28 + $0x4bc] ss:$20 sps:$4 sm:$0xff]  }
 0x167   : > { %2343 = vmatprep.mubr.bf16.mxu0 %v4300_v26  ;;  %3798 = vmatprep.mubr.msk.bf16.mxu1 %vm1651_vm0, %v4302_v28  ;;  %v4322_v22 = vld [vmem:[%s4425_s28 + $0x3d0] ss:$20 sps:$4 sm:$0xff]  }
 0x169   : > { %v4759_v30 = vpop.f32.mrb[36].mxu1 }
 0x16a   : > { %v1954_v34 = vpop.f32.mrb[37].mxu1 }
 0x16b   : > { %v4763_v36 = vpop.f32.mrb[38].mxu1  ;;  %v4324_v34 = vld [vmem:[%s4425_s28 + $0x3f8] ss:$20 sps:$4 sm:$0xff]  }
 0x16c   : > { %v1957_v40 = vpop.f32.mrb[39].mxu1 }
 0x16e   : > { %2344 = vmatmul.mubr.bf16.gmra.mrb[104].mxu0 %v4303_v32  ;;  %3799 = vmatmul.mubr.msk.bf16.gmra.mrb[144].mxu1 %vm1651_vm0, %v4304_v33  ;;  %v4323_v33 = vld [vmem:[%s4425_s28 + $0x4b8] ss:$20 sps:$4 sm:$0xff]  }
 0x16f   : > { %2351 = vmatprep.mubr.bf16.mxu0 %v4305_v37  ;;  %3802 = vmatprep.mubr.msk.bf16.mxu1 %vm1651_vm0, %v4307_v38 }
 0x171   : > { %v4769_v41 = vpop.f32.mrb[0].mxu0  ;;  %v4771_v42 = vpop.f32.mrb[40].mxu1 }
 0x172   : > { %v2139_v44 = vpop.f32.mrb[1].mxu0  ;;  %v1962_v48 = vpop.f32.mrb[41].mxu1 }
 0x173   : > { %v4775_v49 = vpop.f32.mrb[2].mxu0  ;;  %v4777_v50 = vpop.f32.mrb[42].mxu1  ;;  %v4325_v44 = vld [vmem:[%s4425_s28 + $0x4e4] ss:$20 sps:$4 sm:$0xff]  }
 0x174   : > { %v2142_v54 = vpop.f32.mrb[3].mxu0  ;;  %v1965_v56 = vpop.f32.mrb[43].mxu1 }
 0x175   : > { %v4328_v56 = vld [vmem:[%s4425_s28 + $0x4e0] ss:$20 sps:$4 sm:$0xff]  }
 0x176   : > { %2352 = vmatmul.mubr.bf16.gmra.mrb[108].mxu0 %v4308_v45  ;;  %3803 = vmatmul.mubr.msk.bf16.gmra.mrb[148].mxu1 %vm1651_vm0, %v4309_v46  ;;  %v4327_v45 = vld [vmem:[%s4425_s28 + $0x420] ss:$20 sps:$4 sm:$0xff]  }
 0x177   : > { %2359 = vmatprep.mubr.bf16.mxu0 %v4310_v52  ;;  %3806 = vmatprep.mubr.msk.bf16.mxu1 %vm1651_vm0, %v4312_v53 }
 0x179   : > { %v4783_v57 = vpop.f32.mrb[4].mxu0  ;;  %v4785_v58 = vpop.f32.mrb[44].mxu1 }
 0x17a   : > { %v2147_v60 = vpop.f32.mrb[5].mxu0  ;;  %v1970_v0 = vpop.f32.mrb[45].mxu1 }
 0x17b   : > { %v4789_v2 = vpop.f32.mrb[6].mxu0  ;;  %v4791_v3 = vpop.f32.mrb[46].mxu1  ;;  %v4329_v60 = vld [vmem:[%s4425_s28 + $0x448] ss:$20 sps:$4 sm:$0xff]  }
 0x17c   : > { %v2150_v7 = vpop.f32.mrb[7].mxu0  ;;  %v1973_v9 = vpop.f32.mrb[47].mxu1 }
 0x17e   : > { %2360 = vmatmul.mubr.bf16.gmra.mrb[112].mxu0 %v4313_v61  ;;  %3807 = vmatmul.mubr.msk.bf16.gmra.mrb[152].mxu1 %vm1651_vm0, %v4314_v62 }
 0x17f   : > { %2367 = vmatprep.mubr.bf16.mxu0 %v4315_v5  ;;  %3810 = vmatprep.mubr.msk.bf16.mxu1 %vm1651_vm0, %v4317_v6  ;;  %v4330_v5 = vld [vmem:[%s4425_s28 + $0x50c] ss:$20 sps:$4 sm:$0xff]   ;;  %v4332_v6 = vld [vmem:[%s4425_s28 + $0x470] ss:$20 sps:$4 sm:$0xff]  }
 0x181   : > { %v4797_v10 = vpop.f32.mrb[8].mxu0  ;;  %v4799_v11 = vpop.f32.mrb[48].mxu1 }
 0x182   : > { %v2155_v13 = vpop.f32.mrb[9].mxu0  ;;  %v1978_v16 = vpop.f32.mrb[49].mxu1 }
 0x183   : > { %v4803_v17 = vpop.f32.mrb[10].mxu0  ;;  %v4805_v18 = vpop.f32.mrb[50].mxu1  ;;  %v4333_v16 = vld [vmem:[%s4425_s28 + $0x508] ss:$20 sps:$4 sm:$0xff]  }
 0x184   : > { %v2158_v24 = vpop.f32.mrb[11].mxu0  ;;  %v1981_v26 = vpop.f32.mrb[51].mxu1 }
 0x186   : > { %2368 = vmatmul.mubr.bf16.gmra.mrb[116].mxu0 %v4318_v14  ;;  %3811 = vmatmul.mubr.msk.bf16.gmra.mrb[156].mxu1 %vm1651_vm0, %v4319_v15 }
 0x187   : > { %2375 = vmatprep.mubr.bf16.mxu0 %v4320_v21  ;;  %3814 = vmatprep.mubr.msk.bf16.mxu1 %vm1651_vm0, %v4322_v22  ;;  %v4334_v21 = vld [vmem:[%s4425_s28 + $0x498] ss:$20 sps:$4 sm:$0xff]  }
 0x189   : > { %v4811_v28 = vpop.f32.mrb[12].mxu0  ;;  %v4813_v29 = vpop.f32.mrb[52].mxu1 }
 0x18a   : > { %v2163_v32 = vpop.f32.mrb[13].mxu0  ;;  %v1986_v37 = vpop.f32.mrb[53].mxu1 }
 0x18b   : > { %v4817_v38 = vpop.f32.mrb[14].mxu0  ;;  %v4819_v40 = vpop.f32.mrb[54].mxu1  ;;  %v4335_v32 = vld [vmem:[%s4425_s28 + $0x534] ss:$20 sps:$4 sm:$0xff]  }
 0x18c   : > { %v2166_v46 = vpop.f32.mrb[15].mxu0  ;;  %v1989_v48 = vpop.f32.mrb[55].mxu1 }
 0x18d   : > { %v4338_v48 = vld [vmem:[%s4425_s28 + $0x530] ss:$20 sps:$4 sm:$0xff]  }
 0x18e   : > { %2376 = vmatmul.mubr.bf16.gmra.mrb[120].mxu0 %v4323_v33  ;;  %3815 = vmatmul.mubr.msk.bf16.gmra.mrb[160].mxu1 %vm1651_vm0, %v4324_v34  ;;  %v4337_v33 = vld [vmem:[%s4425_s28 + $0x4c0] ss:$20 sps:$4 sm:$0xff]  }
 0x18f   : > { %2383 = vmatprep.mubr.bf16.mxu0 %v4325_v44  ;;  %3818 = vmatprep.mubr.msk.bf16.mxu1 %vm1651_vm0, %v4327_v45 }
 0x191   : > { %v4825_v52 = vpop.f32.mrb[16].mxu0  ;;  %v4827_v53 = vpop.f32.mrb[56].mxu1 }
 0x192   : > { %v2171_v54 = vpop.f32.mrb[17].mxu0  ;;  %v1994_v61 = vpop.f32.mrb[57].mxu1 }
 0x193   : > { %v4831_v62 = vpop.f32.mrb[18].mxu0  ;;  %v4833_v0 = vpop.f32.mrb[58].mxu1  ;;  %v4339_v54 = vld [vmem:[%s4425_s28 + $0x4e8] ss:$20 sps:$4 sm:$0xff]  }
 0x194   : > { %5393 = vst [vmem:[#allocation2_spill] sm:$0xff] %v4833_v0  ;;  %v2174_v7 = vpop.f32.mrb[19].mxu0  ;;  %v1997_v9 = vpop.f32.mrb[59].mxu1 }
 0x196   : > { %2384 = vmatmul.mubr.bf16.gmra.mrb[124].mxu0 %v4328_v56  ;;  %3819 = vmatmul.mubr.msk.bf16.gmra.mrb[164].mxu1 %vm1651_vm0, %v4329_v60 }
 0x197   : > { %2391 = vmatprep.mubr.bf16.mxu0 %v4330_v5  ;;  %3822 = vmatprep.mubr.msk.bf16.mxu1 %vm1651_vm0, %v4332_v6  ;;  %v4340_v5 = vld [vmem:[%s4425_s28 + $0x55c] ss:$20 sps:$4 sm:$0xff]  }
 0x198   : > { %v4342_v6 = vld [vmem:[%s4425_s28 + $0x510] ss:$20 sps:$4 sm:$0xff]  }
 0x199   : > { %v4839_v13 = vpop.f32.mrb[20].mxu0  ;;  %v4841_v14 = vpop.f32.mrb[60].mxu1 }
 0x19a   : > { %5394 = vst [vmem:[#allocation3_spill] sm:$0xff] %v4841_v14  ;;  %v2179_v15 = vpop.f32.mrb[21].mxu0  ;;  %v2002_v22 = vpop.f32.mrb[61].mxu1 }
 0x19b   : > { %v4845_v24 = vpop.f32.mrb[22].mxu0  ;;  %v4847_v26 = vpop.f32.mrb[62].mxu1  ;;  %v4343_v22 = vld [vmem:[%s4425_s28 + $0x558] ss:$20 sps:$4 sm:$0xff]  }
 0x19c   : > { %5395 = vst [vmem:[#allocation4_spill] sm:$0xff] %v4847_v26  ;;  %v2182_v34 = vpop.f32.mrb[23].mxu0  ;;  %v2005_v37 = vpop.f32.mrb[63].mxu1 }
 0x19e   : > { %2392 = vmatmul.mubr.bf16.gmra.mrb[128].mxu0 %v4333_v16  ;;  %3823 = vmatmul.mubr.msk.bf16.gmra.mrb[168].mxu1 %vm1651_vm0, %v4334_v21 }
 0x19f   : > { %2399 = vmatprep.mubr.bf16.mxu0 %v4335_v32  ;;  %3826 = vmatprep.mubr.msk.bf16.mxu1 %vm1651_vm0, %v4337_v33  ;;  %v4344_v32 = vld [vmem:[%s4425_s28 + $0x538] ss:$20 sps:$4 sm:$0xff]  }
 0x1a1   : > { %v4853_v44 = vpop.f32.mrb[24].mxu0  ;;  %v4855_v45 = vpop.f32.mrb[64].mxu1 }
 0x1a2   : > { %5396 = vst [vmem:[#allocation5_spill] sm:$0xff] %v4855_v45  ;;  %v2187_v46 = vpop.f32.mrb[25].mxu0  ;;  %v2010_v56 = vpop.f32.mrb[65].mxu1 }
 0x1a3   : > { %v4859_v60 = vpop.f32.mrb[26].mxu0  ;;  %v4861_v61 = vpop.f32.mrb[66].mxu1  ;;  %v4345_v46 = vld [vmem:[%s4425_s28 + $0x584] ss:$20 sps:$4 sm:$0xff]  }
 0x1a4   : > { %5397 = vst [vmem:[#allocation6_spill] sm:$0xff] %v4861_v61  ;;  %v2190_v7 = vpop.f32.mrb[27].mxu0  ;;  %v2013_v9 = vpop.f32.mrb[67].mxu1 }
 0x1a5   : > { %v4348_v9 = vld [vmem:[%s4425_s28 + $0x580] ss:$20 sps:$4 sm:$0xff]  }
 0x1a6   : > { %2400 = vmatmul.mubr.bf16.gmra.mrb[132].mxu0 %v4338_v48  ;;  %3827 = vmatmul.mubr.msk.bf16.gmra.mrb[172].mxu1 %vm1651_vm0, %v4339_v54  ;;  %v4347_v48 = vld [vmem:[%s4425_s28 + $0x560] ss:$20 sps:$4 sm:$0xff]  }
 0x1a7   : > { %2407 = vmatprep.mubr.bf16.mxu0 %v4340_v5  ;;  %3830 = vmatprep.mubr.msk.bf16.mxu1 %vm1651_vm0, %v4342_v6 }
 0x1a9   : > { %v4867_v15 = vpop.f32.mrb[28].mxu0  ;;  %v4869_v16 = vpop.f32.mrb[68].mxu1 }
 0x1aa   : > { %5398 = vst [vmem:[#allocation7_spill] sm:$0xff] %v4869_v16  ;;  %v2195_v21 = vpop.f32.mrb[29].mxu0  ;;  %v2018_v33 = vpop.f32.mrb[69].mxu1  ;;  %v4354_v16 = vld [vmem:[%s4425_s28 + $0x5d8] ss:$20 sps:$4 sm:$0xff]  }
 0x1ab   : > { %v4873_v34 = vpop.f32.mrb[30].mxu0  ;;  %v4875_v37 = vpop.f32.mrb[70].mxu1  ;;  %v4349_v21 = vld [vmem:[%s4425_s28 + $0x588] ss:$20 sps:$4 sm:$0xff]  }
 0x1ac   : > { %5399 = vst [vmem:[#allocation8_spill] sm:$0xff] %v4875_v37  ;;  %v2198_v54 = vpop.f32.mrb[31].mxu0  ;;  %v2021_v56 = vpop.f32.mrb[71].mxu1 }
 0x1ae   : > { %2408 = vmatmul.mubr.bf16.gmra.mrb[136].mxu0 %v4343_v22  ;;  %3831 = vmatmul.mubr.msk.bf16.gmra.mrb[176].mxu1 %vm1651_vm0, %v4344_v32  ;;  %v4350_v22 = vld [vmem:[%s4425_s28 + $0x5ac] ss:$20 sps:$4 sm:$0xff]   ;;  %v4353_v32 = vld [vmem:[%s4425_s28 + $0x5b0] ss:$20 sps:$4 sm:$0xff]  }
 0x1af   : > { %2415 = vmatprep.mubr.bf16.mxu0 %v4345_v46  ;;  %3834 = vmatprep.mubr.msk.bf16.mxu1 %vm1651_vm0, %v4347_v48 }
 0x1b1   : > { %v4881_v5 = vpop.f32.mrb[32].mxu0  ;;  %v4883_v6 = vpop.f32.mrb[72].mxu1 }
 0x1b2   : > { %5400 = vst [vmem:[#allocation9_spill] sm:$0xff] %v4883_v6  ;;  %v2203_v7 = vpop.f32.mrb[33].mxu0  ;;  %v2026_v33 = vpop.f32.mrb[73].mxu1  ;;  %v4352_v6 = vld [vmem:[%s4425_s28 + $0x5a8] ss:$20 sps:$4 sm:$0xff]  }
 0x1b3   : > { %v4887_v37 = vpop.f32.mrb[34].mxu0  ;;  %v4889_v54 = vpop.f32.mrb[74].mxu1 }
 0x1b4   : > { %5401 = vst [vmem:[#allocation10_spill] sm:$0xff] %v4889_v54  ;;  %v2206_v46 = vpop.f32.mrb[35].mxu0  ;;  %v2029_v56 = vpop.f32.mrb[75].mxu1 }
 0x1b5   : > { %v4355_v46 = vld [vmem:[%s4425_s28 + $0x5d4] ss:$20 sps:$4 sm:$0xff]  }
 0x1b6   : > { %2416 = vmatmul.mubr.bf16.gmra.mrb[140].mxu0 %v4348_v9  ;;  %3835 = vmatmul.mubr.msk.bf16.gmra.mrb[180].mxu1 %vm1651_vm0, %v4349_v21  ;;  %v4909_v21 = vld [vmem:[%s5391_s2] ss:$0 sm:$0xff] }
 0x1b7   : > { %2423 = vmatprep.mubr.bf16.mxu0 %v4350_v22  ;;  %3838 = vmatprep.mubr.msk.bf16.mxu1 %vm1651_vm0, %v4353_v32 }
 0x1b9   : > { %v4895_v48 = vpop.f32.mrb[36].mxu0  ;;  %v4897_v7 = vpop.f32.mrb[76].mxu1 }
 0x1ba   : > { %5402 = vst [vmem:[#allocation11_spill] sm:$0xff] %v4897_v7  ;;  %v2211_v33 = vpop.f32.mrb[37].mxu0  ;;  %v2034_v61 = vpop.f32.mrb[77].mxu1 }
 0x1bb   : > { %v4901_v54 = vpop.f32.mrb[38].mxu0  ;;  %v4903_v45 = vpop.f32.mrb[78].mxu1  ;;  %v1881_v61 = vadd.f32 %v4909_v21, %v4670_v19  ;;  %v1884_v33 = vadd.f32 %v4909_v21, %v4674_v23  ;;  %v1889_v19 = vadd.f32 %v4909_v21, %v4679_v27  ;;  %v1892_v23 = vadd.f32 %v4909_v21, %v4683_v31 }
 0x1bc   : > { %5403 = vst [vmem:[#allocation12_spill] sm:$0xff] %v4903_v45  ;;  %v2214_v9 = vpop.f32.mrb[39].mxu0  ;;  %v2037_v56 = vpop.f32.mrb[79].mxu1  ;;  %v4357_v45 = vld [vmem:[%s4425_s28 + $0x5d0] ss:$20 sps:$4 sm:$0xff]   ;;  %v1897_v27 = vadd.f32 %v4909_v21, %v4689_v35  ;;  %v1900_v31 = vadd.f32 %v4909_v21, %v4693_v39  ;;  %v1905_v35 = vadd.f32 %v4909_v21, %v4699_v43  ;;  %v1908_v39 = vadd.f32 %v4909_v21, %v4703_v47  ;;  %s3296_s28 = sshll.u32 %s5452_s16, 2 }
 0x1bd   : > { %v1913_v43 = vadd.f32 %v4909_v21, %v4709_v51  ;;  %v1916_v47 = vadd.f32 %v4909_v21, %v4713_v55  ;;  %v1921_v51 = vadd.f32 %v4909_v21, %v4719_v59  ;;  %v1924_v55 = vadd.f32 %v4909_v21, %v4723_v63  ;;  %s5029_s22 = scalar_lea.vmem %s5392_s3, %s3296_s28 }
 0x1be   : > { %2424 = vmatmul.mubr.bf16.gmra.mrb[144].mxu0 %v4352_v6  ;;  %3839 = vmatmul.mubr.msk.bf16.gmra.mrb[184].mxu1 %vm1651_vm0, %v4354_v16  ;;  %v1929_v59 = vadd.f32 %v4909_v21, %v4729_v4  ;;  %v1932_v63 = vadd.f32 %v4909_v21, %v4733_v8  ;;  %v1937_v4 = vadd.f32 %v4909_v21, %v4739_v12 }
 0x1bf   : > { %2431 = vmatprep.mubr.bf16.mxu0 %v4355_v46  ;;  %v1940_v8 = vadd.f32 %v4909_v21, %v4743_v1  ;;  %v1945_v12 = vadd.f32 %v4909_v21, %v4749_v20  ;;  %v3874_v1 = vadd.f32 %v4909_v21, %v4769_v41 }
 0x1c1   : > { %v2217_v22 = vpop.f32.mrb[40].mxu0  ;;  %v4914_v32 = vpop.f32.mrb[80].mxu1 }
 0x1c2   : > { %5404 = vst [vmem:[#allocation13_spill] sm:$0xff] %v4914_v32  ;;  %v4918_v9 = vadd.f32 %v2217_v22, %v1881_v61  ;;  %v2219_v56 = vpop.f32.mrb[41].mxu0  ;;  %v2042_v7 = vpop.f32.mrb[81].mxu1 }
 0x1c3   : > { %v2220_v26 = vpop.f32.mrb[42].mxu0  ;;  %v4921_v14 = vpop.f32.mrb[82].mxu1 }
 0x1c4   : > { %5405 = vst [vmem:[#allocation14_spill] sm:$0xff] %v4921_v14  ;;  %v4923_v6 = vadd.f32 %v2220_v26, %v1884_v33  ;;  %v2222_v16 = vpop.f32.mrb[43].mxu0  ;;  %v2045_v46 = vpop.f32.mrb[83].mxu1 }
 0x1c6   : > { %2432 = vmatmul.mubr.bf16.gmra.mrb[148].mxu0 %v4357_v45 }
 0x1c9   : > { %v2225_v32 = vpop.f32.mrb[44].mxu0  ;;  %v4927_v0 = vpop.f32.mrb[84].mxu1 }
 0x1ca   : > { %5406 = vst [vmem:[#allocation15_spill] sm:$0xff] %v4927_v0  ;;  %v4931_v61 = vadd.f32 %v2225_v32, %v1889_v19  ;;  %v2227_v7 = vpop.f32.mrb[45].mxu0  ;;  %v2050_v22 = vpop.f32.mrb[85].mxu1 }
 0x1cb   : > { %v2228_v56 = vpop.f32.mrb[46].mxu0  ;;  %v4933_v14 = vpop.f32.mrb[86].mxu1 }
 0x1cc   : > { %5407 = vst [vmem:[#allocation16_spill] sm:$0xff] %v4933_v14  ;;  %v4935_v26 = vadd.f32 %v2228_v56, %v1892_v23  ;;  %v2230_v33 = vpop.f32.mrb[47].mxu0  ;;  %v2053_v45 = vpop.f32.mrb[87].mxu1 }
 0x1d1   : > { %v2233_v16 = vpop.f32.mrb[48].mxu0  ;;  %v4939_v46 = vpop.f32.mrb[88].mxu1 }
 0x1d2   : > { %5408 = vst [vmem:[#allocation17_spill] sm:$0xff] %v4939_v46  ;;  %v4943_v32 = vadd.f32 %v2233_v16, %v1897_v27  ;;  %v2235_v19 = vpop.f32.mrb[49].mxu0  ;;  %v2058_v7 = vpop.f32.mrb[89].mxu1 }
 0x1d3   : > { %v2236_v22 = vpop.f32.mrb[50].mxu0  ;;  %v4945_v0 = vpop.f32.mrb[90].mxu1 }
 0x1d4   : > { %5409 = vst [vmem:[#allocation18_spill] sm:$0xff] %v4945_v0  ;;  %v4947_v23 = vadd.f32 %v2236_v22, %v1900_v31  ;;  %v2238_v56 = vpop.f32.mrb[51].mxu0  ;;  %v2061_v33 = vpop.f32.mrb[91].mxu1 }
 0x1d9   : > { %v2241_v45 = vpop.f32.mrb[52].mxu0  ;;  %v4951_v14 = vpop.f32.mrb[92].mxu1 }
 0x1da   : > { %5410 = vst [vmem:[#allocation19_spill] sm:$0xff] %v4951_v14  ;;  %v4955_v27 = vadd.f32 %v2241_v45, %v1905_v35  ;;  %v2243_v16 = vpop.f32.mrb[53].mxu0  ;;  %v2066_v19 = vpop.f32.mrb[93].mxu1 }
 0x1db   : > { %v2244_v7 = vpop.f32.mrb[54].mxu0  ;;  %v4957_v46 = vpop.f32.mrb[94].mxu1 }
 0x1dc   : > { %5411 = vst [vmem:[#allocation20_spill] sm:$0xff] %v4957_v46  ;;  %v4959_v31 = vadd.f32 %v2244_v7, %v1908_v39  ;;  %v2246_v22 = vpop.f32.mrb[55].mxu0  ;;  %v2069_v56 = vpop.f32.mrb[95].mxu1 }
 0x1e1   : > { %v2249_v33 = vpop.f32.mrb[56].mxu0  ;;  %v4963_v0 = vpop.f32.mrb[96].mxu1 }
 0x1e2   : > { %5412 = vst [vmem:[#allocation21_spill] sm:$0xff] %v4963_v0  ;;  %v4967_v35 = vadd.f32 %v2249_v33, %v1913_v43  ;;  %v2251_v45 = vpop.f32.mrb[57].mxu0  ;;  %v2074_v16 = vpop.f32.mrb[97].mxu1 }
 0x1e3   : > { %v2252_v19 = vpop.f32.mrb[58].mxu0  ;;  %v4969_v14 = vpop.f32.mrb[98].mxu1 }
 0x1e4   : > { %5413 = vst [vmem:[#allocation22_spill] sm:$0xff] %v4969_v14  ;;  %v4971_v39 = vadd.f32 %v2252_v19, %v1916_v47  ;;  %v2254_v7 = vpop.f32.mrb[59].mxu0  ;;  %v2077_v22 = vpop.f32.mrb[99].mxu1 }
 0x1e9   : > { %v2257_v56 = vpop.f32.mrb[60].mxu0  ;;  %v4975_v46 = vpop.f32.mrb[100].mxu1 }
 0x1ea   : > { %5414 = vst [vmem:[#allocation23_spill] sm:$0xff] %v4975_v46  ;;  %v4979_v43 = vadd.f32 %v2257_v56, %v1921_v51  ;;  %v2259_v33 = vpop.f32.mrb[61].mxu0  ;;  %v2082_v45 = vpop.f32.mrb[101].mxu1 }
 0x1eb   : > { %v2260_v16 = vpop.f32.mrb[62].mxu0  ;;  %v4981_v0 = vpop.f32.mrb[102].mxu1 }
 0x1ec   : > { %5415 = vst [vmem:[#allocation24_spill] sm:$0xff] %v4981_v0  ;;  %v4983_v47 = vadd.f32 %v2260_v16, %v1924_v55  ;;  %v2262_v19 = vpop.f32.mrb[63].mxu0  ;;  %v2085_v7 = vpop.f32.mrb[103].mxu1 }
 0x1f1   : > { %v2265_v22 = vpop.f32.mrb[64].mxu0  ;;  %v4987_v14 = vpop.f32.mrb[104].mxu1 }
 0x1f2   : > { %5416 = vst [vmem:[#allocation25_spill] sm:$0xff] %v4987_v14  ;;  %v4991_v51 = vadd.f32 %v2265_v22, %v1929_v59  ;;  %v2267_v56 = vpop.f32.mrb[65].mxu0  ;;  %v2090_v33 = vpop.f32.mrb[105].mxu1 }
 0x1f3   : > { %v2268_v45 = vpop.f32.mrb[66].mxu0  ;;  %v4993_v46 = vpop.f32.mrb[106].mxu1 }
 0x1f4   : > { %5417 = vst [vmem:[#allocation26_spill] sm:$0xff] %v4993_v46  ;;  %v4995_v55 = vadd.f32 %v2268_v45, %v1932_v63  ;;  %v2270_v16 = vpop.f32.mrb[67].mxu0  ;;  %v2093_v19 = vpop.f32.mrb[107].mxu1 }
 0x1f5   : > { %v3876_v19 = vadd.f32 %v4909_v21, %v4783_v57  ;;  %v3875_v57 = vadd.f32 %v4909_v21, %v4775_v49 }
 0x1f6   : > { %5418 = vst [vmem:[#allocation27_spill] sm:$0xff] %v4995_v55 }
 0x1f9   : > { %v2273_v7 = vpop.f32.mrb[68].mxu0  ;;  %v4999_v0 = vpop.f32.mrb[108].mxu1 }
 0x1fa   : > { %5419 = vst [vmem:[#allocation28_spill] sm:$0xff] %v4999_v0  ;;  %v5003_v59 = vadd.f32 %v2273_v7, %v1937_v4  ;;  %v2275_v22 = vpop.f32.mrb[69].mxu0  ;;  %v2098_v56 = vpop.f32.mrb[109].mxu1 }
 0x1fb   : > { %v2276_v33 = vpop.f32.mrb[70].mxu0  ;;  %v5005_v46 = vpop.f32.mrb[110].mxu1  ;;  %v1948_v22 = vadd.f32 %v4909_v21, %v4753_v25 }
 0x1fc   : > { %5420 = vst [vmem:[#allocation29_spill] sm:$0xff] %v5005_v46  ;;  %v5007_v63 = vadd.f32 %v2276_v33, %v1940_v8  ;;  %v2278_v45 = vpop.f32.mrb[71].mxu0  ;;  %v2101_v16 = vpop.f32.mrb[111].mxu1  ;;  %v3877_v8 = vadd.f32 %v4909_v21, %v4789_v2 }
 0x1fe   : > { %5421 = vst [vmem:[#allocation30_spill] sm:$0xff] %v5007_v63 }
 0x201   : > { %v2281_v4 = vpop.f32.mrb[72].mxu0  ;;  %v3768_v7 = vpop.f32.mrb[112].mxu1 }
 0x202   : > { %v5019_v56 = vadd.f32 %v2281_v4, %v1945_v12  ;;  %v2483_v33 = vadd.f32 %v3876_v19, %v3768_v7  ;;  %v2283_v45 = vpop.f32.mrb[73].mxu0  ;;  %v2474_v20 = vpop.f32.mrb[113].mxu1  ;;  %v3880_v7 = vadd.f32 %v4909_v21, %v4811_v28 }
 0x203   : > { %v2475_v16 = vadd.f32 %v3874_v1, %v2474_v20  ;;  %v2284_v46 = vpop.f32.mrb[74].mxu0  ;;  %v3769_v41 = vpop.f32.mrb[114].mxu1 }
 0x204   : > { %v2779_v0 = vmax.f32 %v2483_v33, 0.0  ;;  %v5024_v14 = vadd.f32 %v2284_v46, %v1948_v22  ;;  %v2486_v55 = vadd.f32 %v3877_v8, %v3769_v41  ;;  %v2286_v25 = vpop.f32.mrb[75].mxu0  ;;  %v2477_v63 = vpop.f32.mrb[115].mxu1  ;;  %v1953_v46 = vadd.f32 %v4909_v21, %v4759_v30 }
 0x205   : > { %v2777_v2 = vmax.f32 %v2475_v16, 0.0  ;;  %v2478_v12 = vadd.f32 %v3875_v57, %v2477_v63  ;;  %v3878_v8 = vadd.f32 %v4909_v21, %v4797_v10  ;;  %v1956_v33 = vadd.f32 %v4909_v21, %v4763_v36 }
 0x206   : > { %v3642_v49 = vpack.c.bf16 %v2779_v0, %v2779_v0  ;;  %v2780_v19 = vmax.f32 %v2486_v55, 0.0  ;;  %v3881_v30 = vadd.f32 %v4909_v21, %v4817_v38  ;;  %v3879_v10 = vadd.f32 %v4909_v21, %v4803_v17 }
 0x207   : > { %v3640_v1 = vpack.c.bf16 %v2777_v2, %v2777_v2  ;;  %v2778_v4 = vmax.f32 %v2478_v12, 0.0 }
 0x208   : > { %3160 = vst.msk [vmem:[%s5029_s22 + $0x8] sm:$0xf] %vm3157_vm1, %v3642_v49  ;;  %v3643_v22 = vpack.c.bf16 %v2780_v19, %v2780_v19 }
 0x209   : > { %3158 = vst.msk [vmem:[%s5029_s22] sm:$0xf] %vm3157_vm1, %v3640_v1  ;;  %v3641_v63 = vpack.c.bf16 %v2778_v4, %v2778_v4  ;;  %v2289_v0 = vpop.f32.mrb[76].mxu0  ;;  %v3772_v55 = vpop.f32.mrb[116].mxu1 }
 0x20a   : > { %3161 = vst.msk [vmem:[%s5029_s22 + $0xc] sm:$0xf] %vm3157_vm1, %v3643_v22  ;;  %v5047_v28 = vadd.f32 %v2289_v0, %v1953_v46  ;;  %v2499_v45 = vadd.f32 %v3880_v7, %v3772_v55  ;;  %v2291_v20 = vpop.f32.mrb[77].mxu0  ;;  %v2490_v57 = vpop.f32.mrb[117].mxu1  ;;  %v1961_v22 = vadd.f32 %v4909_v21, %v4771_v42  ;;  %v3882_v0 = vadd.f32 %v4909_v21, %v4825_v52 }
 0x20b   : > { %3159 = vst.msk [vmem:[%s5029_s22 + $0x4] sm:$0xf] %vm3157_vm1, %v3641_v63  ;;  %v2491_v16 = vadd.f32 %v3878_v8, %v2490_v57  ;;  %v2292_v41 = vpop.f32.mrb[78].mxu0  ;;  %v3773_v25 = vpop.f32.mrb[118].mxu1  ;;  %v3884_v8 = vadd.f32 %v4909_v21, %v4839_v13  ;;  %v3885_v42 = vadd.f32 %v4909_v21, %v4845_v24  ;;  %v3883_v52 = vadd.f32 %v4909_v21, %v4831_v62 }
 0x20c   : > { %v2783_v36 = vmax.f32 %v2499_v45, 0.0  ;;  %v5053_v2 = vadd.f32 %v2292_v41, %v1956_v33  ;;  %v2502_v38 = vadd.f32 %v3881_v30, %v3773_v25  ;;  %v2294_v12 = vpop.f32.mrb[79].mxu0  ;;  %v2493_v49 = vpop.f32.mrb[119].mxu1  ;;  %v1964_v45 = vadd.f32 %v4909_v21, %v4777_v50 }
 0x20d   : > { %v2781_v19 = vmax.f32 %v2491_v16, 0.0  ;;  %v2494_v1 = vadd.f32 %v3879_v10, %v2493_v49 }
 0x20e   : > { %v3646_v4 = vpack.c.bf16 %v2783_v36, %v2783_v36  ;;  %v2784_v46 = vmax.f32 %v2502_v38, 0.0 }
 0x20f   : > { %v3644_v7 = vpack.c.bf16 %v2781_v19, %v2781_v19  ;;  %v2782_v17 = vmax.f32 %v2494_v1, 0.0 }
 0x210   : > { %3164 = vst.msk [vmem:[%s5029_s22 + $0x18] sm:$0xf] %vm3157_vm1, %v3646_v4  ;;  %v3647_v63 = vpack.c.bf16 %v2784_v46, %v2784_v46 }
 0x211   : > { %3162 = vst.msk [vmem:[%s5029_s22 + $0x10] sm:$0xf] %vm3157_vm1, %v3644_v7  ;;  %v3645_v55 = vpack.c.bf16 %v2782_v17, %v2782_v17  ;;  %v2297_v33 = vpop.f32.mrb[80].mxu0  ;;  %v3776_v30 = vpop.f32.mrb[120].mxu1  ;;  %v1969_v7 = vadd.f32 %v4909_v21, %v4785_v58  ;;  %v3888_v17 = vadd.f32 %v4909_v21, %v4867_v15  ;;  %v3889_v58 = vadd.f32 %v4909_v21, %v4873_v34 }
 0x212   : > { %3165 = vst.msk [vmem:[%s5029_s22 + $0x1c] sm:$0xf] %vm3157_vm1, %v3647_v63  ;;  %v5071_v13 = vadd.f32 %v2297_v33, %v1961_v22  ;;  %v2515_v20 = vadd.f32 %v3884_v8, %v3776_v30  ;;  %v2299_v57 = vpop.f32.mrb[81].mxu0  ;;  %v2506_v10 = vpop.f32.mrb[121].mxu1  ;;  %v3886_v8 = vadd.f32 %v4909_v21, %v4853_v44  ;;  %v1972_v33 = vadd.f32 %v4909_v21, %v4791_v3 }
 0x213   : > { %3163 = vst.msk [vmem:[%s5029_s22 + $0x14] sm:$0xf] %vm3157_vm1, %v3645_v55  ;;  %v2507_v16 = vadd.f32 %v3882_v0, %v2506_v10  ;;  %v2300_v41 = vpop.f32.mrb[82].mxu0  ;;  %v3777_v25 = vpop.f32.mrb[122].mxu1  ;;  %v3887_v44 = vadd.f32 %v4909_v21, %v4859_v60 }
 0x214   : > { %v2787_v50 = vmax.f32 %v2515_v20, 0.0  ;;  %v5077_v36 = vadd.f32 %v2300_v41, %v1964_v45  ;;  %v2518_v24 = vadd.f32 %v3885_v42, %v3777_v25  ;;  %v2302_v38 = vpop.f32.mrb[83].mxu0  ;;  %v2509_v12 = vpop.f32.mrb[123].mxu1 }
 0x215   : > { %v2785_v49 = vmax.f32 %v2507_v16, 0.0  ;;  %v2510_v19 = vadd.f32 %v3883_v52, %v2509_v12 }
 0x216   : > { %v3650_v1 = vpack.c.bf16 %v2787_v50, %v2787_v50  ;;  %v2788_v4 = vmax.f32 %v2518_v24, 0.0 }
 0x217   : > { %v3648_v46 = vpack.c.bf16 %v2785_v49, %v2785_v49  ;;  %v2786_v62 = vmax.f32 %v2510_v19, 0.0  ;;  %v1977_v49 = vadd.f32 %v4909_v21, %v4799_v11  ;;  %v3892_v19 = vadd.f32 %v4909_v21, %v4895_v48 }
 0x218   : > { %3168 = vst.msk [vmem:[%s5029_s22 + $0x28] sm:$0xf] %vm3157_vm1, %v3650_v1  ;;  %v3651_v22 = vpack.c.bf16 %v2788_v4, %v2788_v4  ;;  %v3890_v4 = vadd.f32 %v4909_v21, %v4881_v5  ;;  %v3893_v11 = vadd.f32 %v4909_v21, %v4901_v54  ;;  %v3891_v5 = vadd.f32 %v4909_v21, %v4887_v37 }
 0x219   : > { %3166 = vst.msk [vmem:[%s5029_s22 + $0x20] sm:$0xf] %vm3157_vm1, %v3648_v46  ;;  %v3649_v63 = vpack.c.bf16 %v2786_v62, %v2786_v62  ;;  %v2305_v0 = vpop.f32.mrb[84].mxu0  ;;  %v3780_v55 = vpop.f32.mrb[124].mxu1 }
 0x21a   : > { %3169 = vst.msk [vmem:[%s5029_s22 + $0x2c] sm:$0xf] %vm3157_vm1, %v3651_v22  ;;  %v5095_v15 = vadd.f32 %v2305_v0, %v1969_v7  ;;  %v2531_v30 = vadd.f32 %v3888_v17, %v3780_v55  ;;  %v2307_v45 = vpop.f32.mrb[85].mxu0  ;;  %v2522_v42 = vpop.f32.mrb[125].mxu1  ;;  %v1980_v17 = vadd.f32 %v4909_v21, %v4805_v18 }
 0x21b   : > { %3167 = vst.msk [vmem:[%s5029_s22 + $0x24] sm:$0xf] %vm3157_vm1, %v3649_v63  ;;  %v2523_v20 = vadd.f32 %v3886_v8, %v2522_v42  ;;  %v2308_v57 = vpop.f32.mrb[86].mxu0  ;;  %v3781_v10 = vpop.f32.mrb[126].mxu1 }
 0x21c   : > { %v2791_v3 = vmax.f32 %v2531_v30, 0.0  ;;  %v5101_v52 = vadd.f32 %v2308_v57, %v1972_v33  ;;  %v2534_v34 = vadd.f32 %v3889_v58, %v3781_v10  ;;  %v2310_v16 = vpop.f32.mrb[87].mxu0  ;;  %v2525_v41 = vpop.f32.mrb[127].mxu1 }
 0x21d   : > { %v2789_v25 = vmax.f32 %v2523_v20, 0.0  ;;  %v2526_v50 = vadd.f32 %v3887_v44, %v2525_v41 }
 0x21e   : > { %v3654_v24 = vpack.c.bf16 %v2791_v3, %v2791_v3  ;;  %v2792_v38 = vmax.f32 %v2534_v34, 0.0  ;;  %v1985_v3 = vadd.f32 %v4909_v21, %v4813_v29 }
 0x21f   : > { %v3652_v12 = vpack.c.bf16 %v2789_v25, %v2789_v25  ;;  %v2790_v60 = vmax.f32 %v2526_v50, 0.0  ;;  %v1988_v50 = vadd.f32 %v4909_v21, %v4819_v40 }
 0x220   : > { %3172 = vst.msk [vmem:[%s5029_s22 + $0x38] sm:$0xf] %vm3157_vm1, %v3654_v24  ;;  %v3655_v1 = vpack.c.bf16 %v2792_v38, %v2792_v38 }
 0x221   : > { %3170 = vst.msk [vmem:[%s5029_s22 + $0x30] sm:$0xf] %vm3157_vm1, %v3652_v12  ;;  %v3653_v46 = vpack.c.bf16 %v2790_v60, %v2790_v60  ;;  %v2313_v62 = vpop.f32.mrb[88].mxu0  ;;  %v3784_v7 = vpop.f32.mrb[128].mxu1 }
 0x222   : > { %3173 = vst.msk [vmem:[%s5029_s22 + $0x3c] sm:$0xf] %vm3157_vm1, %v3655_v1  ;;  %v5119_v48 = vadd.f32 %v2313_v62, %v1977_v49  ;;  %v2547_v22 = vadd.f32 %v3892_v19, %v3784_v7  ;;  %v2315_v8 = vpop.f32.mrb[89].mxu0  ;;  %v2538_v63 = vpop.f32.mrb[129].mxu1 }
 0x223   : > { %3171 = vst.msk [vmem:[%s5029_s22 + $0x34] sm:$0xf] %vm3157_vm1, %v3653_v46  ;;  %v2539_v0 = vadd.f32 %v3890_v4, %v2538_v63  ;;  %v2316_v55 = vpop.f32.mrb[90].mxu0  ;;  %v3785_v18 = vpop.f32.mrb[130].mxu1 }
 0x224   : > { %v2795_v33 = vmax.f32 %v2547_v22, 0.0  ;;  %v5125_v58 = vadd.f32 %v2316_v55, %v1980_v17  ;;  %v2550_v54 = vadd.f32 %v3893_v11, %v3785_v18  ;;  %v2318_v30 = vpop.f32.mrb[91].mxu0  ;;  %v2541_v45 = vpop.f32.mrb[131].mxu1  ;;  %v5422_v55 = vld [vmem:[#allocation2_spill] sm:$0xff] }
 0x225   : > { %v2793_v42 = vmax.f32 %v2539_v0, 0.0  ;;  %v2542_v44 = vadd.f32 %v3891_v5, %v2541_v45  ;;  %v1996_v18 = vadd.f32 %v4909_v21, %v5422_v55 }
 0x226   : > { %v3658_v20 = vpack.c.bf16 %v2795_v33, %v2795_v33  ;;  %v2796_v57 = vmax.f32 %v2550_v54, 0.0 }
 0x227   : > { %v3656_v37 = vpack.c.bf16 %v2793_v42, %v2793_v42  ;;  %v2794_v10 = vmax.f32 %v2542_v44, 0.0 }
 0x228   : > { %3176 = vst.msk [vmem:[%s5029_s22 + $0x48] sm:$0xf] %vm3157_vm1, %v3658_v20  ;;  %v3659_v34 = vpack.c.bf16 %v2796_v57, %v2796_v57 }
 0x229   : > { %3174 = vst.msk [vmem:[%s5029_s22 + $0x40] sm:$0xf] %vm3157_vm1, %v3656_v37  ;;  %v3657_v16 = vpack.c.bf16 %v2794_v10, %v2794_v10  ;;  %v2321_v41 = vpop.f32.mrb[92].mxu0  ;;  %v3788_v25 = vpop.f32.mrb[132].mxu1 }
 0x22a   : > { %3177 = vst.msk [vmem:[%s5029_s22 + $0x4c] sm:$0xf] %vm3157_vm1, %v3659_v34  ;;  %v5137_v24 = vadd.f32 %v2321_v41, %v1985_v3  ;;  %v2563_v38 = vadd.f32 %v3788_v25, %v4931_v61  ;;  %v2323_v12 = vpop.f32.mrb[93].mxu0  ;;  %v2554_v60 = vpop.f32.mrb[133].mxu1 }
 0x22b   : > { %3175 = vst.msk [vmem:[%s5029_s22 + $0x44] sm:$0xf] %vm3157_vm1, %v3657_v16  ;;  %v2555_v29 = vadd.f32 %v2554_v60, %v4918_v9  ;;  %v2324_v49 = vpop.f32.mrb[94].mxu0  ;;  %v3789_v19 = vpop.f32.mrb[134].mxu1  ;;  %v1993_v9 = vadd.f32 %v4909_v21, %v4827_v53 }
 0x22c   : > { %v2799_v1 = vmax.f32 %v2563_v38, 0.0  ;;  %v5143_v4 = vadd.f32 %v2324_v49, %v1988_v50  ;;  %v2566_v40 = vadd.f32 %v3789_v19, %v4935_v26  ;;  %v2326_v46 = vpop.f32.mrb[95].mxu0  ;;  %v2557_v62 = vpop.f32.mrb[135].mxu1 }
 0x22d   : > { %v2797_v7 = vmax.f32 %v2555_v29, 0.0  ;;  %v2558_v61 = vadd.f32 %v2557_v62, %v4923_v6  ;;  %v5424_v29 = vld [vmem:[#allocation4_spill] sm:$0xff] }
 0x22e   : > { %v3662_v17 = vpack.c.bf16 %v2799_v1, %v2799_v1  ;;  %v2800_v11 = vmax.f32 %v2566_v40, 0.0  ;;  %v2004_v49 = vadd.f32 %v4909_v21, %v5424_v29 }
 0x22f   : > { %v3660_v22 = vpack.c.bf16 %v2797_v7, %v2797_v7  ;;  %v2798_v8 = vmax.f32 %v2558_v61, 0.0 }
 0x230   : > { %3180 = vst.msk [vmem:[%s5029_s22 + $0x58] sm:$0xf] %vm3157_vm1, %v3662_v17  ;;  %v3663_v63 = vpack.c.bf16 %v2800_v11, %v2800_v11 }
 0x231   : > { %3178 = vst.msk [vmem:[%s5029_s22 + $0x50] sm:$0xf] %vm3157_vm1, %v3660_v22  ;;  %v3661_v26 = vpack.c.bf16 %v2798_v8, %v2798_v8  ;;  %v2329_v5 = vpop.f32.mrb[96].mxu0  ;;  %v3792_v0 = vpop.f32.mrb[136].mxu1 }
 0x232   : > { %3181 = vst.msk [vmem:[%s5029_s22 + $0x5c] sm:$0xf] %vm3157_vm1, %v3663_v63  ;;  %v5157_v6 = vadd.f32 %v2329_v5, %v1993_v9  ;;  %v2579_v33 = vadd.f32 %v3792_v0, %v4955_v27  ;;  %v2331_v54 = vpop.f32.mrb[97].mxu0  ;;  %v2570_v30 = vpop.f32.mrb[137].mxu1 }
 0x233   : > { %3179 = vst.msk [vmem:[%s5029_s22 + $0x54] sm:$0xf] %vm3157_vm1, %v3661_v26  ;;  %v2571_v53 = vadd.f32 %v2570_v30, %v4943_v32  ;;  %v2332_v45 = vpop.f32.mrb[98].mxu0  ;;  %v3793_v42 = vpop.f32.mrb[138].mxu1  ;;  %v5423_v32 = vld [vmem:[#allocation3_spill] sm:$0xff]  ;;  %v5426_v30 = vld [vmem:[#allocation6_spill] sm:$0xff] }
 0x234   : > { %v2803_v44 = vmax.f32 %v2579_v33, 0.0  ;;  %v5163_v20 = vadd.f32 %v2332_v45, %v1996_v18  ;;  %v2582_v57 = vadd.f32 %v3793_v42, %v4959_v31  ;;  %v2334_v37 = vpop.f32.mrb[99].mxu0  ;;  %v2573_v10 = vpop.f32.mrb[139].mxu1  ;;  %v2001_v50 = vadd.f32 %v4909_v21, %v5423_v32 }
 0x235   : > { %v2801_v3 = vmax.f32 %v2571_v53, 0.0  ;;  %v2574_v27 = vadd.f32 %v2573_v10, %v4947_v23  ;;  %v2012_v53 = vadd.f32 %v4909_v21, %v5426_v30 }
 0x236   : > { %v3666_v34 = vpack.c.bf16 %v2803_v44, %v2803_v44  ;;  %v2804_v16 = vmax.f32 %v2582_v57, 0.0 }
 0x237   : > { %v3664_v41 = vpack.c.bf16 %v2801_v3, %v2801_v3  ;;  %v2802_v25 = vmax.f32 %v2574_v27, 0.0 }
 0x238   : > { %3184 = vst.msk [vmem:[%s5029_s22 + $0x68] sm:$0xf] %vm3157_vm1, %v3666_v34  ;;  %v3667_v38 = vpack.c.bf16 %v2804_v16, %v2804_v16  ;;  %v5427_v34 = vld [vmem:[#allocation30_spill] sm:$0xff] }
 0x239   : > { %3182 = vst.msk [vmem:[%s5029_s22 + $0x60] sm:$0xf] %vm3157_vm1, %v3664_v41  ;;  %v3665_v31 = vpack.c.bf16 %v2802_v25, %v2802_v25  ;;  %v2337_v12 = vpop.f32.mrb[100].mxu0  ;;  %v3796_v60 = vpop.f32.mrb[140].mxu1 }
 0x23a   : > { %3185 = vst.msk [vmem:[%s5029_s22 + $0x6c] sm:$0xf] %vm3157_vm1, %v3667_v38  ;;  %v5177_v23 = vadd.f32 %v2337_v12, %v2001_v50  ;;  %v2595_v19 = vadd.f32 %v3796_v60, %v4979_v43  ;;  %v2339_v1 = vpop.f32.mrb[101].mxu0  ;;  %v2586_v40 = vpop.f32.mrb[141].mxu1 }
 0x23b   : > { %3183 = vst.msk [vmem:[%s5029_s22 + $0x64] sm:$0xf] %vm3157_vm1, %v3665_v31  ;;  %v2587_v46 = vadd.f32 %v2586_v40, %v4967_v35  ;;  %v2340_v62 = vpop.f32.mrb[102].mxu0  ;;  %v3797_v7 = vpop.f32.mrb[142].mxu1  ;;  %v5425_v35 = vld [vmem:[#allocation5_spill] sm:$0xff] }
 0x23c   : > { %v2807_v61 = vmax.f32 %v2595_v19, 0.0  ;;  %v5183_v17 = vadd.f32 %v2340_v62, %v2004_v49  ;;  %v2598_v11 = vadd.f32 %v3797_v7, %v4983_v47  ;;  %v2342_v22 = vpop.f32.mrb[103].mxu0  ;;  %v2589_v8 = vpop.f32.mrb[143].mxu1  ;;  %v2009_v55 = vadd.f32 %v4909_v21, %v5425_v35 }
 0x23d   : > { %v2805_v9 = vmax.f32 %v2587_v46, 0.0  ;;  %v2590_v43 = vadd.f32 %v2589_v8, %v4971_v39  ;;  %v5430_v46 = vld [vmem:[#allocation8_spill] sm:$0xff] }
 0x23e   : > { %v3670_v63 = vpack.c.bf16 %v2807_v61, %v2807_v61  ;;  %v2808_v26 = vmax.f32 %v2598_v11, 0.0  ;;  %v2020_v62 = vadd.f32 %v4909_v21, %v5430_v46  ;;  %v5434_v46 = vld [vmem:[#allocation12_spill] sm:$0xff] }
 0x23f   : > { %v3668_v5 = vpack.c.bf16 %v2805_v9, %v2805_v9  ;;  %v2806_v0 = vmax.f32 %v2590_v43, 0.0 }
 0x240   : > { %3188 = vst.msk [vmem:[%s5029_s22 + $0x78] sm:$0xf] %vm3157_vm1, %v3670_v63  ;;  %v3671_v18 = vpack.c.bf16 %v2808_v26, %v2808_v26 }
 0x241   : > { %3186 = vst.msk [vmem:[%s5029_s22 + $0x70] sm:$0xf] %vm3157_vm1, %v3668_v5  ;;  %v3669_v47 = vpack.c.bf16 %v2806_v0, %v2806_v0  ;;  %v2345_v33 = vpop.f32.mrb[104].mxu0  ;;  %v3800_v54 = vpop.f32.mrb[144].mxu1 }
 0x242   : > { %3189 = vst.msk [vmem:[%s5029_s22 + $0x7c] sm:$0xf] %vm3157_vm1, %v3671_v18  ;;  %v5197_v39 = vadd.f32 %v2345_v33, %v2009_v55  ;;  %v2611_v45 = vadd.f32 %v3800_v54, %v5003_v59  ;;  %v2347_v42 = vpop.f32.mrb[105].mxu0  ;;  %v2602_v44 = vpop.f32.mrb[145].mxu1  ;;  %v5428_v59 = vld [vmem:[#allocation27_spill] sm:$0xff] }
 0x243   : > { %3187 = vst.msk [vmem:[%s5029_s22 + $0x74] sm:$0xf] %vm3157_vm1, %v3669_v47  ;;  %v2603_v57 = vadd.f32 %v2602_v44, %v4991_v51  ;;  %v2348_v37 = vpop.f32.mrb[106].mxu0  ;;  %v3801_v10 = vpop.f32.mrb[146].mxu1  ;;  %v5429_v51 = vld [vmem:[#allocation7_spill] sm:$0xff]  ;;  %v5432_v44 = vld [vmem:[#allocation10_spill] sm:$0xff] }
 0x244   : > { %v2811_v3 = vmax.f32 %v2611_v45, 0.0  ;;  %v5203_v27 = vadd.f32 %v2348_v37, %v2012_v53  ;;  %v2614_v16 = vadd.f32 %v3801_v10, %v5427_v34  ;;  %v2350_v41 = vpop.f32.mrb[107].mxu0  ;;  %v2605_v25 = vpop.f32.mrb[147].mxu1  ;;  %v2017_v29 = vadd.f32 %v4909_v21, %v5429_v51 }
 0x245   : > { %v2809_v32 = vmax.f32 %v2603_v57, 0.0  ;;  %v2606_v50 = vadd.f32 %v2605_v25, %v5428_v59  ;;  %v2028_v57 = vadd.f32 %v4909_v21, %v5432_v44 }
 0x246   : > { %v3674_v38 = vpack.c.bf16 %v2811_v3, %v2811_v3  ;;  %v2812_v31 = vmax.f32 %v2614_v16, 0.0 }
 0x247   : > { %v3672_v12 = vpack.c.bf16 %v2809_v32, %v2809_v32  ;;  %v2810_v60 = vmax.f32 %v2606_v50, 0.0 }
 0x248   : > { %3192 = vst.msk [vmem:[%s5029_s22 + $0x88] sm:$0xf] %vm3157_vm1, %v3674_v38  ;;  %v3675_v49 = vpack.c.bf16 %v2812_v31, %v2812_v31 }
 0x249   : > { %3190 = vst.msk [vmem:[%s5029_s22 + $0x80] sm:$0xf] %vm3157_vm1, %v3672_v12  ;;  %v3673_v19 = vpack.c.bf16 %v2810_v60, %v2810_v60  ;;  %v2353_v1 = vpop.f32.mrb[108].mxu0  ;;  %v3804_v40 = vpop.f32.mrb[148].mxu1 }
 0x24a   : > { %3193 = vst.msk [vmem:[%s5029_s22 + $0x8c] sm:$0xf] %vm3157_vm1, %v3675_v49  ;;  %v5217_v7 = vadd.f32 %v2353_v1, %v2017_v29  ;;  %v2627_v61 = vadd.f32 %v3804_v40, %v5047_v28  ;;  %v2355_v11 = vpop.f32.mrb[109].mxu0  ;;  %v2618_v22 = vpop.f32.mrb[149].mxu1 }
 0x24b   : > { %3191 = vst.msk [vmem:[%s5029_s22 + $0x84] sm:$0xf] %vm3157_vm1, %v3673_v19  ;;  %v2619_v8 = vadd.f32 %v2618_v22, %v5019_v56  ;;  %v2356_v9 = vpop.f32.mrb[110].mxu0  ;;  %v3805_v43 = vpop.f32.mrb[150].mxu1  ;;  %v5431_v56 = vld [vmem:[#allocation9_spill] sm:$0xff] }
 0x24c   : > { %v2815_v63 = vmax.f32 %v2627_v61, 0.0  ;;  %v5223_v26 = vadd.f32 %v2356_v9, %v2020_v62  ;;  %v2630_v5 = vadd.f32 %v3805_v43, %v5053_v2  ;;  %v2358_v0 = vpop.f32.mrb[111].mxu0  ;;  %v2621_v35 = vpop.f32.mrb[151].mxu1  ;;  %v2025_v30 = vadd.f32 %v4909_v21, %v5431_v56 }
 0x24d   : > { %v2813_v55 = vmax.f32 %v2619_v8, 0.0  ;;  %v2622_v28 = vadd.f32 %v2621_v35, %v5024_v14  ;;  %v2036_v62 = vadd.f32 %v4909_v21, %v5434_v46 }
 0x24e   : > { %v3678_v18 = vpack.c.bf16 %v2815_v63, %v2815_v63  ;;  %v2816_v47 = vmax.f32 %v2630_v5, 0.0 }
 0x24f   : > { %v3676_v33 = vpack.c.bf16 %v2813_v55, %v2813_v55  ;;  %v2814_v54 = vmax.f32 %v2622_v28, 0.0 }
 0x250   : > { %3196 = vst.msk [vmem:[%s5029_s22 + $0x98] sm:$0xf] %vm3157_vm1, %v3678_v18  ;;  %v3679_v53 = vpack.c.bf16 %v2816_v47, %v2816_v47 }
 0x251   : > { %3194 = vst.msk [vmem:[%s5029_s22 + $0x90] sm:$0xf] %vm3157_vm1, %v3676_v33  ;;  %v3677_v2 = vpack.c.bf16 %v2814_v54, %v2814_v54  ;;  %v2361_v45 = vpop.f32.mrb[112].mxu0  ;;  %v3808_v42 = vpop.f32.mrb[152].mxu1 }
 0x252   : > { %3197 = vst.msk [vmem:[%s5029_s22 + $0x9c] sm:$0xf] %vm3157_vm1, %v3679_v53  ;;  %v5237_v14 = vadd.f32 %v2361_v45, %v2025_v30  ;;  %v2643_v37 = vadd.f32 %v3808_v42, %v5095_v15  ;;  %v2363_v10 = vpop.f32.mrb[113].mxu0  ;;  %v2634_v3 = vpop.f32.mrb[153].mxu1  ;;  %v5436_v45 = vld [vmem:[#allocation14_spill] sm:$0xff] }
 0x253   : > { %3195 = vst.msk [vmem:[%s5029_s22 + $0x94] sm:$0xf] %vm3157_vm1, %v3677_v2  ;;  %v2635_v34 = vadd.f32 %v2634_v3, %v5071_v13  ;;  %v2364_v16 = vpop.f32.mrb[114].mxu0  ;;  %v3809_v41 = vpop.f32.mrb[154].mxu1  ;;  %v5433_v13 = vld [vmem:[#allocation11_spill] sm:$0xff]  ;;  %v2044_v42 = vadd.f32 %v4909_v21, %v5436_v45 }
 0x254   : > { %v2819_v25 = vmax.f32 %v2643_v37, 0.0  ;;  %v5243_v32 = vadd.f32 %v2364_v16, %v2028_v57  ;;  %v2646_v59 = vadd.f32 %v3809_v41, %v5101_v52  ;;  %v2366_v50 = vpop.f32.mrb[115].mxu0  ;;  %v2637_v38 = vpop.f32.mrb[155].mxu1  ;;  %v2033_v49 = vadd.f32 %v4909_v21, %v5433_v13 }
 0x255   : > { %v2817_v31 = vmax.f32 %v2635_v34, 0.0  ;;  %v2638_v15 = vadd.f32 %v2637_v38, %v5077_v36 }
 0x256   : > { %v3682_v12 = vpack.c.bf16 %v2819_v25, %v2819_v25  ;;  %v2820_v60 = vmax.f32 %v2646_v59, 0.0 }
 0x257   : > { %v3680_v51 = vpack.c.bf16 %v2817_v31, %v2817_v31  ;;  %v2818_v29 = vmax.f32 %v2638_v15, 0.0 }
 0x258   : > { %3200 = vst.msk [vmem:[%s5029_s22 + $0xa8] sm:$0xf] %vm3157_vm1, %v3682_v12  ;;  %v3683_v19 = vpack.c.bf16 %v2820_v60, %v2820_v60 }
 0x259   : > { %3198 = vst.msk [vmem:[%s5029_s22 + $0xa0] sm:$0xf] %vm3157_vm1, %v3680_v51  ;;  %v3681_v52 = vpack.c.bf16 %v2818_v29, %v2818_v29  ;;  %v2369_v1 = vpop.f32.mrb[116].mxu0  ;;  %v3812_v40 = vpop.f32.mrb[156].mxu1 }
 0x25a   : > { %3201 = vst.msk [vmem:[%s5029_s22 + $0xac] sm:$0xf] %vm3157_vm1, %v3683_v19  ;;  %v5257_v36 = vadd.f32 %v2369_v1, %v2033_v49  ;;  %v2659_v61 = vadd.f32 %v3812_v40, %v5137_v24  ;;  %v2371_v11 = vpop.f32.mrb[117].mxu0  ;;  %v2650_v22 = vpop.f32.mrb[157].mxu1  ;;  %v5438_v19 = vld [vmem:[#allocation16_spill] sm:$0xff] }
 0x25b   : > { %3199 = vst.msk [vmem:[%s5029_s22 + $0xa4] sm:$0xf] %vm3157_vm1, %v3681_v52  ;;  %v2651_v8 = vadd.f32 %v2650_v22, %v5119_v48  ;;  %v2372_v9 = vpop.f32.mrb[118].mxu0  ;;  %v3813_v43 = vpop.f32.mrb[158].mxu1  ;;  %v5435_v48 = vld [vmem:[#allocation13_spill] sm:$0xff]  ;;  %v2052_v52 = vadd.f32 %v4909_v21, %v5438_v19 }
 0x25c   : > { %v2823_v63 = vmax.f32 %v2659_v61, 0.0  ;;  %v5263_v5 = vadd.f32 %v2372_v9, %v2036_v62  ;;  %v2662_v0 = vadd.f32 %v3813_v43, %v5143_v4  ;;  %v2374_v35 = vpop.f32.mrb[119].mxu0  ;;  %v2653_v55 = vpop.f32.mrb[159].mxu1  ;;  %v2041_v56 = vadd.f32 %v4909_v21, %v5435_v48  ;;  %v5440_v48 = vld [vmem:[#allocation18_spill] sm:$0xff] }
 0x25d   : > { %v2821_v28 = vmax.f32 %v2651_v8, 0.0  ;;  %v2654_v24 = vadd.f32 %v2653_v55, %v5125_v58 }
 0x25e   : > { %v3686_v18 = vpack.c.bf16 %v2823_v63, %v2823_v63  ;;  %v2824_v47 = vmax.f32 %v2662_v0, 0.0 }
 0x25f   : > { %v3684_v33 = vpack.c.bf16 %v2821_v28, %v2821_v28  ;;  %v2822_v54 = vmax.f32 %v2654_v24, 0.0 }
 0x260   : > { %3204 = vst.msk [vmem:[%s5029_s22 + $0xb8] sm:$0xf] %vm3157_vm1, %v3686_v18  ;;  %v3687_v30 = vpack.c.bf16 %v2824_v47, %v2824_v47  ;;  %v5439_v18 = vld [vmem:[#allocation17_spill] sm:$0xff] }
 0x261   : > { %3202 = vst.msk [vmem:[%s5029_s22 + $0xb0] sm:$0xf] %vm3157_vm1, %v3684_v33  ;;  %v3685_v4 = vpack.c.bf16 %v2822_v54, %v2822_v54  ;;  %v2377_v53 = vpop.f32.mrb[120].mxu0  ;;  %v3816_v2 = vpop.f32.mrb[160].mxu1 }
 0x262   : > { %3205 = vst.msk [vmem:[%s5029_s22 + $0xbc] sm:$0xf] %vm3157_vm1, %v3687_v30  ;;  %v5277_v58 = vadd.f32 %v2377_v53, %v2041_v56  ;;  %v2675_v44 = vadd.f32 %v3816_v2, %v5177_v23  ;;  %v2379_v57 = vpop.f32.mrb[121].mxu0  ;;  %v2666_v37 = vpop.f32.mrb[161].mxu1 }
 0x263   : > { %3203 = vst.msk [vmem:[%s5029_s22 + $0xb4] sm:$0xf] %vm3157_vm1, %v3685_v4  ;;  %v2667_v10 = vadd.f32 %v2666_v37, %v5157_v6  ;;  %v2380_v3 = vpop.f32.mrb[122].mxu0  ;;  %v3817_v34 = vpop.f32.mrb[162].mxu1  ;;  %v5437_v6 = vld [vmem:[#allocation15_spill] sm:$0xff] }
 0x264   : > { %v2827_v16 = vmax.f32 %v2675_v44, 0.0  ;;  %v5283_v41 = vadd.f32 %v2380_v3, %v2044_v42  ;;  %v2678_v25 = vadd.f32 %v3817_v34, %v5183_v17  ;;  %v2382_v59 = vpop.f32.mrb[123].mxu0  ;;  %v2669_v50 = vpop.f32.mrb[163].mxu1  ;;  %v2049_v51 = vadd.f32 %v4909_v21, %v5437_v6 }
 0x265   : > { %v2825_v38 = vmax.f32 %v2667_v10, 0.0  ;;  %v2670_v23 = vadd.f32 %v2669_v50, %v5163_v20 }
 0x266   : > { %v3690_v31 = vpack.c.bf16 %v2827_v16, %v2827_v16  ;;  %v2828_v15 = vmax.f32 %v2678_v25, 0.0 }
 0x267   : > { %v3688_v12 = vpack.c.bf16 %v2825_v38, %v2825_v38  ;;  %v2826_v60 = vmax.f32 %v2670_v23, 0.0  ;;  %v5441_v38 = vld [vmem:[#allocation19_spill] sm:$0xff] }
 0x268   : > { %3208 = vst.msk [vmem:[%s5029_s22 + $0xc8] sm:$0xf] %vm3157_vm1, %v3690_v31  ;;  %v3691_v29 = vpack.c.bf16 %v2828_v15, %v2828_v15 }
 0x269   : > { %3206 = vst.msk [vmem:[%s5029_s22 + $0xc0] sm:$0xf] %vm3157_vm1, %v3688_v12  ;;  %v3689_v17 = vpack.c.bf16 %v2826_v60, %v2826_v60  ;;  %v2385_v13 = vpop.f32.mrb[124].mxu0  ;;  %v3820_v49 = vpop.f32.mrb[164].mxu1  ;;  %v5442_v12 = vld [vmem:[#allocation20_spill] sm:$0xff] }
 0x26a   : > { %3209 = vst.msk [vmem:[%s5029_s22 + $0xcc] sm:$0xf] %vm3157_vm1, %v3691_v29  ;;  %v2386_v20 = vadd.f32 %v2385_v13, %v2049_v51  ;;  %v2691_v1 = vadd.f32 %v3820_v49, %v5217_v7  ;;  %v2387_v40 = vpop.f32.mrb[125].mxu0  ;;  %v2682_v46 = vpop.f32.mrb[165].mxu1 }
 0x26b   : > { %3207 = vst.msk [vmem:[%s5029_s22 + $0xc4] sm:$0xf] %vm3157_vm1, %v3689_v17  ;;  %v2683_v62 = vadd.f32 %v2682_v46, %v5197_v39  ;;  %v2388_v61 = vpop.f32.mrb[126].mxu0  ;;  %v3821_v11 = vpop.f32.mrb[166].mxu1  ;;  %v2057_v39 = vadd.f32 %v4909_v21, %v5439_v18 }
 0x26c   : > { %v2831_v22 = vmax.f32 %v2691_v1, 0.0  ;;  %v2389_v8 = vadd.f32 %v2388_v61, %v2052_v52  ;;  %v2694_v9 = vadd.f32 %v3821_v11, %v5223_v26  ;;  %v2390_v43 = vpop.f32.mrb[127].mxu0  ;;  %v2685_v63 = vpop.f32.mrb[167].mxu1 }
 0x26d   : > { %v2829_v0 = vmax.f32 %v2683_v62, 0.0  ;;  %v2686_v7 = vadd.f32 %v2685_v63, %v5203_v27  ;;  %v5312_v27 = vld [vmem:[%s5391_s2] ss:$0 sm:$0xff]  ;;  %v5443_v43 = vld [vmem:[#allocation21_spill] sm:$0xff] }
 0x26e   : > { %v3694_v35 = vpack.c.bf16 %v2831_v22, %v2831_v22  ;;  %v2832_v55 = vmax.f32 %v2694_v9, 0.0  ;;  %v2060_v56 = vadd.f32 %v5312_v27, %v5440_v48  ;;  %v2068_v60 = vadd.f32 %v5312_v27, %v5442_v12 }
 0x26f   : > { %v3692_v28 = vpack.c.bf16 %v2829_v0, %v2829_v0  ;;  %v2830_v24 = vmax.f32 %v2686_v7, 0.0 }
 0x270   : > { %3212 = vst.msk [vmem:[%s5029_s22 + $0xd8] sm:$0xf] %vm3157_vm1, %v3694_v35  ;;  %v3695_v47 = vpack.c.bf16 %v2832_v55, %v2832_v55  ;;  %v5444_v35 = vld [vmem:[#allocation22_spill] sm:$0xff] }
 0x271   : > { %3210 = vst.msk [vmem:[%s5029_s22 + $0xd0] sm:$0xf] %vm3157_vm1, %v3692_v28  ;;  %v3693_v26 = vpack.c.bf16 %v2830_v24, %v2830_v24  ;;  %v2393_v33 = vpop.f32.mrb[128].mxu0  ;;  %v3824_v54 = vpop.f32.mrb[168].mxu1  ;;  %v2076_v55 = vadd.f32 %v5312_v27, %v5444_v35 }
 0x272   : > { %3213 = vst.msk [vmem:[%s5029_s22 + $0xdc] sm:$0xf] %vm3157_vm1, %v3695_v47  ;;  %v2394_v30 = vadd.f32 %v2393_v33, %v2057_v39  ;;  %v2707_v21 = vadd.f32 %v3824_v54, %v5257_v36  ;;  %v2395_v4 = vpop.f32.mrb[129].mxu0  ;;  %v2698_v53 = vpop.f32.mrb[169].mxu1 }
 0x273   : > { %3211 = vst.msk [vmem:[%s5029_s22 + $0xd4] sm:$0xf] %vm3157_vm1, %v3693_v26  ;;  %v2699_v2 = vadd.f32 %v2698_v53, %v5237_v14  ;;  %v2396_v45 = vpop.f32.mrb[130].mxu0  ;;  %v3825_v42 = vpop.f32.mrb[170].mxu1  ;;  %v2065_v14 = vadd.f32 %v5312_v27, %v5441_v38 }
 0x274   : > { %v2835_v44 = vmax.f32 %v2707_v21, 0.0  ;;  %v2397_v57 = vadd.f32 %v2396_v45, %v2060_v56  ;;  %v2710_v37 = vadd.f32 %v3825_v42, %v5263_v5  ;;  %v2398_v10 = vpop.f32.mrb[131].mxu0  ;;  %v2701_v3 = vpop.f32.mrb[171].mxu1 }
 0x275   : > { %v2833_v34 = vmax.f32 %v2699_v2, 0.0  ;;  %v2702_v36 = vadd.f32 %v2701_v3, %v5243_v32 }
 0x276   : > { %v3698_v16 = vpack.c.bf16 %v2835_v44, %v2835_v44  ;;  %v2836_v25 = vmax.f32 %v2710_v37, 0.0  ;;  %v5445_v37 = vld [vmem:[#allocation23_spill] sm:$0xff] }
 0x277   : > { %v3696_v59 = vpack.c.bf16 %v2833_v34, %v2833_v34  ;;  %v2834_v50 = vmax.f32 %v2702_v36, 0.0  ;;  %v2081_v10 = vadd.f32 %v5312_v27, %v5445_v37 }
 0x278   : > { %3216 = vst.msk [vmem:[%s5029_s22 + $0xe8] sm:$0xf] %vm3157_vm1, %v3698_v16  ;;  %v3699_v23 = vpack.c.bf16 %v2836_v25, %v2836_v25  ;;  %v5446_v16 = vld [vmem:[#allocation24_spill] sm:$0xff] }
 0x279   : > { %3214 = vst.msk [vmem:[%s5029_s22 + $0xe0] sm:$0xf] %vm3157_vm1, %v3696_v59  ;;  %v3697_v5 = vpack.c.bf16 %v2834_v50, %v2834_v50  ;;  %v2401_v31 = vpop.f32.mrb[132].mxu0  ;;  %v3828_v15 = vpop.f32.mrb[172].mxu1  ;;  %v2084_v25 = vadd.f32 %v5312_v27, %v5446_v16 }
 0x27a   : > { %3217 = vst.msk [vmem:[%s5029_s22 + $0xec] sm:$0xf] %vm3157_vm1, %v3699_v23  ;;  %v2402_v32 = vadd.f32 %v2401_v31, %v2065_v14  ;;  %v2723_v6 = vadd.f32 %v3828_v15, %v2386_v20  ;;  %v2403_v51 = vpop.f32.mrb[133].mxu0  ;;  %v2714_v29 = vpop.f32.mrb[173].mxu1 }
 0x27b   : > { %3215 = vst.msk [vmem:[%s5029_s22 + $0xe4] sm:$0xf] %vm3157_vm1, %v3697_v5  ;;  %v2715_v17 = vadd.f32 %v2714_v29, %v5277_v58  ;;  %v2404_v13 = vpop.f32.mrb[134].mxu0  ;;  %v3829_v49 = vpop.f32.mrb[174].mxu1  ;;  %v2073_v58 = vadd.f32 %v5312_v27, %v5443_v43 }
 0x27c   : > { %v2839_v19 = vmax.f32 %v2723_v6, 0.0  ;;  %v2405_v52 = vadd.f32 %v2404_v13, %v2068_v60  ;;  %v2726_v1 = vadd.f32 %v3829_v49, %v2389_v8  ;;  %v2406_v40 = vpop.f32.mrb[135].mxu0  ;;  %v2717_v46 = vpop.f32.mrb[175].mxu1  ;;  %v5447_v13 = vld [vmem:[#allocation25_spill] sm:$0xff] }
 0x27d   : > { %v2837_v62 = vmax.f32 %v2715_v17, 0.0  ;;  %v2718_v61 = vadd.f32 %v2717_v46, %v5283_v41  ;;  %v2089_v49 = vadd.f32 %v5312_v27, %v5447_v13 }
 0x27e   : > { %v3702_v20 = vpack.c.bf16 %v2839_v19, %v2839_v19  ;;  %v2840_v11 = vmax.f32 %v2726_v1, 0.0 }
 0x27f   : > { %v3700_v22 = vpack.c.bf16 %v2837_v62, %v2837_v62  ;;  %v2838_v9 = vmax.f32 %v2718_v61, 0.0  ;;  %v5448_v62 = vld [vmem:[#allocation26_spill] sm:$0xff] }
 0x280   : > { %3220 = vst.msk [vmem:[%s5029_s22 + $0xf8] sm:$0xf] %vm3157_vm1, %v3702_v20  ;;  %v3703_v63 = vpack.c.bf16 %v2840_v11, %v2840_v11  ;;  %v2092_v61 = vadd.f32 %v5312_v27, %v5448_v62 }
 0x281   : > { %3218 = vst.msk [vmem:[%s5029_s22 + $0xf0] sm:$0xf] %vm3157_vm1, %v3700_v22  ;;  %v3701_v8 = vpack.c.bf16 %v2838_v9, %v2838_v9  ;;  %v2409_v0 = vpop.f32.mrb[136].mxu0  ;;  %v3832_v7 = vpop.f32.mrb[176].mxu1 }
 0x282   : > { %3221 = vst.msk [vmem:[%s5029_s22 + $0xfc] sm:$0xf] %vm3157_vm1, %v3703_v63  ;;  %v2410_v41 = vadd.f32 %v2409_v0, %v2073_v58  ;;  %v2739_v28 = vadd.f32 %v3832_v7, %v2402_v32  ;;  %v2411_v24 = vpop.f32.mrb[137].mxu0  ;;  %v2730_v18 = vpop.f32.mrb[177].mxu1 }
 0x283   : > { %3219 = vst.msk [vmem:[%s5029_s22 + $0xf4] sm:$0xf] %vm3157_vm1, %v3701_v8  ;;  %v2731_v39 = vadd.f32 %v2730_v18, %v2394_v30  ;;  %v2412_v47 = vpop.f32.mrb[138].mxu0  ;;  %v3833_v26 = vpop.f32.mrb[178].mxu1 }
 0x284   : > { %v2843_v33 = vmax.f32 %v2739_v28, 0.0  ;;  %v2413_v54 = vadd.f32 %v2412_v47, %v2076_v55  ;;  %v2742_v48 = vadd.f32 %v3833_v26, %v2405_v52  ;;  %v2414_v56 = vpop.f32.mrb[139].mxu0  ;;  %v2733_v21 = vpop.f32.mrb[179].mxu1  ;;  %v5450_v47 = vld [vmem:[#allocation29_spill] sm:$0xff] }
 0x285   : > { %v2841_v4 = vmax.f32 %v2731_v39, 0.0  ;;  %v2734_v53 = vadd.f32 %v2733_v21, %v2397_v57  ;;  %v2100_v26 = vadd.f32 %v5312_v27, %v5450_v47 }
 0x286   : > { %v3706_v2 = vpack.c.bf16 %v2843_v33, %v2843_v33  ;;  %v2844_v45 = vmax.f32 %v2742_v48, 0.0 }
 0x287   : > { %v3704_v42 = vpack.c.bf16 %v2841_v4, %v2841_v4  ;;  %v2842_v44 = vmax.f32 %v2734_v53, 0.0 }
 0x288   : > { %3224 = vst.msk [vmem:[%s5029_s22 + $0x108] sm:$0xf] %vm3157_vm1, %v3706_v2  ;;  %v3707_v30 = vpack.c.bf16 %v2844_v45, %v2844_v45 }
 0x289   : > { %3222 = vst.msk [vmem:[%s5029_s22 + $0x100] sm:$0xf] %vm3157_vm1, %v3704_v42  ;;  %v3705_v3 = vpack.c.bf16 %v2842_v44, %v2842_v44  ;;  %v2417_v34 = vpop.f32.mrb[140].mxu0  ;;  %v3836_v36 = vpop.f32.mrb[180].mxu1 }
 0x28a   : > { %3225 = vst.msk [vmem:[%s5029_s22 + $0x10c] sm:$0xf] %vm3157_vm1, %v3707_v30  ;;  %v2418_v57 = vadd.f32 %v2417_v34, %v2081_v10  ;;  %v2419_v59 = vpop.f32.mrb[141].mxu0  ;;  %v2746_v50 = vpop.f32.mrb[181].mxu1 }
 0x28b   : > { %3223 = vst.msk [vmem:[%s5029_s22 + $0x104] sm:$0xf] %vm3157_vm1, %v3705_v3  ;;  %v2747_v38 = vadd.f32 %v2746_v50, %v2410_v41  ;;  %v2420_v14 = vpop.f32.mrb[142].mxu0  ;;  %v3837_v23 = vpop.f32.mrb[182].mxu1  ;;  %v5449_v41 = vld [vmem:[#allocation28_spill] sm:$0xff] }
 0x28c   : > { %v2755_v5 = vadd.f32 %v3836_v36, %v2418_v57  ;;  %v2421_v31 = vadd.f32 %v2420_v14, %v2084_v25  ;;  %v2422_v15 = vpop.f32.mrb[143].mxu0  ;;  %v2749_v12 = vpop.f32.mrb[183].mxu1  ;;  %v2097_v28 = vadd.f32 %v5312_v27, %v5449_v41 }
 0x28d   : > { %v2845_v60 = vmax.f32 %v2747_v38, 0.0  ;;  %v2750_v32 = vadd.f32 %v2749_v12, %v2413_v54 }
 0x28e   : > { %v2847_v6 = vmax.f32 %v2755_v5, 0.0  ;;  %v2758_v51 = vadd.f32 %v3837_v23, %v2421_v31 }
 0x28f   : > { %v3708_v29 = vpack.c.bf16 %v2845_v60, %v2845_v60  ;;  %v2846_v17 = vmax.f32 %v2750_v32, 0.0 }
 0x290   : > { %v3710_v19 = vpack.c.bf16 %v2847_v6, %v2847_v6  ;;  %v2848_v52 = vmax.f32 %v2758_v51, 0.0 }
 0x291   : > { %3226 = vst.msk [vmem:[%s5029_s22 + $0x110] sm:$0xf] %vm3157_vm1, %v3708_v29  ;;  %v3709_v1 = vpack.c.bf16 %v2846_v17, %v2846_v17  ;;  %v2425_v40 = vpop.f32.mrb[144].mxu0  ;;  %v3840_v46 = vpop.f32.mrb[184].mxu1 }
 0x292   : > { %3228 = vst.msk [vmem:[%s5029_s22 + $0x118] sm:$0xf] %vm3157_vm1, %v3710_v19  ;;  %v3711_v20 = vpack.c.bf16 %v2848_v52, %v2848_v52  ;;  %v2426_v11 = vadd.f32 %v2425_v40, %v2089_v49  ;;  %v2427_v22 = vpop.f32.mrb[145].mxu0  ;;  %v2762_v9 = vpop.f32.mrb[185].mxu1 }
 0x293   : > { %3227 = vst.msk [vmem:[%s5029_s22 + $0x114] sm:$0xf] %vm3157_vm1, %v3709_v1  ;;  %v2428_v43 = vpop.f32.mrb[146].mxu0  ;;  %v3841_v58 = vpop.f32.mrb[186].mxu1 }
 0x294   : > { %3229 = vst.msk [vmem:[%s5029_s22 + $0x11c] sm:$0xf] %vm3157_vm1, %v3711_v20  ;;  %v2429_v63 = vadd.f32 %v2428_v43, %v2092_v61  ;;  %v2763_v8 = vadd.f32 %v2762_v9, %v2426_v11  ;;  %v2430_v0 = vpop.f32.mrb[147].mxu0  ;;  %v2765_v7 = vpop.f32.mrb[187].mxu1 }
 0x296   : > { %v2849_v35 = vmax.f32 %v2763_v8, 0.0  ;;  %v2766_v55 = vadd.f32 %v2765_v7, %v2429_v63 }
 0x298   : > { %v3712_v24 = vpack.c.bf16 %v2849_v35, %v2849_v35  ;;  %v2850_v18 = vmax.f32 %v2766_v55, 0.0 }
 0x299   : > { %v2433_v39 = vpop.f32.mrb[148].mxu0 }
 0x29a   : > { %3230 = vst.msk [vmem:[%s5029_s22 + $0x120] sm:$0xf] %vm3157_vm1, %v3712_v24  ;;  %v3713_v33 = vpack.c.bf16 %v2850_v18, %v2850_v18  ;;  %v2434_v54 = vadd.f32 %v2433_v39, %v2097_v28  ;;  %v2435_v48 = vpop.f32.mrb[149].mxu0 }
 0x29b   : > { %v2436_v56 = vpop.f32.mrb[150].mxu0 }
 0x29c   : > { %3231 = vst.msk [vmem:[%s5029_s22 + $0x124] sm:$0xf] %vm3157_vm1, %v3713_v33  ;;  %v2771_v21 = vadd.f32 %v3840_v46, %v2434_v54  ;;  %v2437_v4 = vadd.f32 %v2436_v56, %v2100_v26  ;;  %v2438_v53 = vpop.f32.mrb[151].mxu0 }
 0x29e   : > { %v2851_v2 = vmax.f32 %v2771_v21, 0.0  ;;  %v2774_v45 = vadd.f32 %v3841_v58, %v2437_v4 }
 0x2a0   : > { %v3714_v42 = vpack.c.bf16 %v2851_v2, %v2851_v2  ;;  %v2852_v44 = vmax.f32 %v2774_v45, 0.0 }
 0x2a2   : > { %3232 = vst.msk [vmem:[%s5029_s22 + $0x128] sm:$0xf] %vm3157_vm1, %v3714_v42  ;;  %v3715_v37 = vpack.c.bf16 %v2852_v44, %v2852_v44 }
 0x2a4   : > { %3233 = vst.msk [vmem:[%s5029_s22 + $0x12c] sm:$0xf] %vm3157_vm1, %v3715_v37 }
 0x2a5 PF: > { %s13_s12 = sadd.s32 1, %s4365_s12  }
 0x2a6   : > { %p10_p4 = scmp.ge.s32.totalorder %s13_s12, 4  }
 0x2a8   :  { %12 = sbr.rel (!%p10_p4) target bundleno = 1 (0x1), region = 62 }

// kernel: forward.8
= control target key start
LH: loop header
LB: loop body
LE: loop exit
PB: predicated region body
PF: predicated region fallthrough
CT: control target
= control target key end

     0   :  { %s2475_s12 = smov 0   ;;  %s2477_s13 = smov 0   ;;  %s2960_s0 = inlined_call_operand.vmem [shape: bf16[360,576], index: 0, kind: input, shape index: {}]   ;;  %s2961_s1 = inlined_call_operand.vmem [shape: bf16[576,64], index: 1, kind: input, shape index: {}]   ;;  %s2962_s2 = inlined_call_operand.vmem [shape: f32[1,64], index: 2, kind: input, shape index: {}]   ;;  %s2963_s3 = inlined_call_operand.vmem [shape: bf16[360,64], index: 3, kind: output, shape index: {}]  }
   0x1   :  { %s2479_s14 = smov 0  }
   0x2 LB: > { %s2488_s15 = sadd.s32 4294967295, %s2421_s14   ;;  %s2490_s16 = sadd.s32 1, %s2421_s14   ;;  %s2421_s14 = sphi %s2479_s14, %s2970_s14   ;;  %s2417_s13 = sphi %s2477_s13, %s2969_s13   ;;  %s2413_s12 = sphi %s2475_s12, %s2968_s12  }
   0x3   : > { %s85_s17 = ssub.s32 %s2421_s14, %s2490_s16  ;;  %s88_s18 = sadd.s32 1, %s2417_s13 }
   0x4   : > { %p86_p0 = scmp.eq.s32.totalorder %s85_s17, 0  ;;  %p98_p1 = scmp.ne.s32.totalorder %s2417_s13, %s2413_s12 }
   0x5   : > { %p99_p2 = scmp.eq.s32.totalorder %s2488_s15, 1  ;;  %p1748_p3 = scmp.ge.s32.totalorder %s2421_s14, 1 }
   0x6   : > { %s2498_s19 = scalar_select %p86_p0, %s2417_s13, %s88_s18  }
   0x7   : > { %p2500_p4 = por %p99_p2, %p98_p1  ;;  %p149_p5 = scmp.lt.s32.totalorder %s2421_s14, 3 }
   0x9   : > { %p150_p6 = pnand %p1748_p3, %p149_p5 }
   0xa   : > { %v2243_v0 = vld [vmem:[%s2961_s1 + $0x40] sm:$0xff] (!%p150_p6)   ;;  %v2247_v4 = vld [vmem:[%s2961_s1 + $0x48] sm:$0xff] (!%p150_p6)   ;;  %v2251_v8 = vld [vmem:[%s2961_s1 + $0x50] sm:$0xff] (!%p150_p6)   ;;  %s2547_s28 = smul.u32 (!%p150_p6), 24, %s2488_s15  ;;  %vm868_vm0 = vcmask (!%p150_p6), 523264   ;;  %s175_s17 = sand.u32 (!%p150_p6), 1, %s2413_s12  }
   0xb   : > { %153 = sbr.rel (%p150_p6) target bundleno = 456 (0x1c8), region = 32  ;;  %v2244_v1 = vld [vmem:[%s2961_s1 + $0xc0] sm:$0xff] (!%p150_p6)   ;;  %1920 = vmatprep.subr.bf16.mxu0 (!%p150_p6), %v2243_v0  ;;  %v2248_v5 = vld [vmem:[%s2961_s1 + $0xc8] sm:$0xff] (!%p150_p6)   ;;  %v2252_v9 = vld [vmem:[%s2961_s1 + $0xd0] sm:$0xff] (!%p150_p6)   ;;  %vm1412_vm1 = vcmask (!%p150_p6), 519168  }
   0xc   : > { %v2245_v2 = vld [vmem:[%s2961_s1] sm:$0xff] (!%p150_p6)   ;;  %2008 = vmatprep.subr.bf16.mxu1 (!%p150_p6), %v2244_v1  ;;  %v2249_v6 = vld [vmem:[%s2961_s1 + $0x8] sm:$0xff] (!%p150_p6)   ;;  %v2253_v10 = vld [vmem:[%s2961_s1 + $0x10] sm:$0xff] (!%p150_p6)   ;;  %p184_p7 = scmp.lt.s32.totalorder (!%p150_p6), %s2547_s28, 44  ;;  %s2152_s18 = smul.u32 (!%p150_p6), 96, %s175_s17 }
   0xd   : > { %v2246_v3 = vld [vmem:[%s2961_s1 + $0x80] sm:$0xff] (!%p150_p6)   ;;  %1921 = vmatpush3.bf16.msra.mxu0 (!%p150_p6), %v2245_v2  ;;  %v2250_v7 = vld [vmem:[%s2961_s1 + $0x88] sm:$0xff] (!%p150_p6)   ;;  %v2254_v11 = vld [vmem:[%s2961_s1 + $0x90] sm:$0xff] (!%p150_p6)  }
   0xe   : > { %2009 = vmatpush3.bf16.msra.mxu1 (!%p150_p6), %v2246_v3  ;;  %1922 = vmatprep.subr.bf16.mxu0 (!%p150_p6), %v2247_v4  ;;  %v2255_v12 = vld [vmem:[%s2961_s1 + $0x58] sm:$0xff] (!%p150_p6)   ;;  %v2259_v16 = vld [vmem:[%s2961_s1 + $0x60] sm:$0xff] (!%p150_p6)   ;;  %v2263_v20 = vld [vmem:[%s2961_s1 + $0x68] sm:$0xff] (!%p150_p6)   ;;  %s2780_s12 = scalar_lea.vmem (!%p150_p6), [#allocation2], %s2152_s18  }
   0xf   : > { %2010 = vmatprep.subr.bf16.mxu1 (!%p150_p6), %v2248_v5  ;;  %v2256_v13 = vld [vmem:[%s2961_s1 + $0xd8] sm:$0xff] (!%p150_p6)   ;;  %v2260_v17 = vld [vmem:[%s2961_s1 + $0xe0] sm:$0xff] (!%p150_p6)   ;;  %v2264_v21 = vld [vmem:[%s2961_s1 + $0xe8] sm:$0xff] (!%p150_p6)  }
  0x10   : > { %v2257_v14 = vld [vmem:[%s2961_s1 + $0x18] sm:$0xff] (!%p150_p6)   ;;  %v2261_v18 = vld [vmem:[%s2961_s1 + $0x20] sm:$0xff] (!%p150_p6)   ;;  %v2265_v22 = vld [vmem:[%s2961_s1 + $0x28] sm:$0xff] (!%p150_p6)  }
  0x11   : > { %1923 = vmatpush3.bf16.msra.mxu0 (!%p150_p6), %v2249_v6  ;;  %v2258_v15 = vld [vmem:[%s2961_s1 + $0x98] sm:$0xff] (!%p150_p6)   ;;  %v2262_v19 = vld [vmem:[%s2961_s1 + $0xa0] sm:$0xff] (!%p150_p6)   ;;  %v2266_v23 = vld [vmem:[%s2961_s1 + $0xa8] sm:$0xff] (!%p150_p6)  }
  0x12   : > { %2011 = vmatpush3.bf16.msra.mxu1 %v2250_v7  ;;  %1924 = vmatprep.subr.bf16.mxu0 %v2251_v8  ;;  %s185_s24 = scalar_select %p184_p7, %s2547_s28, 44  ;;  %v2267_v24 = vld [vmem:[%s2961_s1 + $0x70] sm:$0xff]   ;;  %v2271_v28 = vld [vmem:[%s2961_s1 + $0x78] sm:$0xff]   ;;  %v2281_v36 = vld [vmem:[%s2961_s1 + $0x100] sm:$0xff]  }
  0x13   : > { %2012 = vmatprep.subr.bf16.mxu1 %v2252_v9  ;;  %v2268_v25 = vld [vmem:[%s2961_s1 + $0xf0] sm:$0xff]   ;;  %v2272_v29 = vld [vmem:[%s2961_s1 + $0xf8] sm:$0xff]   ;;  %v2300_v43 = vld [vmem:[%s2961_s1 + $0x108] sm:$0xff]   ;;  %s1445_s21 = ssub.s32 (%p2500_p4), 45, %s2547_s28  ;;  %s1919_s22 = smul.u32 (%p2500_p4), 96, %s2488_s15 }
  0x14   : > { %s2153_s7 = smul.u32 20, %s185_s24  ;;  %v2269_v26 = vld [vmem:[%s2961_s1 + $0x30] sm:$0xff]   ;;  %v2273_v30 = vld [vmem:[%s2961_s1 + $0x38] sm:$0xff]   ;;  %p1446_p8 = scmp.lt.s32.totalorder (%p2500_p4), %s1445_s21, 24 }
  0x15   : > { %1925 = vmatpush3.bf16.msra.mxu0 %v2253_v10  ;;  %v2270_v27 = vld [vmem:[%s2961_s1 + $0xb0] sm:$0xff]   ;;  %v2274_v31 = vld [vmem:[%s2961_s1 + $0xb8] sm:$0xff]   ;;  %s2853_s25 = scalar_lea.vmem (%p2500_p4), %s2963_s3, %s1919_s22  }
  0x16   : > { %2013 = vmatpush3.bf16.msra.mxu1 %v2254_v11  ;;  %1926 = vmatprep.subr.bf16.mxu0 %v2255_v12  ;;  %s2602_s24 = scalar_lea.vmem %s2960_s0, %s2153_s7  ;;  %v2319_v48 = vld [vmem:[%s2961_s1 + $0x110] sm:$0xff]   ;;  %v2338_v53 = vld [vmem:[%s2961_s1 + $0x118] sm:$0xff]  }
  0x17   : > { %2014 = vmatprep.subr.bf16.mxu1 %v2256_v13  ;;  %v2275_v32 = vld [vmem:[%s2602_s24] ss:$20 sps:$4 sm:$0xff]   ;;  %v2277_v33 = vld [vmem:[%s2602_s24 + $0x4] ss:$20 sps:$4 sm:$0xff]   ;;  %v2278_v34 = vld [vmem:[%s2602_s24 + $0x8] ss:$20 sps:$4 sm:$0xff]  }
  0x18   : > { %v2280_v35 = vld [vmem:[%s2602_s24 + $0xc] ss:$20 sps:$4 sm:$0xff]   ;;  %937 = vmatprep.mubr.bf16.mxu0 %v2277_v33  ;;  %v2284_v38 = vld [vmem:[%s2602_s24 + $0x34] ss:$20 sps:$4 sm:$0xff]   ;;  %v2287_v40 = vld [vmem:[%s2602_s24 + $0x30] ss:$20 sps:$4 sm:$0xff]  }
  0x19   : > { %1927 = vmatpush3.bf16.msra.mxu0 %v2257_v14  ;;  %1066 = vmatprep.mubr.bf16.mxu1 %v2280_v35  ;;  %v2282_v37 = vld [vmem:[%s2602_s24 + $0x2c] ss:$20 sps:$4 sm:$0xff]   ;;  %v2286_v39 = vld [vmem:[%s2602_s24 + $0x28] ss:$20 sps:$4 sm:$0xff]   ;;  %v2292_v44 = vld [vmem:[%s2602_s24 + $0x50] ss:$20 sps:$4 sm:$0xff]  }
  0x1a   : > { %2015 = vmatpush3.bf16.msra.mxu1 %v2258_v15  ;;  %1928 = vmatprep.subr.bf16.mxu0 %v2259_v16  ;;  %v2288_v41 = vld [vmem:[%s2602_s24 + $0x54] ss:$20 sps:$4 sm:$0xff]   ;;  %v2290_v42 = vld [vmem:[%s2602_s24 + $0x5c] ss:$20 sps:$4 sm:$0xff]   ;;  %v2293_v45 = vld [vmem:[%s2602_s24 + $0x58] ss:$20 sps:$4 sm:$0xff]  }
  0x1b   : > { %2016 = vmatprep.subr.bf16.mxu1 %v2260_v17  ;;  %v2294_v46 = vld [vmem:[%s2602_s24 + $0x7c] ss:$20 sps:$4 sm:$0xff]   ;;  %v2296_v47 = vld [vmem:[%s2602_s24 + $0x84] ss:$20 sps:$4 sm:$0xff]   ;;  %v2299_v50 = vld [vmem:[%s2602_s24 + $0x80] ss:$20 sps:$4 sm:$0xff]  }
  0x1c   : > { %v2298_v49 = vld [vmem:[%s2602_s24 + $0x78] ss:$20 sps:$4 sm:$0xff]   ;;  %v2305_v54 = vld [vmem:[%s2602_s24 + $0xa0] ss:$20 sps:$4 sm:$0xff]   ;;  %v2306_v55 = vld [vmem:[%s2602_s24 + $0xa8] ss:$20 sps:$4 sm:$0xff]  }
  0x1d   : > { %1929 = vmatpush3.bf16.msra.mxu0 %v2261_v18  ;;  %v2301_v51 = vld [vmem:[%s2602_s24 + $0xa4] ss:$20 sps:$4 sm:$0xff]   ;;  %v2303_v52 = vld [vmem:[%s2602_s24 + $0xac] ss:$20 sps:$4 sm:$0xff]   ;;  %v2309_v57 = vld [vmem:[%s2602_s24 + $0xd4] ss:$20 sps:$4 sm:$0xff]  }
  0x1e   : > { %2017 = vmatpush3.bf16.msra.mxu1 %v2262_v19  ;;  %1930 = vmatprep.subr.bf16.mxu0 %v2263_v20  ;;  %v2307_v56 = vld [vmem:[%s2602_s24 + $0xcc] ss:$20 sps:$4 sm:$0xff]   ;;  %v2311_v58 = vld [vmem:[%s2602_s24 + $0xc8] ss:$20 sps:$4 sm:$0xff]   ;;  %v2312_v59 = vld [vmem:[%s2602_s24 + $0xd0] ss:$20 sps:$4 sm:$0xff]  }
  0x1f   : > { %2018 = vmatprep.subr.bf16.mxu1 %v2264_v21  ;;  %v2313_v60 = vld [vmem:[%s2602_s24 + $0xf4] ss:$20 sps:$4 sm:$0xff]   ;;  %v2315_v61 = vld [vmem:[%s2602_s24 + $0xfc] ss:$20 sps:$4 sm:$0xff]   ;;  %v2318_v63 = vld [vmem:[%s2602_s24 + $0xf8] ss:$20 sps:$4 sm:$0xff]  }
  0x20   : > { %v2317_v62 = vld [vmem:[%s2602_s24 + $0xf0] ss:$20 sps:$4 sm:$0xff]   ;;  %v2324_v2 = vld [vmem:[%s2602_s24 + $0x118] ss:$20 sps:$4 sm:$0xff]   ;;  %v2325_v3 = vld [vmem:[%s2602_s24 + $0x120] ss:$20 sps:$4 sm:$0xff]  }
  0x21   : > { %1931 = vmatpush3.bf16.msra.mxu0 %v2265_v22  ;;  %v2320_v0 = vld [vmem:[%s2602_s24 + $0x11c] ss:$20 sps:$4 sm:$0xff]   ;;  %v2322_v1 = vld [vmem:[%s2602_s24 + $0x124] ss:$20 sps:$4 sm:$0xff]   ;;  %v2328_v5 = vld [vmem:[%s2602_s24 + $0x14c] ss:$20 sps:$4 sm:$0xff]  }
  0x22   : > { %2019 = vmatpush3.bf16.msra.mxu1 %v2266_v23  ;;  %1932 = vmatprep.subr.bf16.mxu0 %v2267_v24  ;;  %v2326_v4 = vld [vmem:[%s2602_s24 + $0x144] ss:$20 sps:$4 sm:$0xff]   ;;  %v2330_v6 = vld [vmem:[%s2602_s24 + $0x140] ss:$20 sps:$4 sm:$0xff]   ;;  %v2331_v7 = vld [vmem:[%s2602_s24 + $0x148] ss:$20 sps:$4 sm:$0xff]  }
  0x23   : > { %2020 = vmatprep.subr.bf16.mxu1 %v2268_v25  ;;  %v2332_v8 = vld [vmem:[%s2602_s24 + $0x16c] ss:$20 sps:$4 sm:$0xff]   ;;  %v2334_v9 = vld [vmem:[%s2602_s24 + $0x174] ss:$20 sps:$4 sm:$0xff]   ;;  %v2337_v11 = vld [vmem:[%s2602_s24 + $0x170] ss:$20 sps:$4 sm:$0xff]  }
  0x24   : > { %v2336_v10 = vld [vmem:[%s2602_s24 + $0x168] ss:$20 sps:$4 sm:$0xff]   ;;  %v2343_v14 = vld [vmem:[%s2602_s24 + $0x190] ss:$20 sps:$4 sm:$0xff]   ;;  %v2344_v15 = vld [vmem:[%s2602_s24 + $0x198] ss:$20 sps:$4 sm:$0xff]  }
  0x25   : > { %1933 = vmatpush3.bf16.msra.mxu0 %v2269_v26  ;;  %v2339_v12 = vld [vmem:[%s2602_s24 + $0x194] ss:$20 sps:$4 sm:$0xff]   ;;  %v2341_v13 = vld [vmem:[%s2602_s24 + $0x19c] ss:$20 sps:$4 sm:$0xff]   ;;  %v2347_v17 = vld [vmem:[%s2602_s24 + $0x1c4] ss:$20 sps:$4 sm:$0xff]  }
  0x26   : > { %2021 = vmatpush3.bf16.msra.mxu1 %v2270_v27  ;;  %1934 = vmatprep.subr.bf16.mxu0 %v2271_v28  ;;  %v2345_v16 = vld [vmem:[%s2602_s24 + $0x1bc] ss:$20 sps:$4 sm:$0xff]   ;;  %v2349_v18 = vld [vmem:[%s2602_s24 + $0x1b8] ss:$20 sps:$4 sm:$0xff]   ;;  %v2350_v19 = vld [vmem:[%s2602_s24 + $0x1c0] ss:$20 sps:$4 sm:$0xff]  }
  0x27   : > { %2022 = vmatprep.subr.bf16.mxu1 %v2272_v29  ;;  %v2351_v20 = vld [vmem:[%s2602_s24 + $0x10] ss:$20 sps:$4 sm:$0xff]   ;;  %v2352_v21 = vld [vmem:[%s2602_s24 + $0x100] ss:$20 sps:$4 sm:$0xff]   ;;  %v2353_v22 = vld [vmem:[%s2602_s24 + $0x38] ss:$20 sps:$4 sm:$0xff]  }
  0x28   : > { %v2354_v23 = vld [vmem:[%s2602_s24 + $0x128] ss:$20 sps:$4 sm:$0xff]   ;;  %v2355_v24 = vld [vmem:[%s2602_s24 + $0x60] ss:$20 sps:$4 sm:$0xff]   ;;  %v2356_v25 = vld [vmem:[%s2602_s24 + $0x150] ss:$20 sps:$4 sm:$0xff]  }
  0x29   : > { %1935 = vmatpush3.bf16.msra.mxu0 %v2273_v30  ;;  %v2357_v26 = vld [vmem:[%s2602_s24 + $0x88] ss:$20 sps:$4 sm:$0xff]   ;;  %v2358_v27 = vld [vmem:[%s2602_s24 + $0x178] ss:$20 sps:$4 sm:$0xff]   ;;  %v2359_v28 = vld [vmem:[%s2602_s24 + $0xb0] ss:$20 sps:$4 sm:$0xff]  }
  0x2a   : > { %2023 = vmatpush3.bf16.msra.mxu1 %v2274_v31  ;;  %2112 = vmatprep.subr.bf16.mxu0 %v2281_v36  ;;  %v2360_v29 = vld [vmem:[%s2602_s24 + $0x1a0] ss:$20 sps:$4 sm:$0xff]   ;;  %v2361_v30 = vld [vmem:[%s2602_s24 + $0xd8] ss:$20 sps:$4 sm:$0xff]   ;;  %v2362_v31 = vld [vmem:[%s2602_s24 + $0x1c8] ss:$20 sps:$4 sm:$0xff]  }
  0x2b   : > { %2144 = vmatprep.subr.bf16.mxu1 %v2281_v36 }
  0x2c   : > { %938 = vmatmul.mubr.bf16.vlgmr.msra.gmra.mrb[0].mxu0 %v2275_v32 }
  0x2d   : > { %1067 = vmatmul.mubr.bf16.vlgmr.msra.gmra.mrb[0].mxu1 %v2278_v34  ;;  %2113 = vmatpush3.bf16.msra.mxu0 %v2281_v36  ;;  %v2697_v34 = vld [vmem:[%s2962_s2] ss:$0 sm:$0xff] }
  0x2e   : > { %2148 = vmatpush3.bf16.msra.mxu1 %v2281_v36  ;;  %945 = vmatprep.mubr.bf16.mxu0 %v2282_v37 }
  0x2f   : > { %1074 = vmatprep.mubr.bf16.mxu1 %v2284_v38  ;;  %2114 = vmatprep.subr.bf16.mxu0 %v2300_v43 }
  0x30   : > { %2145 = vmatprep.subr.bf16.mxu1 %v2300_v43 }
  0x31   : > { %2115 = vmatpush3.bf16.msra.mxu0 %v2300_v43 }
  0x32   : > { %2149 = vmatpush3.bf16.msra.mxu1 %v2300_v43  ;;  %2116 = vmatprep.subr.bf16.mxu0 %v2319_v48 }
  0x33   : > { %2146 = vmatprep.subr.bf16.mxu1 %v2319_v48 }
  0x34   : > { %946 = vmatmul.mubr.bf16.gmra.mrb[4].mxu0 %v2286_v39 }
  0x35   : > { %1075 = vmatmul.mubr.bf16.gmra.mrb[4].mxu1 %v2287_v40  ;;  %953 = vmatprep.mubr.bf16.mxu0 %v2288_v41 }
  0x36   : > { %1082 = vmatprep.mubr.bf16.mxu1 %v2290_v42  ;;  %2117 = vmatpush3.bf16.msra.mxu0 %v2319_v48 }
  0x37   : > { %2150 = vmatpush3.bf16.msra.mxu1 %v2319_v48  ;;  %2118 = vmatprep.subr.bf16.mxu0 %v2338_v53 }
  0x38   : > { %2147 = vmatprep.subr.bf16.mxu1 %v2338_v53 }
  0x3a   : > { %2119 = vmatpush3.bf16.msra.mxu0 %v2338_v53 }
  0x3b   : > { %2151 = vmatpush3.bf16.msra.mxu1 %v2338_v53 }
  0x3c   : > { %954 = vmatmul.mubr.bf16.gmra.mrb[8].mxu0 %v2292_v44 }
  0x3d   : > { %1083 = vmatmul.mubr.bf16.gmra.mrb[8].mxu1 %v2293_v45  ;;  %961 = vmatprep.mubr.bf16.mxu0 %v2294_v46 }
  0x3e   : > { %1090 = vmatprep.mubr.bf16.mxu1 %v2296_v47 }
  0x44   : > { %962 = vmatmul.mubr.bf16.gmra.mrb[12].mxu0 %v2298_v49 }
  0x45   : > { %1091 = vmatmul.mubr.bf16.gmra.mrb[12].mxu1 %v2299_v50  ;;  %969 = vmatprep.mubr.bf16.mxu0 %v2301_v51 }
  0x46   : > { %1098 = vmatprep.mubr.bf16.mxu1 %v2303_v52 }
  0x4c   : > { %970 = vmatmul.mubr.bf16.gmra.mrb[16].mxu0 %v2305_v54 }
  0x4d   : > { %1099 = vmatmul.mubr.bf16.gmra.mrb[16].mxu1 %v2306_v55  ;;  %977 = vmatprep.mubr.bf16.mxu0 %v2307_v56 }
  0x4e   : > { %1106 = vmatprep.mubr.bf16.mxu1 %v2309_v57 }
  0x54   : > { %978 = vmatmul.mubr.bf16.gmra.mrb[20].mxu0 %v2311_v58 }
  0x55   : > { %1107 = vmatmul.mubr.bf16.gmra.mrb[20].mxu1 %v2312_v59  ;;  %985 = vmatprep.mubr.bf16.mxu0 %v2313_v60 }
  0x56   : > { %1114 = vmatprep.mubr.bf16.mxu1 %v2315_v61 }
  0x5c   : > { %986 = vmatmul.mubr.bf16.gmra.mrb[24].mxu0 %v2317_v62 }
  0x5d   : > { %1115 = vmatmul.mubr.bf16.gmra.mrb[24].mxu1 %v2318_v63  ;;  %993 = vmatprep.mubr.bf16.mxu0 %v2320_v0 }
  0x5e   : > { %1122 = vmatprep.mubr.bf16.mxu1 %v2322_v1 }
  0x64   : > { %994 = vmatmul.mubr.bf16.gmra.mrb[28].mxu0 %v2324_v2 }
  0x65   : > { %1123 = vmatmul.mubr.bf16.gmra.mrb[28].mxu1 %v2325_v3  ;;  %1001 = vmatprep.mubr.bf16.mxu0 %v2326_v4 }
  0x66   : > { %1130 = vmatprep.mubr.bf16.mxu1 %v2328_v5 }
  0x6c   : > { %1002 = vmatmul.mubr.bf16.gmra.mrb[32].mxu0 %v2330_v6 }
  0x6d   : > { %1131 = vmatmul.mubr.bf16.gmra.mrb[32].mxu1 %v2331_v7  ;;  %1009 = vmatprep.mubr.bf16.mxu0 %v2332_v8 }
  0x6e   : > { %1138 = vmatprep.mubr.bf16.mxu1 %v2334_v9 }
  0x74   : > { %1010 = vmatmul.mubr.bf16.gmra.mrb[36].mxu0 %v2336_v10 }
  0x75   : > { %1139 = vmatmul.mubr.bf16.gmra.mrb[36].mxu1 %v2337_v11  ;;  %1017 = vmatprep.mubr.bf16.mxu0 %v2339_v12 }
  0x76   : > { %1146 = vmatprep.mubr.bf16.mxu1 %v2341_v13 }
  0x7c   : > { %1018 = vmatmul.mubr.bf16.gmra.mrb[40].mxu0 %v2343_v14 }
  0x7d   : > { %1147 = vmatmul.mubr.bf16.gmra.mrb[40].mxu1 %v2344_v15  ;;  %1025 = vmatprep.mubr.bf16.mxu0 %v2345_v16 }
  0x7e   : > { %1154 = vmatprep.mubr.bf16.mxu1 %v2347_v17 }
  0x84   : > { %1026 = vmatmul.mubr.bf16.gmra.mrb[44].mxu0 %v2349_v18 }
  0x85   : > { %1155 = vmatmul.mubr.bf16.gmra.mrb[44].mxu1 %v2350_v19  ;;  %2120 = vmatprep.mubr.msk.bf16.mxu0 %vm868_vm0, %v2351_v20 }
  0x86   : > { %2132 = vmatprep.mubr.msk.bf16.mxu1 %vm868_vm0, %v2352_v21 }
  0x8c   : > { %2121 = vmatmul.mubr.msk.bf16.vlgmr.msra.gmra.mrb[48].mxu0 %vm868_vm0, %v2353_v22 }
  0x8d   : > { %2133 = vmatmul.mubr.msk.bf16.vlgmr.msra.gmra.mrb[48].mxu1 %vm868_vm0, %v2354_v23  ;;  %2124 = vmatprep.mubr.msk.bf16.mxu0 %vm868_vm0, %v2355_v24 }
  0x8e   : > { %2136 = vmatprep.mubr.msk.bf16.mxu1 %vm868_vm0, %v2356_v25 }
  0x94   : > { %2125 = vmatmul.mubr.msk.bf16.gmra.mrb[52].mxu0 %vm868_vm0, %v2357_v26 }
  0x95   : > { %2137 = vmatmul.mubr.msk.bf16.gmra.mrb[52].mxu1 %vm868_vm0, %v2358_v27  ;;  %2128 = vmatprep.mubr.msk.bf16.mxu0 %vm868_vm0, %v2359_v28 }
  0x96   : > { %2140 = vmatprep.mubr.msk.bf16.mxu1 %vm868_vm0, %v2360_v29 }
  0x9c   : > { %2129 = vmatmul.mubr.msk.bf16.gmra.mrb[56].mxu0 %vm868_vm0, %v2361_v30 }
  0x9d   : > { %2141 = vmatmul.mubr.msk.bf16.gmra.mrb[56].mxu1 %vm868_vm0, %v2362_v31 }
  0xff   : > { %v1936_v32 = vpop.f32.mrb[0].mxu0 }
 0x100   : > { %v2024_v33 = vpop.f32.mrb[0].mxu1  ;;  %v1937_v35 = vpop.f32.mrb[1].mxu0 }
 0x101   : > { %v1938_v36 = vadd.f32 %v1937_v35, %v1936_v32  ;;  %v2025_v37 = vpop.f32.mrb[1].mxu1  ;;  %v1939_v38 = vpop.f32.mrb[2].mxu0 }
 0x102   : > { %v2026_v39 = vadd.f32 %v2025_v37, %v2024_v33  ;;  %v2027_v40 = vpop.f32.mrb[2].mxu1  ;;  %v1940_v41 = vpop.f32.mrb[3].mxu0 }
 0x103   : > { %v940_v42 = vadd.f32 %v1938_v36, %v2697_v34  ;;  %v1941_v43 = vadd.f32 %v1940_v41, %v1939_v38  ;;  %v2028_v44 = vpop.f32.mrb[3].mxu1 }
 0x104   : > { %v2029_v45 = vadd.f32 %v2028_v44, %v2027_v40 }
 0x105   : > { %v943_v46 = vadd.f32 %v1941_v43, %v2697_v34  ;;  %v2701_v47 = vadd.f32 %v2026_v39, %v940_v42 }
 0x107   : > { %v1942_v48 = vpop.f32.mrb[4].mxu0  ;;  %v2703_v49 = vadd.f32 %v2029_v45, %v943_v46 }
 0x108   : > { %v2030_v50 = vpop.f32.mrb[4].mxu1  ;;  %v1943_v51 = vpop.f32.mrb[5].mxu0 }
 0x109   : > { %v1944_v52 = vadd.f32 %v1943_v51, %v1942_v48  ;;  %v2031_v53 = vpop.f32.mrb[5].mxu1  ;;  %v1945_v54 = vpop.f32.mrb[6].mxu0 }
 0x10a   : > { %v2032_v55 = vadd.f32 %v2031_v53, %v2030_v50  ;;  %v2033_v56 = vpop.f32.mrb[6].mxu1  ;;  %v1946_v57 = vpop.f32.mrb[7].mxu0 }
 0x10b   : > { %v948_v58 = vadd.f32 %v1944_v52, %v2697_v34  ;;  %v1947_v59 = vadd.f32 %v1946_v57, %v1945_v54  ;;  %v2034_v60 = vpop.f32.mrb[7].mxu1 }
 0x10c   : > { %v2035_v61 = vadd.f32 %v2034_v60, %v2033_v56 }
 0x10d   : > { %v951_v62 = vadd.f32 %v1947_v59, %v2697_v34  ;;  %v2707_v63 = vadd.f32 %v2032_v55, %v948_v58 }
 0x10f   : > { %v1948_v0 = vpop.f32.mrb[8].mxu0  ;;  %v2709_v1 = vadd.f32 %v2035_v61, %v951_v62 }
 0x110   : > { %v2036_v2 = vpop.f32.mrb[8].mxu1  ;;  %v1949_v3 = vpop.f32.mrb[9].mxu0 }
 0x111   : > { %v1950_v4 = vadd.f32 %v1949_v3, %v1948_v0  ;;  %v2037_v5 = vpop.f32.mrb[9].mxu1  ;;  %v1951_v6 = vpop.f32.mrb[10].mxu0 }
 0x112   : > { %v2038_v7 = vadd.f32 %v2037_v5, %v2036_v2  ;;  %v2039_v8 = vpop.f32.mrb[10].mxu1  ;;  %v1952_v9 = vpop.f32.mrb[11].mxu0 }
 0x113   : > { %v956_v10 = vadd.f32 %v1950_v4, %v2697_v34  ;;  %v1953_v11 = vadd.f32 %v1952_v9, %v1951_v6  ;;  %v2040_v12 = vpop.f32.mrb[11].mxu1 }
 0x114   : > { %v2041_v13 = vadd.f32 %v2040_v12, %v2039_v8 }
 0x115   : > { %v959_v14 = vadd.f32 %v1953_v11, %v2697_v34  ;;  %v2713_v15 = vadd.f32 %v2038_v7, %v956_v10 }
 0x117   : > { %v1954_v16 = vpop.f32.mrb[12].mxu0  ;;  %v2715_v17 = vadd.f32 %v2041_v13, %v959_v14 }
 0x118   : > { %v2042_v18 = vpop.f32.mrb[12].mxu1  ;;  %v1955_v19 = vpop.f32.mrb[13].mxu0 }
 0x119   : > { %v1956_v20 = vadd.f32 %v1955_v19, %v1954_v16  ;;  %v2043_v21 = vpop.f32.mrb[13].mxu1  ;;  %v1957_v22 = vpop.f32.mrb[14].mxu0 }
 0x11a   : > { %v2044_v23 = vadd.f32 %v2043_v21, %v2042_v18  ;;  %v2045_v24 = vpop.f32.mrb[14].mxu1  ;;  %v1958_v25 = vpop.f32.mrb[15].mxu0 }
 0x11b   : > { %v964_v26 = vadd.f32 %v1956_v20, %v2697_v34  ;;  %v1959_v27 = vadd.f32 %v1958_v25, %v1957_v22  ;;  %v2046_v28 = vpop.f32.mrb[15].mxu1 }
 0x11c   : > { %v2047_v29 = vadd.f32 %v2046_v28, %v2045_v24 }
 0x11d   : > { %v967_v30 = vadd.f32 %v1959_v27, %v2697_v34  ;;  %v2719_v31 = vadd.f32 %v2044_v23, %v964_v26 }
 0x11f   : > { %v1960_v32 = vpop.f32.mrb[16].mxu0  ;;  %v2721_v33 = vadd.f32 %v2047_v29, %v967_v30 }
 0x120   : > { %v2048_v35 = vpop.f32.mrb[16].mxu1  ;;  %v1961_v36 = vpop.f32.mrb[17].mxu0 }
 0x121   : > { %v1962_v37 = vadd.f32 %v1961_v36, %v1960_v32  ;;  %v2049_v38 = vpop.f32.mrb[17].mxu1  ;;  %v1963_v39 = vpop.f32.mrb[18].mxu0 }
 0x122   : > { %v2050_v40 = vadd.f32 %v2049_v38, %v2048_v35  ;;  %v2051_v41 = vpop.f32.mrb[18].mxu1  ;;  %v1964_v42 = vpop.f32.mrb[19].mxu0 }
 0x123   : > { %v972_v43 = vadd.f32 %v1962_v37, %v2697_v34  ;;  %v1965_v44 = vadd.f32 %v1964_v42, %v1963_v39  ;;  %v2052_v45 = vpop.f32.mrb[19].mxu1 }
 0x124   : > { %v2053_v46 = vadd.f32 %v2052_v45, %v2051_v41 }
 0x125   : > { %v975_v48 = vadd.f32 %v1965_v44, %v2697_v34  ;;  %v2725_v50 = vadd.f32 %v2050_v40, %v972_v43 }
 0x127   : > { %v1966_v51 = vpop.f32.mrb[20].mxu0  ;;  %v2727_v52 = vadd.f32 %v2053_v46, %v975_v48 }
 0x128   : > { %v2054_v53 = vpop.f32.mrb[20].mxu1  ;;  %v1967_v54 = vpop.f32.mrb[21].mxu0 }
 0x129   : > { %v1968_v55 = vadd.f32 %v1967_v54, %v1966_v51  ;;  %v2055_v56 = vpop.f32.mrb[21].mxu1  ;;  %v1969_v57 = vpop.f32.mrb[22].mxu0 }
 0x12a   : > { %v2056_v58 = vadd.f32 %v2055_v56, %v2054_v53  ;;  %v2057_v59 = vpop.f32.mrb[22].mxu1  ;;  %v1970_v60 = vpop.f32.mrb[23].mxu0 }
 0x12b   : > { %v980_v61 = vadd.f32 %v1968_v55, %v2697_v34  ;;  %v1971_v62 = vadd.f32 %v1970_v60, %v1969_v57  ;;  %v2058_v0 = vpop.f32.mrb[23].mxu1 }
 0x12c   : > { %v2059_v2 = vadd.f32 %v2058_v0, %v2057_v59 }
 0x12d   : > { %v983_v3 = vadd.f32 %v1971_v62, %v2697_v34  ;;  %v2731_v4 = vadd.f32 %v2056_v58, %v980_v61 }
 0x12f   : > { %v1972_v5 = vpop.f32.mrb[24].mxu0  ;;  %v2733_v6 = vadd.f32 %v2059_v2, %v983_v3 }
 0x130   : > { %v2060_v7 = vpop.f32.mrb[24].mxu1  ;;  %v1973_v8 = vpop.f32.mrb[25].mxu0 }
 0x131   : > { %v1974_v9 = vadd.f32 %v1973_v8, %v1972_v5  ;;  %v2061_v10 = vpop.f32.mrb[25].mxu1  ;;  %v1975_v11 = vpop.f32.mrb[26].mxu0 }
 0x132   : > { %v2062_v12 = vadd.f32 %v2061_v10, %v2060_v7  ;;  %v2063_v13 = vpop.f32.mrb[26].mxu1  ;;  %v1976_v14 = vpop.f32.mrb[27].mxu0 }
 0x133   : > { %v988_v16 = vadd.f32 %v1974_v9, %v2697_v34  ;;  %v1977_v18 = vadd.f32 %v1976_v14, %v1975_v11  ;;  %v2064_v19 = vpop.f32.mrb[27].mxu1 }
 0x134   : > { %v2065_v20 = vadd.f32 %v2064_v19, %v2063_v13 }
 0x135   : > { %v991_v21 = vadd.f32 %v1977_v18, %v2697_v34  ;;  %v2737_v22 = vadd.f32 %v2062_v12, %v988_v16 }
 0x137   : > { %v1978_v23 = vpop.f32.mrb[28].mxu0  ;;  %v2739_v24 = vadd.f32 %v2065_v20, %v991_v21 }
 0x138   : > { %v2066_v25 = vpop.f32.mrb[28].mxu1  ;;  %v1979_v26 = vpop.f32.mrb[29].mxu0 }
 0x139   : > { %v1980_v27 = vadd.f32 %v1979_v26, %v1978_v23  ;;  %v2067_v28 = vpop.f32.mrb[29].mxu1  ;;  %v1981_v29 = vpop.f32.mrb[30].mxu0 }
 0x13a   : > { %v2068_v30 = vadd.f32 %v2067_v28, %v2066_v25  ;;  %v2069_v32 = vpop.f32.mrb[30].mxu1  ;;  %v1982_v35 = vpop.f32.mrb[31].mxu0 }
 0x13b   : > { %v996_v36 = vadd.f32 %v1980_v27, %v2697_v34  ;;  %v1983_v37 = vadd.f32 %v1982_v35, %v1981_v29  ;;  %v2070_v38 = vpop.f32.mrb[31].mxu1 }
 0x13c   : > { %v2071_v39 = vadd.f32 %v2070_v38, %v2069_v32 }
 0x13d   : > { %v999_v40 = vadd.f32 %v1983_v37, %v2697_v34  ;;  %v2743_v41 = vadd.f32 %v2068_v30, %v996_v36 }
 0x13f   : > { %v1984_v42 = vpop.f32.mrb[32].mxu0  ;;  %v2745_v43 = vadd.f32 %v2071_v39, %v999_v40 }
 0x140   : > { %v2072_v44 = vpop.f32.mrb[32].mxu1  ;;  %v1985_v45 = vpop.f32.mrb[33].mxu0 }
 0x141   : > { %v1986_v46 = vadd.f32 %v1985_v45, %v1984_v42  ;;  %v2073_v48 = vpop.f32.mrb[33].mxu1  ;;  %v1987_v51 = vpop.f32.mrb[34].mxu0 }
 0x142   : > { %v2074_v53 = vadd.f32 %v2073_v48, %v2072_v44  ;;  %v2075_v54 = vpop.f32.mrb[34].mxu1  ;;  %v1988_v55 = vpop.f32.mrb[35].mxu0 }
 0x143   : > { %v1004_v56 = vadd.f32 %v1986_v46, %v2697_v34  ;;  %v1989_v57 = vadd.f32 %v1988_v55, %v1987_v51  ;;  %v2076_v58 = vpop.f32.mrb[35].mxu1 }
 0x144   : > { %v2077_v59 = vadd.f32 %v2076_v58, %v2075_v54 }
 0x145   : > { %v1007_v60 = vadd.f32 %v1989_v57, %v2697_v34  ;;  %v2749_v61 = vadd.f32 %v2074_v53, %v1004_v56 }
 0x147   : > { %v1990_v62 = vpop.f32.mrb[36].mxu0  ;;  %v2751_v0 = vadd.f32 %v2077_v59, %v1007_v60 }
 0x148   : > { %v2078_v2 = vpop.f32.mrb[36].mxu1  ;;  %v1991_v3 = vpop.f32.mrb[37].mxu0 }
 0x149   : > { %v1992_v5 = vadd.f32 %v1991_v3, %v1990_v62  ;;  %v2079_v7 = vpop.f32.mrb[37].mxu1  ;;  %v1993_v8 = vpop.f32.mrb[38].mxu0 }
 0x14a   : > { %v2080_v9 = vadd.f32 %v2079_v7, %v2078_v2  ;;  %v2081_v10 = vpop.f32.mrb[38].mxu1  ;;  %v1994_v11 = vpop.f32.mrb[39].mxu0 }
 0x14b   : > { %v1012_v12 = vadd.f32 %v1992_v5, %v2697_v34  ;;  %v1995_v13 = vadd.f32 %v1994_v11, %v1993_v8  ;;  %v2082_v14 = vpop.f32.mrb[39].mxu1 }
 0x14c   : > { %v2083_v16 = vadd.f32 %v2082_v14, %v2081_v10 }
 0x14d   : > { %v1015_v18 = vadd.f32 %v1995_v13, %v2697_v34  ;;  %v2755_v19 = vadd.f32 %v2080_v9, %v1012_v12 }
 0x14f   : > { %v1996_v20 = vpop.f32.mrb[40].mxu0  ;;  %v2757_v21 = vadd.f32 %v2083_v16, %v1015_v18 }
 0x150   : > { %v2084_v23 = vpop.f32.mrb[40].mxu1  ;;  %v1997_v25 = vpop.f32.mrb[41].mxu0 }
 0x151   : > { %v1998_v26 = vadd.f32 %v1997_v25, %v1996_v20  ;;  %v2085_v27 = vpop.f32.mrb[41].mxu1  ;;  %v1999_v28 = vpop.f32.mrb[42].mxu0 }
 0x152   : > { %v2086_v29 = vadd.f32 %v2085_v27, %v2084_v23  ;;  %v2087_v30 = vpop.f32.mrb[42].mxu1  ;;  %v2000_v32 = vpop.f32.mrb[43].mxu0 }
 0x153   : > { %v1020_v35 = vadd.f32 %v1998_v26, %v2697_v34  ;;  %v2001_v36 = vadd.f32 %v2000_v32, %v1999_v28  ;;  %v2088_v37 = vpop.f32.mrb[43].mxu1 }
 0x154   : > { %v2089_v38 = vadd.f32 %v2088_v37, %v2087_v30 }
 0x155   : > { %v1023_v39 = vadd.f32 %v2001_v36, %v2697_v34  ;;  %v2761_v40 = vadd.f32 %v2086_v29, %v1020_v35 }
 0x157   : > { %v2002_v42 = vpop.f32.mrb[44].mxu0  ;;  %v2763_v44 = vadd.f32 %v2089_v38, %v1023_v39 }
 0x158   : > { %v2090_v45 = vpop.f32.mrb[44].mxu1  ;;  %v2003_v46 = vpop.f32.mrb[45].mxu0 }
 0x159   : > { %v2004_v48 = vadd.f32 %v2003_v46, %v2002_v42  ;;  %v2091_v51 = vpop.f32.mrb[45].mxu1  ;;  %v2005_v53 = vpop.f32.mrb[46].mxu0 }
 0x15a   : > { %v2092_v54 = vadd.f32 %v2091_v51, %v2090_v45  ;;  %v2093_v55 = vpop.f32.mrb[46].mxu1  ;;  %v2006_v56 = vpop.f32.mrb[47].mxu0 }
 0x15b   : > { %v1028_v57 = vadd.f32 %v2004_v48, %v2697_v34  ;;  %v2007_v58 = vadd.f32 %v2006_v56, %v2005_v53  ;;  %v2094_v59 = vpop.f32.mrb[47].mxu1 }
 0x15c   : > { %v2095_v60 = vadd.f32 %v2094_v59, %v2093_v55 }
 0x15d   : > { %v1031_v62 = vadd.f32 %v2007_v58, %v2697_v34  ;;  %v2768_v2 = vadd.f32 %v2092_v54, %v1028_v57 }
 0x15f   : > { %v2122_v3 = vpop.f32.mrb[48].mxu0  ;;  %v2770_v5 = vadd.f32 %v2095_v60, %v1031_v62 }
 0x160   : > { %v1206_v7 = vadd.f32 %v2122_v3, %v2707_v63  ;;  %v2134_v8 = vpop.f32.mrb[48].mxu1  ;;  %v1197_v9 = vpop.f32.mrb[49].mxu0 }
 0x161   : > { %v1254_v10 = vadd.f32 %v2134_v8, %v2743_v41  ;;  %v1198_v11 = vadd.f32 %v1197_v9, %v2701_v47  ;;  %v1245_v12 = vpop.f32.mrb[49].mxu1  ;;  %v2123_v13 = vpop.f32.mrb[50].mxu0 }
 0x162   : > { %v1294_v14 = vmax.f32 %v1206_v7, 0.0  ;;  %v1246_v34 = vadd.f32 %v1245_v12, %v2737_v22  ;;  %v1209_v16 = vadd.f32 %v2123_v13, %v2709_v1  ;;  %v2135_v18 = vpop.f32.mrb[50].mxu1  ;;  %v1200_v20 = vpop.f32.mrb[51].mxu0 }
 0x163   : > { %v1306_v23 = vmax.f32 %v1254_v10, 0.0  ;;  %v1292_v25 = vmax.f32 %v1198_v11, 0.0  ;;  %v1257_v63 = vadd.f32 %v2135_v18, %v2745_v43  ;;  %v1201_v26 = vadd.f32 %v1200_v20, %v2703_v49  ;;  %v1248_v27 = vpop.f32.mrb[51].mxu1 }
 0x164   : > { %v1897_v41 = vpack.c.bf16 %v1294_v14, %v1294_v14  ;;  %v1304_v28 = vmax.f32 %v1246_v34, 0.0  ;;  %v1295_v47 = vmax.f32 %v1209_v16, 0.0  ;;  %v1249_v29 = vadd.f32 %v1248_v27, %v2739_v24 }
 0x165   : > { %v1909_v30 = vpack.c.bf16 %v1306_v23, %v1306_v23  ;;  %v1895_v32 = vpack.c.bf16 %v1292_v25, %v1292_v25  ;;  %v1307_v35 = vmax.f32 %v1257_v63, 0.0  ;;  %v1293_v22 = vmax.f32 %v1201_v26, 0.0 }
 0x166   : > { %1415 = vst.msk [vmem:[%s2780_s12 + $0x8] sm:$0xf] %vm1412_vm1, %v1897_v41  ;;  %v1907_v49 = vpack.c.bf16 %v1304_v28, %v1304_v28  ;;  %v1898_v1 = vpack.c.bf16 %v1295_v47, %v1295_v47  ;;  %v1305_v43 = vmax.f32 %v1249_v29, 0.0 }
 0x167   : > { %1427 = vst.msk [vmem:[%s2780_s12 + $0x38] sm:$0xf] %vm1412_vm1, %v1909_v30  ;;  %1413 = vst.msk [vmem:[%s2780_s12] sm:$0xf] %vm1412_vm1, %v1895_v32  ;;  %v1910_v24 = vpack.c.bf16 %v1307_v35, %v1307_v35  ;;  %v1896_v36 = vpack.c.bf16 %v1293_v22, %v1293_v22  ;;  %v2126_v37 = vpop.f32.mrb[52].mxu0 }
 0x168   : > { %1425 = vst.msk [vmem:[%s2780_s12 + $0x30] sm:$0xf] %vm1412_vm1, %v1907_v49  ;;  %1416 = vst.msk [vmem:[%s2780_s12 + $0xc] sm:$0xf] %vm1412_vm1, %v1898_v1  ;;  %v1908_v38 = vpack.c.bf16 %v1305_v43, %v1305_v43  ;;  %v1222_v39 = vadd.f32 %v2126_v37, %v2719_v31  ;;  %v2138_v42 = vpop.f32.mrb[52].mxu1  ;;  %v1213_v45 = vpop.f32.mrb[53].mxu0 }
 0x169   : > { %1428 = vst.msk [vmem:[%s2780_s12 + $0x3c] sm:$0xf] %vm1412_vm1, %v1910_v24  ;;  %1414 = vst.msk [vmem:[%s2780_s12 + $0x4] sm:$0xf] %vm1412_vm1, %v1896_v36  ;;  %v1270_v46 = vadd.f32 %v2138_v42, %v2755_v19  ;;  %v1214_v48 = vadd.f32 %v1213_v45, %v2713_v15  ;;  %v1261_v51 = vpop.f32.mrb[53].mxu1  ;;  %v2127_v53 = vpop.f32.mrb[54].mxu0 }
 0x16a   : > { %1426 = vst.msk [vmem:[%s2780_s12 + $0x34] sm:$0xf] %vm1412_vm1, %v1908_v38  ;;  %v1298_v54 = vmax.f32 %v1222_v39, 0.0  ;;  %v1262_v55 = vadd.f32 %v1261_v51, %v2749_v61  ;;  %v1225_v56 = vadd.f32 %v2127_v53, %v2721_v33  ;;  %v2139_v31 = vpop.f32.mrb[54].mxu1  ;;  %v1216_v57 = vpop.f32.mrb[55].mxu0 }
 0x16b   : > { %v1310_v58 = vmax.f32 %v1270_v46, 0.0  ;;  %v1296_v59 = vmax.f32 %v1214_v48, 0.0  ;;  %v1273_v60 = vadd.f32 %v2139_v31, %v2757_v21  ;;  %v1217_v15 = vadd.f32 %v1216_v57, %v2715_v17  ;;  %v1264_v19 = vpop.f32.mrb[55].mxu1 }
 0x16c   : > { %v1901_v62 = vpack.c.bf16 %v1298_v54, %v1298_v54  ;;  %v1308_v3 = vmax.f32 %v1262_v55, 0.0  ;;  %v1299_v7 = vmax.f32 %v1225_v56, 0.0  ;;  %v1265_v61 = vadd.f32 %v1264_v19, %v2751_v0 }
 0x16d   : > { %v1913_v33 = vpack.c.bf16 %v1310_v58, %v1310_v58  ;;  %v1899_v8 = vpack.c.bf16 %v1296_v59, %v1296_v59  ;;  %v1311_v9 = vmax.f32 %v1273_v60, 0.0  ;;  %v1297_v10 = vmax.f32 %v1217_v15, 0.0 }
 0x16e   : > { %1419 = vst.msk [vmem:[%s2780_s12 + $0x18] sm:$0xf] %vm1412_vm1, %v1901_v62  ;;  %v1911_v21 = vpack.c.bf16 %v1308_v3, %v1308_v3  ;;  %v1902_v11 = vpack.c.bf16 %v1299_v7, %v1299_v7  ;;  %v1309_v12 = vmax.f32 %v1265_v61, 0.0 }
 0x16f   : > { %1431 = vst.msk [vmem:[%s2780_s12 + $0x48] sm:$0xf] %vm1412_vm1, %v1913_v33  ;;  %1417 = vst.msk [vmem:[%s2780_s12 + $0x10] sm:$0xf] %vm1412_vm1, %v1899_v8  ;;  %v1914_v17 = vpack.c.bf16 %v1311_v9, %v1311_v9  ;;  %v1900_v13 = vpack.c.bf16 %v1297_v10, %v1297_v10  ;;  %v2130_v14 = vpop.f32.mrb[56].mxu0 }
 0x170   : > { %1429 = vst.msk [vmem:[%s2780_s12 + $0x40] sm:$0xf] %vm1412_vm1, %v1911_v21  ;;  %1420 = vst.msk [vmem:[%s2780_s12 + $0x1c] sm:$0xf] %vm1412_vm1, %v1902_v11  ;;  %v1912_v0 = vpack.c.bf16 %v1309_v12, %v1309_v12  ;;  %v1238_v34 = vadd.f32 %v2130_v14, %v2731_v4  ;;  %v2142_v16 = vpop.f32.mrb[56].mxu1  ;;  %v1229_v18 = vpop.f32.mrb[57].mxu0 }
 0x171   : > { %1432 = vst.msk [vmem:[%s2780_s12 + $0x4c] sm:$0xf] %vm1412_vm1, %v1914_v17  ;;  %1418 = vst.msk [vmem:[%s2780_s12 + $0x14] sm:$0xf] %vm1412_vm1, %v1900_v13  ;;  %v1286_v20 = vadd.f32 %v2142_v16, %v2768_v2  ;;  %v1230_v23 = vadd.f32 %v1229_v18, %v2725_v50  ;;  %v1277_v25 = vpop.f32.mrb[57].mxu1  ;;  %v2131_v63 = vpop.f32.mrb[58].mxu0 }
 0x172   : > { %1430 = vst.msk [vmem:[%s2780_s12 + $0x44] sm:$0xf] %vm1412_vm1, %v1912_v0  ;;  %v1302_v26 = vmax.f32 %v1238_v34, 0.0  ;;  %v1278_v27 = vadd.f32 %v1277_v25, %v2761_v40  ;;  %v1241_v41 = vadd.f32 %v2131_v63, %v2733_v6  ;;  %v2143_v4 = vpop.f32.mrb[58].mxu1  ;;  %v1232_v28 = vpop.f32.mrb[59].mxu0 }
 0x173   : > { %v1314_v47 = vmax.f32 %v1286_v20, 0.0  ;;  %v1300_v29 = vmax.f32 %v1230_v23, 0.0  ;;  %v1289_v30 = vadd.f32 %v2143_v4, %v2770_v5  ;;  %v1233_v50 = vadd.f32 %v1232_v28, %v2727_v52  ;;  %v1280_v2 = vpop.f32.mrb[59].mxu1 }
 0x174   : > { %v1905_v32 = vpack.c.bf16 %v1302_v26, %v1302_v26  ;;  %v1312_v35 = vmax.f32 %v1278_v27, 0.0  ;;  %v1303_v22 = vmax.f32 %v1241_v41, 0.0  ;;  %v1281_v40 = vadd.f32 %v1280_v2, %v2763_v44  ;;  %1443 = sbr.rel (!%p2500_p4) target bundleno = 456 (0x1c8), region = 36 }
 0x175   : > { %v1917_v6 = vpack.c.bf16 %v1314_v47, %v1314_v47  ;;  %v1903_v49 = vpack.c.bf16 %v1300_v29, %v1300_v29  ;;  %v1315_v1 = vmax.f32 %v1289_v30, 0.0  ;;  %v1301_v43 = vmax.f32 %v1233_v50, 0.0 }
 0x176   : > { %1423 = vst.msk [vmem:[%s2780_s12 + $0x28] sm:$0xf] %vm1412_vm1, %v1905_v32  ;;  %v1915_v5 = vpack.c.bf16 %v1312_v35, %v1312_v35  ;;  %v1906_v24 = vpack.c.bf16 %v1303_v22, %v1303_v22  ;;  %v1313_v52 = vmax.f32 %v1281_v40, 0.0 }
 0x177   : > { %1435 = vst.msk [vmem:[%s2780_s12 + $0x58] sm:$0xf] %vm1412_vm1, %v1917_v6  ;;  %1421 = vst.msk [vmem:[%s2780_s12 + $0x20] sm:$0xf] %vm1412_vm1, %v1903_v49  ;;  %v1918_v36 = vpack.c.bf16 %v1315_v1, %v1315_v1  ;;  %v1904_v37 = vpack.c.bf16 %v1301_v43, %v1301_v43 }
 0x178   : > { %1433 = vst.msk [vmem:[%s2780_s12 + $0x50] sm:$0xf] %vm1412_vm1, %v1915_v5  ;;  %1424 = vst.msk [vmem:[%s2780_s12 + $0x2c] sm:$0xf] %vm1412_vm1, %v1906_v24  ;;  %v1916_v44 = vpack.c.bf16 %v1313_v52, %v1313_v52 }
 0x179   : > { %1436 = vst.msk [vmem:[%s2780_s12 + $0x5c] sm:$0xf] %vm1412_vm1, %v1918_v36  ;;  %1422 = vst.msk [vmem:[%s2780_s12 + $0x24] sm:$0xf] %vm1412_vm1, %v1904_v37 }
 0x17a   : > { %1434 = vst.msk [vmem:[%s2780_s12 + $0x54] sm:$0xf] %vm1412_vm1, %v1916_v44 }
 0x17b   : > { %s2972_s21 = smov (!%p1446_p8, %s1445_s21), 24 }
 0x17c   : > { %s1883_s26 = sshll.u32 %s2972_s21, 6 }
 0x17d   : > { %p1886_p9 = scmp.eq.s32.totalorder %s1883_s26, 0 }
 0x17e   : > { %2363 = sdivrem.u32 (!%p1886_p9), %s2972_s21, 24 }
 0x17f   : > { %1454 = sbr.rel (%p1886_p9) target bundleno = 456 (0x1c8), region = 40 }
 0x187   : > { %s2859_s20 = spop.drf %2363 }
 0x188   : > { %p1887_p10 = scmp.le.s32.totalorder %s2859_s20, 0 }
 0x189   : > { %s2965_s15 = smov (!%p1887_p10), %s2853_s25  ;;  %s2966_s28 = smov (!%p1887_p10), %s2780_s12 }
 0x18a   : > { %1701 = sbr.rel (%p1887_p10) target bundleno = 427 (0x1ab), region = 112  ;;  %s2868_s27 = smov (!%p1887_p10), 0  }
 0x18b   : > { %s2870_s29 = smov (!%p1887_p10), 0  }
 0x191 LB: >> { %v1471_v38 = vld [vmem:[%s2429_s28] sm:$0xf]  ;;  %v1473_v39 = vld [vmem:[%s2429_s28 + $0x4] sm:$0xf]  ;;  %v1475_v42 = vld [vmem:[%s2429_s28 + $0x8] sm:$0xf]  ;;  %s2437_s29 = sphi %s2870_s29, %s1465_s29   ;;  %s2433_s27 = sphi %s2868_s27, %s2967_s27   ;;  %s2429_s28 = sphi %s2966_s28, %s1524_s28   ;;  %s2425_s15 = sphi %s2965_s15, %s1525_s15  }
 0x192   : >> { %1472 = vst [vmem:[%s2425_s15] sm:$0xf] %v1471_v38  ;;  %1474 = vst [vmem:[%s2425_s15 + $0x4] sm:$0xf] %v1473_v39  ;;  %v1477_v45 = vld [vmem:[%s2429_s28 + $0xc] sm:$0xf]  ;;  %s1519_s30 = sadd.s32 1, %s2433_s27 }
 0x193   : >> { %1476 = vst [vmem:[%s2425_s15 + $0x8] sm:$0xf] %v1475_v42  ;;  %v1479_v46 = vld [vmem:[%s2429_s28 + $0x10] sm:$0xf]  ;;  %v1481_v48 = vld [vmem:[%s2429_s28 + $0x14] sm:$0xf]  ;;  %p1520_p11 = scmp.ge.s32.totalorder %s1519_s30, %s2859_s20 }
 0x194   : >> { %1478 = vst [vmem:[%s2425_s15 + $0xc] sm:$0xf] %v1477_v45  ;;  %1480 = vst [vmem:[%s2425_s15 + $0x10] sm:$0xf] %v1479_v46  ;;  %v1483_v51 = vld [vmem:[%s2429_s28 + $0x18] sm:$0xf] }
 0x195   : >> { %1482 = vst [vmem:[%s2425_s15 + $0x14] sm:$0xf] %v1481_v48  ;;  %v1485_v53 = vld [vmem:[%s2429_s28 + $0x1c] sm:$0xf]  ;;  %v1487_v54 = vld [vmem:[%s2429_s28 + $0x20] sm:$0xf] }
 0x196   : >> { %1484 = vst [vmem:[%s2425_s15 + $0x18] sm:$0xf] %v1483_v51  ;;  %1486 = vst [vmem:[%s2425_s15 + $0x1c] sm:$0xf] %v1485_v53  ;;  %v1489_v55 = vld [vmem:[%s2429_s28 + $0x24] sm:$0xf] }
 0x197   : >> { %1488 = vst [vmem:[%s2425_s15 + $0x20] sm:$0xf] %v1487_v54  ;;  %v1491_v56 = vld [vmem:[%s2429_s28 + $0x28] sm:$0xf]  ;;  %v1493_v31 = vld [vmem:[%s2429_s28 + $0x2c] sm:$0xf] }
 0x198   : >> { %1490 = vst [vmem:[%s2425_s15 + $0x24] sm:$0xf] %v1489_v55  ;;  %1492 = vst [vmem:[%s2425_s15 + $0x28] sm:$0xf] %v1491_v56  ;;  %v1495_v57 = vld [vmem:[%s2429_s28 + $0x30] sm:$0xf] }
 0x199   : >> { %1494 = vst [vmem:[%s2425_s15 + $0x2c] sm:$0xf] %v1493_v31  ;;  %v1497_v58 = vld [vmem:[%s2429_s28 + $0x34] sm:$0xf]  ;;  %v1499_v59 = vld [vmem:[%s2429_s28 + $0x38] sm:$0xf] }
 0x19a   : >> { %1496 = vst [vmem:[%s2425_s15 + $0x30] sm:$0xf] %v1495_v57  ;;  %1498 = vst [vmem:[%s2425_s15 + $0x34] sm:$0xf] %v1497_v58  ;;  %v1501_v60 = vld [vmem:[%s2429_s28 + $0x3c] sm:$0xf] }
 0x19b   : >> { %1500 = vst [vmem:[%s2425_s15 + $0x38] sm:$0xf] %v1499_v59  ;;  %v1503_v15 = vld [vmem:[%s2429_s28 + $0x40] sm:$0xf]  ;;  %v1505_v19 = vld [vmem:[%s2429_s28 + $0x44] sm:$0xf] }
 0x19c   : >> { %1502 = vst [vmem:[%s2425_s15 + $0x3c] sm:$0xf] %v1501_v60  ;;  %1504 = vst [vmem:[%s2425_s15 + $0x40] sm:$0xf] %v1503_v15  ;;  %v1507_v62 = vld [vmem:[%s2429_s28 + $0x48] sm:$0xf] }
 0x19d   : >> { %1506 = vst [vmem:[%s2425_s15 + $0x44] sm:$0xf] %v1505_v19  ;;  %v1509_v3 = vld [vmem:[%s2429_s28 + $0x4c] sm:$0xf]  ;;  %v1511_v7 = vld [vmem:[%s2429_s28 + $0x50] sm:$0xf] }
 0x19e   : >> { %1508 = vst [vmem:[%s2425_s15 + $0x48] sm:$0xf] %v1507_v62  ;;  %1510 = vst [vmem:[%s2425_s15 + $0x4c] sm:$0xf] %v1509_v3  ;;  %v1513_v61 = vld [vmem:[%s2429_s28 + $0x54] sm:$0xf] }
 0x19f   : >> { %1512 = vst [vmem:[%s2425_s15 + $0x50] sm:$0xf] %v1511_v7  ;;  %v1515_v33 = vld [vmem:[%s2429_s28 + $0x58] sm:$0xf]  ;;  %v1517_v8 = vld [vmem:[%s2429_s28 + $0x5c] sm:$0xf] }
 0x1a0   : >> { %1514 = vst [vmem:[%s2425_s15 + $0x54] sm:$0xf] %v1513_v61  ;;  %1516 = vst [vmem:[%s2425_s15 + $0x58] sm:$0xf] %v1515_v33  ;;  %s2974_s30 = smov (%p1520_p11, %s1519_s30), 0  ;;  %s1465_s29 = sadd.s32 1, %s2437_s29  }
 0x1a1   : >> { %1518 = vst [vmem:[%s2425_s15 + $0x5c] sm:$0xf] %v1517_v8  ;;  %s1522_s4 = smul.u32 96, %s2974_s30  ;;  %p1464_p12 = scmp.ge.s32.totalorder %s1465_s29, %s2859_s20 }
 0x1a2   : >> { %s2967_s27 = smov %s2974_s30 }
 0x1a3   : >> { %s1524_s28 = scalar_lea.vmem %s2780_s12, %s1522_s4 [#allocation2]   ;;  %s1525_s15 = scalar_lea.vmem %s2853_s25, %s1522_s4  }
 0x1a4   : > { %1467 = sbr.rel (!%p1464_p12) target bundleno = 401 (0x191), region = 118 }
 0x1ab PF: > { %2365 = sdivrem.u32 %s2972_s21, 24 }
 0x1ac   : > { %s1888_s5 = smul.u32 96, %s2859_s20 }
 0x1ae   : > { %s1530_s6 = scalar_lea.vmem %s2780_s12, %s1888_s5 [#allocation2]   ;;  %s1532_s7 = scalar_lea.vmem %s2853_s25, %s1888_s5  }
 0x1b4   : > { %s2366_s8 = spop.drf %2365 }
 0x1b5   : > { %p1890_p13 = scmp.le.s32.totalorder %s2366_s8, 0 }
 0x1b6   : > { %s2439_s9 = smov (!%p1890_p13), %s1532_s7   ;;  %s2443_s10 = smov (!%p1890_p13), %s1530_s6  }
 0x1b7   : > { %1715 = sbr.rel (%p1890_p13) target bundleno = 456 (0x1c8), region = 123  ;;  %s2447_s11 = smov (!%p1890_p13), 0  }
 0x1b8   : > { %s2451_s14 = smov (!%p1890_p13), 0  }
 0x1be LB: >> { %v1542_v9 = vld [vmem:[%s2445_s10] sm:$0xf]  ;;  %s1544_s17 = sadd.s32 1, %s2449_s11  ;;  %s1536_s14 = sadd.s32 1, %s2453_s14   ;;  %s2453_s14 = sphi %s2451_s14, %s1536_s14   ;;  %s2449_s11 = sphi %s2447_s11, %s2448_s11   ;;  %s2445_s10 = sphi %s2443_s10, %s1549_s10   ;;  %s2441_s9 = sphi %s2439_s9, %s1550_s9  }
 0x1bf   : >> { %1543 = vst [vmem:[%s2441_s9] sm:$0xf] %v1542_v9  ;;  %p1545_p0 = scmp.ge.s32.totalorder %s1544_s17, %s2366_s8  ;;  %p1535_p1 = scmp.ge.s32.totalorder %s1536_s14, %s2366_s8 }
 0x1c1   : >> { %s2976_s17 = smov (%p1545_p0, %s1544_s17), 0  ;;  %1538 = sbr.rel (!%p1535_p1) target bundleno = 446 (0x1be), region = 129 }
 0x1c2   : >> { %s1891_s18 = sshll.u32 %s2976_s17, 2  ;;  %s2448_s11 = smov %s2976_s17  }
 0x1c3   : >> { %s1549_s10 = scalar_lea.vmem %s1530_s6, %s1891_s18 [#allocation2]   ;;  %s1550_s9 = scalar_lea.vmem %s1532_s7, %s1891_s18  }
 0x1c8 PF: > { %p10_p2 = scmp.ge.s32.totalorder %s2490_s16, 4   ;;  %s2968_s12 = smov %s2417_s13 }
 0x1c9   : > { %s2969_s13 = smov %s2498_s19  ;;  %s2970_s14 = smov %s2490_s16 }
 0x1ca   :  { %12 = sbr.rel (!%p10_p2) target bundleno = 2 (0x2), region = 140 }

// kernel: forward.9
= control target key start
LH: loop header
LB: loop body
LE: loop exit
PB: predicated region body
PF: predicated region fallthrough
CT: control target
= control target key end

     0   :  { %s3760_s0 = inlined_call_operand.vmem [shape: bf16[10,2304], index: 0, kind: input, shape index: {}]   ;;  %s3761_s1 = inlined_call_operand.vmem [shape: bf16[2304,50], index: 1, kind: input, shape index: {}]   ;;  %s3762_s2 = inlined_call_operand.vmem [shape: f32[1,50], index: 2, kind: input, shape index: {}]   ;;  %s3763_s3 = inlined_call_operand.vmem [shape: bf16[50,128], index: 3, kind: input, shape index: {}]   ;;  %s3764_s4 = inlined_call_operand.vmem [shape: f32[1,128], index: 4, kind: input, shape index: {}]   ;;  %s3765_s5 = inlined_call_operand.vmem [shape: bf16[32,128], index: 5, kind: input, shape index: {}]   ;;  %s3766_s6 = inlined_call_operand.vmem [shape: bf16[32,50], index: 6, kind: input, shape index: {}]   ;;  %s3767_s7 = inlined_call_operand.vmem [shape: f32[1,50], index: 7, kind: input, shape index: {}]   ;;  %s3768_s8 = inlined_call_operand.vmem [shape: bf16[50,7], index: 8, kind: input, shape index: {}]   ;;  %s3769_s9 = inlined_call_operand.vmem [shape: f32[1,7], index: 9, kind: input, shape index: {}]   ;;  %s3770_s10 = inlined_call_operand.hbm [shape: f32[2,7], index: 10, kind: output, shape index: {}]  }
   0x1   :  { %v2818_v0 = vld [vmem:[%s3761_s1 + $0x40] sm:$0xff]   ;;  %v2822_v4 = vld [vmem:[%s3761_s1 + $0x48] sm:$0xff]   ;;  %v2826_v8 = vld [vmem:[%s3761_s1 + $0x50] sm:$0xff]  }
   0x2   :  { %v2819_v1 = vld [vmem:[%s3761_s1] sm:$0xff]   ;;  %2514 = vmatprep.subr.bf16.mxu0 %v2818_v0  ;;  %v2823_v5 = vld [vmem:[%s3761_s1 + $0x8] sm:$0xff]   ;;  %v2827_v9 = vld [vmem:[%s3761_s1 + $0x10] sm:$0xff]  }
   0x3   :  { %v2820_v2 = vld [vmem:[%s3761_s1 + $0xc0] sm:$0xff]   ;;  %2515 = vmatpush3.bf16.msra.mxu0 %v2819_v1  ;;  %v2824_v6 = vld [vmem:[%s3761_s1 + $0xc8] sm:$0xff]   ;;  %v2828_v10 = vld [vmem:[%s3761_s1 + $0xd0] sm:$0xff]  }
   0x4   :  { %v2821_v3 = vld [vmem:[%s3761_s1 + $0x80] sm:$0xff]   ;;  %2536 = vmatprep.subr.bf16.mxu1 %v2820_v2  ;;  %2516 = vmatprep.subr.bf16.mxu0 %v2822_v4  ;;  %v2825_v7 = vld [vmem:[%s3761_s1 + $0x88] sm:$0xff]   ;;  %v2829_v11 = vld [vmem:[%s3761_s1 + $0x90] sm:$0xff]  }
   0x5   :  { %2537 = vmatpush3.bf16.msra.mxu1 %v2821_v3  ;;  %v2830_v12 = vld [vmem:[%s3761_s1 + $0x58] sm:$0xff]   ;;  %v2834_v16 = vld [vmem:[%s3761_s1 + $0x60] sm:$0xff]   ;;  %v2838_v20 = vld [vmem:[%s3761_s1 + $0x68] sm:$0xff]  }
   0x6   :  { %2538 = vmatprep.subr.bf16.mxu1 %v2824_v6  ;;  %v2831_v13 = vld [vmem:[%s3761_s1 + $0x18] sm:$0xff]   ;;  %v2835_v17 = vld [vmem:[%s3761_s1 + $0x20] sm:$0xff]   ;;  %v2839_v21 = vld [vmem:[%s3761_s1 + $0x28] sm:$0xff]  }
   0x7   :  { %2517 = vmatpush3.bf16.msra.mxu0 %v2823_v5  ;;  %v2832_v14 = vld [vmem:[%s3761_s1 + $0xd8] sm:$0xff]   ;;  %v2836_v18 = vld [vmem:[%s3761_s1 + $0xe0] sm:$0xff]   ;;  %v2840_v22 = vld [vmem:[%s3761_s1 + $0xe8] sm:$0xff]  }
   0x8   :  { %2518 = vmatprep.subr.bf16.mxu0 %v2826_v8  ;;  %v2833_v15 = vld [vmem:[%s3761_s1 + $0x98] sm:$0xff]   ;;  %v2837_v19 = vld [vmem:[%s3761_s1 + $0xa0] sm:$0xff]   ;;  %v2841_v23 = vld [vmem:[%s3761_s1 + $0xa8] sm:$0xff]  }
   0x9   :  { %2539 = vmatpush3.bf16.msra.mxu1 %v2825_v7  ;;  %v2842_v24 = vld [vmem:[%s3761_s1 + $0x70] sm:$0xff]   ;;  %v2846_v28 = vld [vmem:[%s3761_s1 + $0x78] sm:$0xff]   ;;  %v2849_v31 = vld [vmem:[%s3760_s0] ss:$72 sps:$4 sm:$0x1f]  }
   0xa   :  { %2540 = vmatprep.subr.bf16.mxu1 %v2828_v10  ;;  %v2843_v25 = vld [vmem:[%s3761_s1 + $0x30] sm:$0xff]   ;;  %v2847_v29 = vld [vmem:[%s3761_s1 + $0x38] sm:$0xff]   ;;  %v2851_v32 = vld [vmem:[%s3760_s0 + $0x4] ss:$72 sps:$4 sm:$0x1f]  }
   0xb   :  { %2519 = vmatpush3.bf16.msra.mxu0 %v2827_v9  ;;  %v2844_v26 = vld [vmem:[%s3761_s1 + $0xf0] sm:$0xff]   ;;  %v2848_v30 = vld [vmem:[%s3761_s1 + $0xf8] sm:$0xff]   ;;  %1336 = vmatprep.mubr.bf16.mxu0 %v2851_v32  ;;  %v2853_v34 = vld [vmem:[%s3761_s1 + $0x140] sm:$0xff]  }
   0xc   :  { %2520 = vmatprep.subr.bf16.mxu0 %v2830_v12  ;;  %v2845_v27 = vld [vmem:[%s3761_s1 + $0xb0] sm:$0xff]   ;;  %v2852_v33 = vld [vmem:[%s3761_s1 + $0xb8] sm:$0xff]   ;;  %v2857_v37 = vld [vmem:[%s3761_s1 + $0x100] sm:$0xff]  }
   0xd   :  { %2541 = vmatpush3.bf16.msra.mxu1 %v2829_v11  ;;  %v2854_v35 = vld [vmem:[%s3760_s0 + $0x8] ss:$72 sps:$4 sm:$0x1f]   ;;  %v2856_v36 = vld [vmem:[%s3760_s0 + $0xc] ss:$72 sps:$4 sm:$0x1f]  }
   0xe   :  { %2542 = vmatprep.subr.bf16.mxu1 %v2832_v14  ;;  %1377 = vmatprep.mubr.bf16.mxu1 %v2856_v36  ;;  %v2858_v38 = vld [vmem:[%s3761_s1 + $0x1c0] sm:$0xff]   ;;  %v2860_v40 = vld [vmem:[%s3761_s1 + $0x148] sm:$0xff]   ;;  %v2864_v44 = vld [vmem:[%s3761_s1 + $0x150] sm:$0xff]  }
   0xf   :  { %2521 = vmatpush3.bf16.msra.mxu0 %v2831_v13  ;;  %v2859_v39 = vld [vmem:[%s3761_s1 + $0x180] sm:$0xff]   ;;  %v2861_v41 = vld [vmem:[%s3761_s1 + $0x108] sm:$0xff]   ;;  %v2865_v45 = vld [vmem:[%s3761_s1 + $0x110] sm:$0xff]  }
  0x10   :  { %2522 = vmatprep.subr.bf16.mxu0 %v2834_v16  ;;  %v2862_v42 = vld [vmem:[%s3761_s1 + $0x1c8] sm:$0xff]   ;;  %v2866_v46 = vld [vmem:[%s3761_s1 + $0x1d0] sm:$0xff]   ;;  %v2868_v48 = vld [vmem:[%s3761_s1 + $0x158] sm:$0xff]  }
  0x11   :  { %2543 = vmatpush3.bf16.msra.mxu1 %v2833_v15  ;;  %v2863_v43 = vld [vmem:[%s3761_s1 + $0x188] sm:$0xff]   ;;  %v2867_v47 = vld [vmem:[%s3761_s1 + $0x190] sm:$0xff]   ;;  %v2869_v49 = vld [vmem:[%s3761_s1 + $0x118] sm:$0xff]  }
  0x12   :  { %2544 = vmatprep.subr.bf16.mxu1 %v2836_v18  ;;  %v2870_v50 = vld [vmem:[%s3761_s1 + $0x1d8] sm:$0xff]   ;;  %v2872_v52 = vld [vmem:[%s3761_s1 + $0x160] sm:$0xff]   ;;  %v2876_v56 = vld [vmem:[%s3761_s1 + $0x168] sm:$0xff]  }
  0x13   :  { %2523 = vmatpush3.bf16.msra.mxu0 %v2835_v17  ;;  %v2871_v51 = vld [vmem:[%s3761_s1 + $0x198] sm:$0xff]   ;;  %v2873_v53 = vld [vmem:[%s3761_s1 + $0x120] sm:$0xff]   ;;  %v2877_v57 = vld [vmem:[%s3761_s1 + $0x128] sm:$0xff]  }
  0x14   :  { %2524 = vmatprep.subr.bf16.mxu0 %v2838_v20  ;;  %v2874_v54 = vld [vmem:[%s3761_s1 + $0x1e0] sm:$0xff]   ;;  %v2878_v58 = vld [vmem:[%s3761_s1 + $0x1e8] sm:$0xff]   ;;  %v2880_v60 = vld [vmem:[%s3761_s1 + $0x170] sm:$0xff]  }
  0x15   :  { %2545 = vmatpush3.bf16.msra.mxu1 %v2837_v19  ;;  %v2875_v55 = vld [vmem:[%s3761_s1 + $0x1a0] sm:$0xff]   ;;  %v2879_v59 = vld [vmem:[%s3761_s1 + $0x1a8] sm:$0xff]   ;;  %v2881_v61 = vld [vmem:[%s3761_s1 + $0x130] sm:$0xff]  }
  0x16   :  { %2546 = vmatprep.subr.bf16.mxu1 %v2840_v22  ;;  %v2882_v62 = vld [vmem:[%s3761_s1 + $0x1f0] sm:$0xff]   ;;  %v2884_v0 = vld [vmem:[%s3761_s1 + $0x178] sm:$0xff]   ;;  %v2891_v6 = vld [vmem:[%s3761_s1 + $0x240] sm:$0xff]  }
  0x17   :  { %2525 = vmatpush3.bf16.msra.mxu0 %v2839_v21  ;;  %v2883_v63 = vld [vmem:[%s3761_s1 + $0x1b0] sm:$0xff]   ;;  %v2885_v1 = vld [vmem:[%s3761_s1 + $0x138] sm:$0xff]   ;;  %v2895_v9 = vld [vmem:[%s3761_s1 + $0x200] sm:$0xff]  }
  0x18   :  { %2526 = vmatprep.subr.bf16.mxu0 %v2842_v24  ;;  %v2886_v2 = vld [vmem:[%s3761_s1 + $0x1f8] sm:$0xff]   ;;  %v2896_v10 = vld [vmem:[%s3761_s1 + $0x2c0] sm:$0xff]   ;;  %v2898_v12 = vld [vmem:[%s3761_s1 + $0x248] sm:$0xff]  }
  0x19   :  { %2547 = vmatpush3.bf16.msra.mxu1 %v2841_v23  ;;  %v2887_v3 = vld [vmem:[%s3760_s0 + $0x10] ss:$72 sps:$4 sm:$0x1f]   ;;  %v2889_v4 = vld [vmem:[%s3760_s0 + $0x14] ss:$72 sps:$4 sm:$0x1f]  }
  0x1a   :  { %2548 = vmatprep.subr.bf16.mxu1 %v2844_v26  ;;  %v2890_v5 = vld [vmem:[%s3761_s1 + $0x1b8] sm:$0xff]   ;;  %v2897_v11 = vld [vmem:[%s3761_s1 + $0x280] sm:$0xff]   ;;  %v2899_v13 = vld [vmem:[%s3761_s1 + $0x208] sm:$0xff]  }
  0x1b   :  { %2527 = vmatpush3.bf16.msra.mxu0 %v2843_v25  ;;  %v2892_v7 = vld [vmem:[%s3760_s0 + $0x18] ss:$72 sps:$4 sm:$0x1f]   ;;  %v2894_v8 = vld [vmem:[%s3760_s0 + $0x1c] ss:$72 sps:$4 sm:$0x1f]  }
  0x1c   :  { %2528 = vmatprep.subr.bf16.mxu0 %v2846_v28  ;;  %v2900_v14 = vld [vmem:[%s3761_s1 + $0x2c8] sm:$0xff]   ;;  %v2902_v16 = vld [vmem:[%s3761_s1 + $0x250] sm:$0xff]   ;;  %v2906_v20 = vld [vmem:[%s3761_s1 + $0x258] sm:$0xff]  }
  0x1d   :  { %2549 = vmatpush3.bf16.msra.mxu1 %v2845_v27  ;;  %v2901_v15 = vld [vmem:[%s3761_s1 + $0x288] sm:$0xff]   ;;  %v2903_v17 = vld [vmem:[%s3761_s1 + $0x210] sm:$0xff]   ;;  %v2907_v21 = vld [vmem:[%s3761_s1 + $0x218] sm:$0xff]  }
  0x1e   :  { %2550 = vmatprep.subr.bf16.mxu1 %v2848_v30  ;;  %v2904_v18 = vld [vmem:[%s3761_s1 + $0x2d0] sm:$0xff]   ;;  %v2908_v22 = vld [vmem:[%s3761_s1 + $0x2d8] sm:$0xff]   ;;  %v2910_v24 = vld [vmem:[%s3761_s1 + $0x260] sm:$0xff]  }
  0x1f   :  { %2529 = vmatpush3.bf16.msra.mxu0 %v2847_v29  ;;  %v2905_v19 = vld [vmem:[%s3761_s1 + $0x290] sm:$0xff]   ;;  %v2909_v23 = vld [vmem:[%s3761_s1 + $0x298] sm:$0xff]   ;;  %v2911_v25 = vld [vmem:[%s3761_s1 + $0x220] sm:$0xff]  }
  0x20   :  { %2558 = vmatprep.subr.bf16.mxu0 %v2853_v34  ;;  %v2912_v26 = vld [vmem:[%s3761_s1 + $0x2e0] sm:$0xff]   ;;  %v2914_v28 = vld [vmem:[%s3761_s1 + $0x268] sm:$0xff]   ;;  %v2918_v32 = vld [vmem:[%s3761_s1 + $0x270] sm:$0xff]  }
  0x21   :  { %2551 = vmatpush3.bf16.msra.mxu1 %v2852_v33  ;;  %v2913_v27 = vld [vmem:[%s3761_s1 + $0x2a0] sm:$0xff]   ;;  %v2915_v29 = vld [vmem:[%s3761_s1 + $0x228] sm:$0xff]   ;;  %v2919_v33 = vld [vmem:[%s3761_s1 + $0x230] sm:$0xff]  }
  0x22   :  { %1337 = vmatmul.mubr.bf16.vlgmr.msra.gmra.mrb[0].mxu0 %v2849_v31  ;;  %2580 = vmatprep.subr.bf16.mxu1 %v2858_v38  ;;  %v2916_v30 = vld [vmem:[%s3761_s1 + $0x2e8] sm:$0xff]   ;;  %v2920_v34 = vld [vmem:[%s3761_s1 + $0x2f0] sm:$0xff]   ;;  %v2922_v36 = vld [vmem:[%s3761_s1 + $0x278] sm:$0xff]  }
  0x23   :  { %2559 = vmatpush3.bf16.msra.mxu0 %v2857_v37  ;;  %1418 = vmatprep.mubr.bf16.mxu0 %v2889_v4  ;;  %v2917_v31 = vld [vmem:[%s3761_s1 + $0x2a8] sm:$0xff]   ;;  %v2923_v37 = vld [vmem:[%s3761_s1 + $0x238] sm:$0xff]   ;;  %v2956_v4 = vld [vmem:[%s3761_s1 + $0x370] sm:$0xff]  }
  0x24   :  { %1378 = vmatmul.mubr.bf16.vlgmr.msra.gmra.mrb[0].mxu1 %v2854_v35  ;;  %2560 = vmatprep.subr.bf16.mxu0 %v2860_v40  ;;  %v2921_v35 = vld [vmem:[%s3761_s1 + $0x2b0] sm:$0xff]   ;;  %v2924_v38 = vld [vmem:[%s3761_s1 + $0x2f8] sm:$0xff]   ;;  %v2927_v40 = vld [vmem:[%s3760_s0 + $0x24] ss:$72 sps:$4 sm:$0x1f]  }
  0x25   :  { %2581 = vmatpush3.bf16.msra.mxu1 %v2859_v39  ;;  %1459 = vmatprep.mubr.bf16.mxu1 %v2894_v8  ;;  %v2925_v39 = vld [vmem:[%s3760_s0 + $0x20] ss:$72 sps:$4 sm:$0x1f]   ;;  %v2960_v8 = vld [vmem:[%s3761_s1 + $0x378] sm:$0xff]  }
  0x26   :  { %2582 = vmatprep.subr.bf16.mxu1 %v2862_v42  ;;  %v2929_v42 = vld [vmem:[%s3761_s1 + $0x340] sm:$0xff]  }
  0x27   :  { %2561 = vmatpush3.bf16.msra.mxu0 %v2861_v41  ;;  %v2928_v41 = vld [vmem:[%s3761_s1 + $0x2b8] sm:$0xff]  }
  0x28   :  { %2562 = vmatprep.subr.bf16.mxu0 %v2864_v44  ;;  %v2932_v44 = vld [vmem:[%s3760_s0 + $0x2c] ss:$72 sps:$4 sm:$0x1f]  }
  0x29   :  { %2583 = vmatpush3.bf16.msra.mxu1 %v2863_v43  ;;  %v2930_v43 = vld [vmem:[%s3760_s0 + $0x28] ss:$72 sps:$4 sm:$0x1f]  }
  0x2a   :  { %2584 = vmatprep.subr.bf16.mxu1 %v2866_v46  ;;  %v2934_v46 = vld [vmem:[%s3761_s1 + $0x3c0] sm:$0xff]  }
  0x2b   :  { %2563 = vmatpush3.bf16.msra.mxu0 %v2865_v45  ;;  %v2933_v45 = vld [vmem:[%s3761_s1 + $0x300] sm:$0xff]  }
  0x2c   :  { %2564 = vmatprep.subr.bf16.mxu0 %v2868_v48  ;;  %v2936_v48 = vld [vmem:[%s3761_s1 + $0x348] sm:$0xff]  }
  0x2d   :  { %2585 = vmatpush3.bf16.msra.mxu1 %v2867_v47  ;;  %v2935_v47 = vld [vmem:[%s3761_s1 + $0x380] sm:$0xff]  }
  0x2e   :  { %2586 = vmatprep.subr.bf16.mxu1 %v2870_v50  ;;  %v2938_v50 = vld [vmem:[%s3761_s1 + $0x3c8] sm:$0xff]  }
  0x2f   :  { %2565 = vmatpush3.bf16.msra.mxu0 %v2869_v49  ;;  %v2937_v49 = vld [vmem:[%s3761_s1 + $0x308] sm:$0xff]  }
  0x30   :  { %2566 = vmatprep.subr.bf16.mxu0 %v2872_v52  ;;  %v2940_v52 = vld [vmem:[%s3761_s1 + $0x350] sm:$0xff]  }
  0x31   :  { %2587 = vmatpush3.bf16.msra.mxu1 %v2871_v51  ;;  %v2939_v51 = vld [vmem:[%s3761_s1 + $0x388] sm:$0xff]  }
  0x32   :  { %2588 = vmatprep.subr.bf16.mxu1 %v2874_v54  ;;  %v2942_v54 = vld [vmem:[%s3761_s1 + $0x3d0] sm:$0xff]  }
  0x33   :  { %2567 = vmatpush3.bf16.msra.mxu0 %v2873_v53  ;;  %v2941_v53 = vld [vmem:[%s3761_s1 + $0x310] sm:$0xff]  }
  0x34   :  { %2568 = vmatprep.subr.bf16.mxu0 %v2876_v56  ;;  %v2944_v56 = vld [vmem:[%s3761_s1 + $0x358] sm:$0xff]  }
  0x35   :  { %2589 = vmatpush3.bf16.msra.mxu1 %v2875_v55  ;;  %v2943_v55 = vld [vmem:[%s3761_s1 + $0x390] sm:$0xff]  }
  0x36   :  { %2590 = vmatprep.subr.bf16.mxu1 %v2878_v58  ;;  %v2946_v58 = vld [vmem:[%s3761_s1 + $0x3d8] sm:$0xff]  }
  0x37   :  { %2569 = vmatpush3.bf16.msra.mxu0 %v2877_v57  ;;  %v2945_v57 = vld [vmem:[%s3761_s1 + $0x318] sm:$0xff]  }
  0x38   :  { %2570 = vmatprep.subr.bf16.mxu0 %v2880_v60  ;;  %v2948_v60 = vld [vmem:[%s3761_s1 + $0x360] sm:$0xff]  }
  0x39   :  { %2591 = vmatpush3.bf16.msra.mxu1 %v2879_v59  ;;  %v2947_v59 = vld [vmem:[%s3761_s1 + $0x398] sm:$0xff]  }
  0x3a   :  { %2592 = vmatprep.subr.bf16.mxu1 %v2882_v62  ;;  %v2950_v62 = vld [vmem:[%s3761_s1 + $0x3e0] sm:$0xff]  }
  0x3b   :  { %2571 = vmatpush3.bf16.msra.mxu0 %v2881_v61  ;;  %v2949_v61 = vld [vmem:[%s3761_s1 + $0x320] sm:$0xff]  }
  0x3c   :  { %2572 = vmatprep.subr.bf16.mxu0 %v2884_v0  ;;  %v2952_v0 = vld [vmem:[%s3761_s1 + $0x368] sm:$0xff]  }
  0x3d   :  { %2593 = vmatpush3.bf16.msra.mxu1 %v2883_v63  ;;  %v2951_v63 = vld [vmem:[%s3761_s1 + $0x3a0] sm:$0xff]  }
  0x3e   :  { %2594 = vmatprep.subr.bf16.mxu1 %v2886_v2  ;;  %v2954_v2 = vld [vmem:[%s3761_s1 + $0x3e8] sm:$0xff]  }
  0x3f   :  { %2573 = vmatpush3.bf16.msra.mxu0 %v2885_v1  ;;  %v2953_v1 = vld [vmem:[%s3761_s1 + $0x328] sm:$0xff]  }
  0x40   :  { %2602 = vmatprep.subr.bf16.mxu0 %v2891_v6  ;;  %v2958_v6 = vld [vmem:[%s3761_s1 + $0x3f0] sm:$0xff]  }
  0x41   :  { %2595 = vmatpush3.bf16.msra.mxu1 %v2890_v5  ;;  %v2957_v5 = vld [vmem:[%s3761_s1 + $0x330] sm:$0xff]  }
  0x42   :  { %1419 = vmatmul.mubr.bf16.vlgmr.msra.gmra.mrb[4].mxu0 %v2887_v3  ;;  %2624 = vmatprep.subr.bf16.mxu1 %v2896_v10  ;;  %v2955_v3 = vld [vmem:[%s3761_s1 + $0x3a8] sm:$0xff]   ;;  %v2962_v10 = vld [vmem:[%s3761_s1 + $0x3f8] sm:$0xff]  }
  0x43   :  { %2603 = vmatpush3.bf16.msra.mxu0 %v2895_v9  ;;  %1500 = vmatprep.mubr.bf16.mxu0 %v2927_v40  ;;  %v2961_v9 = vld [vmem:[%s3761_s1 + $0x338] sm:$0xff]  }
  0x44   :  { %1460 = vmatmul.mubr.bf16.vlgmr.msra.gmra.mrb[4].mxu1 %v2892_v7  ;;  %2604 = vmatprep.subr.bf16.mxu0 %v2898_v12  ;;  %v2959_v7 = vld [vmem:[%s3761_s1 + $0x3b0] sm:$0xff]  }
  0x45   :  { %2625 = vmatpush3.bf16.msra.mxu1 %v2897_v11  ;;  %1541 = vmatprep.mubr.bf16.mxu1 %v2932_v44  ;;  %v2963_v11 = vld [vmem:[%s3760_s0 + $0x30] ss:$72 sps:$4 sm:$0x1f]   ;;  %v2965_v12 = vld [vmem:[%s3760_s0 + $0x34] ss:$72 sps:$4 sm:$0x1f]  }
  0x46   :  { %2626 = vmatprep.subr.bf16.mxu1 %v2900_v14  ;;  %v2967_v14 = vld [vmem:[%s3761_s1 + $0x440] sm:$0xff]  }
  0x47   :  { %2605 = vmatpush3.bf16.msra.mxu0 %v2899_v13  ;;  %v2966_v13 = vld [vmem:[%s3761_s1 + $0x3b8] sm:$0xff]  }
  0x48   :  { %2606 = vmatprep.subr.bf16.mxu0 %v2902_v16  ;;  %v2970_v16 = vld [vmem:[%s3760_s0 + $0x3c] ss:$72 sps:$4 sm:$0x1f]  }
  0x49   :  { %2627 = vmatpush3.bf16.msra.mxu1 %v2901_v15  ;;  %v2968_v15 = vld [vmem:[%s3760_s0 + $0x38] ss:$72 sps:$4 sm:$0x1f]  }
  0x4a   :  { %2628 = vmatprep.subr.bf16.mxu1 %v2904_v18  ;;  %v2972_v18 = vld [vmem:[%s3761_s1 + $0x448] sm:$0xff]  }
  0x4b   :  { %2607 = vmatpush3.bf16.msra.mxu0 %v2903_v17  ;;  %v2971_v17 = vld [vmem:[%s3761_s1 + $0x400] sm:$0xff]  }
  0x4c   :  { %2608 = vmatprep.subr.bf16.mxu0 %v2906_v20  ;;  %v2974_v20 = vld [vmem:[%s3761_s1 + $0x450] sm:$0xff]  }
  0x4d   :  { %2629 = vmatpush3.bf16.msra.mxu1 %v2905_v19  ;;  %v2973_v19 = vld [vmem:[%s3761_s1 + $0x408] sm:$0xff]  }
  0x4e   :  { %2630 = vmatprep.subr.bf16.mxu1 %v2908_v22  ;;  %v2976_v22 = vld [vmem:[%s3761_s1 + $0x458] sm:$0xff]  }
  0x4f   :  { %2609 = vmatpush3.bf16.msra.mxu0 %v2907_v21  ;;  %v2975_v21 = vld [vmem:[%s3761_s1 + $0x410] sm:$0xff]  }
  0x50   :  { %2610 = vmatprep.subr.bf16.mxu0 %v2910_v24  ;;  %v2978_v24 = vld [vmem:[%s3761_s1 + $0x460] sm:$0xff]  }
  0x51   :  { %2631 = vmatpush3.bf16.msra.mxu1 %v2909_v23  ;;  %v2977_v23 = vld [vmem:[%s3761_s1 + $0x418] sm:$0xff]  }
  0x52   :  { %2632 = vmatprep.subr.bf16.mxu1 %v2912_v26  ;;  %v2980_v26 = vld [vmem:[%s3761_s1 + $0x468] sm:$0xff]  }
  0x53   :  { %2611 = vmatpush3.bf16.msra.mxu0 %v2911_v25  ;;  %v2979_v25 = vld [vmem:[%s3761_s1 + $0x420] sm:$0xff]  }
  0x54   :  { %2612 = vmatprep.subr.bf16.mxu0 %v2914_v28  ;;  %v2988_v28 = vld [vmem:[%s3760_s0 + $0x44] ss:$72 sps:$4 sm:$0x1f]  }
  0x55   :  { %2633 = vmatpush3.bf16.msra.mxu1 %v2913_v27  ;;  %v2981_v27 = vld [vmem:[%s3761_s1 + $0x428] sm:$0xff]  }
  0x56   :  { %2634 = vmatprep.subr.bf16.mxu1 %v2916_v30  ;;  %v2983_v30 = vld [vmem:[%s3761_s1 + $0x430] sm:$0xff]  }
  0x57   :  { %2613 = vmatpush3.bf16.msra.mxu0 %v2915_v29  ;;  %v2982_v29 = vld [vmem:[%s3761_s1 + $0x470] sm:$0xff]  }
  0x58   :  { %2614 = vmatprep.subr.bf16.mxu0 %v2918_v32 }
  0x59   :  { %2635 = vmatpush3.bf16.msra.mxu1 %v2917_v31  ;;  %v2984_v31 = vld [vmem:[%s3761_s1 + $0x478] sm:$0xff]  }
  0x5a   :  { %2636 = vmatprep.subr.bf16.mxu1 %v2920_v34 }
  0x5b   :  { %2615 = vmatpush3.bf16.msra.mxu0 %v2919_v33 }
  0x5c   :  { %2616 = vmatprep.subr.bf16.mxu0 %v2922_v36 }
  0x5d   :  { %2637 = vmatpush3.bf16.msra.mxu1 %v2921_v35 }
  0x5e   :  { %2638 = vmatprep.subr.bf16.mxu1 %v2924_v38 }
  0x5f   :  { %2617 = vmatpush3.bf16.msra.mxu0 %v2923_v37 }
  0x60   :  { %2646 = vmatprep.subr.bf16.mxu0 %v2929_v42 }
  0x61   :  { %2639 = vmatpush3.bf16.msra.mxu1 %v2928_v41 }
  0x62   :  { %1501 = vmatmul.mubr.bf16.vlgmr.msra.gmra.mrb[8].mxu0 %v2925_v39  ;;  %2668 = vmatprep.subr.bf16.mxu1 %v2934_v46 }
  0x63   :  { %2647 = vmatpush3.bf16.msra.mxu0 %v2933_v45  ;;  %1582 = vmatprep.mubr.bf16.mxu0 %v2965_v12 }
  0x64   :  { %1542 = vmatmul.mubr.bf16.vlgmr.msra.gmra.mrb[8].mxu1 %v2930_v43  ;;  %2648 = vmatprep.subr.bf16.mxu0 %v2936_v48 }
  0x65   :  { %2669 = vmatpush3.bf16.msra.mxu1 %v2935_v47  ;;  %1623 = vmatprep.mubr.bf16.mxu1 %v2970_v16 }
  0x66   :  { %2670 = vmatprep.subr.bf16.mxu1 %v2938_v50 }
  0x67   :  { %2649 = vmatpush3.bf16.msra.mxu0 %v2937_v49 }
  0x68   :  { %2650 = vmatprep.subr.bf16.mxu0 %v2940_v52 }
  0x69   :  { %2671 = vmatpush3.bf16.msra.mxu1 %v2939_v51 }
  0x6a   :  { %2672 = vmatprep.subr.bf16.mxu1 %v2942_v54 }
  0x6b   :  { %2651 = vmatpush3.bf16.msra.mxu0 %v2941_v53 }
  0x6c   :  { %2652 = vmatprep.subr.bf16.mxu0 %v2944_v56 }
  0x6d   :  { %2673 = vmatpush3.bf16.msra.mxu1 %v2943_v55 }
  0x6e   :  { %2674 = vmatprep.subr.bf16.mxu1 %v2946_v58 }
  0x6f   :  { %2653 = vmatpush3.bf16.msra.mxu0 %v2945_v57 }
  0x70   :  { %2654 = vmatprep.subr.bf16.mxu0 %v2948_v60 }
  0x71   :  { %2675 = vmatpush3.bf16.msra.mxu1 %v2947_v59 }
  0x72   :  { %2676 = vmatprep.subr.bf16.mxu1 %v2950_v62 }
  0x73   :  { %2655 = vmatpush3.bf16.msra.mxu0 %v2949_v61 }
  0x74   :  { %2656 = vmatprep.subr.bf16.mxu0 %v2952_v0 }
  0x75   :  { %2677 = vmatpush3.bf16.msra.mxu1 %v2951_v63 }
  0x76   :  { %2678 = vmatprep.subr.bf16.mxu1 %v2954_v2 }
  0x77   :  { %2657 = vmatpush3.bf16.msra.mxu0 %v2953_v1 }
  0x78   :  { %2658 = vmatprep.subr.bf16.mxu0 %v2956_v4 }
  0x79   :  { %2679 = vmatpush3.bf16.msra.mxu1 %v2955_v3 }
  0x7a   :  { %2680 = vmatprep.subr.bf16.mxu1 %v2958_v6 }
  0x7b   :  { %2659 = vmatpush3.bf16.msra.mxu0 %v2957_v5 }
  0x7c   :  { %2660 = vmatprep.subr.bf16.mxu0 %v2960_v8 }
  0x7d   :  { %2681 = vmatpush3.bf16.msra.mxu1 %v2959_v7 }
  0x7e   :  { %2682 = vmatprep.subr.bf16.mxu1 %v2962_v10 }
  0x7f   :  { %2661 = vmatpush3.bf16.msra.mxu0 %v2961_v9 }
  0x80   :  { %2690 = vmatprep.subr.bf16.mxu0 %v2967_v14 }
  0x81   :  { %2683 = vmatpush3.bf16.msra.mxu1 %v2966_v13 }
  0x82   :  { %1583 = vmatmul.mubr.bf16.vlgmr.msra.gmra.mrb[12].mxu0 %v2963_v11 }
  0x83   :  { %2691 = vmatpush3.bf16.msra.mxu0 %v2971_v17  ;;  %1664 = vmatprep.mubr.bf16.mxu0 %v2988_v28 }
  0x84   :  { %1624 = vmatmul.mubr.bf16.vlgmr.msra.gmra.mrb[12].mxu1 %v2968_v15  ;;  %2692 = vmatprep.subr.bf16.mxu0 %v2972_v18 }
  0x87   :  { %2693 = vmatpush3.bf16.msra.mxu0 %v2973_v19 }
  0x88   :  { %2694 = vmatprep.subr.bf16.mxu0 %v2974_v20 }
  0x8b   :  { %2695 = vmatpush3.bf16.msra.mxu0 %v2975_v21 }
  0x8c   :  { %2696 = vmatprep.subr.bf16.mxu0 %v2976_v22 }
  0x8f   :  { %2697 = vmatpush3.bf16.msra.mxu0 %v2977_v23 }
  0x90   :  { %2698 = vmatprep.subr.bf16.mxu0 %v2978_v24 }
  0x93   :  { %2699 = vmatpush3.bf16.msra.mxu0 %v2979_v25 }
  0x94   :  { %2700 = vmatprep.subr.bf16.mxu0 %v2980_v26 }
  0x97   :  { %2701 = vmatpush3.bf16.msra.mxu0 %v2981_v27 }
  0x98   :  { %2702 = vmatprep.subr.bf16.mxu0 %v2982_v29 }
  0x99   :  { %15 = vsyncpa [#allocation3], 0  ;;  %v2985_v32 = vld [vmem:[%s3761_s1 + $0x438] sm:$0xff]   ;;  %v2986_v33 = vld [vmem:[%s3760_s0 + $0x40] ss:$72 sps:$4 sm:$0x1f]  }
  0x9a   :  { %v2989_v34 = vld [vmem:[%s3763_s3] sm:$0xff]   ;;  %v3065_v35 = vmov 0.0   ;;  %v2990_v36 = vld [vmem:[%s3763_s3 + $0x8] sm:$0xff]   ;;  %v2991_v54 = vld [vmem:[%s3763_s3 + $0x10] sm:$0xff]   ;;  %vm1713_vm0 = vcmask 1040384   ;;  %vm3066_vm1 = vmmov 0  }
  0x9b   :  { %2703 = vmatpush3.bf16.msra.mxu0 %v2983_v30  ;;  %2740 = vmatprep.subr.bf16.mxu1 %v3065_v35  ;;  %v2324_v38 = vld [vmem:[%s3762_s2] ss:$0 sm:$0xff]  ;;  %v2992_v55 = vld [vmem:[%s3763_s3 + $0x18] ss:$0 sps:$4 sm:$0x11]   ;;  %v3648_v58 = vld [vmem:[%s3765_s5 + $0x8] sm:$0xff]  }
  0x9c   :  { %2704 = vmatprep.subr.bf16.mxu0 %v2984_v31  ;;  %2741 = vmatpush3.bf16.msra.mxu1 %v2989_v34  ;;  %v1715_v56 = vsel %vm1713_vm0, %v2992_v55, 0  ;;  %v3639_v57 = vld [vmem:[%s3765_s5] sm:$0xff]   ;;  %vm1709_vm2 = vcmask 408576   ;;  %s3068_s28 = smov 64   ;;  %vm1774_vm3 = vcmask 261120   ;;  %vm2308_vm4 = vcmask 50176  }
  0x9d   :  { %2742 = vmatprep.subr.bf16.mxu1 %v3065_v35  ;;  %2748 = vmatprep.mubr.msk.bf16.mxu1 %vm3066_vm1, %v3065_v35 }
  0x9f   :  { %2705 = vmatpush3.bf16.msra.mxu0 %v2985_v32 }
  0xa0   :  { %2784 = vmatprep.subr.bf16.mxu0 %v3065_v35  ;;  %2743 = vmatpush3.bf16.msra.mxu1 %v2990_v36 }
  0xa1   :  { %2744 = vmatprep.subr.bf16.mxu1 %v3065_v35 }
  0xa2   :  { %1665 = vmatmul.mubr.bf16.vlgmr.msra.gmra.mrb[16].mxu0 %v2986_v33 }
  0xa3   :  { %2788 = vmatprep.mubr.msk.bf16.mxu0 %vm3066_vm1, %v3065_v35  ;;  %2785 = vmatpush3.bf16.msra.mxu0 %v3639_v57 }
  0xa4   :  { %2745 = vmatpush3.bf16.msra.mxu1 %v2991_v54  ;;  %2786 = vmatprep.subr.bf16.mxu0 %v3065_v35 }
  0xa5   :  { %2746 = vmatprep.subr.bf16.mxu1 %v3065_v35 }
  0xa7   :  { %2787 = vmatpush3.bf16.msra.mxu0 %v3648_v58 }
  0xa8   :  { %2747 = vmatpush3.bf16.msra.mxu1 %v1715_v56  ;;  %2800 = vmatprep.subr.bf16.mxu0 %v3065_v35  ;;  %v2487_v56 = vld [vmem:[%s3764_s4] ss:$0 sm:$0xff]  ;;  %s3069_s4 = smov 32  }
  0xa9   :  { %2752 = vmatprep.subr.bf16.mxu1 %v3065_v35 }
  0xf5   :  { %v2530_v37 = vpop.f32.mrb[0].mxu0 }
  0xf6   :  { %v2531_v39 = vpop.f32.mrb[1].mxu0 }
  0xf7   :  { %v2532_v40 = vadd.f32 %v2531_v39, %v2530_v37  ;;  %v2533_v41 = vpop.f32.mrb[2].mxu0  ;;  %v2552_v42 = vpop.f32.mrb[0].mxu1 }
  0xf8   :  { %v2534_v43 = vpop.f32.mrb[3].mxu0  ;;  %v2553_v46 = vpop.f32.mrb[1].mxu1 }
  0xf9   :  { %v1339_v44 = vadd.f32 %v2532_v40, %v2324_v38  ;;  %v2535_v45 = vadd.f32 %v2534_v43, %v2533_v41  ;;  %v2554_v47 = vadd.f32 %v2553_v46, %v2552_v42  ;;  %v2555_v48 = vpop.f32.mrb[2].mxu1 }
  0xfa   :  { %v2556_v50 = vpop.f32.mrb[3].mxu1 }
  0xfb   :  { %v1342_v49 = vadd.f32 %v2535_v45, %v2324_v38  ;;  %v1380_v51 = vadd.f32 %v2554_v47, %v1339_v44  ;;  %v2557_v52 = vadd.f32 %v2556_v50, %v2555_v48 }
  0xfd   :  { %v1383_v53 = vadd.f32 %v2557_v52, %v1342_v49 }
 0x115   :  { %v2574_v59 = vpop.f32.mrb[4].mxu0 }
 0x116   :  { %v2575_v60 = vpop.f32.mrb[5].mxu0 }
 0x117   :  { %v2576_v61 = vadd.f32 %v2575_v60, %v2574_v59  ;;  %v2577_v62 = vpop.f32.mrb[6].mxu0  ;;  %v2596_v63 = vpop.f32.mrb[4].mxu1 }
 0x118   :  { %v2578_v0 = vpop.f32.mrb[7].mxu0  ;;  %v2597_v3 = vpop.f32.mrb[5].mxu1 }
 0x119   :  { %v1421_v1 = vadd.f32 %v2576_v61, %v1380_v51  ;;  %v2579_v2 = vadd.f32 %v2578_v0, %v2577_v62  ;;  %v2598_v4 = vadd.f32 %v2597_v3, %v2596_v63  ;;  %v2599_v5 = vpop.f32.mrb[6].mxu1 }
 0x11a   :  { %v2600_v7 = vpop.f32.mrb[7].mxu1 }
 0x11b   :  { %v1424_v6 = vadd.f32 %v2579_v2, %v1383_v53  ;;  %v1462_v8 = vadd.f32 %v2598_v4, %v1421_v1  ;;  %v2601_v9 = vadd.f32 %v2600_v7, %v2599_v5  ;;  %v3067_v53 = vmov 0  }
 0x11d   :  { %v1465_v10 = vadd.f32 %v2601_v9, %v1424_v6 }
 0x135   :  { %v2618_v11 = vpop.f32.mrb[8].mxu0 }
 0x136   :  { %v2619_v12 = vpop.f32.mrb[9].mxu0 }
 0x137   :  { %v2620_v13 = vadd.f32 %v2619_v12, %v2618_v11  ;;  %v2621_v14 = vpop.f32.mrb[10].mxu0  ;;  %v2640_v15 = vpop.f32.mrb[8].mxu1 }
 0x138   :  { %v2622_v16 = vpop.f32.mrb[11].mxu0  ;;  %v2641_v19 = vpop.f32.mrb[9].mxu1 }
 0x139   :  { %v1503_v17 = vadd.f32 %v2620_v13, %v1462_v8  ;;  %v2623_v18 = vadd.f32 %v2622_v16, %v2621_v14  ;;  %v2642_v20 = vadd.f32 %v2641_v19, %v2640_v15  ;;  %v2643_v21 = vpop.f32.mrb[10].mxu1 }
 0x13a   :  { %v2644_v23 = vpop.f32.mrb[11].mxu1 }
 0x13b   :  { %v1506_v22 = vadd.f32 %v2623_v18, %v1465_v10  ;;  %v1544_v24 = vadd.f32 %v2642_v20, %v1503_v17  ;;  %v2645_v25 = vadd.f32 %v2644_v23, %v2643_v21 }
 0x13d   :  { %v1547_v26 = vadd.f32 %v2645_v25, %v1506_v22 }
 0x155   :  { %v2662_v27 = vpop.f32.mrb[12].mxu0 }
 0x156   :  { %v2663_v28 = vpop.f32.mrb[13].mxu0 }
 0x157   :  { %v2664_v29 = vadd.f32 %v2663_v28, %v2662_v27  ;;  %v2665_v30 = vpop.f32.mrb[14].mxu0  ;;  %v2684_v31 = vpop.f32.mrb[12].mxu1 }
 0x158   :  { %v2666_v32 = vpop.f32.mrb[15].mxu0  ;;  %v2685_v36 = vpop.f32.mrb[13].mxu1 }
 0x159   :  { %v1585_v33 = vadd.f32 %v2664_v29, %v1544_v24  ;;  %v2667_v34 = vadd.f32 %v2666_v32, %v2665_v30  ;;  %v2686_v37 = vadd.f32 %v2685_v36, %v2684_v31  ;;  %v2687_v38 = vpop.f32.mrb[14].mxu1 }
 0x15a   :  { %v2688_v40 = vpop.f32.mrb[15].mxu1 }
 0x15b   :  { %v1588_v39 = vadd.f32 %v2667_v34, %v1547_v26  ;;  %v1626_v41 = vadd.f32 %v2686_v37, %v1585_v33  ;;  %v2689_v42 = vadd.f32 %v2688_v40, %v2687_v38 }
 0x15d   :  { %v1629_v43 = vadd.f32 %v2689_v42, %v1588_v39 }
 0x175   :  { %v2706_v44 = vpop.f32.mrb[16].mxu0 }
 0x176   :  { %v2707_v45 = vpop.f32.mrb[17].mxu0 }
 0x177   :  { %v2708_v46 = vadd.f32 %v2707_v45, %v2706_v44  ;;  %v2709_v47 = vpop.f32.mrb[18].mxu0 }
 0x178   :  { %v2710_v48 = vpop.f32.mrb[19].mxu0 }
 0x179   :  { %v1667_v49 = vadd.f32 %v2708_v46, %v1626_v41  ;;  %v2711_v50 = vadd.f32 %v2710_v48, %v2709_v47 }
 0x17b   :  { %v1670_v51 = vadd.f32 %v2711_v50, %v1629_v43 }
 0x17d   :  { %v1673_v52 = vpack.c.bf16 %v1670_v51, %v1667_v49 }
 0x17f   :  { %2749 = vmatmul.mubr.msk.bf16.vlgmr.msra.gmra.mrb[16].mxu1 %vm1709_vm2, %v1673_v52 }
 0x180   :  { %2753 = vmatpush3.bf16.msra.mxu1 %v3639_v57  ;;  %2756 = vmatprep.mubr.msk.bf16.mxu1 %vm3066_vm1, %v3065_v35 }
 0x181   :  { %2754 = vmatprep.subr.bf16.mxu1 %v3065_v35 }
 0x184   :  { %2755 = vmatpush3.bf16.msra.mxu1 %v3648_v58 }
 0x185   :  { %2760 = vmatprep.subr.bf16.mxu1 %v3065_v35 }
 0x187   :  { %2757 = vmatmul.mubr.bf16.vlgmr.msra.gmra.mrb[20].mxu1 %v3067_v53 }
 0x188   :  { %2761 = vmatpush3.bf16.msra.mxu1 %v3639_v57  ;;  %2764 = vmatprep.mubr.msk.bf16.mxu1 %vm3066_vm1, %v3065_v35 }
 0x189   :  { %2762 = vmatprep.subr.bf16.mxu1 %v3065_v35 }
 0x18c   :  { %2763 = vmatpush3.bf16.msra.mxu1 %v3648_v58 }
 0x18d   :  { %2768 = vmatprep.subr.bf16.mxu1 %v3065_v35 }
 0x252   :  { %v1751_v54 = vpop.f32.mrb[16].mxu1 }
 0x253   :  { %v2750_v55 = vpop.f32.mrb[17].mxu1  ;;  %v3670_v62 = vadd.f32 %v2487_v56, %v1751_v54 }
 0x254   :  { %v1754_v59 = vpop.f32.mrb[18].mxu1 }
 0x255   :  { %v3668_v60 = vadd.f32 %v2487_v56, %v1754_v59  ;;  %v2751_v61 = vpop.f32.mrb[19].mxu1 }
 0x25a   :  { %v1812_v63 = vpop.f32.mrb[20].mxu1 }
 0x25b   :  { %v1818_v0 = vadd.f32 %v1812_v63, %v3670_v62  ;;  %v2758_v1 = vpop.f32.mrb[21].mxu1 }
 0x25c   :  { %v1815_v2 = vpop.f32.mrb[22].mxu1 }
 0x25d   :  { %3001 = vtanh.f32 %v1818_v0  ;;  %v2759_v3 = vpop.f32.mrb[23].mxu1  ;;  %v2495_v5 = vmul.f32 -1.442695, %v1818_v0 }
 0x25f   :  { %3003 = vpow2.f32 %v2495_v5 }
 0x267   :  { %v3002_v4 = vpop.eup %3001 }
 0x268   :  { %1828 = vrot.lane.b32.xlu0 %v3002_v4, %s3068_s28 }
 0x269   :  { %v3004_v6 = vpop.eup %3003 }
 0x26a   :  { %v1822_v7 = vadd.f32 1.0, %v3004_v6 }
 0x26c   :  { %3005 = vrcp.f32 %v1822_v7 }
 0x276   :  { %v3006_v8 = vpop.eup %3005 }
 0x277   :  { %v1826_v11 = vmul.f32 0.0, %v3006_v8 }
 0x2da   :  { %v1829_v9 = vpop.permute.xlu0 %1828 }
 0x2db   :  { %v1831_v10 = vmul.f32 %v3006_v8, %v1829_v9 }
 0x2dd   :  { %1833 = vrot.lane.b32.xlu0 %v1831_v10, %s3069_s4 }
 0x34f   :  { %v1834_v12 = vpop.permute.xlu0 %1833 }
 0x350   :  { %v1836_v13 = vadd.f32 %v1834_v12, %v1826_v11 }
 0x352   :  { %3007 = vtanh.f32 %v1836_v13  ;;  %v1902_v32 = vrot.slane %v1836_v13, 6 }
 0x35c   :  { %v3008_v14 = vpop.eup %3007 }
 0x35d   :  { %1839 = vrot.lane.b32.xlu1 %v3008_v14, %s3068_s28 }
 0x3cf   :  { %v1840_v15 = vpop.permute.xlu1 %1839 }
 0x3d0   :  { %v1842_v16 = vmul.f32 %v3006_v8, %v1840_v15 }
 0x3d2   :  { %v1843_v17 = vpack.c.bf16 %v1842_v16, %v1842_v16 }
 0x3d4   :  { %1845 = vrot.lane.b32.xlu1 %v1843_v17, %s3069_s4 }
 0x446   :  { %v1846_v18 = vpop.permute.xlu1 %1845 }
 0x447   :  { %2765 = vmatmul.mubr.msk.bf16.vlgmr.msra.gmra.mrb[24].mxu1 %vm1774_vm3, %v1846_v18 }
 0x448   :  { %2769 = vmatpush3.bf16.msra.mxu1 %v3639_v57  ;;  %2772 = vmatprep.mubr.msk.bf16.mxu1 %vm3066_vm1, %v3065_v35 }
 0x449   :  { %2770 = vmatprep.subr.bf16.mxu1 %v3065_v35 }
 0x44c   :  { %2771 = vmatpush3.bf16.msra.mxu1 %v3648_v58 }
 0x44d   :  { %2776 = vmatprep.subr.bf16.mxu1 %v3065_v35 }
 0x51a   :  { %v1884_v19 = vpop.f32.mrb[24].mxu1 }
 0x51b   :  { %v1891_v20 = vrot.slane %v1884_v19, 6  ;;  %v2766_v21 = vpop.f32.mrb[25].mxu1 }
 0x51c   :  { %v1887_v22 = vpop.f32.mrb[26].mxu1 }
 0x51d   :  { %v1893_v23 = vadd.f32 %v1891_v20, %v3670_v62  ;;  %v2767_v24 = vpop.f32.mrb[27].mxu1 }
 0x51f   :  { %3009 = vtanh.f32 %v1893_v23  ;;  %v2497_v26 = vmul.f32 -1.442695, %v1893_v23 }
 0x521   :  { %3011 = vpow2.f32 %v2497_v26 }
 0x529   :  { %v3010_v25 = vpop.eup %3009 }
 0x52a   :  { %1906 = vrot.lane.b32.xlu0 %v3010_v25, %s3068_s28 }
 0x52b   :  { %v3012_v27 = vpop.eup %3011 }
 0x52c   :  { %v1897_v28 = vadd.f32 1.0, %v3012_v27 }
 0x52e   :  { %3013 = vrcp.f32 %v1897_v28 }
 0x538   :  { %v3014_v29 = vpop.eup %3013 }
 0x539   :  { %v1904_v33 = vmul.f32 %v3014_v29, %v1902_v32 }
 0x59c   :  { %v1907_v30 = vpop.permute.xlu0 %1906 }
 0x59d   :  { %v1909_v31 = vmul.f32 %v3014_v29, %v1907_v30 }
 0x59f   :  { %1911 = vrot.lane.b32.xlu1 %v1909_v31, %s3069_s4 }
 0x611   :  { %v1912_v34 = vpop.permute.xlu1 %1911 }
 0x612   :  { %v1914_v36 = vadd.f32 %v1912_v34, %v1904_v33 }
 0x614   :  { %3015 = vtanh.f32 %v1914_v36  ;;  %v1981_v54 = vrot.slane %v1914_v36, 6 }
 0x61e   :  { %v3016_v37 = vpop.eup %3015 }
 0x61f   :  { %1917 = vrot.lane.b32.xlu0 %v3016_v37, %s3068_s28 }
 0x691   :  { %v1918_v38 = vpop.permute.xlu0 %1917 }
 0x692   :  { %v1920_v39 = vmul.f32 %v3014_v29, %v1918_v38 }
 0x694   :  { %v1921_v40 = vpack.c.bf16 %v1920_v39, %v1920_v39 }
 0x696   :  { %v1923_v41 = vrot.slane %v1921_v40, 1 }
 0x698   :  { %1924 = vrot.lane.b32.xlu1 %v1923_v41, %s3069_s4 }
 0x70a   :  { %v1925_v42 = vpop.permute.xlu1 %1924 }
 0x70b   :  { %2773 = vmatmul.mubr.msk.bf16.vlgmr.msra.gmra.mrb[28].mxu1 %vm1774_vm3, %v1925_v42  ;;  %v2995_v42 = vld [vmem:[%s3766_s6] sm:$0xff]  }
 0x70c   :  { %2777 = vmatpush3.bf16.msra.mxu1 %v3639_v57  ;;  %2780 = vmatprep.mubr.msk.bf16.mxu1 %vm3066_vm1, %v3065_v35 }
 0x70d   :  { %2778 = vmatprep.subr.bf16.mxu1 %v3065_v35 }
 0x710   :  { %2779 = vmatpush3.bf16.msra.mxu1 %v3648_v58 }
 0x711   :  { %2792 = vmatprep.subr.bf16.mxu1 %v3065_v35 }
 0x7de   :  { %v1963_v43 = vpop.f32.mrb[28].mxu1 }
 0x7df   :  { %v1970_v44 = vrot.slane %v1963_v43, 4  ;;  %v2774_v45 = vpop.f32.mrb[29].mxu1  ;;  %v2996_v43 = vld [vmem:[%s3766_s6 + $0x8] sm:$0xff]  }
 0x7e0   :  { %v1966_v46 = vpop.f32.mrb[30].mxu1  ;;  %v2997_v45 = vld [vmem:[%s3768_s8] sm:$0xff]  }
 0x7e1   :  { %v1972_v47 = vadd.f32 %v1970_v44, %v3670_v62  ;;  %v2775_v48 = vpop.f32.mrb[31].mxu1  ;;  %v2998_v46 = vld [vmem:[%s3768_s8 + $0x8] sm:$0xff]  }
 0x7e3   :  { %3017 = vtanh.f32 %v1972_v47  ;;  %v2499_v57 = vmul.f32 -1.442695, %v1972_v47 }
 0x7e5   :  { %3019 = vpow2.f32 %v2499_v57 }
 0x7ed   :  { %v3018_v49 = vpop.eup %3017 }
 0x7ee   :  { %1985 = vrot.lane.b32.xlu0 %v3018_v49, %s3068_s28 }
 0x7ef   :  { %v3020_v50 = vpop.eup %3019 }
 0x7f0   :  { %v1976_v51 = vadd.f32 1.0, %v3020_v50  ;;  %v2999_v50 = vld [vmem:[%s3768_s8 + $0x10] sm:$0xff]  }
 0x7f2   :  { %3021 = vrcp.f32 %v1976_v51  ;;  %v3000_v51 = vld [vmem:[%s3768_s8 + $0x18] ss:$0 sps:$4 sm:$0x11]   ;;  %s3070_s8 = smov [#allocation2]  }
 0x7f3   :  { %s2316_s22 = sshll.u32 %s3070_s8, 4  ;;  %s2317_s22 = int_to_ptr.vmem [resolvable:$true] %s2316_s22 }
 0x7f4   :  { %p3046_p1 = scmp.lt.s32.totalorder %s2317_s22, %s2317_s22 }
 0x7fc   :  { %v3022_v52 = vpop.eup %3021 }
 0x7fd   :  { %v1983_v55 = vmul.f32 %v3022_v52, %v1981_v54 }
 0x860   :  { %v1986_v58 = vpop.permute.xlu0 %1985 }
 0x861   :  { %v1988_v53 = vmul.f32 %v3022_v52, %v1986_v58  ;;  %v2504_v58 = vld [vmem:[%s3767_s7] ss:$0 sm:$0xff]  ;;  %s3041_s7 = scalar_lea.vmem %s2317_s22, 32 }
 0x862   :  { %p3042_p0 = scmp.ne.s32.totalorder %s2317_s22, %s3041_s7  ;;  %p3047_p2 = scmp.lt.s32.totalorder %s3041_s7, %s3041_s7 }
 0x863   :  { %1990 = vrot.lane.b32.xlu1 %v1988_v53, %s3069_s4 }
 0x864   :  { %p3048_p3 = por %p3047_p2, %p3046_p1 }
 0x866   :  { %p3049_p4 = pnand %p3048_p3, %p3042_p0 }
 0x8d5   :  { %v1991_v56 = vpop.permute.xlu1 %1990 }
 0x8d6   :  { %v1993_v59 = vadd.f32 %v1991_v56, %v1983_v55 }
 0x8d8   :  { %3023 = vtanh.f32 %v1993_v59  ;;  %v2060_v17 = vrot.slane %v1993_v59, 6 }
 0x8e2   :  { %v3024_v61 = vpop.eup %3023 }
 0x8e3   :  { %1996 = vrot.lane.b32.xlu0 %v3024_v61, %s3068_s28 }
 0x955   :  { %v1997_v63 = vpop.permute.xlu0 %1996 }
 0x956   :  { %v1999_v0 = vmul.f32 %v3022_v52, %v1997_v63  ;;  %v2266_v52 = vsel %vm1713_vm0, %v3000_v51, 0 }
 0x958   :  { %v2000_v1 = vpack.c.bf16 %v1999_v0, %v1999_v0 }
 0x95a   :  { %v2002_v2 = vrot.slane %v2000_v1, 2 }
 0x95c   :  { %2003 = vrot.lane.b32.xlu1 %v2002_v2, %s3069_s4 }
 0x9ce   :  { %v2004_v3 = vpop.permute.xlu1 %2003 }
 0x9cf   :  { %2781 = vmatmul.mubr.msk.bf16.vlgmr.msra.gmra.mrb[32].mxu1 %vm1774_vm3, %v2004_v3 }
 0x9d0   :  { %2796 = vmatprep.mubr.msk.bf16.mxu1 %vm3066_vm1, %v3065_v35  ;;  %2793 = vmatpush3.bf16.msra.mxu1 %v2995_v42 }
 0x9d1   :  { %2794 = vmatprep.subr.bf16.mxu1 %v3065_v35 }
 0x9d4   :  { %2795 = vmatpush3.bf16.msra.mxu1 %v2996_v43 }
 0xaa2   :  { %v2042_v4 = vpop.f32.mrb[32].mxu1 }
 0xaa3   :  { %v2049_v5 = vrot.slane %v2042_v4, 2  ;;  %v2782_v6 = vpop.f32.mrb[33].mxu1 }
 0xaa4   :  { %v2045_v7 = vpop.f32.mrb[34].mxu1 }
 0xaa5   :  { %v2051_v8 = vadd.f32 %v2049_v5, %v3670_v62  ;;  %v2783_v9 = vpop.f32.mrb[35].mxu1 }
 0xaa7   :  { %3025 = vtanh.f32 %v2051_v8  ;;  %v2501_v11 = vmul.f32 -1.442695, %v2051_v8 }
 0xaa9   :  { %3027 = vpow2.f32 %v2501_v11 }
 0xab1   :  { %v3026_v10 = vpop.eup %3025 }
 0xab2   :  { %2064 = vrot.lane.b32.xlu0 %v3026_v10, %s3068_s28 }
 0xab3   :  { %v3028_v12 = vpop.eup %3027 }
 0xab4   :  { %v2055_v13 = vadd.f32 1.0, %v3028_v12 }
 0xab6   :  { %3029 = vrcp.f32 %v2055_v13 }
 0xac0   :  { %v3030_v14 = vpop.eup %3029 }
 0xac1   :  { %v2062_v18 = vmul.f32 %v3030_v14, %v2060_v17 }
 0xb24   :  { %v2065_v15 = vpop.permute.xlu0 %2064 }
 0xb25   :  { %v2067_v16 = vmul.f32 %v3030_v14, %v2065_v15 }
 0xb27   :  { %2069 = vrot.lane.b32.xlu1 %v2067_v16, %s3069_s4 }
 0xb99   :  { %v2070_v19 = vpop.permute.xlu1 %2069 }
 0xb9a   :  { %v2072_v20 = vadd.f32 %v2070_v19, %v2062_v18 }
 0xb9c   :  { %3031 = vtanh.f32 %v2072_v20  ;;  %v2136_v39 = vrot.slane %v2072_v20, 6 }
 0xba6   :  { %v3032_v62 = vpop.eup %3031 }
 0xba7   :  { %2075 = vrot.lane.b32.xlu0 %v3032_v62, %s3068_s28 }
 0xc19   :  { %v2076_v21 = vpop.permute.xlu0 %2075 }
 0xc1a   :  { %v2078_v22 = vmul.f32 %v3030_v14, %v2076_v21 }
 0xc1c   :  { %v2079_v23 = vpack.c.bf16 %v2078_v22, %v2078_v22 }
 0xc1e   :  { %v2081_v24 = vrot.slane %v2079_v23, 3 }
 0xc20   :  { %2082 = vrot.lane.b32.xlu1 %v2081_v24, %s3069_s4 }
 0xc92   :  { %v2083_v25 = vpop.permute.xlu1 %2082 }
 0xc93   :  { %2789 = vmatmul.mubr.msk.bf16.vlgmr.msra.gmra.mrb[20].mxu0 %vm1774_vm3, %v2083_v25 }
 0xc94   :  { %2808 = vmatprep.mubr.msk.bf16.mxu0 %vm3066_vm1, %v3065_v35  ;;  %2801 = vmatpush3.bf16.msra.mxu0 %v2997_v45 }
 0xc95   :  { %2802 = vmatprep.subr.bf16.mxu0 %v3065_v35 }
 0xc98   :  { %2803 = vmatpush3.bf16.msra.mxu0 %v2998_v46 }
 0xc99   :  { %2804 = vmatprep.subr.bf16.mxu0 %v3065_v35 }
 0xc9c   :  { %2805 = vmatpush3.bf16.msra.mxu0 %v2999_v50 }
 0xc9d   :  { %2806 = vmatprep.subr.bf16.mxu0 %v3065_v35  ;;  %v2508_v35 = vld [vmem:[%s3769_s9] ss:$0 sm:$0xff] }
 0xca0   :  { %2807 = vmatpush3.bf16.msra.mxu0 %v2266_v52 }
 0xd66   :  { %v2121_v26 = vpop.f32.mrb[20].mxu0 }
 0xd67   :  { %v2127_v27 = vadd.f32 %v2121_v26, %v3668_v60  ;;  %v2790_v28 = vpop.f32.mrb[21].mxu0 }
 0xd68   :  { %v2124_v29 = vpop.f32.mrb[22].mxu0 }
 0xd69   :  { %3033 = vtanh.f32 %v2127_v27  ;;  %v2791_v30 = vpop.f32.mrb[23].mxu0  ;;  %v2503_v32 = vmul.f32 -1.442695, %v2127_v27 }
 0xd6b   :  { %3035 = vpow2.f32 %v2503_v32 }
 0xd73   :  { %v3034_v31 = vpop.eup %3033 }
 0xd74   :  { %2140 = vrot.lane.b32.xlu0 %v3034_v31, %s3068_s28 }
 0xd75   :  { %v3036_v33 = vpop.eup %3035 }
 0xd76   :  { %v2131_v34 = vadd.f32 1.0, %v3036_v33 }
 0xd78   :  { %3037 = vrcp.f32 %v2131_v34 }
 0xd82   :  { %v3038_v36 = vpop.eup %3037 }
 0xd83   :  { %v2138_v40 = vmul.f32 %v3038_v36, %v2136_v39 }
 0xde6   :  { %v2141_v37 = vpop.permute.xlu0 %2140 }
 0xde7   :  { %v2143_v38 = vmul.f32 %v3038_v36, %v2141_v37 }
 0xde9   :  { %2145 = vrot.lane.b32.xlu1 %v2143_v38, %s3069_s4 }
 0xe5b   :  { %v2146_v60 = vpop.permute.xlu1 %2145 }
 0xe5c   :  { %v2148_v41 = vadd.f32 %v2146_v60, %v2138_v40 }
 0xe5e   :  { %3039 = vtanh.f32 %v2148_v41 }
 0xe68   :  { %v3040_v44 = vpop.eup %3039 }
 0xe69   :  { %2151 = vrot.lane.b32.xlu0 %v3040_v44, %s3068_s28 }
 0xedb   :  { %v2152_v47 = vpop.permute.xlu0 %2151 }
 0xedc   :  { %v2154_v48 = vmul.f32 %v3038_v36, %v2152_v47 }
 0xede   :  { %v2155_v49 = vpack.c.bf16 %v2154_v48, %v2154_v48 }
 0xee0   :  { %2168 = vrot.lane.b32.xlu1 %v2155_v49, %s3069_s4 }
 0xf52   :  { %v2169_v57 = vpop.permute.xlu1 %2168 }
 0xf53   :  { %2797 = vmatmul.mubr.msk.bf16.vlgmr.msra.gmra.mrb[36].mxu1 %vm1774_vm3, %v2169_v57 }
0x1026   :  { %v2219_v53 = vpop.f32.mrb[36].mxu1 }
0x1027   :  { %v2220_v54 = vadd.f32 %v2504_v58, %v2219_v53  ;;  %v2798_v55 = vpop.f32.mrb[37].mxu1 }
0x1028   :  { %v2222_v56 = vpop.f32.mrb[38].mxu1 }
0x1029   :  { %v2225_v59 = vmax.f32 %v2220_v54, 0.0  ;;  %v2799_v61 = vpop.f32.mrb[39].mxu1 }
0x102b   :  { %v2226_v63 = vpack.c.bf16 %v2225_v59, %v2225_v59 }
0x102d   :  { %2809 = vmatmul.mubr.msk.bf16.vlgmr.msra.gmra.mrb[24].mxu0 %vm1709_vm2, %v2226_v63 }
0x1100   :  { %v2302_v0 = vpop.f32.mrb[24].mxu0 }
0x1101   :  { %v2303_v1 = vadd.f32 %v2508_v35, %v2302_v0  ;;  %v2810_v2 = vpop.f32.mrb[25].mxu0 }
0x1102   :  { %v2305_v3 = vpop.f32.mrb[26].mxu0 }
0x1103   :  { %v2811_v4 = vpop.f32.mrb[27].mxu0  ;;  %2309 = vst.msk [vmem:[#allocation2] sm:$0x3] %vm2308_vm4, %v2303_v1 }
0x1104   :  { %3052 = shalt.err (!%p3049_p4)
}
0x1105   :  { %s3053_s9 = scalar_lea.hbm %s3770_s10, 32 }
0x1106   :  { %p3054_p5 = scmp.ne.s32.totalorder %s3770_s10, %s3053_s9  ;;  %p3057_p6 = scmp.lt.u32.totalorder %s3053_s9, %s3770_s10 }
0x1108   :  { %p3059_p7 = pnand %p3057_p6, %p3054_p5 }
0x110a   :  { %3062 = shalt.err (!%p3059_p7)
}
0x110b   :  { %2319 = dma.vmem_to_hbm [thread:$0]  %s2317_s22, 32, %s3770_s10, [#allocation3]  }
0x110c   :  { %3063 = dma.done.wait [#allocation3], 32  }
0x110d   :  { %3064 = vsyncadd [#allocation3], 4294967264 }
0x110e   :  { %2323 = vsyncpa [#allocation3], 1 }

</bundles_post_ra>
